<compile_context>
chip_gen: v7x
topology: tpu7x:2x2x1
jax: 0.10.0
libtpu: 0.0.40
codegen_flags: <defaults>
</compile_context>

<pallas_src>
import numpy as np

import jax
import jax.numpy as jnp
from jax.experimental import pallas as pl
from jax.experimental.pallas import tpu as pltpu

_VMEM_LIMIT = 40 * 1024 * 1024   # > ~17 MiB worst-case footprint, < v7x 64 MiB physical
_BATCH_BLOCK_CAP = 32            # <=32 images/block keeps activations + 2x weights < ~20 MiB


# ------------------------------ fused kernel ------------------------------- #

def _fused_forward_kernel(x_ref, w1_ref, b1_ref, w2_ref, b2_ref, w3_ref, b3_ref,
                          w4_ref, b4_ref, w5_ref, b5_ref, o_ref, p1_ref):
    bb = x_ref.shape[2]                                   # images in this batch block
    f32 = jnp.float32
    xv = x_ref[0]                                         # (28, bb, 28) bf16, rows h-major

    # ---- conv1 (5x5, 1->32): 5 banded matmuls; out cols = [ow-even | ow-odd] x 32
    acc = None
    for i in range(5):
        lhs = xv[i:i + 24].reshape(24 * bb, 28)           # rows = oh*bb + n   (in-VMEM "im2col")
        d = jnp.dot(lhs, w1_ref[i], preferred_element_type=f32)
        acc = d if acc is None else acc + d               # (24*bb, 768)
    h1 = jnp.maximum(acc + b1_ref[...], 0.0)              # f32 epilogue (v5e-safe)

    # ---- fused ReLU'd-conv1 -> 2x2 maxpool; pooled rows stay in VMEM scratch
    for p in range(12):
        r = jnp.maximum(h1[(2 * p) * bb:(2 * p + 1) * bb],
                        h1[(2 * p + 1) * bb:(2 * p + 2) * bb])           # H-pool (bb,768)
        p1_ref[p * bb:(p + 1) * bb, :] = jnp.maximum(
            r[:, :384], r[:, 384:]).astype(jnp.bfloat16)                 # W-pool (bb,384)

    # ---- conv2 (5x5, 32->64): same banded-matmul trick on the pooled rows
    acc = None
    for i in range(5):
        d = jnp.dot(p1_ref[i * bb:(i + 8) * bb, :], w2_ref[i],
                    preferred_element_type=f32)
        acc = d if acc is None else acc + d               # (8*bb, 512)
    h2 = jnp.maximum(acc + b2_ref[...], 0.0)

    # ---- pool2 + fc1 fused: each pooled conv2 row hits its 256-col slice of W3
    acc3 = None
    for p in range(4):
        r = jnp.maximum(h2[(2 * p) * bb:(2 * p + 1) * bb],
                        h2[(2 * p + 1) * bb:(2 * p + 2) * bb])           # (bb,512)
        pooled = jnp.maximum(r[:, :256], r[:, 256:]).astype(jnp.bfloat16)  # (bb,256)
        d = jnp.dot(pooled, w3_ref[p], preferred_element_type=f32)         # (bb,1024)
        acc3 = d if acc3 is None else acc3 + d
    h3 = jnp.maximum(acc3 + b3_ref[...], 0.0).astype(jnp.bfloat16)       # (bb,1024)

    # ---- fc2 + fc3
    h4 = jnp.dot(h3, w4_ref[...], preferred_element_type=f32) + b4_ref[...]
    h4 = jnp.maximum(h4, 0.0).astype(jnp.bfloat16)                       # (bb,256)
    logits = jnp.dot(h4, w5_ref[...], preferred_element_type=f32) + b5_ref[...]
    o_ref[0] = logits.astype(o_ref.dtype)                                # (bb,10)


# ------------------------------ call wrapper -------------------------------- #

def _batch_block(batch):
    divs = [d for d in range(1, min(batch, _BATCH_BLOCK_CAP) + 1) if batch % d == 0]
    multi = [d for d in divs if batch // d >= 2]          # grid >= 2 -> both v7x TCs busy
    return max(multi) if multi else max(divs)


def _whole(a):
    zeros = (0,) * a.ndim
    return pl.BlockSpec(a.shape, lambda i, z=zeros: z)


def fused_forward(x4, params, bb):
    g = x4.shape[0]
    batch = g * bb
    names = ("W1", "b1", "W2", "b2", "W3", "b3", "W4", "b4", "W5", "b5")
    weights = [params[n] for n in names]
    flops = batch * (5 * 2 * 24 * 28 * 768 + 5 * 2 * 8 * 384 * 512
                     + 2 * (1024 * 1024 + 1024 * 256 + 256 * 10))
    bytes_accessed = (int(x4.size) * x4.dtype.itemsize
                      + sum(int(w.size) * w.dtype.itemsize for w in weights)
                      + batch * 10 * 4)
    return pl.pallas_call(
        _fused_forward_kernel,
        out_shape=jax.ShapeDtypeStruct((g, bb, 10), jnp.float32),
        grid_spec=pltpu.PrefetchScalarGridSpec(
            num_scalar_prefetch=0,
            grid=(g,),
            in_specs=[pl.BlockSpec((1, 28, bb, 28), lambda i: (i, 0, 0, 0))]
                     + [_whole(w) for w in weights],
            out_specs=pl.BlockSpec((1, bb, 10), lambda i: (i, 0, 0)),
            scratch_shapes=[pltpu.VMEM((12 * bb, 384), jnp.bfloat16)]),   # pooled conv1 rows
        compiler_params=pltpu.CompilerParams(
            dimension_semantics=("parallel",),
            vmem_limit_bytes=_VMEM_LIMIT),
        cost_estimate=pl.CostEstimate(flops=flops, transcendentals=0,
                                      bytes_accessed=bytes_accessed),
    )(x4, *weights)


# ------------------------------- parameters --------------------------------- #

def init_torch_params(key):
    """Random parameters in the PyTorch layouts (Conv: (O,C,KH,KW), Linear: (out,in))."""
    ks = jax.random.split(key, 10)
    nrm = lambda k, shape, s: jax.random.normal(k, shape, jnp.float32) * s
    return {
        "W1": nrm(ks[0], (32, 1, 5, 5), 0.2),   "b1": nrm(ks[1], (32,), 0.1),
        "W2": nrm(ks[2], (64, 32, 5, 5), 0.05), "b2": nrm(ks[3], (64,), 0.1),
        "W3": nrm(ks[4], (1024, 1024), 0.03),   "b3": nrm(ks[5], (1024,), 0.1),
        "W4": nrm(ks[6], (256, 1024), 0.03),    "b4": nrm(ks[7], (256,), 0.1),
        "W5": nrm(ks[8], (10, 256), 0.06),      "b5": nrm(ks[9], (10,), 0.1),
    }


def _conv_row_matrices(w_torch, in_w, out_w):
    """(O,C,5,5) torch conv weight -> (5, in_w*C, out_w*O) banded per-kernel-row
    matmul matrices.  LHS columns are (w_in, c) NHWC-flat; output columns are
    ordered [ow-even | ow-odd] so 2x2 W-pooling is a max of two lane halves."""
    w = np.asarray(w_torch, np.float32)
    O, C, KH, KW = w.shape
    m = np.zeros((KH, in_w, C, out_w, O), np.float32)
    for i in range(KH):
        for ow in range(out_w):
            for j in range(KW):
                m[i, ow + j, :, ow, :] = w[:, :, i, j].T          # m[i, w_in, c, ow, o]
    order = np.concatenate([np.arange(0, out_w, 2), np.arange(1, out_w, 2)])
    m = m[:, :, :, order, :]
    return m.reshape(KH, in_w * C, out_w * O)


def _fc1_split(w3_torch):
    """torch Linear(1024,1024) weight, input = NCHW flatten of (64,4,4) ->
    (4, 256, 1024): per pooled conv2 row h, columns (w*64+c, out)."""
    w = np.asarray(w3_torch, np.float32).reshape(1024, 64, 4, 4)  # (out, c, h, w)
    w = w.transpose(2, 3, 1, 0)                                   # (h, w, c, out)
    return w.reshape(4, 4 * 64, 1024)


def prepare_params(tp):
    """One-time re-layout (host side): banded conv matrices, per-row W3 split,
    pre-transposed FC weights.  bf16 MXU operands, f32 (1,N) biases."""
    bf16, f32 = jnp.bfloat16, jnp.float32
    row = lambda v, rep=1: jnp.asarray(
        np.tile(np.asarray(v, np.float32), rep)[None, :], f32)
    return {
        "W1": jnp.asarray(_conv_row_matrices(tp["W1"], 28, 24), bf16),   # (5,28,768)
        "b1": row(tp["b1"], 24),                                         # (1,768)
        "W2": jnp.asarray(_conv_row_matrices(tp["W2"], 12, 8), bf16),    # (5,384,512)
        "b2": row(tp["b2"], 8),                                          # (1,512)
        "W3": jnp.asarray(_fc1_split(tp["W3"]), bf16),                   # (4,256,1024)
        "b3": row(tp["b3"]),                                             # (1,1024)
        "W4": jnp.asarray(np.asarray(tp["W4"], np.float32).T, bf16),     # (1024,256)
        "b4": row(tp["b4"]),                                             # (1,256)
        "W5": jnp.asarray(np.asarray(tp["W5"], np.float32).T, bf16),     # (256,10)
        "b5": row(tp["b5"]),                                             # (1,10)
    }


# --------------------------------- forward ---------------------------------- #

@jax.jit
def forward(params, x):
    """x: (B, 1, 28, 28) f32 NCHW (PyTorch layout).  Returns (B, 10) f32 logits."""
    batch = x.shape[0]
    assert x.shape[1:] == (1, 28, 28), "myCNN expects 1x28x28 inputs (Linear(1024) head)"
    bb = _batch_block(batch)
    g = batch // bb
    # One-time layout plumbing (XLA glue): drop C=1, bf16, rows h-major / batch-minor.
    x4 = (x.reshape(batch, 28, 28).astype(jnp.bfloat16)
            .reshape(g, bb, 28, 28).transpose(0, 2, 1, 3))       # (G, 28, bb, 28)
    out = fused_forward(x4, params, bb)                          # (G, bb, 10)
    return out.reshape(batch, 10)


if __name__ == "__main__":
    key = jax.random.PRNGKey(0)
    kp, kx = jax.random.split(key)
    params = prepare_params(init_torch_params(kp))
    # Input implied by Linear(1024, ...): 1x28x28 images (MNIST-like), batch=2.
    x = jax.random.normal(kx, (2, 1, 28, 28), jnp.float32)
    out = jax.block_until_ready(forward(params, x))
    assert out.shape == (2, 10) and out.dtype == jnp.float32
    assert bool(jnp.isfinite(out).all())
    print("KERNEL_OK")
</pallas_src>

<mosaic_0001>
module attributes {stable_mosaic.version = 11 : i64} {
  func.func @_fused_forward_kernel(%arg0: i32, %arg1: memref<1x28x1x28xbf16, #tpu.memory_space<vmem>>, %arg2: memref<5x28x768xbf16, #tpu.memory_space<vmem>>, %arg3: memref<1x768xf32, #tpu.memory_space<vmem>>, %arg4: memref<5x384x512xbf16, #tpu.memory_space<vmem>>, %arg5: memref<1x512xf32, #tpu.memory_space<vmem>>, %arg6: memref<4x256x1024xbf16, #tpu.memory_space<vmem>>, %arg7: memref<1x1024xf32, #tpu.memory_space<vmem>>, %arg8: memref<1024x256xbf16, #tpu.memory_space<vmem>>, %arg9: memref<1x256xf32, #tpu.memory_space<vmem>>, %arg10: memref<256x10xbf16, #tpu.memory_space<vmem>>, %arg11: memref<1x10xf32, #tpu.memory_space<vmem>>, %arg12: memref<1x1x10xf32, #tpu.memory_space<vmem>>, %arg13: memref<12x384xbf16, #tpu.memory_space<vmem>>) attributes {dimension_semantics = [#tpu.dimension_semantics<parallel>], iteration_bounds = array<i64: 2>, scalar_prefetch = 0 : i64, scratch_operands = 1 : i64, tpu.core_type = #tpu.core_type<tc>, window_params = [{transform_indices = @transform_0, window_bounds = array<i64: 1, 28, 1, 28>}, {pipeline_mode = #tpu.pipeline_mode<synchronous>, transform_indices = @transform_1, window_bounds = array<i64: 5, 28, 768>}, {pipeline_mode = #tpu.pipeline_mode<synchronous>, transform_indices = @transform_2, window_bounds = array<i64: 1, 768>}, {pipeline_mode = #tpu.pipeline_mode<synchronous>, transform_indices = @transform_3, window_bounds = array<i64: 5, 384, 512>}, {pipeline_mode = #tpu.pipeline_mode<synchronous>, transform_indices = @transform_4, window_bounds = array<i64: 1, 512>}, {pipeline_mode = #tpu.pipeline_mode<synchronous>, transform_indices = @transform_5, window_bounds = array<i64: 4, 256, 1024>}, {pipeline_mode = #tpu.pipeline_mode<synchronous>, transform_indices = @transform_6, window_bounds = array<i64: 1, 1024>}, {pipeline_mode = #tpu.pipeline_mode<synchronous>, transform_indices = @transform_7, window_bounds = array<i64: 1024, 256>}, {pipeline_mode = #tpu.pipeline_mode<synchronous>, transform_indices = @transform_8, window_bounds = array<i64: 1, 256>}, {pipeline_mode = #tpu.pipeline_mode<synchronous>, transform_indices = @transform_9, window_bounds = array<i64: 256, 10>}, {pipeline_mode = #tpu.pipeline_mode<synchronous>, transform_indices = @transform_10, window_bounds = array<i64: 1, 10>}, {transform_indices = @transform_11, window_bounds = array<i64: 1, 1, 10>}]} {
    %c0 = arith.constant 0 : index
    %c0_0 = arith.constant 0 : index
    %c0_1 = arith.constant 0 : index
    %c0_2 = arith.constant 0 : index
    %0 = vector.load %arg1[%c0, %c0_0, %c0_1, %c0_2] : memref<1x28x1x28xbf16, #tpu.memory_space<vmem>>, vector<1x28x1x28xbf16>
    %1 = vector.shape_cast %0 : vector<1x28x1x28xbf16> to vector<28x1x28xbf16>
    %2 = vector.extract_strided_slice %1 {offsets = [0, 0, 0], sizes = [24, 1, 28], strides = [1, 1, 1]} : vector<28x1x28xbf16> to vector<24x1x28xbf16>
    %3 = vector.shape_cast %2 : vector<24x1x28xbf16> to vector<24x28xbf16>
    %c0_3 = arith.constant 0 : index
    %c0_4 = arith.constant 0 : index
    %c0_5 = arith.constant 0 : index
    %4 = vector.load %arg2[%c0_3, %c0_4, %c0_5] : memref<5x28x768xbf16, #tpu.memory_space<vmem>>, vector<1x28x768xbf16>
    %5 = vector.shape_cast %4 : vector<1x28x768xbf16> to vector<28x768xbf16>
    %cst = arith.constant dense<0.000000e+00> : vector<24x768xf32>
    %6 = tpu.matmul %3, %5, %cst {dimension_numbers = #tpu.dot_dimension_numbers<[1], [0], [0], [1], [0, 0, 1, 1], [], []>} : vector<24x28xbf16>, vector<28x768xbf16>, vector<24x768xf32> -> vector<24x768xf32>
    %7 = vector.extract_strided_slice %1 {offsets = [1, 0, 0], sizes = [24, 1, 28], strides = [1, 1, 1]} : vector<28x1x28xbf16> to vector<24x1x28xbf16>
    %8 = vector.shape_cast %7 : vector<24x1x28xbf16> to vector<24x28xbf16>
    %c1 = arith.constant 1 : index
    %c0_6 = arith.constant 0 : index
    %c0_7 = arith.constant 0 : index
    %9 = vector.load %arg2[%c1, %c0_6, %c0_7] : memref<5x28x768xbf16, #tpu.memory_space<vmem>>, vector<1x28x768xbf16>
    %10 = vector.shape_cast %9 : vector<1x28x768xbf16> to vector<28x768xbf16>
    %cst_8 = arith.constant dense<0.000000e+00> : vector<24x768xf32>
    %11 = tpu.matmul %8, %10, %cst_8 {dimension_numbers = #tpu.dot_dimension_numbers<[1], [0], [0], [1], [0, 0, 1, 1], [], []>} : vector<24x28xbf16>, vector<28x768xbf16>, vector<24x768xf32> -> vector<24x768xf32>
    %12 = arith.addf %6, %11 : vector<24x768xf32>
    %13 = vector.extract_strided_slice %1 {offsets = [2, 0, 0], sizes = [24, 1, 28], strides = [1, 1, 1]} : vector<28x1x28xbf16> to vector<24x1x28xbf16>
    %14 = vector.shape_cast %13 : vector<24x1x28xbf16> to vector<24x28xbf16>
    %c2 = arith.constant 2 : index
    %c0_9 = arith.constant 0 : index
    %c0_10 = arith.constant 0 : index
    %15 = vector.load %arg2[%c2, %c0_9, %c0_10] : memref<5x28x768xbf16, #tpu.memory_space<vmem>>, vector<1x28x768xbf16>
    %16 = vector.shape_cast %15 : vector<1x28x768xbf16> to vector<28x768xbf16>
    %cst_11 = arith.constant dense<0.000000e+00> : vector<24x768xf32>
    %17 = tpu.matmul %14, %16, %cst_11 {dimension_numbers = #tpu.dot_dimension_numbers<[1], [0], [0], [1], [0, 0, 1, 1], [], []>} : vector<24x28xbf16>, vector<28x768xbf16>, vector<24x768xf32> -> vector<24x768xf32>
    %18 = arith.addf %12, %17 : vector<24x768xf32>
    %19 = vector.extract_strided_slice %1 {offsets = [3, 0, 0], sizes = [24, 1, 28], strides = [1, 1, 1]} : vector<28x1x28xbf16> to vector<24x1x28xbf16>
    %20 = vector.shape_cast %19 : vector<24x1x28xbf16> to vector<24x28xbf16>
    %c3 = arith.constant 3 : index
    %c0_12 = arith.constant 0 : index
    %c0_13 = arith.constant 0 : index
    %21 = vector.load %arg2[%c3, %c0_12, %c0_13] : memref<5x28x768xbf16, #tpu.memory_space<vmem>>, vector<1x28x768xbf16>
    %22 = vector.shape_cast %21 : vector<1x28x768xbf16> to vector<28x768xbf16>
    %cst_14 = arith.constant dense<0.000000e+00> : vector<24x768xf32>
    %23 = tpu.matmul %20, %22, %cst_14 {dimension_numbers = #tpu.dot_dimension_numbers<[1], [0], [0], [1], [0, 0, 1, 1], [], []>} : vector<24x28xbf16>, vector<28x768xbf16>, vector<24x768xf32> -> vector<24x768xf32>
    %24 = arith.addf %18, %23 : vector<24x768xf32>
    %25 = vector.extract_strided_slice %1 {offsets = [4, 0, 0], sizes = [24, 1, 28], strides = [1, 1, 1]} : vector<28x1x28xbf16> to vector<24x1x28xbf16>
    %26 = vector.shape_cast %25 : vector<24x1x28xbf16> to vector<24x28xbf16>
    %c4 = arith.constant 4 : index
    %c0_15 = arith.constant 0 : index
    %c0_16 = arith.constant 0 : index
    %27 = vector.load %arg2[%c4, %c0_15, %c0_16] : memref<5x28x768xbf16, #tpu.memory_space<vmem>>, vector<1x28x768xbf16>
    %28 = vector.shape_cast %27 : vector<1x28x768xbf16> to vector<28x768xbf16>
    %cst_17 = arith.constant dense<0.000000e+00> : vector<24x768xf32>
    %29 = tpu.matmul %26, %28, %cst_17 {dimension_numbers = #tpu.dot_dimension_numbers<[1], [0], [0], [1], [0, 0, 1, 1], [], []>} : vector<24x28xbf16>, vector<28x768xbf16>, vector<24x768xf32> -> vector<24x768xf32>
    %30 = arith.addf %24, %29 : vector<24x768xf32>
    %c0_18 = arith.constant 0 : index
    %c0_19 = arith.constant 0 : index
    %31 = vector.load %arg3[%c0_18, %c0_19] : memref<1x768xf32, #tpu.memory_space<vmem>>, vector<1x768xf32>
    %32 = vector.broadcast %31 : vector<1x768xf32> to vector<24x768xf32>
    %33 = arith.addf %30, %32 : vector<24x768xf32>
    %cst_20 = arith.constant 0.000000e+00 : f32
    %34 = vector.broadcast %cst_20 : f32 to vector<24x768xf32>
    %35 = arith.maximumf %33, %34 : vector<24x768xf32>
    %36 = vector.extract_strided_slice %35 {offsets = [0, 0], sizes = [1, 768], strides = [1, 1]} : vector<24x768xf32> to vector<1x768xf32>
    %37 = vector.extract_strided_slice %35 {offsets = [1, 0], sizes = [1, 768], strides = [1, 1]} : vector<24x768xf32> to vector<1x768xf32>
    %38 = arith.maximumf %36, %37 : vector<1x768xf32>
    %39 = vector.extract_strided_slice %38 {offsets = [0, 0], sizes = [1, 384], strides = [1, 1]} : vector<1x768xf32> to vector<1x384xf32>
    %40 = vector.extract_strided_slice %38 {offsets = [0, 384], sizes = [1, 384], strides = [1, 1]} : vector<1x768xf32> to vector<1x384xf32>
    %41 = arith.maximumf %39, %40 : vector<1x384xf32>
    %42 = arith.truncf %41 : vector<1x384xf32> to vector<1x384xbf16>
    %c0_21 = arith.constant 0 : index
    %c0_22 = arith.constant 0 : index
    %43 = vector.load %arg13[%c0_21, %c0_22] : memref<12x384xbf16, #tpu.memory_space<vmem>>, vector<1x384xbf16>
    tpu.vector_store %arg13[%c0_21, %c0_22], %42 {strides = array<i32>} : memref<12x384xbf16, #tpu.memory_space<vmem>>, vector<1x384xbf16>,
    %44 = vector.extract_strided_slice %35 {offsets = [2, 0], sizes = [1, 768], strides = [1, 1]} : vector<24x768xf32> to vector<1x768xf32>
    %45 = vector.extract_strided_slice %35 {offsets = [3, 0], sizes = [1, 768], strides = [1, 1]} : vector<24x768xf32> to vector<1x768xf32>
    %46 = arith.maximumf %44, %45 : vector<1x768xf32>
    %47 = vector.extract_strided_slice %46 {offsets = [0, 0], sizes = [1, 384], strides = [1, 1]} : vector<1x768xf32> to vector<1x384xf32>
    %48 = vector.extract_strided_slice %46 {offsets = [0, 384], sizes = [1, 384], strides = [1, 1]} : vector<1x768xf32> to vector<1x384xf32>
    %49 = arith.maximumf %47, %48 : vector<1x384xf32>
    %50 = arith.truncf %49 : vector<1x384xf32> to vector<1x384xbf16>
    %c1_23 = arith.constant 1 : index
    %c0_24 = arith.constant 0 : index
    %51 = vector.load %arg13[%c1_23, %c0_24] : memref<12x384xbf16, #tpu.memory_space<vmem>>, vector<1x384xbf16>
    tpu.vector_store %arg13[%c1_23, %c0_24], %50 {strides = array<i32>} : memref<12x384xbf16, #tpu.memory_space<vmem>>, vector<1x384xbf16>,
    %52 = vector.extract_strided_slice %35 {offsets = [4, 0], sizes = [1, 768], strides = [1, 1]} : vector<24x768xf32> to vector<1x768xf32>
    %53 = vector.extract_strided_slice %35 {offsets = [5, 0], sizes = [1, 768], strides = [1, 1]} : vector<24x768xf32> to vector<1x768xf32>
    %54 = arith.maximumf %52, %53 : vector<1x768xf32>
    %55 = vector.extract_strided_slice %54 {offsets = [0, 0], sizes = [1, 384], strides = [1, 1]} : vector<1x768xf32> to vector<1x384xf32>
    %56 = vector.extract_strided_slice %54 {offsets = [0, 384], sizes = [1, 384], strides = [1, 1]} : vector<1x768xf32> to vector<1x384xf32>
    %57 = arith.maximumf %55, %56 : vector<1x384xf32>
    %58 = arith.truncf %57 : vector<1x384xf32> to vector<1x384xbf16>
    %c2_25 = arith.constant 2 : index
    %c0_26 = arith.constant 0 : index
    %59 = vector.load %arg13[%c2_25, %c0_26] : memref<12x384xbf16, #tpu.memory_space<vmem>>, vector<1x384xbf16>
    tpu.vector_store %arg13[%c2_25, %c0_26], %58 {strides = array<i32>} : memref<12x384xbf16, #tpu.memory_space<vmem>>, vector<1x384xbf16>,
    %60 = vector.extract_strided_slice %35 {offsets = [6, 0], sizes = [1, 768], strides = [1, 1]} : vector<24x768xf32> to vector<1x768xf32>
    %61 = vector.extract_strided_slice %35 {offsets = [7, 0], sizes = [1, 768], strides = [1, 1]} : vector<24x768xf32> to vector<1x768xf32>
    %62 = arith.maximumf %60, %61 : vector<1x768xf32>
    %63 = vector.extract_strided_slice %62 {offsets = [0, 0], sizes = [1, 384], strides = [1, 1]} : vector<1x768xf32> to vector<1x384xf32>
    %64 = vector.extract_strided_slice %62 {offsets = [0, 384], sizes = [1, 384], strides = [1, 1]} : vector<1x768xf32> to vector<1x384xf32>
    %65 = arith.maximumf %63, %64 : vector<1x384xf32>
    %66 = arith.truncf %65 : vector<1x384xf32> to vector<1x384xbf16>
    %c3_27 = arith.constant 3 : index
    %c0_28 = arith.constant 0 : index
    %67 = vector.load %arg13[%c3_27, %c0_28] : memref<12x384xbf16, #tpu.memory_space<vmem>>, vector<1x384xbf16>
    tpu.vector_store %arg13[%c3_27, %c0_28], %66 {strides = array<i32>} : memref<12x384xbf16, #tpu.memory_space<vmem>>, vector<1x384xbf16>,
    %68 = vector.extract_strided_slice %35 {offsets = [8, 0], sizes = [1, 768], strides = [1, 1]} : vector<24x768xf32> to vector<1x768xf32>
    %69 = vector.extract_strided_slice %35 {offsets = [9, 0], sizes = [1, 768], strides = [1, 1]} : vector<24x768xf32> to vector<1x768xf32>
    %70 = arith.maximumf %68, %69 : vector<1x768xf32>
    %71 = vector.extract_strided_slice %70 {offsets = [0, 0], sizes = [1, 384], strides = [1, 1]} : vector<1x768xf32> to vector<1x384xf32>
    %72 = vector.extract_strided_slice %70 {offsets = [0, 384], sizes = [1, 384], strides = [1, 1]} : vector<1x768xf32> to vector<1x384xf32>
    %73 = arith.maximumf %71, %72 : vector<1x384xf32>
    %74 = arith.truncf %73 : vector<1x384xf32> to vector<1x384xbf16>
    %c4_29 = arith.constant 4 : index
    %c0_30 = arith.constant 0 : index
    %75 = vector.load %arg13[%c4_29, %c0_30] : memref<12x384xbf16, #tpu.memory_space<vmem>>, vector<1x384xbf16>
    tpu.vector_store %arg13[%c4_29, %c0_30], %74 {strides = array<i32>} : memref<12x384xbf16, #tpu.memory_space<vmem>>, vector<1x384xbf16>,
    %76 = vector.extract_strided_slice %35 {offsets = [10, 0], sizes = [1, 768], strides = [1, 1]} : vector<24x768xf32> to vector<1x768xf32>
    %77 = vector.extract_strided_slice %35 {offsets = [11, 0], sizes = [1, 768], strides = [1, 1]} : vector<24x768xf32> to vector<1x768xf32>
    %78 = arith.maximumf %76, %77 : vector<1x768xf32>
    %79 = vector.extract_strided_slice %78 {offsets = [0, 0], sizes = [1, 384], strides = [1, 1]} : vector<1x768xf32> to vector<1x384xf32>
    %80 = vector.extract_strided_slice %78 {offsets = [0, 384], sizes = [1, 384], strides = [1, 1]} : vector<1x768xf32> to vector<1x384xf32>
    %81 = arith.maximumf %79, %80 : vector<1x384xf32>
    %82 = arith.truncf %81 : vector<1x384xf32> to vector<1x384xbf16>
    %c5 = arith.constant 5 : index
    %c0_31 = arith.constant 0 : index
    %83 = vector.load %arg13[%c5, %c0_31] : memref<12x384xbf16, #tpu.memory_space<vmem>>, vector<1x384xbf16>
    tpu.vector_store %arg13[%c5, %c0_31], %82 {strides = array<i32>} : memref<12x384xbf16, #tpu.memory_space<vmem>>, vector<1x384xbf16>,
    %84 = vector.extract_strided_slice %35 {offsets = [12, 0], sizes = [1, 768], strides = [1, 1]} : vector<24x768xf32> to vector<1x768xf32>
    %85 = vector.extract_strided_slice %35 {offsets = [13, 0], sizes = [1, 768], strides = [1, 1]} : vector<24x768xf32> to vector<1x768xf32>
    %86 = arith.maximumf %84, %85 : vector<1x768xf32>
    %87 = vector.extract_strided_slice %86 {offsets = [0, 0], sizes = [1, 384], strides = [1, 1]} : vector<1x768xf32> to vector<1x384xf32>
    %88 = vector.extract_strided_slice %86 {offsets = [0, 384], sizes = [1, 384], strides = [1, 1]} : vector<1x768xf32> to vector<1x384xf32>
    %89 = arith.maximumf %87, %88 : vector<1x384xf32>
    %90 = arith.truncf %89 : vector<1x384xf32> to vector<1x384xbf16>
    %c6 = arith.constant 6 : index
    %c0_32 = arith.constant 0 : index
    %91 = vector.load %arg13[%c6, %c0_32] : memref<12x384xbf16, #tpu.memory_space<vmem>>, vector<1x384xbf16>
    tpu.vector_store %arg13[%c6, %c0_32], %90 {strides = array<i32>} : memref<12x384xbf16, #tpu.memory_space<vmem>>, vector<1x384xbf16>,
    %92 = vector.extract_strided_slice %35 {offsets = [14, 0], sizes = [1, 768], strides = [1, 1]} : vector<24x768xf32> to vector<1x768xf32>
    %93 = vector.extract_strided_slice %35 {offsets = [15, 0], sizes = [1, 768], strides = [1, 1]} : vector<24x768xf32> to vector<1x768xf32>
    %94 = arith.maximumf %92, %93 : vector<1x768xf32>
    %95 = vector.extract_strided_slice %94 {offsets = [0, 0], sizes = [1, 384], strides = [1, 1]} : vector<1x768xf32> to vector<1x384xf32>
    %96 = vector.extract_strided_slice %94 {offsets = [0, 384], sizes = [1, 384], strides = [1, 1]} : vector<1x768xf32> to vector<1x384xf32>
    %97 = arith.maximumf %95, %96 : vector<1x384xf32>
    %98 = arith.truncf %97 : vector<1x384xf32> to vector<1x384xbf16>
    %c7 = arith.constant 7 : index
    %c0_33 = arith.constant 0 : index
    %99 = vector.load %arg13[%c7, %c0_33] : memref<12x384xbf16, #tpu.memory_space<vmem>>, vector<1x384xbf16>
    tpu.vector_store %arg13[%c7, %c0_33], %98 {strides = array<i32>} : memref<12x384xbf16, #tpu.memory_space<vmem>>, vector<1x384xbf16>,
    %100 = vector.extract_strided_slice %35 {offsets = [16, 0], sizes = [1, 768], strides = [1, 1]} : vector<24x768xf32> to vector<1x768xf32>
    %101 = vector.extract_strided_slice %35 {offsets = [17, 0], sizes = [1, 768], strides = [1, 1]} : vector<24x768xf32> to vector<1x768xf32>
    %102 = arith.maximumf %100, %101 : vector<1x768xf32>
    %103 = vector.extract_strided_slice %102 {offsets = [0, 0], sizes = [1, 384], strides = [1, 1]} : vector<1x768xf32> to vector<1x384xf32>
    %104 = vector.extract_strided_slice %102 {offsets = [0, 384], sizes = [1, 384], strides = [1, 1]} : vector<1x768xf32> to vector<1x384xf32>
    %105 = arith.maximumf %103, %104 : vector<1x384xf32>
    %106 = arith.truncf %105 : vector<1x384xf32> to vector<1x384xbf16>
    %c8 = arith.constant 8 : index
    %c0_34 = arith.constant 0 : index
    %107 = vector.load %arg13[%c8, %c0_34] : memref<12x384xbf16, #tpu.memory_space<vmem>>, vector<1x384xbf16>
    tpu.vector_store %arg13[%c8, %c0_34], %106 {strides = array<i32>} : memref<12x384xbf16, #tpu.memory_space<vmem>>, vector<1x384xbf16>,
    %108 = vector.extract_strided_slice %35 {offsets = [18, 0], sizes = [1, 768], strides = [1, 1]} : vector<24x768xf32> to vector<1x768xf32>
    %109 = vector.extract_strided_slice %35 {offsets = [19, 0], sizes = [1, 768], strides = [1, 1]} : vector<24x768xf32> to vector<1x768xf32>
    %110 = arith.maximumf %108, %109 : vector<1x768xf32>
    %111 = vector.extract_strided_slice %110 {offsets = [0, 0], sizes = [1, 384], strides = [1, 1]} : vector<1x768xf32> to vector<1x384xf32>
    %112 = vector.extract_strided_slice %110 {offsets = [0, 384], sizes = [1, 384], strides = [1, 1]} : vector<1x768xf32> to vector<1x384xf32>
    %113 = arith.maximumf %111, %112 : vector<1x384xf32>
    %114 = arith.truncf %113 : vector<1x384xf32> to vector<1x384xbf16>
    %c9 = arith.constant 9 : index
    %c0_35 = arith.constant 0 : index
    %115 = vector.load %arg13[%c9, %c0_35] : memref<12x384xbf16, #tpu.memory_space<vmem>>, vector<1x384xbf16>
    tpu.vector_store %arg13[%c9, %c0_35], %114 {strides = array<i32>} : memref<12x384xbf16, #tpu.memory_space<vmem>>, vector<1x384xbf16>,
    %116 = vector.extract_strided_slice %35 {offsets = [20, 0], sizes = [1, 768], strides = [1, 1]} : vector<24x768xf32> to vector<1x768xf32>
    %117 = vector.extract_strided_slice %35 {offsets = [21, 0], sizes = [1, 768], strides = [1, 1]} : vector<24x768xf32> to vector<1x768xf32>
    %118 = arith.maximumf %116, %117 : vector<1x768xf32>
    %119 = vector.extract_strided_slice %118 {offsets = [0, 0], sizes = [1, 384], strides = [1, 1]} : vector<1x768xf32> to vector<1x384xf32>
    %120 = vector.extract_strided_slice %118 {offsets = [0, 384], sizes = [1, 384], strides = [1, 1]} : vector<1x768xf32> to vector<1x384xf32>
    %121 = arith.maximumf %119, %120 : vector<1x384xf32>
    %122 = arith.truncf %121 : vector<1x384xf32> to vector<1x384xbf16>
    %c10 = arith.constant 10 : index
    %c0_36 = arith.constant 0 : index
    %123 = vector.load %arg13[%c10, %c0_36] : memref<12x384xbf16, #tpu.memory_space<vmem>>, vector<1x384xbf16>
    tpu.vector_store %arg13[%c10, %c0_36], %122 {strides = array<i32>} : memref<12x384xbf16, #tpu.memory_space<vmem>>, vector<1x384xbf16>,
    %124 = vector.extract_strided_slice %35 {offsets = [22, 0], sizes = [1, 768], strides = [1, 1]} : vector<24x768xf32> to vector<1x768xf32>
    %125 = vector.extract_strided_slice %35 {offsets = [23, 0], sizes = [1, 768], strides = [1, 1]} : vector<24x768xf32> to vector<1x768xf32>
    %126 = arith.maximumf %124, %125 : vector<1x768xf32>
    %127 = vector.extract_strided_slice %126 {offsets = [0, 0], sizes = [1, 384], strides = [1, 1]} : vector<1x768xf32> to vector<1x384xf32>
    %128 = vector.extract_strided_slice %126 {offsets = [0, 384], sizes = [1, 384], strides = [1, 1]} : vector<1x768xf32> to vector<1x384xf32>
    %129 = arith.maximumf %127, %128 : vector<1x384xf32>
    %130 = arith.truncf %129 : vector<1x384xf32> to vector<1x384xbf16>
    %c11 = arith.constant 11 : index
    %c0_37 = arith.constant 0 : index
    %131 = vector.load %arg13[%c11, %c0_37] : memref<12x384xbf16, #tpu.memory_space<vmem>>, vector<1x384xbf16>
    tpu.vector_store %arg13[%c11, %c0_37], %130 {strides = array<i32>} : memref<12x384xbf16, #tpu.memory_space<vmem>>, vector<1x384xbf16>,
    %c0_38 = arith.constant 0 : index
    %c0_39 = arith.constant 0 : index
    %132 = vector.load %arg13[%c0_38, %c0_39] : memref<12x384xbf16, #tpu.memory_space<vmem>>, vector<8x384xbf16>
    %c0_40 = arith.constant 0 : index
    %c0_41 = arith.constant 0 : index
    %c0_42 = arith.constant 0 : index
    %133 = vector.load %arg4[%c0_40, %c0_41, %c0_42] : memref<5x384x512xbf16, #tpu.memory_space<vmem>>, vector<1x384x512xbf16>
    %134 = vector.shape_cast %133 : vector<1x384x512xbf16> to vector<384x512xbf16>
    %cst_43 = arith.constant dense<0.000000e+00> : vector<8x512xf32>
    %135 = tpu.matmul %132, %134, %cst_43 {dimension_numbers = #tpu.dot_dimension_numbers<[1], [0], [0], [1], [0, 0, 1, 1], [], []>} : vector<8x384xbf16>, vector<384x512xbf16>, vector<8x512xf32> -> vector<8x512xf32>
    %c1_44 = arith.constant 1 : index
    %c0_45 = arith.constant 0 : index
    %136 = vector.load %arg13[%c1_44, %c0_45] : memref<12x384xbf16, #tpu.memory_space<vmem>>, vector<8x384xbf16>
    %c1_46 = arith.constant 1 : index
    %c0_47 = arith.constant 0 : index
    %c0_48 = arith.constant 0 : index
    %137 = vector.load %arg4[%c1_46, %c0_47, %c0_48] : memref<5x384x512xbf16, #tpu.memory_space<vmem>>, vector<1x384x512xbf16>
    %138 = vector.shape_cast %137 : vector<1x384x512xbf16> to vector<384x512xbf16>
    %cst_49 = arith.constant dense<0.000000e+00> : vector<8x512xf32>
    %139 = tpu.matmul %136, %138, %cst_49 {dimension_numbers = #tpu.dot_dimension_numbers<[1], [0], [0], [1], [0, 0, 1, 1], [], []>} : vector<8x384xbf16>, vector<384x512xbf16>, vector<8x512xf32> -> vector<8x512xf32>
    %140 = arith.addf %135, %139 : vector<8x512xf32>
    %c2_50 = arith.constant 2 : index
    %c0_51 = arith.constant 0 : index
    %141 = vector.load %arg13[%c2_50, %c0_51] : memref<12x384xbf16, #tpu.memory_space<vmem>>, vector<8x384xbf16>
    %c2_52 = arith.constant 2 : index
    %c0_53 = arith.constant 0 : index
    %c0_54 = arith.constant 0 : index
    %142 = vector.load %arg4[%c2_52, %c0_53, %c0_54] : memref<5x384x512xbf16, #tpu.memory_space<vmem>>, vector<1x384x512xbf16>
    %143 = vector.shape_cast %142 : vector<1x384x512xbf16> to vector<384x512xbf16>
    %cst_55 = arith.constant dense<0.000000e+00> : vector<8x512xf32>
    %144 = tpu.matmul %141, %143, %cst_55 {dimension_numbers = #tpu.dot_dimension_numbers<[1], [0], [0], [1], [0, 0, 1, 1], [], []>} : vector<8x384xbf16>, vector<384x512xbf16>, vector<8x512xf32> -> vector<8x512xf32>
    %145 = arith.addf %140, %144 : vector<8x512xf32>
    %c3_56 = arith.constant 3 : index
    %c0_57 = arith.constant 0 : index
    %146 = vector.load %arg13[%c3_56, %c0_57] : memref<12x384xbf16, #tpu.memory_space<vmem>>, vector<8x384xbf16>
    %c3_58 = arith.constant 3 : index
    %c0_59 = arith.constant 0 : index
    %c0_60 = arith.constant 0 : index
    %147 = vector.load %arg4[%c3_58, %c0_59, %c0_60] : memref<5x384x512xbf16, #tpu.memory_space<vmem>>, vector<1x384x512xbf16>
    %148 = vector.shape_cast %147 : vector<1x384x512xbf16> to vector<384x512xbf16>
    %cst_61 = arith.constant dense<0.000000e+00> : vector<8x512xf32>
    %149 = tpu.matmul %146, %148, %cst_61 {dimension_numbers = #tpu.dot_dimension_numbers<[1], [0], [0], [1], [0, 0, 1, 1], [], []>} : vector<8x384xbf16>, vector<384x512xbf16>, vector<8x512xf32> -> vector<8x512xf32>
    %150 = arith.addf %145, %149 : vector<8x512xf32>
    %c4_62 = arith.constant 4 : index
    %c0_63 = arith.constant 0 : index
    %151 = vector.load %arg13[%c4_62, %c0_63] : memref<12x384xbf16, #tpu.memory_space<vmem>>, vector<8x384xbf16>
    %c4_64 = arith.constant 4 : index
    %c0_65 = arith.constant 0 : index
    %c0_66 = arith.constant 0 : index
    %152 = vector.load %arg4[%c4_64, %c0_65, %c0_66] : memref<5x384x512xbf16, #tpu.memory_space<vmem>>, vector<1x384x512xbf16>
    %153 = vector.shape_cast %152 : vector<1x384x512xbf16> to vector<384x512xbf16>
    %cst_67 = arith.constant dense<0.000000e+00> : vector<8x512xf32>
    %154 = tpu.matmul %151, %153, %cst_67 {dimension_numbers = #tpu.dot_dimension_numbers<[1], [0], [0], [1], [0, 0, 1, 1], [], []>} : vector<8x384xbf16>, vector<384x512xbf16>, vector<8x512xf32> -> vector<8x512xf32>
    %155 = arith.addf %150, %154 : vector<8x512xf32>
    %c0_68 = arith.constant 0 : index
    %c0_69 = arith.constant 0 : index
    %156 = vector.load %arg5[%c0_68, %c0_69] : memref<1x512xf32, #tpu.memory_space<vmem>>, vector<1x512xf32>
    %157 = vector.broadcast %156 : vector<1x512xf32> to vector<8x512xf32>
    %158 = arith.addf %155, %157 : vector<8x512xf32>
    %cst_70 = arith.constant 0.000000e+00 : f32
    %159 = vector.broadcast %cst_70 : f32 to vector<8x512xf32>
    %160 = arith.maximumf %158, %159 : vector<8x512xf32>
    %161 = vector.extract_strided_slice %160 {offsets = [0, 0], sizes = [1, 512], strides = [1, 1]} : vector<8x512xf32> to vector<1x512xf32>
    %162 = vector.extract_strided_slice %160 {offsets = [1, 0], sizes = [1, 512], strides = [1, 1]} : vector<8x512xf32> to vector<1x512xf32>
    %163 = arith.maximumf %161, %162 : vector<1x512xf32>
    %164 = vector.extract_strided_slice %163 {offsets = [0, 0], sizes = [1, 256], strides = [1, 1]} : vector<1x512xf32> to vector<1x256xf32>
    %165 = vector.extract_strided_slice %163 {offsets = [0, 256], sizes = [1, 256], strides = [1, 1]} : vector<1x512xf32> to vector<1x256xf32>
    %166 = arith.maximumf %164, %165 : vector<1x256xf32>
    %167 = arith.truncf %166 : vector<1x256xf32> to vector<1x256xbf16>
    %c0_71 = arith.constant 0 : index
    %c0_72 = arith.constant 0 : index
    %c0_73 = arith.constant 0 : index
    %168 = vector.load %arg6[%c0_71, %c0_72, %c0_73] : memref<4x256x1024xbf16, #tpu.memory_space<vmem>>, vector<1x256x1024xbf16>
    %169 = vector.shape_cast %168 : vector<1x256x1024xbf16> to vector<256x1024xbf16>
    %cst_74 = arith.constant dense<0.000000e+00> : vector<1x1024xf32>
    %170 = tpu.matmul %167, %169, %cst_74 {dimension_numbers = #tpu.dot_dimension_numbers<[1], [0], [0], [1], [0, 0, 1, 1], [], []>} : vector<1x256xbf16>, vector<256x1024xbf16>, vector<1x1024xf32> -> vector<1x1024xf32>
    %171 = vector.extract_strided_slice %160 {offsets = [2, 0], sizes = [1, 512], strides = [1, 1]} : vector<8x512xf32> to vector<1x512xf32>
    %172 = vector.extract_strided_slice %160 {offsets = [3, 0], sizes = [1, 512], strides = [1, 1]} : vector<8x512xf32> to vector<1x512xf32>
    %173 = arith.maximumf %171, %172 : vector<1x512xf32>
    %174 = vector.extract_strided_slice %173 {offsets = [0, 0], sizes = [1, 256], strides = [1, 1]} : vector<1x512xf32> to vector<1x256xf32>
    %175 = vector.extract_strided_slice %173 {offsets = [0, 256], sizes = [1, 256], strides = [1, 1]} : vector<1x512xf32> to vector<1x256xf32>
    %176 = arith.maximumf %174, %175 : vector<1x256xf32>
    %177 = arith.truncf %176 : vector<1x256xf32> to vector<1x256xbf16>
    %c1_75 = arith.constant 1 : index
    %c0_76 = arith.constant 0 : index
    %c0_77 = arith.constant 0 : index
    %178 = vector.load %arg6[%c1_75, %c0_76, %c0_77] : memref<4x256x1024xbf16, #tpu.memory_space<vmem>>, vector<1x256x1024xbf16>
    %179 = vector.shape_cast %178 : vector<1x256x1024xbf16> to vector<256x1024xbf16>
    %cst_78 = arith.constant dense<0.000000e+00> : vector<1x1024xf32>
    %180 = tpu.matmul %177, %179, %cst_78 {dimension_numbers = #tpu.dot_dimension_numbers<[1], [0], [0], [1], [0, 0, 1, 1], [], []>} : vector<1x256xbf16>, vector<256x1024xbf16>, vector<1x1024xf32> -> vector<1x1024xf32>
    %181 = arith.addf %170, %180 : vector<1x1024xf32>
    %182 = vector.extract_strided_slice %160 {offsets = [4, 0], sizes = [1, 512], strides = [1, 1]} : vector<8x512xf32> to vector<1x512xf32>
    %183 = vector.extract_strided_slice %160 {offsets = [5, 0], sizes = [1, 512], strides = [1, 1]} : vector<8x512xf32> to vector<1x512xf32>
    %184 = arith.maximumf %182, %183 : vector<1x512xf32>
    %185 = vector.extract_strided_slice %184 {offsets = [0, 0], sizes = [1, 256], strides = [1, 1]} : vector<1x512xf32> to vector<1x256xf32>
    %186 = vector.extract_strided_slice %184 {offsets = [0, 256], sizes = [1, 256], strides = [1, 1]} : vector<1x512xf32> to vector<1x256xf32>
    %187 = arith.maximumf %185, %186 : vector<1x256xf32>
    %188 = arith.truncf %187 : vector<1x256xf32> to vector<1x256xbf16>
    %c2_79 = arith.constant 2 : index
    %c0_80 = arith.constant 0 : index
    %c0_81 = arith.constant 0 : index
    %189 = vector.load %arg6[%c2_79, %c0_80, %c0_81] : memref<4x256x1024xbf16, #tpu.memory_space<vmem>>, vector<1x256x1024xbf16>
    %190 = vector.shape_cast %189 : vector<1x256x1024xbf16> to vector<256x1024xbf16>
    %cst_82 = arith.constant dense<0.000000e+00> : vector<1x1024xf32>
    %191 = tpu.matmul %188, %190, %cst_82 {dimension_numbers = #tpu.dot_dimension_numbers<[1], [0], [0], [1], [0, 0, 1, 1], [], []>} : vector<1x256xbf16>, vector<256x1024xbf16>, vector<1x1024xf32> -> vector<1x1024xf32>
    %192 = arith.addf %181, %191 : vector<1x1024xf32>
    %193 = vector.extract_strided_slice %160 {offsets = [6, 0], sizes = [1, 512], strides = [1, 1]} : vector<8x512xf32> to vector<1x512xf32>
    %194 = vector.extract_strided_slice %160 {offsets = [7, 0], sizes = [1, 512], strides = [1, 1]} : vector<8x512xf32> to vector<1x512xf32>
    %195 = arith.maximumf %193, %194 : vector<1x512xf32>
    %196 = vector.extract_strided_slice %195 {offsets = [0, 0], sizes = [1, 256], strides = [1, 1]} : vector<1x512xf32> to vector<1x256xf32>
    %197 = vector.extract_strided_slice %195 {offsets = [0, 256], sizes = [1, 256], strides = [1, 1]} : vector<1x512xf32> to vector<1x256xf32>
    %198 = arith.maximumf %196, %197 : vector<1x256xf32>
    %199 = arith.truncf %198 : vector<1x256xf32> to vector<1x256xbf16>
    %c3_83 = arith.constant 3 : index
    %c0_84 = arith.constant 0 : index
    %c0_85 = arith.constant 0 : index
    %200 = vector.load %arg6[%c3_83, %c0_84, %c0_85] : memref<4x256x1024xbf16, #tpu.memory_space<vmem>>, vector<1x256x1024xbf16>
    %201 = vector.shape_cast %200 : vector<1x256x1024xbf16> to vector<256x1024xbf16>
    %cst_86 = arith.constant dense<0.000000e+00> : vector<1x1024xf32>
    %202 = tpu.matmul %199, %201, %cst_86 {dimension_numbers = #tpu.dot_dimension_numbers<[1], [0], [0], [1], [0, 0, 1, 1], [], []>} : vector<1x256xbf16>, vector<256x1024xbf16>, vector<1x1024xf32> -> vector<1x1024xf32>
    %203 = arith.addf %192, %202 : vector<1x1024xf32>
    %c0_87 = arith.constant 0 : index
    %c0_88 = arith.constant 0 : index
    %204 = vector.load %arg7[%c0_87, %c0_88] : memref<1x1024xf32, #tpu.memory_space<vmem>>, vector<1x1024xf32>
    %205 = arith.addf %203, %204 : vector<1x1024xf32>
    %cst_89 = arith.constant 0.000000e+00 : f32
    %206 = vector.broadcast %cst_89 : f32 to vector<1x1024xf32>
    %207 = arith.maximumf %205, %206 : vector<1x1024xf32>
    %208 = arith.truncf %207 : vector<1x1024xf32> to vector<1x1024xbf16>
    %c0_90 = arith.constant 0 : index
    %c0_91 = arith.constant 0 : index
    %209 = vector.load %arg8[%c0_90, %c0_91] : memref<1024x256xbf16, #tpu.memory_space<vmem>>, vector<1024x256xbf16>
    %cst_92 = arith.constant dense<0.000000e+00> : vector<1x256xf32>
    %210 = tpu.matmul %208, %209, %cst_92 {dimension_numbers = #tpu.dot_dimension_numbers<[1], [0], [0], [1], [0, 0, 1, 1], [], []>} : vector<1x1024xbf16>, vector<1024x256xbf16>, vector<1x256xf32> -> vector<1x256xf32>
    %c0_93 = arith.constant 0 : index
    %c0_94 = arith.constant 0 : index
    %211 = vector.load %arg9[%c0_93, %c0_94] : memref<1x256xf32, #tpu.memory_space<vmem>>, vector<1x256xf32>
    %212 = arith.addf %210, %211 : vector<1x256xf32>
    %cst_95 = arith.constant 0.000000e+00 : f32
    %213 = vector.broadcast %cst_95 : f32 to vector<1x256xf32>
    %214 = arith.maximumf %212, %213 : vector<1x256xf32>
    %215 = arith.truncf %214 : vector<1x256xf32> to vector<1x256xbf16>
    %c0_96 = arith.constant 0 : index
    %c0_97 = arith.constant 0 : index
    %216 = vector.load %arg10[%c0_96, %c0_97] : memref<256x10xbf16, #tpu.memory_space<vmem>>, vector<256x10xbf16>
    %cst_98 = arith.constant dense<0.000000e+00> : vector<1x10xf32>
    %217 = tpu.matmul %215, %216, %cst_98 {dimension_numbers = #tpu.dot_dimension_numbers<[1], [0], [0], [1], [0, 0, 1, 1], [], []>} : vector<1x256xbf16>, vector<256x10xbf16>, vector<1x10xf32> -> vector<1x10xf32>
    %c0_99 = arith.constant 0 : index
    %c0_100 = arith.constant 0 : index
    %218 = vector.load %arg11[%c0_99, %c0_100] : memref<1x10xf32, #tpu.memory_space<vmem>>, vector<1x10xf32>
    %219 = arith.addf %217, %218 : vector<1x10xf32>
    %c0_101 = arith.constant 0 : index
    %c0_102 = arith.constant 0 : index
    %c0_103 = arith.constant 0 : index
    %220 = vector.load %arg12[%c0_101, %c0_102, %c0_103] : memref<1x1x10xf32, #tpu.memory_space<vmem>>, vector<1x1x10xf32>
    %221 = vector.shape_cast %220 : vector<1x1x10xf32> to vector<1x10xf32>
    %222 = vector.shape_cast %219 : vector<1x10xf32> to vector<1x1x10xf32>
    tpu.vector_store %arg12[%c0_101, %c0_102, %c0_103], %222 {strides = array<i32>} : memref<1x1x10xf32, #tpu.memory_space<vmem>>, vector<1x1x10xf32>,
    return
  }
  func.func @transform_0(%arg0: i32) -> (i32, i32, i32, i32) {
    %c0_i32 = arith.constant 0 : i32
    %c0_i32_0 = arith.constant 0 : i32
    %c0_i32_1 = arith.constant 0 : i32
    %c0_i32_2 = arith.constant 0 : i32
    return %arg0, %c0_i32, %c0_i32_0, %c0_i32_1 : i32, i32, i32, i32
  }
  func.func @transform_1(%arg0: i32) -> (i32, i32, i32) {
    %c0_i32 = arith.constant 0 : i32
    %c0_i32_0 = arith.constant 0 : i32
    %c0_i32_1 = arith.constant 0 : i32
    %c0_i32_2 = arith.constant 0 : i32
    return %c0_i32, %c0_i32_0, %c0_i32_1 : i32, i32, i32
  }
  func.func @transform_2(%arg0: i32) -> (i32, i32) {
    %c0_i32 = arith.constant 0 : i32
    %c0_i32_0 = arith.constant 0 : i32
    %c0_i32_1 = arith.constant 0 : i32
    return %c0_i32, %c0_i32_0 : i32, i32
  }
  func.func @transform_3(%arg0: i32) -> (i32, i32, i32) {
    %c0_i32 = arith.constant 0 : i32
    %c0_i32_0 = arith.constant 0 : i32
    %c0_i32_1 = arith.constant 0 : i32
    %c0_i32_2 = arith.constant 0 : i32
    return %c0_i32, %c0_i32_0, %c0_i32_1 : i32, i32, i32
  }
  func.func @transform_4(%arg0: i32) -> (i32, i32) {
    %c0_i32 = arith.constant 0 : i32
    %c0_i32_0 = arith.constant 0 : i32
    %c0_i32_1 = arith.constant 0 : i32
    return %c0_i32, %c0_i32_0 : i32, i32
  }
  func.func @transform_5(%arg0: i32) -> (i32, i32, i32) {
    %c0_i32 = arith.constant 0 : i32
    %c0_i32_0 = arith.constant 0 : i32
    %c0_i32_1 = arith.constant 0 : i32
    %c0_i32_2 = arith.constant 0 : i32
    return %c0_i32, %c0_i32_0, %c0_i32_1 : i32, i32, i32
  }
  func.func @transform_6(%arg0: i32) -> (i32, i32) {
    %c0_i32 = arith.constant 0 : i32
    %c0_i32_0 = arith.constant 0 : i32
    %c0_i32_1 = arith.constant 0 : i32
    return %c0_i32, %c0_i32_0 : i32, i32
  }
  func.func @transform_7(%arg0: i32) -> (i32, i32) {
    %c0_i32 = arith.constant 0 : i32
    %c0_i32_0 = arith.constant 0 : i32
    %c0_i32_1 = arith.constant 0 : i32
    return %c0_i32, %c0_i32_0 : i32, i32
  }
  func.func @transform_8(%arg0: i32) -> (i32, i32) {
    %c0_i32 = arith.constant 0 : i32
    %c0_i32_0 = arith.constant 0 : i32
    %c0_i32_1 = arith.constant 0 : i32
    return %c0_i32, %c0_i32_0 : i32, i32
  }
  func.func @transform_9(%arg0: i32) -> (i32, i32) {
    %c0_i32 = arith.constant 0 : i32
    %c0_i32_0 = arith.constant 0 : i32
    %c0_i32_1 = arith.constant 0 : i32
    return %c0_i32, %c0_i32_0 : i32, i32
  }
  func.func @transform_10(%arg0: i32) -> (i32, i32) {
    %c0_i32 = arith.constant 0 : i32
    %c0_i32_0 = arith.constant 0 : i32
    %c0_i32_1 = arith.constant 0 : i32
    return %c0_i32, %c0_i32_0 : i32, i32
  }
  func.func @transform_11(%arg0: i32) -> (i32, i32, i32) {
    %c0_i32 = arith.constant 0 : i32
    %c0_i32_0 = arith.constant 0 : i32
    %c0_i32_1 = arith.constant 0 : i32
    return %arg0, %c0_i32, %c0_i32_0 : i32, i32, i32
  }
}

</mosaic_0001>

<bundles_post_ra>
// kernel: forward.1
= control target key start
LH: loop header
LB: loop body
LE: loop exit
PB: predicated region body
PF: predicated region fallthrough
CT: control target
= control target key end

     0   :  { %s16458_s0 = inlined_call_operand.vmem [shape: bf16[2,28,1,28], index: 0, kind: input, shape index: {}]   ;;  %s16459_s1 = inlined_call_operand.hbm [shape: bf16[5,28,768], index: 1, kind: input, shape index: {}]   ;;  %s16460_s2 = inlined_call_operand.hbm [shape: f32[1,768], index: 2, kind: input, shape index: {}]   ;;  %s16461_s3 = inlined_call_operand.hbm [shape: bf16[5,384,512], index: 3, kind: input, shape index: {}]   ;;  %s16462_s4 = inlined_call_operand.hbm [shape: f32[1,512], index: 4, kind: input, shape index: {}]   ;;  %s16463_s5 = inlined_call_operand.hbm [shape: bf16[4,256,1024], index: 5, kind: input, shape index: {}]   ;;  %s16464_s6 = inlined_call_operand.hbm [shape: f32[1,1024], index: 6, kind: input, shape index: {}]   ;;  %s16465_s7 = inlined_call_operand.hbm [shape: bf16[1024,256], index: 7, kind: input, shape index: {}]   ;;  %s16466_s8 = inlined_call_operand.hbm [shape: f32[1,256], index: 8, kind: input, shape index: {}]   ;;  %s16467_s9 = inlined_call_operand.vmem [shape: bf16[256,10], index: 9, kind: input, shape index: {}]   ;;  %s16468_s10 = inlined_call_operand.hbm [shape: f32[1,10], index: 10, kind: input, shape index: {}]   ;;  %s16469_s11 = inlined_call_operand.hbm [shape: f32[2,1,10], index: 11, kind: output, shape index: {}]  }
   0x1   :  { %16488 = sst [smem:[#allocation30_spill]] %s16460_s2 }
   0x2   :  { %16489 = sst [smem:[#allocation31_spill]] %s16462_s4 }
   0x3   :  { %16 = vsyncpa [#allocation4], 0 }
   0x4   :  { %17 = vsyncpa [#allocation7], 0 }
   0x5   :  { %18 = vsyncpa [#allocation10], 0 }
   0x6   :  { %19 = vsyncpa [#allocation13], 0 }
   0x7   :  { %20 = vsyncpa [#allocation16], 0 }
   0x8   :  { %21 = vsyncpa [#allocation5], 0 }
   0x9   :  { %23 = vsyncpa [#allocation5 + $0x1], 0  ;;  %s14850_s17 = smov 0   ;;  %s14852_s18 = smov 0  }
   0xa   :  { %s14854_s19 = smov 0   ;;  %s14856_s20 = smov 0  }
   0xb LB: > { %16490 = sst [smem:[#allocation25_spill]] %s14756_s17  ;;  %s14871_s21 = sadd.s32 4294967295, %s14768_s20   ;;  %s14768_s20 = sphi %s14856_s20, %s16573_s20   ;;  %s14764_s19 = sphi %s14854_s19, %s16575_s19   ;;  %s14760_s18 = sphi %s14852_s18, %s16577_s18   ;;  %s14756_s17 = sphi %s14850_s17, %s16576_s17  }
   0xc   : > { %16491 = sst [smem:[#allocation26_spill]] %s14764_s19  ;;  %s11839_s22 = sadd.s32 4294967294, %s14768_s20  }
   0xd   : > { %s14875_s23 = sadd.s32 1, %s14768_s20   ;;  %s272_s24 = sadd.s32 1, %s14764_s19 }
   0xe   : > { %16492 = sst [smem:[#allocation27_spill]] %s14875_s23  ;;  %s269_s25 = ssub.s32 %s14768_s20, %s14875_s23 }
   0xf   : > { %p282_p0 = scmp.ne.s32.totalorder %s14764_s19, %s14760_s18  ;;  %p270_p1 = scmp.eq.s32.totalorder %s269_s25, 0 }
  0x10   : > { %p283_p2 = scmp.eq.s32.totalorder %s14871_s21, 1  ;;  %p288_p3 = scmp.ne.s32.totalorder %s14760_s18, %s14756_s17 }
  0x11   : > { %p289_p4 = scmp.eq.s32.totalorder %s11839_s22, 1  ;;  %p11840_p7 = scmp.ge.s32.totalorder %s14768_s20, 1 }
  0x12   : > { %s14886_s26 = scalar_select %p270_p1, %s14764_s19, %s272_s24  }
  0x13   : > { %p14888_p5 = por %p283_p2, %p282_p0  ;;  %p14892_p6 = por %p289_p4, %p288_p3 }
  0x14   : > { %16493 = sst [smem:[#allocation28_spill]] %s14886_s26  ;;  %p296_p8 = scmp.lt.s32.totalorder %s14768_s20, 3 }
  0x15   : > { %s16494_s27 = scalar_select %p14888_p5, 1, 0 }
  0x16   : > { %s16495_s28 = scalar_select %p14892_p6, 1, 0 }
  0x17   : > { %p16473_p9 = scmp.eq.s32.totalorder %s14871_s21, 0  ;;  %p14899_p10 = pnand %p11840_p7, %p296_p8 }
  0x18   : > { %16496 = sst [smem:[#allocation29_spill]] %s16495_s28  ;;  %s14770_s30 = smov [#allocation6]  }
  0x19   : > { %s16497_s29 = scalar_select %p14899_p10, 1, 0 }
  0x1a   : > { %s322_s12 = sshll.u32 %s14770_s30, 4  ;;  %p13299_p11 = pneg %p14899_p10  ;;  %s323_s12 = int_to_ptr.vmem [resolvable:$true] %s322_s12 }
  0x1b   : > { %s14771_s13 = smov [#allocation9]   ;;  %s14772_s16 = smov [#allocation12]  }
  0x1c   : > { %s346_s14 = sshll.u32 %s14771_s13, 4  ;;  %p14907_p12 = pnand %p16473_p9, %p13299_p11  ;;  %s14911_s14 = int_to_ptr.vmem [resolvable:$true] %s346_s14 }
  0x1d   : > { %s370_s22 = sshll.u32 %s14772_s16, 4  ;;  %s16499_s2 = sld [smem:[#allocation30_spill]]  ;;  %s14913_s22 = int_to_ptr.vmem [resolvable:$true] %s370_s22 }
  0x1e   : > { %p14923_p0 = pneg %p14907_p12 }
  0x23   : > { %s14434_s30 = scalar_lea.hbm %s16499_s2, 96 }
  0x24   : > { %p14435_p13 = scmp.ne.s32.totalorder %s16499_s2, %s14434_s30  ;;  %p14441_p3 = scmp.lt.u32.totalorder %s14434_s30, %s16499_s2 }
  0x26   : > { %p14437_p1 = pnand %p14923_p0, %p14435_p13 }
  0x28   : > { %p14438_p2 = pneg %p14437_p1 }
  0x2a   : > { %p14443_p4 = pnand %p14441_p3, %p14438_p2 }
  0x2c   : > { %14446 = shalt.err (!%p14443_p4)
}
  0x2d   : > { %s14447_s24 = scalar_lea.vmem %s323_s12, 96  ;;  %p14455_p9 = scmp.lt.s32.totalorder %s323_s12, %s323_s12 }
  0x2e   : > { %p14448_p7 = scmp.ne.s32.totalorder %s323_s12, %s14447_s24  ;;  %p14456_p6 = scmp.lt.s32.totalorder %s14447_s24, %s14447_s24 }
  0x30   : > { %p14450_p8 = pnand %p14448_p7, %p14923_p0  ;;  %p14457_p5 = por %p14456_p6, %p14455_p9 }
  0x32   : > { %p14451_p11 = pneg %p14450_p8 }
  0x34   : > { %p14458_p10 = pnand %p14457_p5, %p14451_p11 }
  0x36   : > { %14461 = shalt.err (!%p14458_p10)
}
  0x37   : > { %13305 = dma.hbm_to_vmem [thread:$0]  (!%p14907_p12), %s16499_s2, 96, %s323_s12, [#allocation7]  }
  0x38   : > { %s16501_s4 = sld [smem:[#allocation31_spill]] }
  0x3e   : > { %s14462_s30 = scalar_lea.hbm %s16501_s4, 64 }
  0x3f   : > { %p14463_p13 = scmp.ne.s32.totalorder %s16501_s4, %s14462_s30  ;;  %p14469_p5 = scmp.lt.u32.totalorder %s14462_s30, %s16501_s4 }
  0x41   : > { %p14465_p1 = pnand %p14463_p13, %p14923_p0 }
  0x43   : > { %p14466_p6 = pneg %p14465_p1 }
  0x45   : > { %p14471_p9 = pnand %p14469_p5, %p14466_p6 }
  0x47   : > { %14474 = shalt.err (!%p14471_p9)
}
  0x48   : > { %s14475_s12 = scalar_lea.vmem %s14911_s14, 64  ;;  %p14483_p4 = scmp.lt.s32.totalorder %s14911_s14, %s14911_s14 }
  0x49   : > { %p14476_p10 = scmp.ne.s32.totalorder %s14911_s14, %s14475_s12  ;;  %p14484_p7 = scmp.lt.s32.totalorder %s14475_s12, %s14475_s12 }
  0x4b   : > { %p14478_p2 = pnand %p14476_p10, %p14923_p0  ;;  %p14485_p8 = por %p14484_p7, %p14483_p4 }
  0x4d   : > { %p14479_p3 = pneg %p14478_p2 }
  0x4f   : > { %p14486_p11 = pnand %p14485_p8, %p14479_p3 }
  0x51   : > { %14489 = shalt.err (!%p14486_p11)
}
  0x52   : > { %13311 = dma.hbm_to_vmem [thread:$0]  (!%p14907_p12), %s16501_s4, 64, %s14911_s14, [#allocation10]  }
  0x53   : > { %s14490_s23 = scalar_lea.hbm %s16464_s6, 128 }
  0x54   : > { %p14491_p13 = scmp.ne.s32.totalorder %s16464_s6, %s14490_s23  ;;  %p14497_p5 = scmp.lt.u32.totalorder %s14490_s23, %s16464_s6 }
  0x56   : > { %p14493_p1 = pnand %p14491_p13, %p14923_p0 }
  0x58   : > { %p14494_p6 = pneg %p14493_p1 }
  0x5a   : > { %p14499_p9 = pnand %p14497_p5, %p14494_p6 }
  0x5c   : > { %14502 = shalt.err (!%p14499_p9)
}
  0x5d   : > { %s14503_s14 = scalar_lea.vmem %s14913_s22, 128  ;;  %p14511_p4 = scmp.lt.s32.totalorder %s14913_s22, %s14913_s22 }
  0x5e   : > { %p14504_p10 = scmp.ne.s32.totalorder %s14913_s22, %s14503_s14  ;;  %p14512_p7 = scmp.lt.s32.totalorder %s14503_s14, %s14503_s14 }
  0x60   : > { %p14506_p2 = pnand %p14504_p10, %p14923_p0  ;;  %p14513_p8 = por %p14512_p7, %p14511_p4 }
  0x62   : > { %p14507_p3 = pneg %p14506_p2 }
  0x64   : > { %p14514_p11 = pnand %p14513_p8, %p14507_p3 }
  0x66   : > { %14517 = shalt.err (!%p14514_p11)
}
  0x67   : > { %13317 = dma.hbm_to_vmem [thread:$0]  (!%p14907_p12), %s16464_s6, 128, %s14913_s22, [#allocation13]  }
  0x68   : > { %s14773_s28 = smov [#allocation15]   ;;  %s14774_s26 = smov [#allocation3]  }
  0x69   : > { %s394_s19 = sshll.u32 %s14773_s28, 4  ;;  %s308_s23 = sshll.u32 %s14774_s26, 4  ;;  %s395_s19 = int_to_ptr.vmem [resolvable:$true] %s394_s19  ;;  %s309_s23 = int_to_ptr.vmem [resolvable:$true] %s308_s23 }
  0x6a   : > { %s14518_s16 = scalar_lea.hbm %s16466_s8, 32 }
  0x6b   : > { %p14519_p13 = scmp.ne.s32.totalorder %s16466_s8, %s14518_s16  ;;  %p14525_p5 = scmp.lt.u32.totalorder %s14518_s16, %s16466_s8 }
  0x6d   : > { %p14521_p1 = pnand %p14519_p13, %p14923_p0 }
  0x6f   : > { %p14522_p6 = pneg %p14521_p1 }
  0x71   : > { %p14527_p9 = pnand %p14525_p5, %p14522_p6 }
  0x73   : > { %14530 = shalt.err (!%p14527_p9)
}
  0x74   : > { %s14531_s22 = scalar_lea.vmem %s395_s19, 32  ;;  %p14539_p4 = scmp.lt.s32.totalorder %s395_s19, %s395_s19 }
  0x75   : > { %p14532_p10 = scmp.ne.s32.totalorder %s395_s19, %s14531_s22  ;;  %p14540_p7 = scmp.lt.s32.totalorder %s14531_s22, %s14531_s22 }
  0x77   : > { %p14534_p2 = pnand %p14532_p10, %p14923_p0  ;;  %p14541_p8 = por %p14540_p7, %p14539_p4 }
  0x79   : > { %p14535_p3 = pneg %p14534_p2 }
  0x7b   : > { %p14542_p11 = pnand %p14541_p8, %p14535_p3 }
  0x7d   : > { %14545 = shalt.err (!%p14542_p11)
}
  0x7e   : > { %13323 = dma.hbm_to_vmem [thread:$0]  (!%p14907_p12), %s16466_s8, 32, %s395_s19, [#allocation16]  }
  0x7f   : > { %s14546_s25 = scalar_lea.hbm %s16459_s1, 7680 }
  0x80   : > { %p14547_p13 = scmp.ne.s32.totalorder %s16459_s1, %s14546_s25  ;;  %p14553_p5 = scmp.lt.u32.totalorder %s14546_s25, %s16459_s1 }
  0x82   : > { %p14549_p1 = pnand %p14547_p13, %p14923_p0 }
  0x84   : > { %p14550_p6 = pneg %p14549_p1 }
  0x86   : > { %p14555_p9 = pnand %p14553_p5, %p14550_p6 }
  0x88   : > { %14558 = shalt.err (!%p14555_p9)
}
  0x89   : > { %s14559_s12 = scalar_lea.vmem %s309_s23, 7680  ;;  %p14567_p4 = scmp.lt.s32.totalorder %s309_s23, %s309_s23 }
  0x8a   : > { %p14560_p10 = scmp.ne.s32.totalorder %s309_s23, %s14559_s12  ;;  %p14568_p7 = scmp.lt.s32.totalorder %s14559_s12, %s14559_s12 }
  0x8c   : > { %p14562_p2 = pnand %p14560_p10, %p14923_p0  ;;  %p14569_p8 = por %p14568_p7, %p14567_p4 }
  0x8e   : > { %p14563_p3 = pneg %p14562_p2 }
  0x90   : > { %p14570_p11 = pnand %p14569_p8, %p14563_p3 }
  0x92   : > { %14573 = shalt.err (!%p14570_p11)
}
  0x93   : > { %s14775_s19 = smov 384   ;;  %s14776_s22 = smov 24  }
  0x94   : > { %13302 = dma.hbm_to_vmem [thread:$0]  (!%p14907_p12), %s16459_s1, 7680, %s309_s23, [#allocation4], %s14775_s19, %s14775_s19, %s14776_s22  }
  0x95   : > { %s14777_s2 = smov [#allocation8]   ;;  %s14574_s16 = scalar_lea.hbm %s16461_s3, 61440 }
  0x96   : > { %s332_s26 = sshll.u32 %s14777_s2, 4  ;;  %p14575_p13 = scmp.ne.s32.totalorder %s16461_s3, %s14574_s16  ;;  %s333_s26 = int_to_ptr.vmem [resolvable:$true] %s332_s26 }
  0x97   : > { %p14581_p5 = scmp.lt.u32.totalorder %s14574_s16, %s16461_s3 }
  0x98   : > { %p14577_p1 = pnand %p14575_p13, %p14923_p0 }
  0x9a   : > { %p14578_p6 = pneg %p14577_p1 }
  0x9c   : > { %p14583_p9 = pnand %p14581_p5, %p14578_p6 }
  0x9e   : > { %14586 = shalt.err (!%p14583_p9)
}
  0x9f   : > { %s14587_s23 = scalar_lea.vmem %s333_s26, 61440  ;;  %p14595_p4 = scmp.lt.s32.totalorder %s333_s26, %s333_s26 }
  0xa0   : > { %p14588_p10 = scmp.ne.s32.totalorder %s333_s26, %s14587_s23  ;;  %p14596_p7 = scmp.lt.s32.totalorder %s14587_s23, %s14587_s23 }
  0xa2   : > { %p14590_p2 = pnand %p14588_p10, %p14923_p0  ;;  %p14597_p8 = por %p14596_p7, %p14595_p4 }
  0xa4   : > { %p14591_p3 = pneg %p14590_p2 }
  0xa6   : > { %p14598_p11 = pnand %p14597_p8, %p14591_p3 }
  0xa8   : > { %14601 = shalt.err (!%p14598_p11)
}
  0xa9   : > { %s14778_s19 = smov 256   ;;  %s14779_s22 = smov 16  }
  0xaa   : > { %13308 = dma.hbm_to_vmem [thread:$0]  (!%p14907_p12), %s16461_s3, 61440, %s333_s26, [#allocation7], %s14778_s19, %s14778_s19, %s14779_s22  }
  0xab   : > { %s14780_s28 = smov [#allocation11]   ;;  %s14602_s16 = scalar_lea.hbm %s16463_s5, 65536 }
  0xac   : > { %s356_s2 = sshll.u32 %s14780_s28, 4  ;;  %p14603_p13 = scmp.ne.s32.totalorder %s16463_s5, %s14602_s16  ;;  %s357_s2 = int_to_ptr.vmem [resolvable:$true] %s356_s2 }
  0xad   : > { %p14609_p5 = scmp.lt.u32.totalorder %s14602_s16, %s16463_s5 }
  0xae   : > { %p14605_p1 = pnand %p14603_p13, %p14923_p0 }
  0xb0   : > { %p14606_p6 = pneg %p14605_p1 }
  0xb2   : > { %p14611_p9 = pnand %p14609_p5, %p14606_p6 }
  0xb4   : > { %14614 = shalt.err (!%p14611_p9)
}
  0xb5   : > { %s14615_s26 = scalar_lea.vmem %s357_s2, 65536  ;;  %p14623_p4 = scmp.lt.s32.totalorder %s357_s2, %s357_s2 }
  0xb6   : > { %p14616_p10 = scmp.ne.s32.totalorder %s357_s2, %s14615_s26  ;;  %p14624_p7 = scmp.lt.s32.totalorder %s14615_s26, %s14615_s26 }
  0xb8   : > { %p14618_p2 = pnand %p14616_p10, %p14923_p0  ;;  %p14625_p8 = por %p14624_p7, %p14623_p4 }
  0xba   : > { %p14619_p3 = pneg %p14618_p2 }
  0xbc   : > { %p14626_p11 = pnand %p14625_p8, %p14619_p3 }
  0xbe   : > { %14629 = shalt.err (!%p14626_p11)
}
  0xbf   : > { %s14781_s19 = smov 512   ;;  %s14782_s22 = smov 32  }
  0xc0   : > { %13314 = dma.hbm_to_vmem [thread:$0]  (!%p14907_p12), %s16463_s5, 65536, %s357_s2, [#allocation10], %s14781_s19, %s14781_s19, %s14782_s22  }
  0xc1   : > { %s14783_s28 = smov [#allocation14]   ;;  %s14630_s24 = scalar_lea.hbm %s16465_s7, 16384 }
  0xc2   : > { %s380_s25 = sshll.u32 %s14783_s28, 4  ;;  %p14631_p13 = scmp.ne.s32.totalorder %s16465_s7, %s14630_s24  ;;  %s381_s25 = int_to_ptr.vmem [resolvable:$true] %s380_s25 }
  0xc3   : > { %p14637_p5 = scmp.lt.u32.totalorder %s14630_s24, %s16465_s7 }
  0xc4   : > { %p14633_p1 = pnand %p14631_p13, %p14923_p0 }
  0xc6   : > { %p14634_p6 = pneg %p14633_p1 }
  0xc8   : > { %p14639_p9 = pnand %p14637_p5, %p14634_p6 }
  0xca   : > { %14642 = shalt.err (!%p14639_p9)
}
  0xcb   : > { %s14643_s2 = scalar_lea.vmem %s381_s25, 16384  ;;  %p14651_p4 = scmp.lt.s32.totalorder %s381_s25, %s381_s25 }
  0xcc   : > { %p14644_p10 = scmp.ne.s32.totalorder %s381_s25, %s14643_s2  ;;  %p14652_p7 = scmp.lt.s32.totalorder %s14643_s2, %s14643_s2 }
  0xce   : > { %p14646_p2 = pnand %p14644_p10, %p14923_p0  ;;  %p14653_p8 = por %p14652_p7, %p14651_p4 }
  0xd0   : > { %p14647_p3 = pneg %p14646_p2 }
  0xd2   : > { %p14654_p11 = pnand %p14653_p8, %p14647_p3 }
  0xd4   : > { %14657 = shalt.err (!%p14654_p11)
}
  0xd5   : > { %s14784_s19 = smov 128   ;;  %s14785_s22 = smov 8  }
  0xd6   : > { %13320 = dma.hbm_to_vmem [thread:$0]  (!%p14907_p12), %s16465_s7, 16384, %s381_s25, [#allocation13], %s14784_s19, %s14784_s19, %s14785_s22  }
  0xd7   : > { %s14786_s28 = smov [#allocation17]   ;;  %s14658_s14 = scalar_lea.hbm %s16468_s10, 16 }
  0xd8   : > { %s408_s30 = sshll.u32 %s14786_s28, 4  ;;  %p14659_p13 = scmp.ne.s32.totalorder %s16468_s10, %s14658_s14  ;;  %s409_s30 = int_to_ptr.vmem [resolvable:$true] %s408_s30 }
  0xd9   : > { %p14665_p5 = scmp.lt.u32.totalorder %s14658_s14, %s16468_s10 }
  0xda   : > { %p14661_p1 = pnand %p14659_p13, %p14923_p0 }
  0xdc   : > { %p14662_p6 = pneg %p14661_p1 }
  0xde   : > { %p14667_p9 = pnand %p14665_p5, %p14662_p6 }
  0xe0   : > { %14670 = shalt.err (!%p14667_p9)
}
  0xe1   : > { %s14671_s25 = scalar_lea.vmem %s409_s30, 16  ;;  %s14678_s19 = scalar_lea.vmem %s409_s30, 32 }
  0xe2   : > { %p14672_p10 = scmp.ne.s32.totalorder %s409_s30, %s14671_s25  ;;  %p14679_p4 = scmp.lt.s32.totalorder %s409_s30, %s409_s30 }
  0xe3   : > { %p14680_p7 = scmp.lt.s32.totalorder %s14678_s19, %s14671_s25 }
  0xe4   : > { %p14674_p2 = pnand %p14672_p10, %p14923_p0 }
  0xe5   : > { %p14681_p8 = por %p14680_p7, %p14679_p4 }
  0xe6   : > { %p14675_p3 = pneg %p14674_p2 }
  0xe8   : > { %p14682_p11 = pnand %p14681_p8, %p14675_p3 }
  0xea   : > { %14685 = shalt.err (!%p14682_p11)
}
  0xeb   : > { %13326 = dma.hbm_to_vmem [thread:$0]  (!%p14907_p12), %s16468_s10, 16, %s409_s30, [#allocation16]  }
  0xec   : > { %p16502_p13 = scmp.ne.s32.totalorder %s16497_s29, 0 }
  0xed   : > { %p16503_p1 = scmp.eq.s32.totalorder (!%p16502_p13), %s14871_s21, 0 }
  0xee   : > { %428 = sbr.rel (%p16502_p13) target bundleno = 2671 (0xa6f), region = 64 }
  0xf5   : > { %14731 = dma.done.wait (%p16503_p1), [#allocation4], 7680   ;;  %p16504_p0 = pmov %p16503_p1 }
  0xf7   : > { %14733 = vsyncadd (%p16504_p0), [#allocation4], 4294959616  ;;  %p16505_p6 = pmov %p16504_p0 }
  0xf8   : > { %p16506_p5 = pmov %p16504_p0 }
  0xf9   : > { %14735 = dma.done.wait (%p16505_p6), [#allocation7], 61536  }
  0xfa   : > { %14737 = vsyncadd (%p16506_p5), [#allocation7], 4294905760  ;;  %p16507_p9 = pmov %p16504_p0 }
  0xfb   : > { %p16508_p12 = pmov %p16504_p0 }
  0xfc   : > { %14739 = dma.done.wait (%p16507_p9), [#allocation10], 65600  }
  0xfd   : > { %14741 = vsyncadd (%p16508_p12), [#allocation10], 4294901696  ;;  %p16509_p10 = pmov %p16504_p0 }
  0xfe   : > { %p16510_p2 = pmov %p16504_p0 }
  0xff   : > { %14743 = dma.done.wait (%p16509_p10), [#allocation13], 16512  }
 0x100   : > { %14745 = vsyncadd (%p16510_p2), [#allocation13], 4294950784  ;;  %p16511_p3 = pmov %p16504_p0 }
 0x101   : > { %p16512_p4 = pmov %p16504_p0 }
 0x102   : > { %14747 = dma.done.wait (%p16511_p3), [#allocation16], 48  }
 0x103   : > { %14749 = vsyncadd (%p16512_p4), [#allocation16], 4294967248  ;;  %p498_p7 = scmp.lt.s32.totalorder %s14871_s21, 1  ;;  %v14787_v0 = vmov 0   ;;  %v14788_v1 = vmov 1966171168   ;;  %v590_v3 = vlaneseq }
 0x104   : > { %1103 = vmatprep.mubr.bf16.mxu0 %v14787_v0  ;;  %1164 = vmatprep.mubr.bf16.mxu1 %v14787_v0  ;;  %v588_v2 = vunpack.c.l.s4 %v14788_v1  ;;  %v13401_v4 = vld [vmem:[#allocation3 + $0x64] ss:$24 sps:$4 sm:$0xff]   ;;  %v13403_v7 = vld [vmem:[#allocation3 + $0x60] ss:$24 sps:$4 sm:$0xff]   ;;  %vm1052_vm0 = vcmask 1045504   ;;  %vm941_vm1 = vcmask 1041409  }
 0x105   : > { %s499_s29 = scalar_select %p498_p7, %s14871_s21, 1  ;;  %v15119_v6 = vshrl.u32 %v590_v3, 7  ;;  %1071 = vmatprep.subr.bf16.mxu0 %v13401_v4  ;;  %v13404_v8 = vld [vmem:[#allocation3 + $0x6c] ss:$24 sps:$4 sm:$0xff]   ;;  %v15121_v9 = vld [vmem:[#allocation3 + $0x68] ss:$24 sps:$4 sm:$0xff]  }
 0x106   : > { %v589_v5 = vunpack.c.0.s8 %v588_v2  ;;  %1072 = vmatpush1.bf16.msra.mxu0 %v13403_v7  ;;  %v13407_v10 = vld [vmem:[#allocation3 + $0x94] ss:$24 sps:$4 sm:$0x3f]   ;;  %13194 = vmatprep.subr.bf16.mxu1 %v13404_v8  ;;  %v13409_v11 = vld [vmem:[#allocation3 + $0x90] ss:$24 sps:$4 sm:$0x3f]  }
 0x107   : > { %s13260_s15 = smul.u32 28, %s499_s29  ;;  %vm16481_vm2 = vcmask 1042434   ;;  %13196 = vmatpush1.bf16.msra.mxu1 %v15121_v9  ;;  %11897 = vmatprep.subr.msk.bf16.mxu0 %vm1052_vm0, %v13407_v10  ;;  %v15133_v13 = vld [vmem:[#allocation3 + $0x9c] ss:$24 sps:$4 sm:$0x3f]   ;;  %vm16479_vm3 = vcmask 1043459  }
 0x108   : > { %v15129_v12 = vsub.s32 %v589_v5, %v15119_v6  ;;  %v13412_v14 = vld [vmem:[#allocation3 + $0x98] ss:$24 sps:$4 sm:$0x3f]   ;;  %v1054_v15 = vsel %vm1052_vm0, %v13409_v11, 0  ;;  %vm950_vm4 = vcmask 1044484   ;;  %13195 = vmatprep.subr.msk.bf16.mxu1 %vm1052_vm0, %v15133_v13  ;;  %vm16482_vm5 = vcmask 1045509  }
 0x109   : > { %s15126_s28 = scalar_lea.vmem %s16458_s0, %s13260_s15  ;;  %v15140_v17 = vsel %vm1052_vm0, %v13412_v14, 0  ;;  %vm16480_vm6 = vcmask 1046534   ;;  %vm16478_vm7 = vcmask 1047559   ;;  %v13415_v25 = vld [vmem:[#allocation3 + $0xc] ss:$24 sps:$4 sm:$0xff]   ;;  %vm1045_vm8 = vcmask 228352  }
 0x10a   : > { %v11861_v16 = vld.sshfl [vmem:[%s15126_s28 + $0x1] sm:$0x1 pattern:$0x75316420]  ;;  %1074 = vmatpush1.bf16.msra.mxu0 %v1054_v15  ;;  %vm2589_vm9 = vcmask 1040384   ;;  %s496_s17 = sand.u32 1, %s14760_s18  }
 0x10b   : > { %v11862_v18 = vld.sshfl [vmem:[%s15126_s28 + $0x2] sm:$0x1 pattern:$0x75316420]  ;;  %v593_v19 = vrot.slane %v11861_v16, %v15129_v12  ;;  %1122 = vmatprep.subr.bf16.mxu0 %v13404_v8  ;;  %13197 = vmatpush1.bf16.msra.mxu1 %v15140_v17  ;;  %vm2590_vm10 = vsmask.f32 256 }
 0x10c   : > { %v11863_v20 = vld.sshfl [vmem:[%s15126_s28 + $0x3] sm:$0x1 pattern:$0x75316420]  ;;  %v607_v21 = vrot.slane %v11862_v18, %v15129_v12  ;;  %1413 = vmatprep.subr.bf16.mxu1 %v13415_v25  ;;  %vm2593_vm11 = vsmask.f32 4352  ;;  %vm15723_vm12 = vmand %vm2589_vm9, %vm2590_vm10 }
 0x10d   : > { %v11864_v22 = vld.sshfl [vmem:[%s15126_s28 + $0x4] sm:$0x1 pattern:$0x75316420]  ;;  %v621_v23 = vrot.slane %v11863_v20, %v15129_v12  ;;  %v15149_v24 = vunpack.c.l.b16 %v593_v19  ;;  %vm2614_vm13 = vsmask.f32 7938  ;;  %vm15728_vm15 = vmand %vm950_vm4, %vm2593_vm11 }
 0x10e   : > { %v11865_v26 = vld.sshfl [vmem:[%s15126_s28 + $0x5] sm:$0x1 pattern:$0x75316420]  ;;  %v635_v27 = vrot.slane %v11864_v22, %v15129_v12  ;;  %v15153_v28 = vunpack.c.l.b16 %v607_v21  ;;  %vm2616_vm14 = vsmask.f32 7954 }
 0x10f   : > { %v11866_v29 = vld.sshfl [vmem:[%s15126_s28 + $0x6] sm:$0x1 pattern:$0x75316420]  ;;  %v649_v30 = vrot.slane %v11865_v26, %v15129_v12  ;;  %v15157_v31 = vunpack.c.l.b16 %v621_v23  ;;  %v1240_v32 = vrot.slane %v15149_v24, 7  ;;  %s497_s30 = scalar_lea.vmem [#allocation18], %s496_s17 }
 0x110   : > { %v11867_v33 = vld.sshfl [vmem:[%s15126_s28 + $0x7] sm:$0x1 pattern:$0x75316420]  ;;  %v663_v34 = vrot.slane %v11866_v29, %v15129_v12  ;;  %v15162_v35 = vunpack.c.l.b16 %v635_v27  ;;  %v940_v36 = vrot.slane %v15153_v28, 7  ;;  %v1242_v37 = vrot.slane %v15153_v28, 6 }
 0x111   : > { %v11868_v38 = vld.sshfl [vmem:[%s15126_s28 + $0x8] sm:$0x1 pattern:$0x75316420]  ;;  %v677_v39 = vrot.slane %v11867_v33, %v15129_v12  ;;  %v15168_v40 = vunpack.c.l.b16 %v649_v30  ;;  %v943_v41 = vrot.slane %v15157_v31, 6  ;;  %v1244_v42 = vrot.slane %v15157_v31, 5 }
 0x112   : > { %v11869_v43 = vld.sshfl [vmem:[%s15126_s28 + $0x9] sm:$0x1 pattern:$0x75316420]  ;;  %v691_v44 = vrot.slane %v11868_v38, %v15129_v12  ;;  %v15174_v45 = vunpack.c.l.b16 %v663_v34  ;;  %v942_v46 = vsel %vm941_vm1, %v940_v36, %v15149_v24  ;;  %v946_v47 = vrot.slane %v15162_v35, 5  ;;  %s11696_s16 = sshll.u32 %s497_s30, 4  ;;  %s16418_s16 = int_to_ptr.vmem [resolvable:$true] %s11696_s16 }
 0x113   : > { %v11870_v48 = vld.sshfl [vmem:[%s15126_s28 + $0xa] sm:$0x1 pattern:$0x75316420]  ;;  %v705_v49 = vrot.slane %v11869_v43, %v15129_v12  ;;  %v15181_v50 = vunpack.c.l.b16 %v677_v39  ;;  %v945_v51 = vsel %vm16481_vm2, %v943_v41, %v942_v46  ;;  %v949_v52 = vrot.slane %v15168_v40, 4  ;;  %s11684_s23 = scalar_lea.sflag [#allocation5], %s496_s17 }
 0x114   : > { %v11871_v53 = vld.sshfl [vmem:[%s15126_s28 + $0xb] sm:$0x1 pattern:$0x75316420]  ;;  %v719_v54 = vrot.slane %v11870_v48, %v15129_v12  ;;  %v15187_v55 = vunpack.c.l.b16 %v691_v44  ;;  %v948_v56 = vsel %vm16479_vm3, %v946_v47, %v945_v51  ;;  %v952_v57 = vrot.slane %v15174_v45, 3  ;;  %p16569_p11 = scmp.ne.s32.totalorder %s16494_s27, 0 }
 0x115   : > { %v11872_v58 = vld.sshfl [vmem:[%s15126_s28 + $0xc] sm:$0x1 pattern:$0x75316420]  ;;  %v733_v59 = vrot.slane %v11871_v53, %v15129_v12  ;;  %v15193_v60 = vunpack.c.l.b16 %v705_v49  ;;  %v951_v61 = vsel %vm950_vm4, %v949_v52, %v948_v56  ;;  %v955_v62 = vrot.slane %v15181_v50, 2  ;;  %s14789_s26 = smov [#allocation18]  }
 0x116   : > { %v11873_v63 = vld.sshfl [vmem:[%s15126_s28 + $0xd] sm:$0x1 pattern:$0x75316420]  ;;  %v747_v1 = vrot.slane %v11872_v58, %v15129_v12  ;;  %v15199_v2 = vunpack.c.l.b16 %v719_v54  ;;  %v954_v3 = vsel %vm16482_vm5, %v952_v57, %v951_v61  ;;  %v958_v4 = vrot.slane %v15187_v55, 1  ;;  %s14690_s2 = sshll.u32 %s14789_s26, 4  ;;  %s14691_s2 = int_to_ptr.vmem [resolvable:$false] %s14690_s2 }
 0x117   : > { %v11874_v5 = vld.sshfl [vmem:[%s15126_s28 + $0xe] sm:$0x1 pattern:$0x75316420]  ;;  %v761_v7 = vrot.slane %v11873_v63, %v15129_v12  ;;  %v15205_v8 = vunpack.c.l.b16 %v733_v59  ;;  %v957_v10 = vsel %vm16480_vm6, %v955_v62, %v954_v3  ;;  %v1246_v11 = vrot.slane %v15162_v35, 4  ;;  %s14692_s25 = scalar_lea.vmem %s14691_s2, 32  ;;  %p14693_p0 = scmp.lt.s32.totalorder %s16418_s16, %s14691_s2 }
 0x118   : > { %v11875_v14 = vld.sshfl [vmem:[%s15126_s28 + $0xf] sm:$0x1 pattern:$0x75316420]  ;;  %v775_v15 = vrot.slane %v11874_v5, %v15129_v12  ;;  %v15211_v16 = vunpack.c.l.b16 %v747_v1  ;;  %v960_v18 = vsel %vm16478_vm7, %v958_v4, %v957_v10  ;;  %v961_v19 = vrot.slane %v15199_v2, 7 }
 0x119   : > { %v11876_v20 = vld.sshfl [vmem:[%s15126_s28 + $0x10] sm:$0x1 pattern:$0x75316420]  ;;  %v789_v21 = vrot.slane %v11875_v14, %v15129_v12  ;;  %v15217_v22 = vunpack.c.l.b16 %v761_v7  ;;  %v963_v23 = vrot.slane %v15205_v8, 6  ;;  %v1248_v25 = vrot.slane %v15168_v40, 3 }
 0x11a   : > { %v803_v26 = vrot.slane %v11876_v20, %v15129_v12  ;;  %v15222_v27 = vunpack.c.l.b16 %v775_v15  ;;  %v962_v29 = vsel %vm941_vm1, %v961_v19, %v15193_v60  ;;  %v965_v30 = vrot.slane %v15211_v16, 5  ;;  %v11877_v33 = vld.sshfl [vmem:[%s15126_s28 + $0x11] sm:$0x1 pattern:$0x75316420] }
 0x11b   : > { %v15228_v34 = vunpack.c.l.b16 %v789_v21  ;;  %v964_v36 = vsel %vm16481_vm2, %v963_v23, %v962_v29  ;;  %v967_v38 = vrot.slane %v15217_v22, 4  ;;  %v11878_v39 = vld.sshfl [vmem:[%s15126_s28 + $0x12] sm:$0x1 pattern:$0x75316420]  ;;  %v817_v41 = vrot.slane %v11877_v33, %v15129_v12 }
 0x11c   : > { %v15234_v43 = vunpack.c.l.b16 %v803_v26  ;;  %v966_v44 = vsel %vm16479_vm3, %v965_v30, %v964_v36  ;;  %v969_v46 = vrot.slane %v15222_v27, 3  ;;  %v11879_v47 = vld.sshfl [vmem:[%s15126_s28 + $0x13] sm:$0x1 pattern:$0x75316420]  ;;  %v831_v48 = vrot.slane %v11878_v39, %v15129_v12 }
 0x11d   : > { %v968_v49 = vsel %vm950_vm4, %v967_v38, %v966_v44  ;;  %v971_v51 = vrot.slane %v15228_v34, 2  ;;  %v11880_v52 = vld.sshfl [vmem:[%s15126_s28 + $0x14] sm:$0x1 pattern:$0x75316420]  ;;  %v845_v53 = vrot.slane %v11879_v47, %v15129_v12  ;;  %v15244_v54 = vunpack.c.l.b16 %v817_v41 }
 0x11e   : > { %v970_v56 = vsel %vm16482_vm5, %v969_v46, %v968_v49  ;;  %v973_v57 = vrot.slane %v15234_v43, 1  ;;  %v11881_v58 = vld.sshfl [vmem:[%s15126_s28 + $0x15] sm:$0x1 pattern:$0x75316420]  ;;  %v859_v59 = vrot.slane %v11880_v52, %v15129_v12  ;;  %v15250_v61 = vunpack.c.l.b16 %v831_v48 }
 0x11f   : > { %v972_v62 = vsel %vm16480_vm6, %v971_v51, %v970_v56  ;;  %v11882_v63 = vld.sshfl [vmem:[%s15126_s28 + $0x16] sm:$0x1 pattern:$0x75316420]  ;;  %v873_v1 = vrot.slane %v11881_v58, %v15129_v12  ;;  %v15255_v3 = vunpack.c.l.b16 %v845_v53  ;;  %v1250_v4 = vrot.slane %v15174_v45, 2 }
 0x120   : > { %v974_v5 = vsel %vm16478_vm7, %v973_v57, %v972_v62  ;;  %v11883_v7 = vld.sshfl [vmem:[%s15126_s28 + $0x17] sm:$0x1 pattern:$0x75316420]  ;;  %v887_v10 = vrot.slane %v11882_v63, %v15129_v12  ;;  %v15261_v14 = vunpack.c.l.b16 %v859_v59  ;;  %v975_v15 = vrot.slane %v15250_v61, 7 }
 0x121   : > { %v15264_v19 = vpack.c.b16 %v974_v5, %v960_v18  ;;  %v11884_v20 = vld.sshfl [vmem:[%s15126_s28 + $0x18] sm:$0x1 pattern:$0x75316420]  ;;  %v901_v21 = vrot.slane %v11883_v7, %v15129_v12  ;;  %v15268_v23 = vunpack.c.l.b16 %v873_v1  ;;  %v977_v26 = vrot.slane %v15255_v3, 6 }
 0x122   : > { %v915_v29 = vrot.slane %v11884_v20, %v15129_v12  ;;  %v15272_v30 = vunpack.c.l.b16 %v887_v10  ;;  %v976_v33 = vsel %vm941_vm1, %v975_v15, %v15244_v54  ;;  %v979_v36 = vrot.slane %v15261_v14, 5  ;;  %v13418_v41 = vld [vmem:[#allocation3 + $0x38] ss:$24 sps:$4 sm:$0x3f]   ;;  %v13421_v57 = vld [vmem:[#allocation3 + $0x74] ss:$24 sps:$4 sm:$0xff]  }
 0x123   : > { %11898 = vmatmul.mubr.msk.bf16.vlgmr.msra.gmra.mrb[0].mxu0 %vm1045_vm8, %v15264_v19  ;;  %v15279_v18 = vunpack.c.l.b16 %v901_v21  ;;  %v978_v38 = vsel %vm16481_vm2, %v977_v26, %v976_v33  ;;  %v981_v39 = vrot.slane %v15268_v23, 4  ;;  %v1252_v44 = vrot.slane %v15181_v50, 1  ;;  %v11906_v49 = vld.sshfl [vmem:[%s15126_s28] sm:$0x1 pattern:$0x75316420] }
 0x124   : > { %1123 = vmatpush1.bf16.msra.mxu0 %v15121_v9  ;;  %v15285_v46 = vunpack.c.l.b16 %v915_v29  ;;  %v980_v47 = vsel %vm16479_vm3, %v979_v36, %v978_v38  ;;  %v983_v48 = vrot.slane %v15272_v30, 3  ;;  %1113 = vmatprep.mubr.bf16.mxu0 %v14787_v0  ;;  %v1254_v51 = vrot.slane %v15193_v60, 7  ;;  %v13413_v15 = vld [vmem:[#allocation3 + $0x8] ss:$24 sps:$4 sm:$0xff]  }
 0x125   : > { %v982_v52 = vsel %vm950_vm4, %v981_v39, %v980_v47  ;;  %v985_v53 = vrot.slane %v15279_v18, 2  ;;  %v1351_v56 = vsel %vm1052_vm0, %v13418_v41, 0  ;;  %11900 = vmatprep.subr.msk.bf16.mxu0 %vm1052_vm0, %v15133_v13  ;;  %v1238_v9 = vrot.slane %v11906_v49, %v15129_v12  ;;  %v13416_v33 = vld [vmem:[#allocation3 + $0x3c] ss:$24 sps:$4 sm:$0x3f]  }
 0x126   : > { %v984_v58 = vsel %vm16482_vm5, %v983_v48, %v982_v52  ;;  %v987_v59 = vrot.slane %v15285_v46, 1  ;;  %v1255_v62 = vsel %vm941_vm1, %v1254_v51, %v15187_v55  ;;  %v1256_v63 = vrot.slane %v15199_v2, 6 }
 0x127   : > { %v986_v1 = vsel %vm16480_vm6, %v985_v53, %v984_v58  ;;  %v1239_v5 = vunpack.c.l.b16 %v1238_v9  ;;  %v1258_v7 = vrot.slane %v15205_v8, 5  ;;  %v1260_v10 = vrot.slane %v15211_v16, 4 }
 0x128   : > { %v988_v13 = vsel %vm16478_vm7, %v987_v59, %v986_v1  ;;  %1125 = vmatpush1.bf16.msra.mxu0 %v15140_v17  ;;  %v1257_v20 = vsel %vm16481_vm2, %v1256_v63, %v1255_v62  ;;  %v1262_v21 = vrot.slane %v15217_v22, 3  ;;  %v1264_v26 = vrot.slane %v15222_v27, 2  ;;  %v13424_v59 = vld [vmem:[#allocation3 + $0xcc] ss:$24 sps:$4 sm:$0xff]   ;;  %v13419_v1 = vld [vmem:[#allocation3 + $0x70] ss:$24 sps:$4 sm:$0xff]  }
 0x129   : > { %v15311_v29 = vpack.c.b16 %v988_v13, %v988_v13  ;;  %v1241_v36 = vsel %vm941_vm1, %v1240_v32, %v1239_v5  ;;  %v1259_v38 = vsel %vm16479_vm3, %v1258_v7, %v1257_v20  ;;  %v1266_v39 = vrot.slane %v15228_v34, 1  ;;  %1173 = vmatprep.subr.bf16.mxu0 %v13421_v57  ;;  %v13427_v62 = vld [vmem:[#allocation3 + $0xa0] ss:$24 sps:$4 sm:$0x3f]  }
 0x12a   : > { %v1243_v17 = vsel %vm16481_vm2, %v1242_v37, %v1241_v36  ;;  %v1261_v41 = vsel %vm950_vm4, %v1260_v10, %v1259_v38  ;;  %v1268_v47 = vrot.slane %v15244_v54, 7  ;;  %v1270_v48 = vrot.slane %v15250_v61, 6 }
 0x12b   : > { %11902 = vmatmul.mubr.msk.bf16.vlgmr.msra.gmra.mrb[0].mxu1 %vm1045_vm8, %v15311_v29  ;;  %11899 = vmatmul.mubr.msk.bf16.gmra.mrb[4].mxu0 %vm1045_vm8, %v15311_v29  ;;  %v1245_v24 = vsel %vm16479_vm3, %v1244_v42, %v1243_v17  ;;  %v1263_v32 = vsel %vm16482_vm5, %v1262_v21, %v1261_v41  ;;  %v1272_v37 = vrot.slane %v15255_v3, 5  ;;  %v1274_v49 = vrot.slane %v15261_v14, 4 }
 0x12c   : > { %1414 = vmatpush1.bf16.msra.mxu1 %v13413_v15  ;;  %1445 = vmatprep.mubr.bf16.mxu1 %v14787_v0  ;;  %v1247_v51 = vsel %vm950_vm4, %v1246_v11, %v1245_v24  ;;  %v1265_v52 = vsel %vm16480_vm6, %v1264_v26, %v1263_v32  ;;  %v1269_v53 = vsel %vm941_vm1, %v1268_v47, %v15234_v43  ;;  %v1276_v42 = vrot.slane %v15268_v23, 3  ;;  %v13422_v15 = vld [vmem:[#allocation3 + $0xc8] ss:$24 sps:$4 sm:$0xff]   ;;  %v13425_v26 = vld [vmem:[#allocation3 + $0xa4] ss:$24 sps:$4 sm:$0x3f]  }
 0x12d   : > { %11922 = vmatprep.subr.msk.bf16.mxu1 %vm1052_vm0, %v13416_v33  ;;  %v1249_v9 = vsel %vm16482_vm5, %v1248_v25, %v1247_v51  ;;  %v1267_v57 = vsel %vm16478_vm7, %v1266_v39, %v1265_v52  ;;  %1154 = vmatprep.mubr.bf16.mxu0 %v14787_v0  ;;  %v1271_v58 = vsel %vm16481_vm2, %v1270_v48, %v1269_v53  ;;  %v1278_v11 = vrot.slane %v15272_v30, 2  ;;  %v13430_v25 = vld [vmem:[#allocation3 + $0xf8] ss:$24 sps:$4 sm:$0x3f]  }
 0x12e   : > { %v1251_v63 = vsel %vm16480_vm6, %v1250_v4, %v1249_v9  ;;  %v1273_v5 = vsel %vm16479_vm3, %v1272_v37, %v1271_v58  ;;  %v1280_v7 = vrot.slane %v15279_v18, 1  ;;  %v1544_v20 = vrot.slane %v15157_v31, 7  ;;  %v11928_v32 = vld.sshfl [vmem:[%s15126_s28 + $0x19] sm:$0x1 pattern:$0x75316420] }
 0x12f   : > { %v1253_v10 = vsel %vm16478_vm7, %v1252_v44, %v1251_v63  ;;  %v1275_v13 = vsel %vm950_vm4, %v1274_v49, %v1273_v5  ;;  %v1546_v33 = vrot.slane %v15162_v35, 6  ;;  %v1548_v36 = vrot.slane %v15168_v40, 5  ;;  %v13428_v44 = vld [vmem:[#allocation3 + $0xfc] ss:$24 sps:$4 sm:$0x3f]  }
 0x130   : > { %1416 = vmatpush1.bf16.msra.mxu1 %v1351_v56  ;;  %v15360_v21 = vpack.c.b16 %v1267_v57, %v1253_v10  ;;  %v1277_v4 = vsel %vm16482_vm5, %v1276_v42, %v1275_v13  ;;  %v1545_v39 = vsel %vm941_vm1, %v1544_v20, %v15153_v28  ;;  %v1550_v17 = vrot.slane %v15174_v45, 4  ;;  %v13433_v58 = vld [vmem:[#allocation3 + $0x4] ss:$24 sps:$4 sm:$0xff]   ;;  %v13431_v10 = vld [vmem:[#allocation3] ss:$24 sps:$4 sm:$0xff]  }
 0x131   : > { %v1279_v38 = vsel %vm16480_vm6, %v1278_v11, %v1277_v4  ;;  %1717 = vmatprep.subr.bf16.mxu1 %v13424_v59  ;;  %v1552_v56 = vrot.slane %v15181_v50, 3  ;;  %v1066_v47 = vsel %vm1052_vm0, %v13427_v62, 0  ;;  %v1655_v48 = vsel %vm1052_vm0, %v13430_v25, 0  ;;  %v13439_v25 = vld [vmem:[#allocation3 + $0x12c] ss:$24 sps:$4 sm:$0xff]  }
 0x132   : > { %v1281_v41 = vsel %vm16478_vm7, %v1280_v7, %v1279_v38  ;;  %v1547_v24 = vsel %vm16481_vm2, %v1546_v33, %v1545_v39  ;;  %v1554_v37 = vrot.slane %v15187_v55, 2  ;;  %v1558_v49 = vrot.slane %v15205_v8, 7  ;;  %v13434_v33 = vld [vmem:[#allocation3 + $0x34] ss:$24 sps:$4 sm:$0x3f]  }
 0x133   : > { %11923 = vmatmul.mubr.msk.bf16.vlgmr.msra.gmra.mrb[4].mxu1 %vm1045_vm8, %v15360_v21  ;;  %11901 = vmatmul.mubr.msk.bf16.vlgmr.msra.gmra.mrb[8].mxu0 %vm1045_vm8, %v15264_v19  ;;  %v1549_v28 = vsel %vm16479_vm3, %v1548_v36, %v1547_v24  ;;  %v1560_v51 = vrot.slane %v15211_v16, 6  ;;  %v1556_v53 = vrot.slane %v15193_v60, 1  ;;  %v1562_v42 = vrot.slane %v15217_v22, 5  ;;  %v13436_v39 = vld [vmem:[#allocation3 + $0x30] ss:$24 sps:$4 sm:$0x3f]  }
 0x134   : > { %1455 = vmatprep.mubr.bf16.mxu1 %v14787_v0  ;;  %1174 = vmatpush1.bf16.msra.mxu0 %v13419_v1  ;;  %v1551_v52 = vsel %vm950_vm4, %v1550_v17, %v1549_v28  ;;  %v1564_v9 = vrot.slane %v15222_v27, 4  ;;  %v15388_v57 = vpack.c.b16 %v1281_v41, %v1281_v41  ;;  %v1559_v59 = vsel %vm941_vm1, %v1558_v49, %v15199_v2 }
 0x135   : > { %1718 = vmatpush1.bf16.msra.mxu1 %v13422_v15  ;;  %11903 = vmatprep.subr.msk.bf16.mxu0 %vm1052_vm0, %v13425_v26  ;;  %v1553_v11 = vsel %vm16482_vm5, %v1552_v56, %v1551_v52  ;;  %v1566_v62 = vrot.slane %v15228_v34, 3  ;;  %v1561_v63 = vsel %vm16481_vm2, %v1560_v51, %v1559_v59  ;;  %v1568_v1 = vrot.slane %v15234_v43, 2 }
 0x136   : > { %11944 = vmatprep.subr.msk.bf16.mxu1 %vm1052_vm0, %v13428_v44  ;;  %1205 = vmatprep.mubr.bf16.mxu0 %v14787_v0  ;;  %v1570_v5 = vrot.slane %v15244_v54, 1  ;;  %v1542_v7 = vrot.slane %v11928_v32, %v15129_v12  ;;  %v1555_v13 = vsel %vm16480_vm6, %v1554_v37, %v1553_v11  ;;  %v1563_v15 = vsel %vm16479_vm3, %v1562_v42, %v1561_v63 }
 0x137   : > { %v1572_v20 = vrot.slane %v15255_v3, 7  ;;  %v1574_v4 = vrot.slane %v15261_v14, 6  ;;  %v1565_v26 = vsel %vm950_vm4, %v1564_v9, %v1563_v15  ;;  %v1576_v36 = vrot.slane %v15268_v23, 5 }
 0x138   : > { %1176 = vmatpush1.bf16.msra.mxu0 %v1066_v47  ;;  %v1578_v38 = vrot.slane %v15272_v30, 4  ;;  %v1567_v44 = vsel %vm16482_vm5, %v1566_v62, %v1565_v26  ;;  %v1580_v56 = vrot.slane %v15279_v18, 3  ;;  %v1557_v41 = vsel %vm16478_vm7, %v1556_v53, %v1555_v13 }
 0x139   : > { %1720 = vmatpush1.bf16.msra.mxu1 %v1655_v48  ;;  %1362 = vmatprep.subr.bf16.mxu0 %v13433_v58  ;;  %v1573_v17 = vsel %vm941_vm1, %v1572_v20, %v15250_v61  ;;  %v1569_v47 = vsel %vm16480_vm6, %v1568_v1, %v1567_v44  ;;  %v15414_v24 = vunpack.c.l.b16 %v1542_v7  ;;  %v1866_v37 = vrot.slane %v15162_v35, 7  ;;  %v13445_v58 = vld [vmem:[#allocation3 + $0x14] ss:$24 sps:$4 sm:$0xff]   ;;  %v13437_v7 = vld [vmem:[#allocation3 + $0x128] ss:$24 sps:$4 sm:$0xff]  }
 0x13a   : > { %v1575_v32 = vsel %vm16481_vm2, %v1574_v4, %v1573_v17  ;;  %2039 = vmatprep.subr.bf16.mxu1 %v13439_v25  ;;  %v1571_v48 = vsel %vm16478_vm7, %v1570_v5, %v1569_v47  ;;  %v1868_v49 = vrot.slane %v15168_v40, 6  ;;  %v1582_v52 = vrot.slane %v15285_v46, 2  ;;  %v13440_v25 = vld [vmem:[#allocation3 + $0x15c] ss:$24 sps:$4 sm:$0x3f]  }
 0x13b   : > { %11924 = vmatmul.mubr.msk.bf16.gmra.mrb[8].mxu1 %vm1045_vm8, %v15388_v57  ;;  %11904 = vmatmul.mubr.msk.bf16.vlgmr.msra.gmra.mrb[12].mxu0 %vm1045_vm8, %v15264_v19  ;;  %v1577_v28 = vsel %vm16479_vm3, %v1576_v36, %v1575_v32  ;;  %v1870_v53 = vrot.slane %v15174_v45, 5  ;;  %v1872_v42 = vrot.slane %v15181_v50, 4  ;;  %v1345_v19 = vsel %vm1052_vm0, %v13436_v39, 0 }
 0x13c   : > { %1749 = vmatprep.mubr.bf16.mxu1 %v14787_v0  ;;  %1363 = vmatpush1.bf16.msra.mxu0 %v13431_v10  ;;  %v1579_v51 = vsel %vm950_vm4, %v1578_v38, %v1577_v28  ;;  %v1867_v11 = vsel %vm941_vm1, %v1866_v37, %v15157_v31  ;;  %v1874_v59 = vrot.slane %v15187_v55, 3  ;;  %v15437_v62 = vpack.c.b16 %v1571_v48, %v1557_v41  ;;  %v11950_v36 = vld.sshfl [vmem:[%s15126_s28 + $0x1a] sm:$0x1 pattern:$0x75316420] }
 0x13d   : > { %1215 = vmatprep.mubr.bf16.mxu0 %v14787_v0  ;;  %11919 = vmatprep.subr.msk.bf16.mxu0 %vm1052_vm0, %v13434_v33  ;;  %v1581_v9 = vsel %vm16482_vm5, %v1580_v56, %v1579_v51  ;;  %v1584_v63 = vrot.slane %v15414_v24, 1  ;;  %v1869_v1 = vsel %vm16481_vm2, %v1868_v49, %v1867_v11  ;;  %v1880_v5 = vrot.slane %v15211_v16, 7  ;;  %v13442_v38 = vld [vmem:[#allocation3 + $0x158] ss:$24 sps:$4 sm:$0x3f]  }
 0x13e   : > { %v1871_v10 = vsel %vm16479_vm3, %v1870_v53, %v1869_v1  ;;  %v1876_v13 = vrot.slane %v15193_v60, 2  ;;  %v1882_v15 = vrot.slane %v15217_v22, 6  ;;  %v1884_v31 = vrot.slane %v15222_v27, 5  ;;  %v13448_v37 = vld [vmem:[#allocation3 + $0x40] ss:$24 sps:$4 sm:$0x3f]  }
 0x13f   : > { %v1583_v20 = vsel %vm16480_vm6, %v1582_v52, %v1581_v9  ;;  %v1873_v4 = vsel %vm950_vm4, %v1872_v42, %v1871_v10  ;;  %v1881_v26 = vsel %vm941_vm1, %v1880_v5, %v15205_v8  ;;  %v1886_v33 = vrot.slane %v15228_v34, 4  ;;  %v13443_v5 = vld [vmem:[#allocation3 + $0x10] ss:$24 sps:$4 sm:$0xff]  }
 0x140   : > { %1365 = vmatpush1.bf16.msra.mxu0 %v1345_v19  ;;  %v1875_v44 = vsel %vm16482_vm5, %v1874_v59, %v1873_v4  ;;  %v1883_v39 = vsel %vm16481_vm2, %v1882_v15, %v1881_v26  ;;  %v1888_v17 = vrot.slane %v15234_v43, 3  ;;  %v1878_v56 = vrot.slane %v15199_v2, 1  ;;  %v13446_v15 = vld [vmem:[#allocation3 + $0x44] ss:$24 sps:$4 sm:$0x3f]  }
 0x141   : > { %1464 = vmatprep.subr.bf16.mxu0 %v13445_v58  ;;  %v1885_v41 = vsel %vm16479_vm3, %v1884_v31, %v1883_v39  ;;  %v1890_v47 = vrot.slane %v15244_v54, 2  ;;  %v1585_v32 = vsel %vm16478_vm7, %v1584_v63, %v1583_v20  ;;  %v1877_v48 = vsel %vm16480_vm6, %v1876_v13, %v1875_v44  ;;  %v13451_v58 = vld [vmem:[#allocation3 + $0x18c] ss:$24 sps:$4 sm:$0xff]  }
 0x142   : > { %v1887_v28 = vsel %vm950_vm4, %v1886_v33, %v1885_v41  ;;  %v1894_v49 = vrot.slane %v15261_v14, 7  ;;  %v1864_v52 = vrot.slane %v11950_v36, %v15129_v12  ;;  %v1896_v53 = vrot.slane %v15268_v23, 6 }
 0x143   : > { %11945 = vmatmul.mubr.msk.bf16.vlgmr.msra.gmra.mrb[4].mxu1 %vm1045_vm8, %v15437_v62  ;;  %11905 = vmatmul.mubr.msk.bf16.gmra.mrb[16].mxu0 %vm1045_vm8, %v15311_v29  ;;  %v1889_v51 = vsel %vm16482_vm5, %v1888_v17, %v1887_v28  ;;  %v1898_v29 = vrot.slane %v15272_v30, 5  ;;  %v1977_v42 = vsel %vm1052_vm0, %v13442_v38, 0  ;;  %v1892_v19 = vrot.slane %v15250_v61, 1 }
 0x144   : > { %1759 = vmatprep.mubr.bf16.mxu1 %v14787_v0  ;;  %2040 = vmatpush1.bf16.msra.mxu1 %v13437_v7  ;;  %v1895_v9 = vsel %vm941_vm1, %v1894_v49, %v15255_v3  ;;  %v15477_v11 = vpack.c.b16 %v1585_v32, %v1585_v32  ;;  %v1891_v59 = vsel %vm16480_vm6, %v1890_v47, %v1889_v51  ;;  %v1900_v1 = vrot.slane %v15279_v18, 4 }
 0x145   : > { %11966 = vmatprep.subr.msk.bf16.mxu1 %vm1052_vm0, %v13440_v25  ;;  %1394 = vmatprep.mubr.bf16.mxu0 %v14787_v0  ;;  %v1897_v63 = vsel %vm16481_vm2, %v1896_v53, %v1895_v9  ;;  %v1879_v7 = vsel %vm16478_vm7, %v1878_v56, %v1877_v48  ;;  %v1357_v25 = vsel %vm1052_vm0, %v13448_v37, 0  ;;  %v2188_v13 = vrot.slane %v15168_v40, 7  ;;  %v11972_v56 = vld.sshfl [vmem:[%s15126_s28 + $0x1b] sm:$0x1 pattern:$0x75316420] }
 0x146   : > { %v1899_v10 = vsel %vm16479_vm3, %v1898_v29, %v1897_v63  ;;  %v15486_v31 = vunpack.c.l.b16 %v1864_v52  ;;  %v2190_v20 = vrot.slane %v15174_v45, 6  ;;  %v2192_v4 = vrot.slane %v15181_v50, 5  ;;  %v13449_v37 = vld [vmem:[#allocation3 + $0x188] ss:$24 sps:$4 sm:$0xff]   ;;  %s13163_s28 = sshll.u32 %s14871_s21, 4  ;;  %s14686_s21 = scalar_lea.vmem %s16418_s16, 16 }
 0x147   : > { %v2194_v26 = vrot.slane %v15187_v55, 4  ;;  %v1893_v33 = vsel %vm16478_vm7, %v1892_v19, %v1891_v59  ;;  %v1902_v36 = vrot.slane %v15285_v46, 3  ;;  %v2189_v38 = vsel %vm941_vm1, %v2188_v13, %v15162_v35  ;;  %v13452_v53 = vld [vmem:[#allocation3 + $0x1bc] ss:$24 sps:$4 sm:$0x3f]   ;;  %s16416_s12 = scalar_lea.hbm %s16469_s11, %s13163_s28  ;;  %p14687_p8 = scmp.ne.s32.totalorder %s16418_s16, %s14686_s21 }
 0x148   : > { %2042 = vmatpush1.bf16.msra.mxu1 %v1977_v42  ;;  %v2196_v40 = vrot.slane %v15193_v60, 3  ;;  %v1901_v44 = vsel %vm950_vm4, %v1900_v1, %v1899_v10  ;;  %v2191_v39 = vsel %vm16481_vm2, %v2190_v20, %v2189_v38  ;;  %v2198_v45 = vrot.slane %v15199_v2, 2  ;;  %v13454_v29 = vld [vmem:[#allocation3 + $0x1b8] ss:$24 sps:$4 sm:$0x3f]   ;;  %p14694_p6 = scmp.lt.s32.totalorder %s14692_s25, %s14686_s21 }
 0x149   : > { %2361 = vmatprep.subr.bf16.mxu1 %v13451_v58  ;;  %v2202_v50 = vrot.slane %v15217_v22, 7  ;;  %v2193_v55 = vsel %vm16479_vm3, %v2192_v4, %v2191_v39  ;;  %v2200_v35 = vrot.slane %v15205_v8, 1  ;;  %v2204_v60 = vrot.slane %v15222_v27, 6  ;;  %v13457_v22 = vld [vmem:[#allocation3 + $0xc4] ss:$24 sps:$4 sm:$0xff]   ;;  %p14688_p13 = pnand %p14687_p8, %p16569_p11 }
 0x14a   : > { %v2206_v17 = vrot.slane %v15228_v34, 5  ;;  %v1904_v2 = vrot.slane %v15414_v24, 2  ;;  %v2195_v41 = vsel %vm950_vm4, %v2194_v26, %v2193_v55  ;;  %v2208_v32 = vrot.slane %v15234_v43, 4  ;;  %v13458_v4 = vld [vmem:[#allocation3 + $0xf4] ss:$24 sps:$4 sm:$0x3f]   ;;  %p14695_p5 = por %p14694_p6, %p14693_p0 }
 0x14b   : > { %11946 = vmatmul.mubr.msk.bf16.gmra.mrb[12].mxu1 %vm1045_vm8, %v15477_v11  ;;  %11920 = vmatmul.mubr.msk.bf16.vlgmr.msra.gmra.mrb[0].mxu0 %vm1045_vm8, %v15360_v21  ;;  %v2203_v47 = vsel %vm941_vm1, %v2202_v50, %v15211_v16  ;;  %v2197_v8 = vsel %vm16482_vm5, %v2196_v40, %v2195_v41  ;;  %v2210_v34 = vrot.slane %v15244_v54, 3  ;;  %v2212_v48 = vrot.slane %v15250_v61, 2  ;;  %v13460_v26 = vld [vmem:[#allocation3 + $0xf0] ss:$24 sps:$4 sm:$0x3f]   ;;  %p14689_p1 = pneg %p14688_p13 }
 0x14c   : > { %2071 = vmatprep.mubr.bf16.mxu1 %v14787_v0  ;;  %1465 = vmatpush1.bf16.msra.mxu0 %v13443_v5  ;;  %v2205_v27 = vsel %vm16481_vm2, %v2204_v60, %v2203_v47  ;;  %v1903_v28 = vsel %vm16482_vm5, %v1902_v36, %v1901_v44  ;;  %v2199_v49 = vsel %vm16480_vm6, %v2198_v45, %v2197_v8  ;;  %v2214_v43 = vrot.slane %v15255_v3, 1  ;;  %v13463_v38 = vld [vmem:[#allocation3 + $0xd4] ss:$24 sps:$4 sm:$0xff]   ;;  %v13464_v44 = vld [vmem:[#allocation3 + $0x104] ss:$24 sps:$4 sm:$0x3f]  }
 0x14d   : > { %1404 = vmatprep.mubr.bf16.mxu0 %v14787_v0  ;;  %11925 = vmatprep.subr.msk.bf16.mxu0 %vm1052_vm0, %v13446_v15  ;;  %v2207_v16 = vsel %vm16479_vm3, %v2206_v17, %v2205_v27  ;;  %v15525_v51 = vpack.c.b16 %v1893_v33, %v1879_v7  ;;  %v1906_v52 = vrot.slane %v15486_v31, 1  ;;  %v2201_v42 = vsel %vm16478_vm7, %v2200_v35, %v2199_v49  ;;  %v13455_v15 = vld [vmem:[#allocation3 + $0xc0] ss:$24 sps:$4 sm:$0xff]   ;;  %v13469_v50 = vld [vmem:[#allocation3 + $0x124] ss:$24 sps:$4 sm:$0xff]   ;;  %p14696_p9 = pnand %p14695_p5, %p14689_p1 }
 0x14e   : > { %v2209_v54 = vsel %vm950_vm4, %v2208_v32, %v2207_v16  ;;  %v2186_v19 = vrot.slane %v11972_v56, %v15129_v12  ;;  %v2216_v9 = vrot.slane %v15268_v23, 7  ;;  %v2218_v58 = vrot.slane %v15272_v30, 6  ;;  %v13466_v39 = vld [vmem:[#allocation3 + $0x100] ss:$24 sps:$4 sm:$0x3f]  }
 0x14f   : > { %v2211_v61 = vsel %vm16482_vm5, %v2210_v34, %v2209_v54  ;;  %v1905_v3 = vsel %vm16480_vm6, %v1904_v2, %v1903_v28  ;;  %v2220_v63 = vrot.slane %v15279_v18, 5  ;;  %v2222_v1 = vrot.slane %v15285_v46, 4  ;;  %v13467_v55 = vld [vmem:[#allocation3 + $0x120] ss:$24 sps:$4 sm:$0xff]   ;;  %v13475_v17 = vld [vmem:[#allocation3 + $0x134] ss:$24 sps:$4 sm:$0xff]  }
 0x150   : > { %1467 = vmatpush1.bf16.msra.mxu0 %v1357_v25  ;;  %v2213_v59 = vsel %vm16480_vm6, %v2212_v48, %v2211_v61  ;;  %v2187_v7 = vunpack.c.l.b16 %v2186_v19  ;;  %v2217_v25 = vsel %vm941_vm1, %v2216_v9, %v15261_v14  ;;  %v2224_v12 = vrot.slane %v15414_v24, 3  ;;  %v13470_v35 = vld [vmem:[#allocation3 + $0x154] ss:$24 sps:$4 sm:$0x3f]   ;;  %v13473_v2 = vld [vmem:[#allocation3 + $0x130] ss:$24 sps:$4 sm:$0xff]  }
 0x151   : > { %1666 = vmatprep.subr.bf16.mxu0 %v13457_v22  ;;  %v2215_v5 = vsel %vm16478_vm7, %v2214_v43, %v2213_v59  ;;  %v2219_v30 = vsel %vm16481_vm2, %v2218_v58, %v2217_v25  ;;  %v2226_v18 = vrot.slane %v15486_v31, 2  ;;  %v1907_v46 = vsel %vm16478_vm7, %v1906_v52, %v1905_v3  ;;  %v13472_v60 = vld [vmem:[#allocation3 + $0x150] ss:$24 sps:$4 sm:$0x3f]   ;;  %v13487_v27 = vld [vmem:[#allocation3 + $0x194] ss:$24 sps:$4 sm:$0xff]  }
 0x152   : > { %v15546_v23 = vpack.c.b16 %v2215_v5, %v2201_v42  ;;  %v2221_v14 = vsel %vm16479_vm3, %v2220_v63, %v2219_v30  ;;  %v2228_v24 = vrot.slane %v2187_v7, 1  ;;  %v2299_v10 = vsel %vm1052_vm0, %v13454_v29, 0  ;;  %v13476_v22 = vld [vmem:[#allocation3 + $0x164] ss:$24 sps:$4 sm:$0x3f]  }
 0x153   : > { %11967 = vmatmul.mubr.msk.bf16.vlgmr.msra.gmra.mrb[4].mxu1 %vm1045_vm8, %v15525_v51  ;;  %11921 = vmatmul.mubr.msk.bf16.gmra.mrb[20].mxu0 %vm1045_vm8, %v15388_v57  ;;  %v2223_v13 = vsel %vm950_vm4, %v2222_v1, %v2221_v14  ;;  %v15558_v31 = vpack.c.b16 %v1907_v46, %v1907_v46  ;;  %v1649_v40 = vsel %vm1052_vm0, %v13460_v26, 0  ;;  %v1971_v56 = vsel %vm1052_vm0, %v13472_v60, 0  ;;  %v13478_v41 = vld [vmem:[#allocation3 + $0x160] ss:$24 sps:$4 sm:$0x3f]  }
 0x154   : > { %2081 = vmatprep.mubr.bf16.mxu1 %v14787_v0  ;;  %2362 = vmatpush1.bf16.msra.mxu1 %v13449_v37  ;;  %v2225_v20 = vsel %vm16482_vm5, %v2224_v12, %v2223_v13  ;;  %v1983_v47 = vsel %vm1052_vm0, %v13478_v41, 0  ;;  %v13482_v32 = vld [vmem:[#allocation3 + $0x1b4] ss:$24 sps:$4 sm:$0x3f]   ;;  %v13485_v48 = vld [vmem:[#allocation3 + $0x190] ss:$24 sps:$4 sm:$0xff]  }
 0x155   : > { %11988 = vmatprep.subr.msk.bf16.mxu1 %vm1052_vm0, %v13452_v53  ;;  %1496 = vmatprep.mubr.bf16.mxu0 %v14787_v0  ;;  %v2227_v33 = vsel %vm16480_vm6, %v2226_v18, %v2225_v20  ;;  %v13484_v8 = vld [vmem:[#allocation3 + $0x1b0] ss:$24 sps:$4 sm:$0x3f]   ;;  %v13488_v28 = vld [vmem:[#allocation3 + $0x1c4] ss:$24 sps:$4 sm:$0x3f]  }
 0x156   : > { %v2229_v36 = vsel %vm16478_vm7, %v2228_v24, %v2227_v33  ;;  %v2293_v34 = vsel %vm1052_vm0, %v13484_v8, 0  ;;  %v13490_v37 = vld [vmem:[#allocation3 + $0x1c0] ss:$24 sps:$4 sm:$0x3f]   ;;  %v13493_v61 = vld [vmem:[#allocation8 + $0x304] ss:$16 sps:$4 sm:$0xff]  }
 0x157   : > { %v15576_v45 = vpack.c.b16 %v2229_v36, %v2229_v36  ;;  %v2305_v49 = vsel %vm1052_vm0, %v13490_v37, 0  ;;  %v13491_v9 = vld [vmem:[#allocation8 + $0x300] ss:$16 sps:$4 sm:$0xff]   ;;  %v13496_v1 = vld [vmem:[#allocation8 + $0x324] ss:$16 sps:$4 sm:$0xff]  }
 0x158   : > { %2364 = vmatpush1.bf16.msra.mxu1 %v2299_v10  ;;  %v13494_v63 = vld [vmem:[#allocation8 + $0x320] ss:$16 sps:$4 sm:$0xff]   ;;  %v13499_v5 = vld [vmem:[#allocation8 + $0x344] ss:$16 sps:$4 sm:$0xff]   ;;  %vm2704_vm10 = vsmask.f32 2304 }
 0x159   : > { %v13497_v25 = vld [vmem:[#allocation8 + $0x340] ss:$16 sps:$4 sm:$0xff]   ;;  %v13502_v24 = vld [vmem:[#allocation8 + $0x364] ss:$16 sps:$4 sm:$0xff]   ;;  %vm2650_vm3 = vsmask.f32 7942 }
 0x15a   : > { %v13500_v14 = vld [vmem:[#allocation8 + $0x360] ss:$16 sps:$4 sm:$0xff]   ;;  %v13505_v10 = vld [vmem:[#allocation8 + $0x384] ss:$16 sps:$4 sm:$0xff]   ;;  %vm2742_vm11 = vsmask.f32 3328 }
 0x15b   : > { %11968 = vmatmul.mubr.msk.bf16.gmra.mrb[16].mxu1 %vm1045_vm8, %v15558_v31  ;;  %11926 = vmatmul.mubr.msk.bf16.vlgmr.msra.gmra.mrb[12].mxu0 %vm1045_vm8, %v15360_v21  ;;  %v13461_v21 = vld [vmem:[#allocation3 + $0xd0] ss:$24 sps:$4 sm:$0xff]   ;;  %vm2745_vm6 = vsmask.f32 7424 }
 0x15c   : > { %2393 = vmatprep.mubr.bf16.mxu1 %v14787_v0  ;;  %1667 = vmatpush1.bf16.msra.mxu0 %v13455_v15  ;;  %v13503_v15 = vld [vmem:[#allocation8 + $0x380] ss:$16 sps:$4 sm:$0xff]   ;;  %v13508_v33 = vld [vmem:[#allocation8 + $0x3a4] ss:$16 sps:$4 sm:$0xff]  }
 0x15d   : > { %1506 = vmatprep.mubr.bf16.mxu0 %v14787_v0  ;;  %11941 = vmatprep.subr.msk.bf16.mxu0 %vm1052_vm0, %v13458_v4  ;;  %v13506_v26 = vld [vmem:[#allocation8 + $0x3a0] ss:$16 sps:$4 sm:$0xff]   ;;  %v13511_v36 = vld [vmem:[#allocation8 + $0x3c4] ss:$16 sps:$4 sm:$0xff]  }
 0x15e   : > { %v13515_v41 = vld [vmem:[#allocation8 + $0x400] ss:$16 sps:$4 sm:$0xff]  }
 0x15f   : > { %v13521_v8 = vld [vmem:[#allocation8 + $0x420] ss:$16 sps:$4 sm:$0xff]  }
 0x160   : > { %1669 = vmatpush1.bf16.msra.mxu0 %v1649_v40  ;;  %v13509_v40 = vld [vmem:[#allocation8 + $0x3c0] ss:$16 sps:$4 sm:$0xff]  }
 0x161   : > { %1768 = vmatprep.subr.bf16.mxu0 %v13463_v38 }
 0x163   : > { %11989 = vmatmul.mubr.msk.bf16.vlgmr.msra.gmra.mrb[4].mxu1 %vm1045_vm8, %v15546_v23  ;;  %11927 = vmatmul.mubr.msk.bf16.gmra.mrb[24].mxu0 %vm1045_vm8, %v15388_v57  ;;  %v1661_v57 = vsel %vm1052_vm0, %v13466_v39, 0 }
 0x164   : > { %1698 = vmatprep.mubr.bf16.mxu0 %v14787_v0  ;;  %2403 = vmatprep.mubr.bf16.mxu1 %v14787_v0 }
 0x16b   : > { %11942 = vmatmul.mubr.msk.bf16.vlgmr.msra.gmra.mrb[0].mxu0 %vm1045_vm8, %v15437_v62  ;;  %11990 = vmatmul.mubr.msk.bf16.gmra.mrb[20].mxu1 %vm1045_vm8, %v15576_v45 }
 0x16c   : > { %1769 = vmatpush1.bf16.msra.mxu0 %v13461_v21  ;;  %1708 = vmatprep.mubr.bf16.mxu0 %v14787_v0 }
 0x16d   : > { %11947 = vmatprep.subr.msk.bf16.mxu0 %vm1052_vm0, %v13464_v44  ;;  %3724 = vmatprep.mubr.bf16.mxu1 %v14787_v0 }
 0x170   : > { %1771 = vmatpush1.bf16.msra.mxu0 %v1661_v57  ;;  %v13514_v57 = vld [vmem:[#allocation8 + $0x3e4] ss:$16 sps:$4 sm:$0xff]  }
 0x171   : > { %1988 = vmatprep.subr.bf16.mxu0 %v13469_v50 }
 0x173   : > { %11943 = vmatmul.mubr.msk.bf16.gmra.mrb[28].mxu0 %vm1045_vm8, %v15477_v11 }
 0x174   : > { %1800 = vmatprep.mubr.bf16.mxu0 %v14787_v0 }
 0x17b   : > { %11948 = vmatmul.mubr.msk.bf16.vlgmr.msra.gmra.mrb[12].mxu0 %vm1045_vm8, %v15437_v62  ;;  %v13481_v62 = vld [vmem:[#allocation3 + $0x184] ss:$24 sps:$4 sm:$0xff]  }
 0x17c   : > { %1989 = vmatpush1.bf16.msra.mxu0 %v13467_v55  ;;  %1810 = vmatprep.mubr.bf16.mxu0 %v14787_v0  ;;  %v13512_v55 = vld [vmem:[#allocation8 + $0x3e0] ss:$16 sps:$4 sm:$0xff]  }
 0x17d   : > { %11963 = vmatprep.subr.msk.bf16.mxu0 %vm1052_vm0, %v13470_v35 }
 0x180   : > { %1991 = vmatpush1.bf16.msra.mxu0 %v1971_v56 }
 0x181   : > { %2090 = vmatprep.subr.bf16.mxu0 %v13475_v17 }
 0x183   : > { %11949 = vmatmul.mubr.msk.bf16.gmra.mrb[32].mxu0 %vm1045_vm8, %v15477_v11  ;;  %v13479_v11 = vld [vmem:[#allocation3 + $0x180] ss:$24 sps:$4 sm:$0xff]  }
 0x184   : > { %2020 = vmatprep.mubr.bf16.mxu0 %v14787_v0 }
 0x18b   : > { %11964 = vmatmul.mubr.msk.bf16.vlgmr.msra.gmra.mrb[0].mxu0 %vm1045_vm8, %v15525_v51 }
 0x18c   : > { %2091 = vmatpush1.bf16.msra.mxu0 %v13473_v2  ;;  %2030 = vmatprep.mubr.bf16.mxu0 %v14787_v0 }
 0x18d   : > { %11969 = vmatprep.subr.msk.bf16.mxu0 %vm1052_vm0, %v13476_v22 }
 0x190   : > { %2093 = vmatpush1.bf16.msra.mxu0 %v1983_v47  ;;  %v13518_v47 = vld [vmem:[#allocation8 + $0x508] ss:$16 sps:$4 sm:$0xff]  }
 0x191   : > { %2310 = vmatprep.subr.bf16.mxu0 %v13481_v62  ;;  %v13517_v62 = vld [vmem:[#allocation8 + $0x404] ss:$16 sps:$4 sm:$0xff]  }
 0x193   : > { %11965 = vmatmul.mubr.msk.bf16.gmra.mrb[36].mxu0 %vm1045_vm8, %v15558_v31 }
 0x194   : > { %2122 = vmatprep.mubr.bf16.mxu0 %v14787_v0 }
 0x19b   : > { %11970 = vmatmul.mubr.msk.bf16.vlgmr.msra.gmra.mrb[12].mxu0 %vm1045_vm8, %v15525_v51 }
 0x19c   : > { %2311 = vmatpush1.bf16.msra.mxu0 %v13479_v11  ;;  %2132 = vmatprep.mubr.bf16.mxu0 %v14787_v0  ;;  %v13520_v11 = vld [vmem:[#allocation8 + $0x50c] ss:$16 sps:$4 sm:$0xff]  }
 0x19d   : > { %11985 = vmatprep.subr.msk.bf16.mxu0 %vm1052_vm0, %v13482_v32  ;;  %3692 = vmatprep.subr.bf16.mxu1 %v13520_v11  ;;  %v13560_v11 = vld [vmem:[#allocation8 + $0x5e8] ss:$16 sps:$4 sm:$0xff]  }
 0x19e   : > { %3693 = vmatpush1.bf16.msra.mxu1 %v13518_v47 }
 0x1a0   : > { %2313 = vmatpush1.bf16.msra.mxu0 %v2293_v34 }
 0x1a1   : > { %2412 = vmatprep.subr.bf16.mxu0 %v13487_v27 }
 0x1a3   : > { %11971 = vmatmul.mubr.msk.bf16.gmra.mrb[40].mxu0 %vm1045_vm8, %v15558_v31 }
 0x1a4   : > { %2342 = vmatprep.mubr.bf16.mxu0 %v14787_v0 }
 0x1ab   : > { %11986 = vmatmul.mubr.msk.bf16.vlgmr.msra.gmra.mrb[0].mxu0 %vm1045_vm8, %v15546_v23 }
 0x1ac   : > { %2413 = vmatpush1.bf16.msra.mxu0 %v13485_v48  ;;  %2352 = vmatprep.mubr.bf16.mxu0 %v14787_v0  ;;  %v13523_v48 = vld [vmem:[#allocation8 + $0x424] ss:$16 sps:$4 sm:$0xff]  }
 0x1ad   : > { %11991 = vmatprep.subr.msk.bf16.mxu0 %vm1052_vm0, %v13488_v28  ;;  %vm2632_vm0 = vsmask.f32 1280 }
 0x1ae   : > { %vm15747_vm7 = vmand %vm941_vm1, %vm2632_vm0 }
 0x1af   : > { %vm15760_vm0 = vmand %vm2589_vm9, %vm2614_vm13  ;;  %vm16527_vm13 = vcmask 1042434  }
 0x1b0   : > { %2415 = vmatpush1.bf16.msra.mxu0 %v2305_v49  ;;  %v13524_v49 = vld [vmem:[#allocation8 + $0x528] ss:$16 sps:$4 sm:$0xff]  }
 0x1b1   : > { %3569 = vmatprep.subr.bf16.mxu0 %v13493_v61 }
 0x1b3   : > { %11987 = vmatmul.mubr.msk.bf16.gmra.mrb[44].mxu0 %vm1045_vm8, %v15576_v45 }
 0x1b4   : > { %2444 = vmatprep.mubr.bf16.mxu0 %v14787_v0 }
 0x1bb   : > { %11992 = vmatmul.mubr.msk.bf16.vlgmr.msra.gmra.mrb[12].mxu0 %vm1045_vm8, %v15546_v23 }
 0x1bc   : > { %2454 = vmatprep.mubr.bf16.mxu0 %v14787_v0  ;;  %3570 = vmatpush1.bf16.msra.mxu0 %v13491_v9 }
 0x1bd   : > { %3571 = vmatprep.subr.bf16.mxu0 %v13496_v1  ;;  %v13541_v1 = vld [vmem:[#allocation8 + $0x484] ss:$16 sps:$4 sm:$0xff]  }
 0x1c0   : > { %3572 = vmatpush1.bf16.msra.mxu0 %v13494_v63  ;;  %v13533_v63 = vld [vmem:[#allocation8 + $0x460] ss:$16 sps:$4 sm:$0xff]  }
 0x1c1   : > { %3573 = vmatprep.subr.bf16.mxu0 %v13499_v5 }
 0x1c3   : > { %11993 = vmatmul.mubr.msk.bf16.gmra.mrb[48].mxu0 %vm1045_vm8, %v15576_v45  ;;  %vm2635_vm8 = vsmask.f32 5376 }
 0x1c4   : > { %3574 = vmatpush1.bf16.msra.mxu0 %v13497_v25  ;;  %vm15754_vm2 = vmand %vm16482_vm5, %vm2635_vm8  ;;  %vm16531_vm5 = vcmask 1046534  }
 0x1c5   : > { %3575 = vmatprep.subr.bf16.mxu0 %v13502_v24  ;;  %vm15766_vm8 = vmand %vm950_vm4, %vm2616_vm14 }
 0x1c6   : > { %vm15784_vm4 = vmand %vm941_vm1, %vm2650_vm3  ;;  %vm2652_vm1 = vsmask.f32 7958  ;;  %vm16530_vm3 = vsmask.f32 6400 }
 0x1c7   : > { %vm15791_vm14 = vmand %vm16527_vm13, %vm2704_vm10  ;;  %vm16534_vm10 = vcmask 1043459  }
 0x1c8   : > { %3576 = vmatpush1.bf16.msra.mxu0 %v13500_v14  ;;  %v13536_v14 = vld [vmem:[#allocation8 + $0x568] ss:$16 sps:$4 sm:$0xff]   ;;  %vm15803_vm9 = vmand %vm16531_vm5, %vm16530_vm3 }
 0x1c9   : > { %3577 = vmatprep.subr.bf16.mxu0 %v13505_v10  ;;  %vm15813_vm13 = vmand %vm16534_vm10, %vm2742_vm11  ;;  %vm16538_vm11 = vcmask 1047559   ;;  %vm2726_vm10 = vsmask.f32 7946 }
 0x1ca   : > { %vm16537_vm5 = vmor %vm15728_vm15, %vm15723_vm12 }
 0x1cb   : > { %vm15831_vm3 = vmand %vm16538_vm11, %vm2745_vm6 }
 0x1cc   : > { %3578 = vmatpush1.bf16.msra.mxu0 %v13503_v15  ;;  %v13544_v15 = vld [vmem:[#allocation8 + $0x58c] ss:$16 sps:$4 sm:$0xff]   ;;  %vm16541_vm6 = vmor %vm15754_vm2, %vm15747_vm7 }
 0x1cd   : > { %3579 = vmatprep.subr.bf16.mxu0 %v13508_v33 }
 0x1d0   : > { %3580 = vmatpush1.bf16.msra.mxu0 %v13506_v26  ;;  %v13550_v26 = vld [vmem:[#allocation8 + $0x5ac] ss:$16 sps:$4 sm:$0xff]  }
 0x1d1   : > { %3581 = vmatprep.subr.bf16.mxu0 %v13511_v36  ;;  %v13553_v36 = vld [vmem:[#allocation8 + $0x4c4] ss:$16 sps:$4 sm:$0xff]  }
 0x1d4   : > { %3582 = vmatpush1.bf16.msra.mxu0 %v13509_v40 }
 0x1d5   : > { %3583 = vmatprep.subr.bf16.mxu0 %v13514_v57  ;;  %v13554_v57 = vld [vmem:[#allocation8 + $0x5c8] ss:$16 sps:$4 sm:$0xff]  }
 0x1d8   : > { %3584 = vmatpush1.bf16.msra.mxu0 %v13512_v55  ;;  %v13557_v55 = vld [vmem:[#allocation8 + $0x4e0] ss:$16 sps:$4 sm:$0xff]  }
 0x1d9   : > { %3585 = vmatprep.subr.bf16.mxu0 %v13517_v62 }
 0x1dc   : > { %3586 = vmatpush1.bf16.msra.mxu0 %v13515_v41  ;;  %v13566_v41 = vld [vmem:[#allocation8 + $0x504] ss:$16 sps:$4 sm:$0xff]  }
 0x1dd   : > { %3587 = vmatprep.subr.bf16.mxu0 %v13523_v48 }
 0x1e0   : > { %3588 = vmatpush1.bf16.msra.mxu0 %v13521_v8 }
 0x1fe   : > { %v1115_v16 = vpop.f32.mrb[4].mxu0  ;;  %v1166_v43 = vpop.f32.mrb[0].mxu1 }
 0x1ff   : > { %v1117_v51 = vpop.f32.mrb[5].mxu0  ;;  %v1168_v52 = vpop.f32.mrb[1].mxu1 }
 0x200   : > { %v1119_v53 = vpop.f32.mrb[6].mxu0  ;;  %v1170_v29 = vpop.f32.mrb[2].mxu1 }
 0x201   : > { %v1120_v42 = vpop.f32.mrb[7].mxu0  ;;  %v1171_v54 = vpop.f32.mrb[3].mxu1  ;;  %v13532_v53 = vld [vmem:[#allocation8 + $0x54c] ss:$16 sps:$4 sm:$0xff]   ;;  %v13535_v29 = vld [vmem:[#allocation8 + $0x464] ss:$16 sps:$4 sm:$0xff]  }
 0x202   : > { %v13530_v42 = vld [vmem:[#allocation8 + $0x548] ss:$16 sps:$4 sm:$0xff]   ;;  %v13538_v54 = vld [vmem:[#allocation8 + $0x56c] ss:$16 sps:$4 sm:$0xff]  }
 0x206   : > { %v15626_v19 = vpop.f32.mrb[8].mxu0 }
 0x207   : > { %v15628_v58 = vpop.f32.mrb[9].mxu0 }
 0x208   : > { %v15630_v3 = vpop.f32.mrb[10].mxu0 }
 0x209   : > { %v15632_v59 = vpop.f32.mrb[11].mxu0 }
 0x20e   : > { %v1457_v7 = vpop.f32.mrb[8].mxu1 }
 0x20f   : > { %v1458_v12 = vadd.f32 %v1457_v7, %v1166_v43  ;;  %v1459_v23 = vpop.f32.mrb[9].mxu1 }
 0x210   : > { %v1460_v30 = vadd.f32 %v1459_v23, %v1168_v52  ;;  %v1461_v18 = vpop.f32.mrb[10].mxu1  ;;  %v13527_v52 = vld [vmem:[#allocation8 + $0x440] ss:$16 sps:$4 sm:$0xff]  }
 0x211   : > { %v1462_v46 = vpop.f32.mrb[11].mxu1 }
 0x216   : > { %v15634_v13 = vpop.f32.mrb[16].mxu0 }
 0x217   : > { %v15636_v20 = vpop.f32.mrb[17].mxu0 }
 0x218   : > { %v1221_v31 = vpop.f32.mrb[18].mxu0 }
 0x219   : > { %v1222_v4 = vpop.f32.mrb[19].mxu0  ;;  %v13539_v31 = vld [vmem:[#allocation8 + $0x480] ss:$16 sps:$4 sm:$0xff]  }
 0x21a   : > { %v13542_v4 = vld [vmem:[#allocation8 + $0x588] ss:$16 sps:$4 sm:$0xff]  }
 0x21e   : > { %v1761_v38 = vpop.f32.mrb[12].mxu1 }
 0x21f   : > { %v1833_v21 = vadd.f32 %v1761_v38, %v1458_v12  ;;  %v1763_v44 = vpop.f32.mrb[13].mxu1 }
 0x220   : > { %v1834_v39 = vadd.f32 %v1763_v44, %v1460_v30  ;;  %v1765_v45 = vpop.f32.mrb[14].mxu1 }
 0x221   : > { %v1766_v50 = vpop.f32.mrb[15].mxu1 }
 0x222   : > { %v13559_v50 = vld [vmem:[#allocation8 + $0x4e4] ss:$16 sps:$4 sm:$0xff]  }
 0x226   : > { %v1406_v35 = vpop.f32.mrb[20].mxu0 }
 0x227   : > { %v15638_v60 = vadd.f32 %v1406_v35, %v1115_v16  ;;  %v1408_v17 = vpop.f32.mrb[21].mxu0  ;;  %v13526_v16 = vld [vmem:[#allocation8 + $0x52c] ss:$16 sps:$4 sm:$0xff]  }
 0x228   : > { %v15640_v56 = vadd.f32 %v1408_v17, %v1117_v51  ;;  %v1410_v2 = vpop.f32.mrb[22].mxu0  ;;  %v13529_v51 = vld [vmem:[#allocation8 + $0x444] ss:$16 sps:$4 sm:$0xff]   ;;  %3694 = vmatprep.subr.bf16.mxu1 %v13526_v16  ;;  %v13562_v35 = vld [vmem:[#allocation8 + $0x5ec] ss:$16 sps:$4 sm:$0xff]  }
 0x229   : > { %v1411_v22 = vpop.f32.mrb[23].mxu0  ;;  %3589 = vmatprep.subr.bf16.mxu0 %v13529_v51  ;;  %3695 = vmatpush1.bf16.msra.mxu1 %v13524_v49 }
 0x22a   : > { %3696 = vmatprep.subr.bf16.mxu1 %v13532_v53  ;;  %3590 = vmatpush1.bf16.msra.mxu0 %v13527_v52  ;;  %v15666_v53 = vsub.s32 3, %v15119_v6 }
 0x22b   : > { %3591 = vmatprep.subr.bf16.mxu0 %v13535_v29  ;;  %v2481_v29 = vld [vmem:[#allocation6] sm:$0x3f] }
 0x22d   : > { %3697 = vmatpush1.bf16.msra.mxu1 %v13530_v42  ;;  %v2498_v42 = vrot.slane %v2481_v29, %v15666_v53 }
 0x22e   : > { %v2083_v32 = vpop.f32.mrb[16].mxu1  ;;  %3698 = vmatprep.subr.bf16.mxu1 %v13538_v54  ;;  %3592 = vmatpush1.bf16.msra.mxu0 %v13533_v63  ;;  %v15672_v63 = vsub.s32 0, %v15119_v6 }
 0x22f   : > { %v2155_v27 = vadd.f32 %v2083_v32, %v1833_v21  ;;  %v2085_v34 = vpop.f32.mrb[17].mxu1  ;;  %3593 = vmatprep.subr.bf16.mxu0 %v13541_v1  ;;  %v13556_v21 = vld [vmem:[#allocation8 + $0x5cc] ss:$16 sps:$4 sm:$0xff]   ;;  %v13569_v32 = vld [vmem:[#allocation8 + $0x4] ss:$16 sps:$4 sm:$0xff]  }
 0x230   : > { %v2156_v28 = vadd.f32 %v2085_v34, %v1834_v39  ;;  %v2087_v37 = vpop.f32.mrb[18].mxu1  ;;  %v13551_v39 = vld [vmem:[#allocation8 + $0x4c0] ss:$16 sps:$4 sm:$0xff]  }
 0x231   : > { %v2088_v43 = vpop.f32.mrb[19].mxu1  ;;  %3699 = vmatpush1.bf16.msra.mxu1 %v13536_v14 }
 0x232   : > { %3700 = vmatprep.subr.bf16.mxu1 %v13544_v15  ;;  %3594 = vmatpush1.bf16.msra.mxu0 %v13539_v31  ;;  %v15680_v31 = vsub.s32 2, %v15119_v6 }
 0x235   : > { %3701 = vmatpush1.bf16.msra.mxu1 %v13542_v4 }
 0x236   : > { %v2395_v61 = vpop.f32.mrb[4].mxu1  ;;  %v1508_v9 = vpop.f32.mrb[24].mxu0  ;;  %3702 = vmatprep.subr.bf16.mxu1 %v13550_v26  ;;  %v15683_v26 = vsub.s32 1, %v15119_v6 }
 0x237   : > { %v15643_v5 = vadd.f32 %v2395_v61, %v15626_v19  ;;  %v2397_v7 = vpop.f32.mrb[5].mxu1  ;;  %v15646_v25 = vadd.f32 %v1508_v9, %v15634_v13  ;;  %v1510_v12 = vpop.f32.mrb[25].mxu0 }
 0x238   : > { %v15649_v23 = vadd.f32 %v2397_v7, %v15628_v58  ;;  %v2399_v30 = vpop.f32.mrb[6].mxu1  ;;  %v1511_v18 = vadd.f32 %v1510_v12, %v15636_v20  ;;  %v1512_v46 = vpop.f32.mrb[26].mxu0  ;;  %v13547_v58 = vld [vmem:[#allocation8 + $0x4a4] ss:$16 sps:$4 sm:$0xff]   ;;  %v13545_v20 = vld [vmem:[#allocation8 + $0x4a0] ss:$16 sps:$4 sm:$0xff]  }
 0x239   : > { %v15653_v24 = vadd.f32 %v2399_v30, %v15630_v3  ;;  %v2401_v19 = vpop.f32.mrb[7].mxu1  ;;  %v1513_v10 = vpop.f32.mrb[27].mxu0  ;;  %v13548_v3 = vld [vmem:[#allocation8 + $0x5a8] ss:$16 sps:$4 sm:$0xff]   ;;  %3595 = vmatprep.subr.bf16.mxu0 %v13547_v58 }
 0x23a   : > { %v15656_v13 = vadd.f32 %v2401_v19, %v15632_v59  ;;  %3596 = vmatpush1.bf16.msra.mxu0 %v13545_v20  ;;  %3703 = vmatpush1.bf16.msra.mxu1 %v13548_v3 }
 0x23b   : > { %3597 = vmatprep.subr.bf16.mxu0 %v13553_v36  ;;  %3704 = vmatprep.subr.bf16.mxu1 %v13556_v21  ;;  %v15687_v21 = vrot.slane %v2481_v29, %v15680_v31 }
 0x23c   : > { %v2522_v30 = vadd.f32 %v15656_v13, %v2498_v42 }
 0x23e   : > { %v2405_v33 = vpop.f32.mrb[20].mxu1  ;;  %3598 = vmatpush1.bf16.msra.mxu0 %v13551_v39  ;;  %3705 = vmatpush1.bf16.msra.mxu1 %v13554_v57  ;;  %v2540_v14 = vmax.f32 %v2522_v30, 0.0 }
 0x23f   : > { %v15658_v38 = vadd.f32 %v2405_v33, %v2155_v27  ;;  %v2407_v40 = vpop.f32.mrb[21].mxu1  ;;  %3599 = vmatprep.subr.bf16.mxu0 %v13559_v50  ;;  %3706 = vmatprep.subr.bf16.mxu1 %v13562_v35  ;;  %v2501_v35 = vsub.s32 4, %v15119_v6 }
 0x240   : > { %v15660_v59 = vadd.f32 %v2407_v40, %v2156_v28  ;;  %v2409_v44 = vpop.f32.mrb[22].mxu1  ;;  %v2670_v3 = vrot.slane %v2540_v14, 1 }
 0x241   : > { %v2410_v45 = vpop.f32.mrb[23].mxu1 }
 0x242   : > { %3600 = vmatpush1.bf16.msra.mxu0 %v13557_v55  ;;  %3707 = vmatpush1.bf16.msra.mxu1 %v13560_v11  ;;  %v2528_v13 = vadd.f32 %v2498_v42, %v15660_v59  ;;  %v15694_v45 = vrot.slane %v2481_v29, %v15683_v26  ;;  %v15696_v57 = vmax.f32 %v2540_v14, %v2670_v3 }
 0x243   : > { %3610 = vmatprep.subr.bf16.mxu0 %v13566_v41  ;;  %4219 = vmatprep.subr.bf16.mxu1 %v13569_v32  ;;  %v2505_v32 = vsub.s32 5, %v15119_v6 }
 0x246   : > { %v1710_v17 = vpop.f32.mrb[28].mxu0 }
 0x247   : > { %v1831_v2 = vadd.f32 %v1710_v17, %v15638_v60  ;;  %v1712_v22 = vpop.f32.mrb[29].mxu0  ;;  %v2546_v17 = vmax.f32 %v2528_v13, 0.0  ;;  %v16519_v13 = vmov 0 }
 0x248   : > { %v1832_v62 = vadd.f32 %v1712_v22, %v15640_v56  ;;  %v1714_v47 = vpop.f32.mrb[30].mxu0  ;;  %v16520_v13 = vsel %vm15754_vm2, 4294967295, %v16519_v13 }
 0x249   : > { %v1715_v8 = vpop.f32.mrb[31].mxu0 }
 0x256   : > { %v1812_v27 = vpop.f32.mrb[32].mxu0 }
 0x257   : > { %v1835_v34 = vadd.f32 %v1812_v27, %v15646_v25  ;;  %v1814_v48 = vpop.f32.mrb[33].mxu0  ;;  %v2516_v25 = vadd.f32 %v15649_v23, %v2498_v42 }
 0x258   : > { %v1836_v60 = vadd.f32 %v1814_v48, %v1511_v18  ;;  %v1816_v28 = vpop.f32.mrb[34].mxu0  ;;  %v2486_v18 = vrot.slane %v2481_v29, %v15672_v63 }
 0x259   : > { %v1817_v37 = vpop.f32.mrb[35].mxu0  ;;  %v2534_v46 = vmax.f32 %v2516_v25, 0.0  ;;  %v2776_v28 = vrot.slane %v2546_v17, 1 }
 0x25b   : > { %v2558_v4 = vrot.slane %v2534_v46, 1 }
 0x25d   : > { %v15689_v44 = vmax.f32 %v2534_v46, %v2558_v4  ;;  %v16517_v4 = vmov 0 }
 0x25e   : > { %v16518_v4 = vsel %vm15747_vm7, 4294967295, %v16517_v4 }
 0x266   : > { %v2032_v49 = vpop.f32.mrb[36].mxu0 }
 0x267   : > { %v2153_v16 = vadd.f32 %v2032_v49, %v1831_v2  ;;  %v2034_v56 = vpop.f32.mrb[37].mxu0 }
 0x268   : > { %v2154_v43 = vadd.f32 %v2034_v56, %v1832_v62  ;;  %v2036_v51 = vpop.f32.mrb[38].mxu0  ;;  %v2515_v62 = vadd.f32 %v15643_v5, %v15687_v21  ;;  %v15720_v56 = vrot.slane %v2481_v29, %v2505_v32 }
 0x269   : > { %v2037_v52 = vpop.f32.mrb[39].mxu0 }
 0x26a   : > { %v2533_v49 = vmax.f32 %v2515_v62, 0.0  ;;  %v16513_v52 = vmov 0 }
 0x26b   : > { %v16514_v52 = vsel %vm15723_vm12, 4294967295, %v16513_v52 }
 0x276   : > { %v2134_v54 = vpop.f32.mrb[40].mxu0 }
 0x277   : > { %v15669_v61 = vadd.f32 %v2134_v54, %v1835_v34  ;;  %v2136_v9 = vpop.f32.mrb[41].mxu0 }
 0x278   : > { %v15674_v1 = vadd.f32 %v2136_v9, %v1836_v60  ;;  %v2138_v7 = vpop.f32.mrb[42].mxu0  ;;  %v15713_v60 = vrot.slane %v2481_v29, %v2501_v35 }
 0x279   : > { %v2139_v12 = vpop.f32.mrb[43].mxu0 }
 0x27a   : > { %v2557_v12 = vrot.slane %v2533_v49, 1 }
 0x27e   : > { %v2344_v19 = vpop.f32.mrb[0].mxu0 }
 0x27f   : > { %v2513_v10 = vadd.f32 %v2486_v18, %v2344_v19  ;;  %v2346_v15 = vpop.f32.mrb[1].mxu0 }
 0x280   : > { %v2348_v58 = vpop.f32.mrb[2].mxu0  ;;  %v2514_v8 = vadd.f32 %v15694_v45, %v2346_v15 }
 0x281   : > { %v2531_v20 = vmax.f32 %v2513_v10, 0.0  ;;  %v2519_v23 = vadd.f32 %v2486_v18, %v2348_v58  ;;  %v2350_v33 = vpop.f32.mrb[3].mxu0 }
 0x282   : > { %v2520_v5 = vadd.f32 %v15694_v45, %v2350_v33 }
 0x283   : > { %v2555_v36 = vrot.slane %v2531_v20, 1  ;;  %v2537_v40 = vmax.f32 %v2519_v23, 0.0 }
 0x284   : > { %v2538_v29 = vmax.f32 %v2520_v5, 0.0 }
 0x285   : > { %v15691_v39 = vmax.f32 %v2531_v20, %v2555_v36  ;;  %v2667_v50 = vrot.slane %v2537_v40, 1 }
 0x286   : > { %v2354_v55 = vpop.f32.mrb[44].mxu0  ;;  %v2668_v33 = vrot.slane %v2538_v29, 1 }
 0x287   : > { %v2573_v59 = vmax.f32 %v15691_v39, %v15689_v44  ;;  %v15701_v2 = vmax.f32 %v2537_v40, %v2667_v50  ;;  %v2475_v22 = vadd.f32 %v2354_v55, %v2153_v16  ;;  %v2356_v41 = vpop.f32.mrb[45].mxu0  ;;  %v2521_v16 = vadd.f32 %v15653_v24, %v15687_v21 }
 0x288   : > { %v15705_v47 = vadd.f32 %v2356_v41, %v2154_v43  ;;  %v2358_v11 = vpop.f32.mrb[46].mxu0  ;;  %v2532_v43 = vmax.f32 %v2514_v8, 0.0  ;;  %v15732_v24 = vmax.f32 %v2546_v17, %v2776_v28 }
 0x289   : > { %v2685_v27 = vmax.f32 %v15701_v2, %v15696_v57  ;;  %v2525_v34 = vadd.f32 %v2486_v18, %v2475_v22  ;;  %v2359_v48 = vpop.f32.mrb[47].mxu0  ;;  %v2539_v30 = vmax.f32 %v2521_v16, 0.0  ;;  %v2569_v22 = vmax.f32 %v2533_v49, %v2557_v12  ;;  %v2710_v57 = vld [vmem:[#allocation2] sm:$0x44] }
 0x28a   : > { %v2556_v14 = vrot.slane %v2532_v43, 1  ;;  %v15776_v48 = vadd.f32 %v15694_v45, %v15705_v47  ;;  %v2680_v49 = vmax.f32 %v2538_v29, %v2668_v33 }
 0x28b   : > { %v2543_v37 = vmax.f32 %v2525_v34, 0.0  ;;  %v2669_v40 = vrot.slane %v2539_v30, 1  ;;  %v15772_v34 = vadd.f32 %v15687_v21, %v15658_v38 }
 0x28c   : > { %v2568_v41 = vmax.f32 %v2532_v43, %v2556_v14 }
 0x28d   : > { %v2773_v51 = vrot.slane %v2543_v37, 1  ;;  %v2681_v47 = vmax.f32 %v2539_v30, %v2669_v40 }
 0x28e   : > { %v2446_v42 = vpop.f32.mrb[12].mxu0 }
 0x28f   : > { %v15734_v9 = vmax.f32 %v2543_v37, %v2773_v51  ;;  %v2517_v7 = vadd.f32 %v15713_v60, %v2446_v42  ;;  %v2448_v25 = vpop.f32.mrb[13].mxu0  ;;  %v2596_v51 = vld [vmem:[#allocation2] sm:$0x11] }
 0x290   : > { %v2518_v18 = vadd.f32 %v15720_v56, %v2448_v25  ;;  %v2450_v46 = vpop.f32.mrb[14].mxu0 }
 0x291   : > { %v2791_v19 = vmax.f32 %v15734_v9, %v15732_v24  ;;  %v2535_v10 = vmax.f32 %v2517_v7, 0.0  ;;  %v2523_v15 = vadd.f32 %v15713_v60, %v2450_v46  ;;  %v2452_v58 = vpop.f32.mrb[15].mxu0 }
 0x292   : > { %v2536_v20 = vmax.f32 %v2518_v18, 0.0  ;;  %v2524_v23 = vadd.f32 %v15720_v56, %v2452_v58 }
 0x293   : > { %v2559_v3 = vrot.slane %v2535_v10, 1  ;;  %v2541_v36 = vmax.f32 %v2523_v15, 0.0  ;;  %v2638_v15 = vld [vmem:[#allocation2] sm:$0x22] }
 0x294   : > { %v2560_v55 = vrot.slane %v2536_v20, 1  ;;  %v2542_v17 = vmax.f32 %v2524_v23, 0.0  ;;  %v2641_v23 = vld [vmem:[#allocation2 + $0x8] sm:$0x2] }
 0x295   : > { %v2571_v62 = vmax.f32 %v2535_v10, %v2559_v3  ;;  %v2671_v8 = vrot.slane %v2541_v36, 1  ;;  %v2545_v10 = vmax.f32 %v15772_v34, 0.0 }
 0x296   : > { %v2572_v28 = vmax.f32 %v2536_v20, %v2560_v55  ;;  %v2672_v5 = vrot.slane %v2542_v17, 1  ;;  %v2456_v37 = vpop.f32.mrb[48].mxu0 }
 0x297   : > { %v2574_v16 = vmax.f32 %v2568_v41, %v2571_v62  ;;  %v2683_v38 = vmax.f32 %v2541_v36, %v2671_v8  ;;  %v2479_v21 = vadd.f32 %v2456_v37, %v15669_v61  ;;  %v2458_v45 = vpop.f32.mrb[49].mxu0  ;;  %v2599_v61 = vld [vmem:[#allocation2 + $0x8] sm:$0x1]  ;;  %v2748_v62 = vld [vmem:[#allocation2] sm:$0x88] }
 0x298   : > { %v2575_v42 = vmax.f32 %v2569_v22, %v2572_v28  ;;  %v2684_v29 = vmax.f32 %v2542_v17, %v2672_v5  ;;  %v2480_v25 = vadd.f32 %v2458_v45, %v15674_v1  ;;  %v2460_v12 = vpop.f32.mrb[50].mxu0  ;;  %v2544_v1 = vmax.f32 %v15776_v48, 0.0  ;;  %v2713_v48 = vld [vmem:[#allocation2 + $0x8] sm:$0x4] }
 0x299   : > { %v15799_v18 = vpack.c.bf16 %v2574_v16, %v2573_v59  ;;  %v2686_v30 = vmax.f32 %v2680_v49, %v2683_v38  ;;  %v2461_v14 = vpop.f32.mrb[51].mxu0  ;;  %v2529_v36 = vadd.f32 %v15713_v60, %v2479_v21  ;;  %v2751_v16 = vld [vmem:[#allocation2 + $0x8] sm:$0x8] }
 0x29a   : > { %v15809_v58 = vpack.c.bf16 %v2575_v42, %v2575_v42  ;;  %v2687_v39 = vmax.f32 %v2681_v47, %v2684_v29  ;;  %v2774_v8 = vrot.slane %v2544_v1, 1 }
 0x29b   : > { %v2597_v59 = vsel %vm16537_vm5, %v15799_v18, %v2596_v51  ;;  %v11998_v20 = vrot.slane %v15799_v18, 9  ;;  %v15827_v33 = vpack.c.bf16 %v2686_v30, %v2685_v27  ;;  %v2530_v27 = vadd.f32 %v15720_v56, %v2480_v25 }
 0x29c   : > { %2598 = vst [vmem:[#allocation2] sm:$0x11] %v2597_v59  ;;  %v2600_v40 = vsel %vm15723_vm12, %v15809_v58, %v2599_v61  ;;  %v11999_v55 = vrot.slane %v15809_v58, 9  ;;  %v15844_v2 = vpack.c.bf16 %v2687_v39, %v2687_v39  ;;  %v2603_v17 = vshll.u32 %v15799_v18, 16 }
 0x29d   : > { %v2639_v60 = vsel %vm16541_vm6, %v11998_v20, %v2638_v15  ;;  %vm16542_vm5 = vcmask 1045509   ;;  %2601 = vst [vmem:[#allocation2 + $0x8] sm:$0x1] %v2600_v40  ;;  %v2699_v41 = vrot.slane %v15827_v33, 6  ;;  %v2775_v56 = vrot.slane %v2545_v10, 1 }
 0x29e   : > { %vm15855_vm11 = vmand %vm16542_vm5, %vm2652_vm1  ;;  %2640 = vst [vmem:[#allocation2] sm:$0x22] %v2639_v60  ;;  %v2642_v34 = vsel %vm15747_vm7, %v11999_v55, %v2641_v23  ;;  %v2608_v28 = vshll.u32 %v15809_v58, 16  ;;  %v2737_v37 = vrot.slane %v15827_v33, 7  ;;  %v2700_v49 = vrot.slane %v15844_v2, 6 }
 0x29f   : > { %vm2747_vm1 = vmor %vm15831_vm3, %vm15813_vm13  ;;  %2643 = vst [vmem:[#allocation2 + $0x8] sm:$0x2] %v2642_v34  ;;  %v2738_v38 = vrot.slane %v15844_v2, 7  ;;  %v2547_v21 = vmax.f32 %v2529_v36, 0.0  ;;  %v2548_v45 = vmax.f32 %v2530_v27, 0.0  ;;  %v11996_v47 = vrot.slane %v2603_v17, 9 }
 0x2a0   : > { %vm16545_vm5 = vmor %vm15803_vm9, %vm15791_vm14  ;;  %vm16546_vm9 = vcmask 1042434   ;;  %v2749_v42 = vsel %vm2747_vm1, %v2737_v37, %v2748_v62  ;;  %vm2758_vm12 = vsmask.f32 7966  ;;  %v2714_v29 = vsel %vm15791_vm14, %v2700_v49, %v2713_v48  ;;  %v2810_v48 = vld [vmem:[#allocation2 + $0x14] sm:$0x1] }
 0x2a1   : > { %v2711_v5 = vsel %vm16545_vm5, %v2699_v41, %v2710_v57  ;;  %vm15885_vm5 = vmand %vm16546_vm9, %vm2726_vm10  ;;  %v2717_v25 = vshll.u32 %v15827_v33, 16  ;;  %vm16549_vm6 = vsmask.f32 7962  ;;  %vm16550_vm7 = vcmask 1046534   ;;  %2750 = vst [vmem:[#allocation2] sm:$0x88] %v2749_v42 }
 0x2a2   : > { %2712 = vst [vmem:[#allocation2] sm:$0x44] %v2711_v5  ;;  %vm15899_vm2 = vmand %vm16550_vm7, %vm16549_vm6  ;;  %v2752_v18 = vsel %vm15813_vm13, %v2738_v38, %v2751_v16  ;;  %v2777_v61 = vrot.slane %v2547_v21, 1  ;;  %v2778_v30 = vrot.slane %v2548_v45, 1  ;;  %v2787_v46 = vmax.f32 %v2545_v10, %v2775_v56  ;;  %v2807_v41 = vld [vmem:[#allocation2 + $0xc] sm:$0x11] }
 0x2a3   : > { %2715 = vst [vmem:[#allocation2 + $0x8] sm:$0x4] %v2714_v29  ;;  %v2786_v14 = vmax.f32 %v2544_v1, %v2774_v8  ;;  %v2619_v15 = vld [vmem:[#allocation2] sm:$0x11]  ;;  %v12000_v7 = vrot.slane %v2603_v17, 10  ;;  %v11997_v58 = vrot.slane %v2608_v28, 9  ;;  %vm16557_vm7 = vmor %vm15766_vm8, %vm15760_vm0  ;;  %vm16562_vm9 = vnez %v16514_v52 }
 0x2a4   : > { %vm16553_vm14 = vsmask.f32 7950  ;;  %vm16554_vm3 = vcmask 1043459   ;;  %2753 = vst [vmem:[#allocation2 + $0x8] sm:$0x8] %v2752_v18  ;;  %v2620_v44 = vsel %vm16557_vm7, %v11996_v47, %v2619_v15  ;;  %vm16558_vm13 = vcmask 1047559   ;;  %vm2730_vm6 = vmor %vm15899_vm2, %vm15885_vm5 }
 0x2a5   : > { %vm15907_vm10 = vmand %vm16554_vm3, %vm16553_vm14  ;;  %v2622_v59 = vld [vmem:[#allocation2 + $0x8] sm:$0x1]  ;;  %v2721_v1 = vshll.u32 %v15844_v2, 16  ;;  %v2789_v20 = vmax.f32 %v2547_v21, %v2777_v61  ;;  %v2790_v23 = vmax.f32 %v2548_v45, %v2778_v30  ;;  %2621 = vst [vmem:[#allocation2] sm:$0x11] %v2620_v44  ;;  %v12001_v36 = vrot.slane %v2608_v28, 10 }
 0x2a6   : > { %vm15918_vm1 = vmand %vm16558_vm13, %vm2758_vm12  ;;  %v2655_v33 = vld [vmem:[#allocation2] sm:$0x22]  ;;  %v2623_v3 = vsel %vm15760_vm0, %v11997_v58, %v2622_v59  ;;  %v2658_v55 = vld [vmem:[#allocation2 + $0x8] sm:$0x2]  ;;  %v2719_v57 = vrot.slane %v2717_v25, 7 }
 0x2a7   : > { %vm16561_vm12 = vmor %vm15855_vm11, %vm15784_vm4  ;;  %2624 = vst [vmem:[#allocation2 + $0x8] sm:$0x1] %v2623_v3  ;;  %v2792_v2 = vmax.f32 %v2786_v14, %v2789_v20  ;;  %v2793_v27 = vmax.f32 %v2787_v46, %v2790_v23  ;;  %v2659_v17 = vsel %vm15784_vm4, %v12001_v36, %v2658_v55  ;;  %v2723_v56 = vrot.slane %v2721_v1, 7  ;;  %v2837_v21 = vld [vmem:[#allocation2 + $0xc] sm:$0x22] }
 0x2a8   : > { %v2656_v40 = vsel %vm16561_vm12, %v12000_v7, %v2655_v33  ;;  %vm2760_vm2 = vmor %vm15918_vm1, %vm15907_vm10  ;;  %2660 = vst [vmem:[#allocation2 + $0x8] sm:$0x2] %v2659_v17  ;;  %v2761_v28 = vld [vmem:[#allocation2] sm:$0x88]  ;;  %v2840_v45 = vld [vmem:[#allocation2 + $0x14] sm:$0x2] }
 0x2a9   : > { %2657 = vst [vmem:[#allocation2] sm:$0x22] %v2656_v40  ;;  %v2731_v60 = vld [vmem:[#allocation2] sm:$0x44]  ;;  %v13170_v8 = vpack.c.bf16 %v2792_v2, %v2791_v19  ;;  %v13171_v34 = vpack.c.bf16 %v2793_v27, %v2793_v27  ;;  %v2762_v37 = vsel %vm2760_vm2, %v2717_v25, %v2761_v28  ;;  %vm16563_vm14 = vmor %vm15728_vm15, %vm16562_vm9  ;;  %vm16565_vm15 = vnez %v16518_v4  ;;  %v13567_v2 = vld [vmem:[#allocation8] ss:$16 sps:$4 sm:$0xff]  }
 0x2aa   : > { %v2732_v62 = vsel %vm2730_vm6, %v2719_v57, %v2731_v60  ;;  %v2734_v5 = vld [vmem:[#allocation2 + $0x8] sm:$0x4]  ;;  %2763 = vst [vmem:[#allocation2] sm:$0x88] %v2762_v37  ;;  %v13564_v57 = vld [vmem:[#allocation8 + $0x500] ss:$16 sps:$4 sm:$0xff]  }
 0x2ab   : > { %2733 = vst [vmem:[#allocation2] sm:$0x44] %v2732_v62  ;;  %v2735_v49 = vsel %vm15885_vm5, %v2723_v56, %v2734_v5  ;;  %v2764_v16 = vld [vmem:[#allocation2 + $0x8] sm:$0x8]  ;;  %v2808_v38 = vsel %vm16563_vm14, %v13170_v8, %v2807_v41  ;;  %v12008_v9 = vrot.slane %v13170_v8, 9  ;;  %v2811_v19 = vsel %vm16562_vm9, %v13171_v34, %v2810_v48 }
 0x2ac   : > { %2736 = vst [vmem:[#allocation2 + $0x8] sm:$0x4] %v2735_v49  ;;  %v2765_v24 = vsel %vm15907_vm10, %v2721_v1, %v2764_v16  ;;  %2809 = vst [vmem:[#allocation2 + $0xc] sm:$0x11] %v2808_v38  ;;  %v12009_v47 = vrot.slane %v13171_v34, 9  ;;  %v2814_v54 = vshll.u32 %v13170_v8, 16  ;;  %vm16564_vm5 = vnez %v16520_v13 }
 0x2ad   : > { %2766 = vst [vmem:[#allocation2 + $0x8] sm:$0x8] %v2765_v24  ;;  %2812 = vst [vmem:[#allocation2 + $0x14] sm:$0x1] %v2811_v19  ;;  %v2819_v42 = vshll.u32 %v13171_v34, 16 }
 0x2ae   : > { %vm16566_vm3 = vmor %vm16564_vm5, %vm16565_vm15  ;;  %v2841_v29 = vsel %vm16565_vm15, %v12009_v47, %v2840_v45  ;;  %v12006_v25 = vrot.slane %v2814_v54, 9  ;;  %v12010_v61 = vrot.slane %v2814_v54, 10  ;;  %v13575_v60 = vld [vmem:[#allocation8 + $0x524] ss:$16 sps:$4 sm:$0xff]   ;;  %v13573_v56 = vld [vmem:[#allocation8 + $0x520] ss:$16 sps:$4 sm:$0xff]  }
 0x2af   : > { %v2838_v51 = vsel %vm16566_vm3, %v12008_v9, %v2837_v21  ;;  %2842 = vst [vmem:[#allocation2 + $0x14] sm:$0x2] %v2841_v29  ;;  %v12007_v12 = vrot.slane %v2819_v42, 9  ;;  %vm16567_vm10 = vmmov %vm16557_vm7  ;;  %v12011_v4 = vrot.slane %v2819_v42, 10  ;;  %v13578_v41 = vld [vmem:[#allocation8 + $0x24] ss:$16 sps:$4 sm:$0xff]  }
 0x2b0   : > { %2839 = vst [vmem:[#allocation2 + $0xc] sm:$0x22] %v2838_v51  ;;  %vm16568_vm7 = vmmov %vm16561_vm12  ;;  %v13576_v8 = vld [vmem:[#allocation8 + $0x20] ss:$16 sps:$4 sm:$0xff]   ;;  %v13581_v34 = vld [vmem:[#allocation8 + $0x544] ss:$16 sps:$4 sm:$0xff]  }
 0x2b1   : > { %v13584_v48 = vld [vmem:[#allocation8 + $0x44] ss:$16 sps:$4 sm:$0xff]   ;;  %v13579_v28 = vld [vmem:[#allocation8 + $0x540] ss:$16 sps:$4 sm:$0xff]  }
 0x2b2   : > { %v15975_v7 = vld [vmem:[#allocation2] sm:$0xff] }
 0x2b3   : > { %v2825_v52 = vld [vmem:[#allocation2 + $0xc] sm:$0x11]  ;;  %v16000_v62 = vcombine.high %v15975_v7, %v15975_v7  ;;  %v13587_v37 = vld [vmem:[#allocation8 + $0x564] ss:$16 sps:$4 sm:$0xff]  }
 0x2b4   : > { %v2826_v18 = vsel %vm16567_vm10, %v12006_v25, %v2825_v52  ;;  %v2828_v13 = vld [vmem:[#allocation2 + $0x14] sm:$0x1]  ;;  %v15983_v39 = vld [vmem:[#allocation2 + $0x8] sm:$0xf]  ;;  %v13582_v5 = vld [vmem:[#allocation8 + $0x40] ss:$16 sps:$4 sm:$0xff]  }
 0x2b5   : > { %2827 = vst [vmem:[#allocation2 + $0xc] sm:$0x11] %v2826_v18  ;;  %v2829_v30 = vsel %vm15760_vm0, %v12007_v12, %v2828_v13  ;;  %v13590_v49 = vld [vmem:[#allocation8 + $0x64] ss:$16 sps:$4 sm:$0xff]   ;;  %v13585_v16 = vld [vmem:[#allocation8 + $0x560] ss:$16 sps:$4 sm:$0xff]  }
 0x2b6   : > { %2830 = vst [vmem:[#allocation2 + $0x14] sm:$0x1] %v2829_v30  ;;  %v2852_v11 = vld [vmem:[#allocation2 + $0x14] sm:$0x2]  ;;  %v13588_v38 = vld [vmem:[#allocation8 + $0x60] ss:$16 sps:$4 sm:$0xff]  }
 0x2b7   : > { %v2849_v46 = vld [vmem:[#allocation2 + $0xc] sm:$0x22]  ;;  %v2853_v15 = vsel %vm15784_vm4, %v12011_v4, %v2852_v11  ;;  %v13593_v21 = vld [vmem:[#allocation8 + $0x584] ss:$16 sps:$4 sm:$0xff]   ;;  %v13615_v4 = vld [vmem:[#allocation8 + $0x308] ss:$16 sps:$4 sm:$0xff]  }
 0x2b8   : > { %v2850_v14 = vsel %vm16568_vm7, %v12010_v61, %v2849_v46  ;;  %2854 = vst [vmem:[#allocation2 + $0x14] sm:$0x2] %v2853_v15  ;;  %v13596_v24 = vld [vmem:[#allocation8 + $0x84] ss:$16 sps:$4 sm:$0xff]   ;;  %v13591_v9 = vld [vmem:[#allocation8 + $0x580] ss:$16 sps:$4 sm:$0xff]  }
 0x2b9   : > { %2851 = vst [vmem:[#allocation2 + $0xc] sm:$0x22] %v2850_v14  ;;  %v13594_v19 = vld [vmem:[#allocation8 + $0x80] ss:$16 sps:$4 sm:$0xff]   ;;  %v13599_v45 = vld [vmem:[#allocation8 + $0x5a4] ss:$16 sps:$4 sm:$0xff]  }
 0x2ba   : > { %v13602_v47 = vld [vmem:[#allocation8 + $0xa4] ss:$16 sps:$4 sm:$0xff]   ;;  %v13597_v54 = vld [vmem:[#allocation8 + $0x5a0] ss:$16 sps:$4 sm:$0xff]   ;;  %v13617_v30 = vld [vmem:[#allocation8 + $0x30c] ss:$16 sps:$4 sm:$0xff]  }
 0x2bb   : > { %v13600_v51 = vld [vmem:[#allocation8 + $0xa0] ss:$16 sps:$4 sm:$0xff]   ;;  %v13605_v42 = vld [vmem:[#allocation8 + $0x5c4] ss:$16 sps:$4 sm:$0xff]   ;;  %v13623_v11 = vld [vmem:[#allocation8 + $0x32c] ss:$16 sps:$4 sm:$0xff]  }
 0x2bc   : > { %v15977_v58 = vld [vmem:[#allocation2 + $0xc] sm:$0x11]  ;;  %v13608_v29 = vld [vmem:[#allocation8 + $0xc4] ss:$16 sps:$4 sm:$0xff]   ;;  %vm11681_vm0 = vcmask 73728  }
 0x2bd   : > { %v12013_v50 = vcombine.high %v15975_v7, %v15977_v58  ;;  %v12012_v22 = vcombine.low %v15975_v7, %v15977_v58  ;;  %v15985_v44 = vld [vmem:[#allocation2 + $0x14] sm:$0x1]  ;;  %v13603_v25 = vld [vmem:[#allocation8 + $0x5c0] ss:$16 sps:$4 sm:$0xff]  }
 0x2be   : > { %v12014_v59 = vcombine.low %v15983_v39, %v15985_v44  ;;  %v13606_v52 = vld [vmem:[#allocation8 + $0xc0] ss:$16 sps:$4 sm:$0xff]   ;;  %v13611_v12 = vld [vmem:[#allocation8 + $0x5e4] ss:$16 sps:$4 sm:$0xff]  }
 0x2bf   : > { %v3075_v43 = vshll.u32 %v12013_v50, 16  ;;  %v3068_v10 = vshll.u32 %v12012_v22, 16  ;;  %v3073_v20 = vshrl.u32 %v12013_v50, 16  ;;  %v3066_v33 = vshrl.u32 %v12012_v22, 16  ;;  %v13614_v18 = vld [vmem:[#allocation8 + $0xe4] ss:$16 sps:$4 sm:$0xff]  }
 0x2c0   : > { %v3082_v1 = vshll.u32 %v12014_v59, 16  ;;  %v3080_v36 = vshrl.u32 %v12014_v59, 16  ;;  %v13609_v13 = vld [vmem:[#allocation8 + $0x5e0] ss:$16 sps:$4 sm:$0xff]   ;;  %v13620_v46 = vld [vmem:[#allocation8 + $0x104] ss:$16 sps:$4 sm:$0xff]  }
 0x2c1   : > { %v3077_v23 = vrot.slane %v3075_v43, 1  ;;  %v3070_v3 = vrot.slane %v3068_v10, 1  ;;  %v13612_v61 = vld [vmem:[#allocation8 + $0xe0] ss:$16 sps:$4 sm:$0xff]   ;;  %v13626_v15 = vld [vmem:[#allocation8 + $0x124] ss:$16 sps:$4 sm:$0xff]  }
 0x2c2   : > { %v3084_v40 = vrot.slane %v3082_v1, 1  ;;  %v13618_v14 = vld [vmem:[#allocation8 + $0x100] ss:$16 sps:$4 sm:$0xff]   ;;  %v13621_v50 = vld [vmem:[#allocation8 + $0x328] ss:$16 sps:$4 sm:$0xff]  }
 0x2c3   : > { %v15989_v55 = vor.u32 %v3077_v23, %v3073_v20  ;;  %v15991_v27 = vor.u32 %v3070_v3, %v3066_v33  ;;  %v13624_v22 = vld [vmem:[#allocation8 + $0x120] ss:$16 sps:$4 sm:$0xff]   ;;  %v13629_v59 = vld [vmem:[#allocation8 + $0x34c] ss:$16 sps:$4 sm:$0xff]   ;;  %v13632_v43 = vld [vmem:[#allocation8 + $0x144] ss:$16 sps:$4 sm:$0xff]  }
 0x2c4   : > { %v15993_v17 = vor.u32 %v3084_v40, %v3080_v36  ;;  %v13627_v10 = vld [vmem:[#allocation8 + $0x348] ss:$16 sps:$4 sm:$0xff]   ;;  %v13630_v1 = vld [vmem:[#allocation8 + $0x140] ss:$16 sps:$4 sm:$0xff]   ;;  %v13635_v20 = vld [vmem:[#allocation8 + $0x36c] ss:$16 sps:$4 sm:$0xff]  }
 0x2c5   : > { %3601 = vmatprep.mubr.bf16.mxu0 %v15989_v55  ;;  %v13638_v23 = vld [vmem:[#allocation8 + $0x164] ss:$16 sps:$4 sm:$0xff]   ;;  %v13633_v33 = vld [vmem:[#allocation8 + $0x368] ss:$16 sps:$4 sm:$0xff]   ;;  %v13636_v3 = vld [vmem:[#allocation8 + $0x160] ss:$16 sps:$4 sm:$0xff]  }
 0x2c6   : > { %3602 = vmatmul.mubr.bf16.vlgmr.msra.gmra.mrb[52].mxu0 %v15991_v27  ;;  %3725 = vmatmul.mubr.bf16.vlgmr.msra.gmra.mrb[24].mxu1 %v15993_v17  ;;  %v13641_v36 = vld [vmem:[#allocation8 + $0x38c] ss:$16 sps:$4 sm:$0xff]   ;;  %v13644_v40 = vld [vmem:[#allocation8 + $0x184] ss:$16 sps:$4 sm:$0xff]  }
 0x2c7   : > { %3611 = vmatpush1.bf16.msra.mxu0 %v13564_v57  ;;  %4220 = vmatpush1.bf16.msra.mxu1 %v13567_v2  ;;  %v13642_v57 = vld [vmem:[#allocation8 + $0x180] ss:$16 sps:$4 sm:$0xff]   ;;  %v13647_v2 = vld [vmem:[#allocation8 + $0x3ac] ss:$16 sps:$4 sm:$0xff]  }
 0x2c8   : > { %4251 = vmatprep.mubr.bf16.mxu1 %v16000_v62  ;;  %3612 = vmatprep.subr.bf16.mxu0 %v13575_v60  ;;  %v13645_v60 = vld [vmem:[#allocation8 + $0x3a8] ss:$16 sps:$4 sm:$0xff]  }
 0x2c9   : > { %4221 = vmatprep.subr.bf16.mxu1 %v13578_v41  ;;  %3642 = vmatprep.mubr.bf16.mxu0 %v14787_v0  ;;  %v13648_v41 = vld [vmem:[#allocation8 + $0x1a0] ss:$16 sps:$4 sm:$0xff]  }
 0x2cb   : > { %3613 = vmatpush1.bf16.msra.mxu0 %v13573_v56  ;;  %4222 = vmatpush1.bf16.msra.mxu1 %v13576_v8  ;;  %v13653_v56 = vld [vmem:[#allocation8 + $0x3cc] ss:$16 sps:$4 sm:$0xff]   ;;  %v13656_v8 = vld [vmem:[#allocation8 + $0x1c4] ss:$16 sps:$4 sm:$0xff]  }
 0x2cc   : > { %3614 = vmatprep.subr.bf16.mxu0 %v13581_v34  ;;  %4223 = vmatprep.subr.bf16.mxu1 %v13584_v48  ;;  %v13651_v34 = vld [vmem:[#allocation8 + $0x3c8] ss:$16 sps:$4 sm:$0xff]   ;;  %v13654_v48 = vld [vmem:[#allocation8 + $0x1c0] ss:$16 sps:$4 sm:$0xff]  }
 0x2cf   : > { %3615 = vmatpush1.bf16.msra.mxu0 %v13579_v28  ;;  %4224 = vmatpush1.bf16.msra.mxu1 %v13582_v5  ;;  %v13659_v28 = vld [vmem:[#allocation8 + $0x3ec] ss:$16 sps:$4 sm:$0xff]   ;;  %v13662_v5 = vld [vmem:[#allocation8 + $0x1e4] ss:$16 sps:$4 sm:$0xff]  }
 0x2d0   : > { %3616 = vmatprep.subr.bf16.mxu0 %v13587_v37  ;;  %4225 = vmatprep.subr.bf16.mxu1 %v13590_v49  ;;  %v13657_v37 = vld [vmem:[#allocation8 + $0x3e8] ss:$16 sps:$4 sm:$0xff]   ;;  %v13660_v49 = vld [vmem:[#allocation8 + $0x1e0] ss:$16 sps:$4 sm:$0xff]  }
 0x2d3   : > { %3617 = vmatpush1.bf16.msra.mxu0 %v13585_v16  ;;  %4226 = vmatpush1.bf16.msra.mxu1 %v13588_v38  ;;  %v13665_v16 = vld [vmem:[#allocation8 + $0x40c] ss:$16 sps:$4 sm:$0xff]  }
 0x2d4   : > { %3618 = vmatprep.subr.bf16.mxu0 %v13593_v21  ;;  %4227 = vmatprep.subr.bf16.mxu1 %v13596_v24  ;;  %v13669_v38 = vld [vmem:[#allocation8 + $0x20c] ss:$16 sps:$4 sm:$0xff]   ;;  %v13663_v21 = vld [vmem:[#allocation8 + $0x408] ss:$16 sps:$4 sm:$0xff]  }
 0x2d5   : > { %v13667_v24 = vld [vmem:[#allocation8 + $0x208] ss:$16 sps:$4 sm:$0xff]  }
 0x2d7   : > { %3619 = vmatpush1.bf16.msra.mxu0 %v13591_v9  ;;  %4228 = vmatpush1.bf16.msra.mxu1 %v13594_v19  ;;  %v13672_v9 = vld [vmem:[#allocation8 + $0x42c] ss:$16 sps:$4 sm:$0xff]   ;;  %v16008_v19 = vcombine.low %v15975_v7, %v15975_v7  ;;  %v13679_v7 = vld [vmem:[#allocation8 + $0x248] ss:$16 sps:$4 sm:$0xff]  }
 0x2d8   : > { %3620 = vmatprep.subr.bf16.mxu0 %v13599_v45  ;;  %4229 = vmatprep.subr.bf16.mxu1 %v13602_v47  ;;  %v13675_v45 = vld [vmem:[#allocation8 + $0x22c] ss:$16 sps:$4 sm:$0xff]   ;;  %v13670_v47 = vld [vmem:[#allocation8 + $0x428] ss:$16 sps:$4 sm:$0xff]  }
 0x2db   : > { %3621 = vmatpush1.bf16.msra.mxu0 %v13597_v54  ;;  %4230 = vmatpush1.bf16.msra.mxu1 %v13600_v51  ;;  %v13673_v54 = vld [vmem:[#allocation8 + $0x228] ss:$16 sps:$4 sm:$0xff]   ;;  %v13678_v51 = vld [vmem:[#allocation8 + $0x44c] ss:$16 sps:$4 sm:$0xff]  }
 0x2dc   : > { %3622 = vmatprep.subr.bf16.mxu0 %v13605_v42  ;;  %4231 = vmatprep.subr.bf16.mxu1 %v13608_v29  ;;  %v13681_v42 = vld [vmem:[#allocation8 + $0x24c] ss:$16 sps:$4 sm:$0xff]   ;;  %v13676_v29 = vld [vmem:[#allocation8 + $0x448] ss:$16 sps:$4 sm:$0xff]  }
 0x2df   : > { %3623 = vmatpush1.bf16.msra.mxu0 %v13603_v25  ;;  %4232 = vmatpush1.bf16.msra.mxu1 %v13606_v52  ;;  %v13684_v25 = vld [vmem:[#allocation8 + $0x46c] ss:$16 sps:$4 sm:$0xff]  }
 0x2e0   : > { %3624 = vmatprep.subr.bf16.mxu0 %v13611_v12  ;;  %4233 = vmatprep.subr.bf16.mxu1 %v13614_v18  ;;  %v13687_v52 = vld [vmem:[#allocation8 + $0x26c] ss:$16 sps:$4 sm:$0xff]   ;;  %v13682_v12 = vld [vmem:[#allocation8 + $0x468] ss:$16 sps:$4 sm:$0xff]  }
 0x2e1   : > { %v13685_v18 = vld [vmem:[#allocation8 + $0x268] ss:$16 sps:$4 sm:$0xff]  }
 0x2e3   : > { %3625 = vmatpush1.bf16.msra.mxu0 %v13609_v13  ;;  %4234 = vmatpush1.bf16.msra.mxu1 %v13612_v61  ;;  %v13690_v13 = vld [vmem:[#allocation8 + $0x48c] ss:$16 sps:$4 sm:$0xff]  }
 0x2e4   : > { %3651 = vmatprep.subr.bf16.mxu0 %v13617_v30  ;;  %4235 = vmatprep.subr.bf16.mxu1 %v13620_v46  ;;  %v13693_v61 = vld [vmem:[#allocation8 + $0x28c] ss:$16 sps:$4 sm:$0xff]   ;;  %v13688_v30 = vld [vmem:[#allocation8 + $0x488] ss:$16 sps:$4 sm:$0xff]  }
 0x2e5   : > { %v13691_v46 = vld [vmem:[#allocation8 + $0x288] ss:$16 sps:$4 sm:$0xff]  }
 0x2e6   : > { %3643 = vmatmul.mubr.bf16.vlgmr.msra.gmra.mrb[56].mxu0 %v15993_v17  ;;  %v13650_v17 = vld [vmem:[#allocation8 + $0x1a4] ss:$16 sps:$4 sm:$0xff]  }
 0x2e7   : > { %3652 = vmatpush1.bf16.msra.mxu0 %v13615_v4  ;;  %3683 = vmatprep.mubr.bf16.mxu0 %v15989_v55  ;;  %v13639_v55 = vld [vmem:[#allocation8 + $0x388] ss:$16 sps:$4 sm:$0xff]   ;;  %v13696_v4 = vld [vmem:[#allocation8 + $0x4ac] ss:$16 sps:$4 sm:$0xff]  }
 0x2e8   : > { %4236 = vmatpush1.bf16.msra.mxu1 %v13618_v14  ;;  %3653 = vmatprep.subr.bf16.mxu0 %v13623_v11  ;;  %v13699_v14 = vld [vmem:[#allocation8 + $0x2ac] ss:$16 sps:$4 sm:$0xff]   ;;  %v13694_v11 = vld [vmem:[#allocation8 + $0x4a8] ss:$16 sps:$4 sm:$0xff]  }
 0x2e9   : > { %4237 = vmatprep.subr.bf16.mxu1 %v13626_v15  ;;  %v13697_v15 = vld [vmem:[#allocation8 + $0x2a8] ss:$16 sps:$4 sm:$0xff]  }
 0x2eb   : > { %3654 = vmatpush1.bf16.msra.mxu0 %v13621_v50  ;;  %v13702_v50 = vld [vmem:[#allocation8 + $0x4cc] ss:$16 sps:$4 sm:$0xff]  }
 0x2ec   : > { %4238 = vmatpush1.bf16.msra.mxu1 %v13624_v22  ;;  %3655 = vmatprep.subr.bf16.mxu0 %v13629_v59  ;;  %v13705_v22 = vld [vmem:[#allocation8 + $0x2cc] ss:$16 sps:$4 sm:$0xff]   ;;  %v13700_v59 = vld [vmem:[#allocation8 + $0x4c8] ss:$16 sps:$4 sm:$0xff]  }
 0x2ed   : > { %4239 = vmatprep.subr.bf16.mxu1 %v13632_v43  ;;  %v13703_v43 = vld [vmem:[#allocation8 + $0x2c8] ss:$16 sps:$4 sm:$0xff]  }
 0x2ef   : > { %3656 = vmatpush1.bf16.msra.mxu0 %v13627_v10  ;;  %v13708_v10 = vld [vmem:[#allocation8 + $0x4ec] ss:$16 sps:$4 sm:$0xff]  }
 0x2f0   : > { %4240 = vmatpush1.bf16.msra.mxu1 %v13630_v1  ;;  %3657 = vmatprep.subr.bf16.mxu0 %v13635_v20  ;;  %v13711_v1 = vld [vmem:[#allocation8 + $0x2ec] ss:$16 sps:$4 sm:$0xff]   ;;  %v13706_v20 = vld [vmem:[#allocation8 + $0x4e8] ss:$16 sps:$4 sm:$0xff]  }
 0x2f1   : > { %4241 = vmatprep.subr.bf16.mxu1 %v13638_v23  ;;  %v13709_v23 = vld [vmem:[#allocation8 + $0x2e8] ss:$16 sps:$4 sm:$0xff]  }
 0x2f3   : > { %3658 = vmatpush1.bf16.msra.mxu0 %v13633_v33  ;;  %v13714_v33 = vld [vmem:[#allocation8 + $0x204] ss:$16 sps:$4 sm:$0xff]  }
 0x2f4   : > { %4242 = vmatpush1.bf16.msra.mxu1 %v13636_v3  ;;  %3659 = vmatprep.subr.bf16.mxu0 %v13641_v36  ;;  %v13718_v3 = vld [vmem:[#allocation8 + $0x604] ss:$16 sps:$4 sm:$0xff]  }
 0x2f5   : > { %4243 = vmatprep.subr.bf16.mxu1 %v13644_v40  ;;  %v16012_v36 = vld [vmem:[#allocation2] sm:$0xee] }
 0x2f6   : > { %v12211_v40 = vcombine.high %v16012_v36, %v15977_v58 }
 0x2f7   : > { %3660 = vmatpush1.bf16.msra.mxu0 %v13639_v55  ;;  %v13712_v55 = vld [vmem:[#allocation8 + $0x200] ss:$16 sps:$4 sm:$0xff]  }
 0x2f8   : > { %4244 = vmatpush1.bf16.msra.mxu1 %v13642_v57  ;;  %3661 = vmatprep.subr.bf16.mxu0 %v13647_v2  ;;  %v13716_v57 = vld [vmem:[#allocation8 + $0x600] ss:$16 sps:$4 sm:$0xff]   ;;  %v16018_v2 = vcombine.low %v15983_v39, %v15983_v39  ;;  %v13731_v39 = vld [vmem:[#allocation8 + $0x644] ss:$16 sps:$4 sm:$0xff]  }
 0x2f9   : > { %4245 = vmatprep.subr.bf16.mxu1 %v13650_v17  ;;  %v13722_v17 = vld [vmem:[#allocation8 + $0x224] ss:$16 sps:$4 sm:$0xff]  }
 0x2fb   : > { %3662 = vmatpush1.bf16.msra.mxu0 %v13645_v60  ;;  %v13725_v60 = vld [vmem:[#allocation8 + $0x624] ss:$16 sps:$4 sm:$0xff]  }
 0x2fc   : > { %4246 = vmatpush1.bf16.msra.mxu1 %v13648_v41  ;;  %3663 = vmatprep.subr.bf16.mxu0 %v13653_v56  ;;  %v16021_v41 = vrot.slane %v12211_v40, 1  ;;  %v13720_v56 = vld [vmem:[#allocation8 + $0x220] ss:$16 sps:$4 sm:$0xff]  }
 0x2fd   : > { %4247 = vmatprep.subr.bf16.mxu1 %v13656_v8  ;;  %v13723_v8 = vld [vmem:[#allocation8 + $0x620] ss:$16 sps:$4 sm:$0xff]  }
 0x2fe   : > { %v13789_v40 = vld [vmem:[#allocation8 + $0x780] ss:$16 sps:$4 sm:$0xff]  }
 0x2ff   : > { %3664 = vmatpush1.bf16.msra.mxu0 %v13651_v34  ;;  %v13728_v34 = vld [vmem:[#allocation8 + $0x244] ss:$16 sps:$4 sm:$0xff]  }
 0x300   : > { %4248 = vmatpush1.bf16.msra.mxu1 %v13654_v48  ;;  %3665 = vmatprep.subr.bf16.mxu0 %v13659_v28  ;;  %v13726_v48 = vld [vmem:[#allocation8 + $0x240] ss:$16 sps:$4 sm:$0xff]   ;;  %v13734_v28 = vld [vmem:[#allocation8 + $0x264] ss:$16 sps:$4 sm:$0xff]  }
 0x301   : > { %4249 = vmatprep.subr.bf16.mxu1 %v13662_v5  ;;  %v13737_v5 = vld [vmem:[#allocation8 + $0x664] ss:$16 sps:$4 sm:$0xff]  }
 0x303   : > { %3666 = vmatpush1.bf16.msra.mxu0 %v13657_v37  ;;  %v13732_v37 = vld [vmem:[#allocation8 + $0x260] ss:$16 sps:$4 sm:$0xff]  }
 0x304   : > { %4250 = vmatpush1.bf16.msra.mxu1 %v13660_v49  ;;  %3667 = vmatprep.subr.bf16.mxu0 %v13665_v16  ;;  %v13735_v49 = vld [vmem:[#allocation8 + $0x660] ss:$16 sps:$4 sm:$0xff]   ;;  %v13740_v16 = vld [vmem:[#allocation8 + $0x284] ss:$16 sps:$4 sm:$0xff]  }
 0x305   : > { %4342 = vmatprep.subr.bf16.mxu1 %v13669_v38  ;;  %v13743_v38 = vld [vmem:[#allocation8 + $0x684] ss:$16 sps:$4 sm:$0xff]  }
 0x307   : > { %4252 = vmatmul.mubr.bf16.vlgmr.msra.gmra.mrb[28].mxu1 %v16008_v19  ;;  %3668 = vmatpush1.bf16.msra.mxu0 %v13663_v21  ;;  %v13738_v21 = vld [vmem:[#allocation8 + $0x280] ss:$16 sps:$4 sm:$0xff]  }
 0x308   : > { %4343 = vmatpush1.bf16.msra.mxu1 %v13667_v24  ;;  %3669 = vmatprep.subr.bf16.mxu0 %v13672_v9  ;;  %v13741_v24 = vld [vmem:[#allocation8 + $0x680] ss:$16 sps:$4 sm:$0xff]   ;;  %v13746_v9 = vld [vmem:[#allocation8 + $0x2a4] ss:$16 sps:$4 sm:$0xff]  }
 0x309   : > { %4344 = vmatprep.subr.bf16.mxu1 %v13675_v45  ;;  %4374 = vmatprep.mubr.bf16.mxu1 %v14787_v0  ;;  %v13749_v45 = vld [vmem:[#allocation8 + $0x6a4] ss:$16 sps:$4 sm:$0xff]  }
 0x30b   : > { %3670 = vmatpush1.bf16.msra.mxu0 %v13670_v47  ;;  %v13744_v47 = vld [vmem:[#allocation8 + $0x2a0] ss:$16 sps:$4 sm:$0xff]  }
 0x30c   : > { %4345 = vmatpush1.bf16.msra.mxu1 %v13673_v54  ;;  %3671 = vmatprep.subr.bf16.mxu0 %v13678_v51  ;;  %v13747_v54 = vld [vmem:[#allocation8 + $0x6a0] ss:$16 sps:$4 sm:$0xff]   ;;  %v13752_v51 = vld [vmem:[#allocation8 + $0x2c4] ss:$16 sps:$4 sm:$0xff]  }
 0x30d   : > { %4346 = vmatprep.subr.bf16.mxu1 %v13681_v42  ;;  %v13755_v42 = vld [vmem:[#allocation8 + $0x6c4] ss:$16 sps:$4 sm:$0xff]  }
 0x30f   : > { %3672 = vmatpush1.bf16.msra.mxu0 %v13676_v29  ;;  %v13750_v29 = vld [vmem:[#allocation8 + $0x2c0] ss:$16 sps:$4 sm:$0xff]  }
 0x310   : > { %4347 = vmatpush1.bf16.msra.mxu1 %v13679_v7  ;;  %3673 = vmatprep.subr.bf16.mxu0 %v13684_v25  ;;  %v13753_v7 = vld [vmem:[#allocation8 + $0x6c0] ss:$16 sps:$4 sm:$0xff]   ;;  %v13758_v25 = vld [vmem:[#allocation8 + $0x2e4] ss:$16 sps:$4 sm:$0xff]  }
 0x311   : > { %4348 = vmatprep.subr.bf16.mxu1 %v13687_v52  ;;  %v13761_v52 = vld [vmem:[#allocation8 + $0x6e4] ss:$16 sps:$4 sm:$0xff]  }
 0x313   : > { %3674 = vmatpush1.bf16.msra.mxu0 %v13682_v12  ;;  %v13756_v12 = vld [vmem:[#allocation8 + $0x2e0] ss:$16 sps:$4 sm:$0xff]  }
 0x314   : > { %4349 = vmatpush1.bf16.msra.mxu1 %v13685_v18  ;;  %3675 = vmatprep.subr.bf16.mxu0 %v13690_v13  ;;  %v13759_v18 = vld [vmem:[#allocation8 + $0x6e0] ss:$16 sps:$4 sm:$0xff]   ;;  %v13764_v13 = vld [vmem:[#allocation8 + $0xc] ss:$16 sps:$4 sm:$0xff]  }
 0x315   : > { %4350 = vmatprep.subr.bf16.mxu1 %v13693_v61  ;;  %v13767_v61 = vld [vmem:[#allocation8 + $0x704] ss:$16 sps:$4 sm:$0xff]  }
 0x317   : > { %3676 = vmatpush1.bf16.msra.mxu0 %v13688_v30  ;;  %v13762_v30 = vld [vmem:[#allocation8 + $0x8] ss:$16 sps:$4 sm:$0xff]  }
 0x318   : > { %4351 = vmatpush1.bf16.msra.mxu1 %v13691_v46  ;;  %3677 = vmatprep.subr.bf16.mxu0 %v13696_v4  ;;  %v13765_v46 = vld [vmem:[#allocation8 + $0x700] ss:$16 sps:$4 sm:$0xff]   ;;  %v13770_v4 = vld [vmem:[#allocation8 + $0x2c] ss:$16 sps:$4 sm:$0xff]  }
 0x319   : > { %4352 = vmatprep.subr.bf16.mxu1 %v13699_v14  ;;  %v13773_v14 = vld [vmem:[#allocation8 + $0x724] ss:$16 sps:$4 sm:$0xff]  }
 0x31b   : > { %3678 = vmatpush1.bf16.msra.mxu0 %v13694_v11  ;;  %v13768_v11 = vld [vmem:[#allocation8 + $0x28] ss:$16 sps:$4 sm:$0xff]  }
 0x31c   : > { %4353 = vmatpush1.bf16.msra.mxu1 %v13697_v15  ;;  %3679 = vmatprep.subr.bf16.mxu0 %v13702_v50  ;;  %v13771_v15 = vld [vmem:[#allocation8 + $0x720] ss:$16 sps:$4 sm:$0xff]   ;;  %v13776_v50 = vld [vmem:[#allocation8 + $0x4c] ss:$16 sps:$4 sm:$0xff]  }
 0x31d   : > { %4354 = vmatprep.subr.bf16.mxu1 %v13705_v22  ;;  %v13779_v22 = vld [vmem:[#allocation8 + $0x744] ss:$16 sps:$4 sm:$0xff]  }
 0x31f   : > { %3680 = vmatpush1.bf16.msra.mxu0 %v13700_v59  ;;  %v13774_v59 = vld [vmem:[#allocation8 + $0x48] ss:$16 sps:$4 sm:$0xff]  }
 0x320   : > { %4355 = vmatpush1.bf16.msra.mxu1 %v13703_v43  ;;  %3681 = vmatprep.subr.bf16.mxu0 %v13708_v10  ;;  %v13777_v43 = vld [vmem:[#allocation8 + $0x740] ss:$16 sps:$4 sm:$0xff]   ;;  %v13782_v10 = vld [vmem:[#allocation8 + $0x6c] ss:$16 sps:$4 sm:$0xff]  }
 0x321   : > { %4356 = vmatprep.subr.bf16.mxu1 %v13711_v1  ;;  %v13785_v1 = vld [vmem:[#allocation8 + $0x764] ss:$16 sps:$4 sm:$0xff]  }
 0x323   : > { %3682 = vmatpush1.bf16.msra.mxu0 %v13706_v20  ;;  %v13780_v20 = vld [vmem:[#allocation8 + $0x68] ss:$16 sps:$4 sm:$0xff]  }
 0x324   : > { %4357 = vmatpush1.bf16.msra.mxu1 %v13709_v23  ;;  %4260 = vmatprep.subr.bf16.mxu0 %v13714_v33  ;;  %v13788_v23 = vld [vmem:[#allocation8 + $0x8c] ss:$16 sps:$4 sm:$0xff]   ;;  %v13791_v33 = vld [vmem:[#allocation8 + $0x784] ss:$16 sps:$4 sm:$0xff]  }
 0x325   : > { %4976 = vmatprep.subr.bf16.mxu1 %v13718_v3  ;;  %v13786_v3 = vld [vmem:[#allocation8 + $0x88] ss:$16 sps:$4 sm:$0xff]  }
 0x326   : > { %3684 = vmatmul.mubr.bf16.vlgmr.msra.gmra.mrb[60].mxu0 %v15991_v27  ;;  %v13729_v27 = vld [vmem:[#allocation8 + $0x640] ss:$16 sps:$4 sm:$0xff]  }
 0x327   : > { %4375 = vmatmul.mubr.bf16.vlgmr.msra.gmra.mrb[32].mxu1 %v16018_v2  ;;  %4261 = vmatpush1.bf16.msra.mxu0 %v13712_v55  ;;  %v13794_v55 = vld [vmem:[#allocation8 + $0xac] ss:$16 sps:$4 sm:$0xff]  }
 0x328   : > { %4977 = vmatpush1.bf16.msra.mxu1 %v13716_v57  ;;  %5008 = vmatprep.mubr.bf16.mxu1 %v16021_v41  ;;  %v13797_v57 = vld [vmem:[#allocation8 + $0x7a4] ss:$16 sps:$4 sm:$0xff]  }
 0x329   : > { %4262 = vmatprep.subr.bf16.mxu0 %v13722_v17  ;;  %4978 = vmatprep.subr.bf16.mxu1 %v13725_v60  ;;  %v13795_v17 = vld [vmem:[#allocation8 + $0x7a0] ss:$16 sps:$4 sm:$0xff]   ;;  %v13800_v60 = vld [vmem:[#allocation8 + $0xcc] ss:$16 sps:$4 sm:$0xff]  }
 0x32a   : > { %4292 = vmatprep.mubr.bf16.mxu0 %v14787_v0 }
 0x32b   : > { %4263 = vmatpush1.bf16.msra.mxu0 %v13720_v56  ;;  %v13803_v56 = vld [vmem:[#allocation8 + $0x7c4] ss:$16 sps:$4 sm:$0xff]  }
 0x32c   : > { %4979 = vmatpush1.bf16.msra.mxu1 %v13723_v8  ;;  %4264 = vmatprep.subr.bf16.mxu0 %v13728_v34  ;;  %v13798_v8 = vld [vmem:[#allocation8 + $0xc8] ss:$16 sps:$4 sm:$0xff]   ;;  %v13801_v34 = vld [vmem:[#allocation8 + $0x7c0] ss:$16 sps:$4 sm:$0xff]  }
 0x32d   : > { %4980 = vmatprep.subr.bf16.mxu1 %v13731_v39  ;;  %v13806_v39 = vld [vmem:[#allocation8 + $0xec] ss:$16 sps:$4 sm:$0xff]  }
 0x32f   : > { %4265 = vmatpush1.bf16.msra.mxu0 %v13726_v48  ;;  %v13809_v48 = vld [vmem:[#allocation8 + $0x7e4] ss:$16 sps:$4 sm:$0xff]  }
 0x330   : > { %4981 = vmatpush1.bf16.msra.mxu1 %v13729_v27  ;;  %4266 = vmatprep.subr.bf16.mxu0 %v13734_v28  ;;  %v13804_v27 = vld [vmem:[#allocation8 + $0xe8] ss:$16 sps:$4 sm:$0xff]   ;;  %v13807_v28 = vld [vmem:[#allocation8 + $0x7e0] ss:$16 sps:$4 sm:$0xff]  }
 0x331   : > { %4982 = vmatprep.subr.bf16.mxu1 %v13737_v5  ;;  %v13812_v5 = vld [vmem:[#allocation8 + $0x10c] ss:$16 sps:$4 sm:$0xff]  }
 0x333   : > { %4267 = vmatpush1.bf16.msra.mxu0 %v13732_v37  ;;  %v12210_v37 = vcombine.low %v16012_v36, %v15977_v58  ;;  %v13828_v58 = vld [vmem:[#allocation8 + $0x84c] ss:$16 sps:$4 sm:$0xff]  }
 0x334   : > { %4983 = vmatpush1.bf16.msra.mxu1 %v13735_v49  ;;  %4268 = vmatprep.subr.bf16.mxu0 %v13740_v16  ;;  %v13816_v49 = vld [vmem:[#allocation8 + $0x80c] ss:$16 sps:$4 sm:$0xff]   ;;  %v13810_v16 = vld [vmem:[#allocation8 + $0x108] ss:$16 sps:$4 sm:$0xff]  }
 0x335   : > { %4984 = vmatprep.subr.bf16.mxu1 %v13743_v38  ;;  %v13814_v38 = vld [vmem:[#allocation8 + $0x808] ss:$16 sps:$4 sm:$0xff]  }
 0x337   : > { %4269 = vmatpush1.bf16.msra.mxu0 %v13738_v21  ;;  %v13819_v21 = vld [vmem:[#allocation8 + $0x12c] ss:$16 sps:$4 sm:$0xff]  }
 0x338   : > { %4985 = vmatpush1.bf16.msra.mxu1 %v13741_v24  ;;  %4270 = vmatprep.subr.bf16.mxu0 %v13746_v9  ;;  %v16030_v24 = vrot.slane %v12210_v37, 1  ;;  %v13822_v9 = vld [vmem:[#allocation8 + $0x82c] ss:$16 sps:$4 sm:$0xff]   ;;  %v13874_v37 = vld [vmem:[#allocation8 + $0x840] ss:$16 sps:$4 sm:$0xff]  }
 0x339   : > { %4986 = vmatprep.subr.bf16.mxu1 %v13749_v45  ;;  %v13817_v45 = vld [vmem:[#allocation8 + $0x128] ss:$16 sps:$4 sm:$0xff]  }
 0x33b   : > { %4271 = vmatpush1.bf16.msra.mxu0 %v13744_v47  ;;  %v13820_v47 = vld [vmem:[#allocation8 + $0x828] ss:$16 sps:$4 sm:$0xff]  }
 0x33c   : > { %4987 = vmatpush1.bf16.msra.mxu1 %v13747_v54  ;;  %4272 = vmatprep.subr.bf16.mxu0 %v13752_v51  ;;  %v13825_v54 = vld [vmem:[#allocation8 + $0x14c] ss:$16 sps:$4 sm:$0xff]   ;;  %v13823_v51 = vld [vmem:[#allocation8 + $0x148] ss:$16 sps:$4 sm:$0xff]  }
 0x33d   : > { %4988 = vmatprep.subr.bf16.mxu1 %v13755_v42  ;;  %v13826_v42 = vld [vmem:[#allocation8 + $0x848] ss:$16 sps:$4 sm:$0xff]  }
 0x33f   : > { %4273 = vmatpush1.bf16.msra.mxu0 %v13750_v29  ;;  %v13831_v29 = vld [vmem:[#allocation8 + $0x16c] ss:$16 sps:$4 sm:$0xff]  }
 0x340   : > { %4989 = vmatpush1.bf16.msra.mxu1 %v13753_v7  ;;  %4274 = vmatprep.subr.bf16.mxu0 %v13758_v25  ;;  %v13834_v7 = vld [vmem:[#allocation8 + $0x86c] ss:$16 sps:$4 sm:$0xff]   ;;  %v13829_v25 = vld [vmem:[#allocation8 + $0x168] ss:$16 sps:$4 sm:$0xff]  }
 0x341   : > { %4990 = vmatprep.subr.bf16.mxu1 %v13761_v52  ;;  %v13832_v52 = vld [vmem:[#allocation8 + $0x868] ss:$16 sps:$4 sm:$0xff]  }
 0x343   : > { %4275 = vmatpush1.bf16.msra.mxu0 %v13756_v12  ;;  %v13837_v12 = vld [vmem:[#allocation8 + $0x18c] ss:$16 sps:$4 sm:$0xff]  }
 0x344   : > { %4991 = vmatpush1.bf16.msra.mxu1 %v13759_v18  ;;  %4301 = vmatprep.subr.bf16.mxu0 %v13764_v13  ;;  %v13840_v18 = vld [vmem:[#allocation8 + $0x88c] ss:$16 sps:$4 sm:$0xff]   ;;  %v13835_v13 = vld [vmem:[#allocation8 + $0x188] ss:$16 sps:$4 sm:$0xff]  }
 0x345   : > { %4992 = vmatprep.subr.bf16.mxu1 %v13767_v61  ;;  %v13838_v61 = vld [vmem:[#allocation8 + $0x888] ss:$16 sps:$4 sm:$0xff]  }
 0x346   : > { %4293 = vmatmul.mubr.bf16.vlgmr.msra.gmra.mrb[64].mxu0 %v16018_v2  ;;  %v13792_v2 = vld [vmem:[#allocation8 + $0xa8] ss:$16 sps:$4 sm:$0xff]  }
 0x347   : > { %4302 = vmatpush1.bf16.msra.mxu0 %v13762_v30  ;;  %4333 = vmatprep.mubr.bf16.mxu0 %v16000_v62  ;;  %v13783_v62 = vld [vmem:[#allocation8 + $0x760] ss:$16 sps:$4 sm:$0xff]   ;;  %v13843_v30 = vld [vmem:[#allocation8 + $0x1ac] ss:$16 sps:$4 sm:$0xff]  }
 0x348   : > { %4993 = vmatpush1.bf16.msra.mxu1 %v13765_v46  ;;  %4303 = vmatprep.subr.bf16.mxu0 %v13770_v4  ;;  %v13846_v46 = vld [vmem:[#allocation8 + $0x8ac] ss:$16 sps:$4 sm:$0xff]   ;;  %v13841_v4 = vld [vmem:[#allocation8 + $0x1a8] ss:$16 sps:$4 sm:$0xff]  }
 0x349   : > { %4994 = vmatprep.subr.bf16.mxu1 %v13773_v14  ;;  %v16034_v14 = vld [vmem:[#allocation2 + $0xc] sm:$0x33] }
 0x34b   : > { %4304 = vmatpush1.bf16.msra.mxu0 %v13768_v11  ;;  %v13844_v11 = vld [vmem:[#allocation8 + $0x8a8] ss:$16 sps:$4 sm:$0xff]  }
 0x34c   : > { %4995 = vmatpush1.bf16.msra.mxu1 %v13771_v15  ;;  %4305 = vmatprep.subr.bf16.mxu0 %v13776_v50  ;;  %v13849_v15 = vld [vmem:[#allocation8 + $0x1cc] ss:$16 sps:$4 sm:$0xff]  }
 0x34d   : > { %4996 = vmatprep.subr.bf16.mxu1 %v13779_v22  ;;  %v13852_v50 = vld [vmem:[#allocation8 + $0x8cc] ss:$16 sps:$4 sm:$0xff]   ;;  %v12310_v22 = vcombine.high %v16012_v36, %v16034_v14 }
 0x34f   : > { %4306 = vmatpush1.bf16.msra.mxu0 %v13774_v59  ;;  %v13847_v59 = vld [vmem:[#allocation8 + $0x1c8] ss:$16 sps:$4 sm:$0xff]  }
 0x350   : > { %4997 = vmatpush1.bf16.msra.mxu1 %v13777_v43  ;;  %4307 = vmatprep.subr.bf16.mxu0 %v13782_v10  ;;  %v13850_v43 = vld [vmem:[#allocation8 + $0x8c8] ss:$16 sps:$4 sm:$0xff]   ;;  %v13855_v10 = vld [vmem:[#allocation8 + $0x1ec] ss:$16 sps:$4 sm:$0xff]  }
 0x351   : > { %4998 = vmatprep.subr.bf16.mxu1 %v13785_v1  ;;  %v13858_v1 = vld [vmem:[#allocation8 + $0x8ec] ss:$16 sps:$4 sm:$0xff]  }
 0x353   : > { %4308 = vmatpush1.bf16.msra.mxu0 %v13780_v20  ;;  %v5260_v20 = vshrl.u32 %v12310_v22, 16 }
 0x354   : > { %4999 = vmatpush1.bf16.msra.mxu1 %v13783_v62  ;;  %4309 = vmatprep.subr.bf16.mxu0 %v13788_v23  ;;  %v5263_v62 = vshll.u32 %v12310_v22, 16  ;;  %v13853_v23 = vld [vmem:[#allocation8 + $0x1e8] ss:$16 sps:$4 sm:$0xff]   ;;  %v13909_v22 = vld [vmem:[#allocation8 + $0x9e4] ss:$16 sps:$4 sm:$0xff]  }
 0x355   : > { %5000 = vmatprep.subr.bf16.mxu1 %v13791_v33  ;;  %v13856_v33 = vld [vmem:[#allocation8 + $0x8e8] ss:$16 sps:$4 sm:$0xff]  }
 0x357   : > { %4310 = vmatpush1.bf16.msra.mxu0 %v13786_v3  ;;  %v13861_v3 = vld [vmem:[#allocation8 + $0x804] ss:$16 sps:$4 sm:$0xff]  }
 0x358   : > { %5001 = vmatpush1.bf16.msra.mxu1 %v13789_v40  ;;  %4311 = vmatprep.subr.bf16.mxu0 %v13794_v55  ;;  %v16038_v40 = vld [vmem:[#allocation2 + $0x8] sm:$0xe] }
 0x359   : > { %5002 = vmatprep.subr.bf16.mxu1 %v13797_v57  ;;  %v12212_v55 = vcombine.low %v16038_v40, %v15985_v44  ;;  %v13866_v57 = vld [vmem:[#allocation8 + $0x904] ss:$16 sps:$4 sm:$0xff]   ;;  %v13868_v44 = vld [vmem:[#allocation8 + $0x820] ss:$16 sps:$4 sm:$0xff]  }
 0x35b   : > { %4312 = vmatpush1.bf16.msra.mxu0 %v13792_v2  ;;  %v5262_v2 = vrot.slane %v5260_v20, 1  ;;  %v13910_v20 = vld [vmem:[#allocation8 + $0x608] ss:$16 sps:$4 sm:$0xff]  }
 0x35c   : > { %5003 = vmatpush1.bf16.msra.mxu1 %v13795_v17  ;;  %4313 = vmatprep.subr.bf16.mxu0 %v13800_v60  ;;  %v5265_v17 = vrot.slane %v5263_v62, 2  ;;  %v13859_v60 = vld [vmem:[#allocation8 + $0x800] ss:$16 sps:$4 sm:$0xff]  }
 0x35d   : > { %5004 = vmatprep.subr.bf16.mxu1 %v13803_v56  ;;  %v13864_v56 = vld [vmem:[#allocation8 + $0x900] ss:$16 sps:$4 sm:$0xff]  }
 0x35e   : > { %v13913_v62 = vld [vmem:[#allocation8 + $0xa00] ss:$16 sps:$4 sm:$0xff]  }
 0x35f   : > { %4314 = vmatpush1.bf16.msra.mxu0 %v13798_v8  ;;  %v16042_v8 = vrot.slane %v12212_v55, 1  ;;  %v13919_v55 = vld [vmem:[#allocation8 + $0xa20] ss:$16 sps:$4 sm:$0xff]  }
 0x360   : > { %5005 = vmatpush1.bf16.msra.mxu1 %v13801_v34  ;;  %4315 = vmatprep.subr.bf16.mxu0 %v13806_v39  ;;  %v13870_v34 = vld [vmem:[#allocation8 + $0x824] ss:$16 sps:$4 sm:$0xff]  }
 0x361   : > { %5006 = vmatprep.subr.bf16.mxu1 %v13809_v48  ;;  %v13873_v39 = vld [vmem:[#allocation8 + $0x924] ss:$16 sps:$4 sm:$0xff]   ;;  %v16045_v48 = vor.u32 %v5265_v17, %v5262_v2  ;;  %v13922_v17 = vld [vmem:[#allocation8 + $0x648] ss:$16 sps:$4 sm:$0xff]  }
 0x362   : > { %v13927_v2 = vld [vmem:[#allocation8 + $0xa44] ss:$16 sps:$4 sm:$0xff]  }
 0x363   : > { %4316 = vmatpush1.bf16.msra.mxu0 %v13804_v27  ;;  %v13871_v27 = vld [vmem:[#allocation8 + $0x920] ss:$16 sps:$4 sm:$0xff]  }
 0x364   : > { %5007 = vmatpush1.bf16.msra.mxu1 %v13807_v28  ;;  %4317 = vmatprep.subr.bf16.mxu0 %v13812_v5  ;;  %v13876_v28 = vld [vmem:[#allocation8 + $0x844] ss:$16 sps:$4 sm:$0xff]  }
 0x365   : > { %5099 = vmatprep.subr.bf16.mxu1 %v13816_v49  ;;  %v13879_v5 = vld [vmem:[#allocation8 + $0x944] ss:$16 sps:$4 sm:$0xff]  }
 0x366   : > { %v13882_v49 = vld [vmem:[#allocation8 + $0x864] ss:$16 sps:$4 sm:$0xff]  }
 0x367   : > { %5009 = vmatmul.mubr.bf16.vlgmr.msra.gmra.mrb[36].mxu1 %v16030_v24  ;;  %4318 = vmatpush1.bf16.msra.mxu0 %v13810_v16  ;;  %v13885_v16 = vld [vmem:[#allocation8 + $0x964] ss:$16 sps:$4 sm:$0xff]  }
 0x368   : > { %5100 = vmatpush1.bf16.msra.mxu1 %v13814_v38  ;;  %4319 = vmatprep.subr.bf16.mxu0 %v13819_v21  ;;  %v13880_v38 = vld [vmem:[#allocation8 + $0x860] ss:$16 sps:$4 sm:$0xff]  }
 0x369   : > { %5101 = vmatprep.subr.bf16.mxu1 %v13822_v9  ;;  %5131 = vmatprep.mubr.bf16.mxu1 %v14787_v0  ;;  %v13883_v21 = vld [vmem:[#allocation8 + $0x960] ss:$16 sps:$4 sm:$0xff]   ;;  %v13888_v9 = vld [vmem:[#allocation8 + $0x884] ss:$16 sps:$4 sm:$0xff]  }
 0x36b   : > { %4320 = vmatpush1.bf16.msra.mxu0 %v13817_v45  ;;  %v13891_v45 = vld [vmem:[#allocation8 + $0x984] ss:$16 sps:$4 sm:$0xff]  }
 0x36c   : > { %5102 = vmatpush1.bf16.msra.mxu1 %v13820_v47  ;;  %4321 = vmatprep.subr.bf16.mxu0 %v13825_v54  ;;  %v13886_v47 = vld [vmem:[#allocation8 + $0x880] ss:$16 sps:$4 sm:$0xff]  }
 0x36d   : > { %5103 = vmatprep.subr.bf16.mxu1 %v13828_v58  ;;  %v13889_v54 = vld [vmem:[#allocation8 + $0x980] ss:$16 sps:$4 sm:$0xff]   ;;  %v13894_v58 = vld [vmem:[#allocation8 + $0x8a4] ss:$16 sps:$4 sm:$0xff]  }
 0x36f   : > { %4322 = vmatpush1.bf16.msra.mxu0 %v13823_v51  ;;  %v13897_v51 = vld [vmem:[#allocation8 + $0x9a4] ss:$16 sps:$4 sm:$0xff]  }
 0x370   : > { %5104 = vmatpush1.bf16.msra.mxu1 %v13826_v42  ;;  %4323 = vmatprep.subr.bf16.mxu0 %v13831_v29  ;;  %v13892_v42 = vld [vmem:[#allocation8 + $0x8a0] ss:$16 sps:$4 sm:$0xff]  }
 0x371   : > { %5105 = vmatprep.subr.bf16.mxu1 %v13834_v7  ;;  %v13895_v29 = vld [vmem:[#allocation8 + $0x9a0] ss:$16 sps:$4 sm:$0xff]   ;;  %v13900_v7 = vld [vmem:[#allocation8 + $0x8c4] ss:$16 sps:$4 sm:$0xff]  }
 0x373   : > { %4324 = vmatpush1.bf16.msra.mxu0 %v13829_v25 }
 0x374   : > { %5106 = vmatpush1.bf16.msra.mxu1 %v13832_v52  ;;  %4325 = vmatprep.subr.bf16.mxu0 %v13837_v12  ;;  %v13903_v12 = vld [vmem:[#allocation8 + $0x9c4] ss:$16 sps:$4 sm:$0xff]  }
 0x375   : > { %5107 = vmatprep.subr.bf16.mxu1 %v13840_v18 }
 0x377   : > { %4326 = vmatpush1.bf16.msra.mxu0 %v13835_v13 }
 0x378   : > { %5108 = vmatpush1.bf16.msra.mxu1 %v13838_v61  ;;  %4327 = vmatprep.subr.bf16.mxu0 %v13843_v30 }
 0x379   : > { %5109 = vmatprep.subr.bf16.mxu1 %v13846_v46  ;;  %v13898_v46 = vld [vmem:[#allocation8 + $0x8c0] ss:$16 sps:$4 sm:$0xff]  }
 0x37b   : > { %4328 = vmatpush1.bf16.msra.mxu0 %v13841_v4 }
 0x37c   : > { %5110 = vmatpush1.bf16.msra.mxu1 %v13844_v11  ;;  %4329 = vmatprep.subr.bf16.mxu0 %v13849_v15  ;;  %v13901_v15 = vld [vmem:[#allocation8 + $0x9c0] ss:$16 sps:$4 sm:$0xff]  }
 0x37d   : > { %5111 = vmatprep.subr.bf16.mxu1 %v13852_v50  ;;  %v13906_v50 = vld [vmem:[#allocation8 + $0x8e4] ss:$16 sps:$4 sm:$0xff]  }
 0x37f   : > { %4330 = vmatpush1.bf16.msra.mxu0 %v13847_v59  ;;  %v13904_v59 = vld [vmem:[#allocation8 + $0x8e0] ss:$16 sps:$4 sm:$0xff]  }
 0x380   : > { %5112 = vmatpush1.bf16.msra.mxu1 %v13850_v43  ;;  %4331 = vmatprep.subr.bf16.mxu0 %v13855_v10  ;;  %v13907_v43 = vld [vmem:[#allocation8 + $0x9e0] ss:$16 sps:$4 sm:$0xff]   ;;  %v13912_v10 = vld [vmem:[#allocation8 + $0x60c] ss:$16 sps:$4 sm:$0xff]  }
 0x381   : > { %5113 = vmatprep.subr.bf16.mxu1 %v13858_v1  ;;  %v13915_v1 = vld [vmem:[#allocation8 + $0xa04] ss:$16 sps:$4 sm:$0xff]  }
 0x383   : > { %4332 = vmatpush1.bf16.msra.mxu0 %v13853_v23  ;;  %v13918_v23 = vld [vmem:[#allocation8 + $0x62c] ss:$16 sps:$4 sm:$0xff]  }
 0x384   : > { %5114 = vmatpush1.bf16.msra.mxu1 %v13856_v33  ;;  %5017 = vmatprep.subr.bf16.mxu0 %v13861_v3  ;;  %v13921_v33 = vld [vmem:[#allocation8 + $0xa24] ss:$16 sps:$4 sm:$0xff]   ;;  %v13916_v3 = vld [vmem:[#allocation8 + $0x628] ss:$16 sps:$4 sm:$0xff]  }
 0x385   : > { %5758 = vmatprep.subr.bf16.mxu1 %v13866_v57  ;;  %v13924_v57 = vld [vmem:[#allocation8 + $0x64c] ss:$16 sps:$4 sm:$0xff]  }
 0x386   : > { %4334 = vmatmul.mubr.bf16.vlgmr.msra.gmra.mrb[68].mxu0 %v16008_v19  ;;  %v13877_v19 = vld [vmem:[#allocation8 + $0x940] ss:$16 sps:$4 sm:$0xff]  }
 0x387   : > { %5132 = vmatmul.mubr.bf16.vlgmr.msra.gmra.mrb[40].mxu1 %v16042_v8  ;;  %5018 = vmatpush1.bf16.msra.mxu0 %v13859_v60  ;;  %v13925_v60 = vld [vmem:[#allocation8 + $0xa40] ss:$16 sps:$4 sm:$0xff]  }
 0x388   : > { %5759 = vmatpush1.bf16.msra.mxu1 %v13864_v56  ;;  %5790 = vmatprep.mubr.bf16.mxu1 %v16045_v48  ;;  %v13930_v56 = vld [vmem:[#allocation8 + $0x66c] ss:$16 sps:$4 sm:$0xff]  }
 0x389   : > { %5019 = vmatprep.subr.bf16.mxu0 %v13870_v34  ;;  %5760 = vmatprep.subr.bf16.mxu1 %v13873_v39  ;;  %v13933_v34 = vld [vmem:[#allocation8 + $0xa64] ss:$16 sps:$4 sm:$0xff]   ;;  %v13936_v39 = vld [vmem:[#allocation8 + $0x68c] ss:$16 sps:$4 sm:$0xff]  }
 0x38a   : > { %5049 = vmatprep.mubr.bf16.mxu0 %v14787_v0 }
 0x38b   : > { %5020 = vmatpush1.bf16.msra.mxu0 %v13868_v44  ;;  %v13939_v44 = vld [vmem:[#allocation8 + $0xa84] ss:$16 sps:$4 sm:$0xff]  }
 0x38c   : > { %5761 = vmatpush1.bf16.msra.mxu1 %v13871_v27  ;;  %5021 = vmatprep.subr.bf16.mxu0 %v13876_v28  ;;  %v13934_v27 = vld [vmem:[#allocation8 + $0x688] ss:$16 sps:$4 sm:$0xff]   ;;  %v13937_v28 = vld [vmem:[#allocation8 + $0xa80] ss:$16 sps:$4 sm:$0xff]  }
 0x38d   : > { %5762 = vmatprep.subr.bf16.mxu1 %v13879_v5  ;;  %v13942_v5 = vld [vmem:[#allocation8 + $0x6ac] ss:$16 sps:$4 sm:$0xff]  }
 0x38f   : > { %5022 = vmatpush1.bf16.msra.mxu0 %v13874_v37  ;;  %v13945_v37 = vld [vmem:[#allocation8 + $0xaa4] ss:$16 sps:$4 sm:$0xff]  }
 0x390   : > { %5763 = vmatpush1.bf16.msra.mxu1 %v13877_v19  ;;  %5023 = vmatprep.subr.bf16.mxu0 %v13882_v49  ;;  %v13940_v19 = vld [vmem:[#allocation8 + $0x6a8] ss:$16 sps:$4 sm:$0xff]   ;;  %v13943_v49 = vld [vmem:[#allocation8 + $0xaa0] ss:$16 sps:$4 sm:$0xff]  }
 0x391   : > { %5764 = vmatprep.subr.bf16.mxu1 %v13885_v16  ;;  %v13948_v16 = vld [vmem:[#allocation8 + $0x6cc] ss:$16 sps:$4 sm:$0xff]  }
 0x393   : > { %5024 = vmatpush1.bf16.msra.mxu0 %v13880_v38 }
 0x394   : > { %5765 = vmatpush1.bf16.msra.mxu1 %v13883_v21  ;;  %5025 = vmatprep.subr.bf16.mxu0 %v13888_v9  ;;  %v13951_v21 = vld [vmem:[#allocation8 + $0xac4] ss:$16 sps:$4 sm:$0xff]   ;;  %v12309_v9 = vcombine.low %v16012_v36, %v16034_v14  ;;  %v13952_v36 = vld [vmem:[#allocation8 + $0x6e8] ss:$16 sps:$4 sm:$0xff]  }
 0x395   : > { %5766 = vmatprep.subr.bf16.mxu1 %v13891_v45 }
 0x397   : > { %5026 = vmatpush1.bf16.msra.mxu0 %v13886_v47 }
 0x398   : > { %5767 = vmatpush1.bf16.msra.mxu1 %v13889_v54  ;;  %5027 = vmatprep.subr.bf16.mxu0 %v13894_v58 }
 0x399   : > { %v16050_v25 = vpop.f32.mrb[52].mxu0  ;;  %v16052_v52 = vpop.f32.mrb[24].mxu1  ;;  %5768 = vmatprep.subr.bf16.mxu1 %v13897_v51  ;;  %v13946_v51 = vld [vmem:[#allocation8 + $0x6c8] ss:$16 sps:$4 sm:$0xff]  }
 0x39a   : > { %v16054_v18 = vpop.f32.mrb[53].mxu0  ;;  %v16056_v13 = vpop.f32.mrb[25].mxu1 }
 0x39b   : > { %5028 = vmatpush1.bf16.msra.mxu0 %v13892_v42  ;;  %v3607_v61 = vpop.f32.mrb[54].mxu0  ;;  %v3730_v30 = vpop.f32.mrb[26].mxu1 }
 0x39c   : > { %5769 = vmatpush1.bf16.msra.mxu1 %v13895_v29  ;;  %v3608_v4 = vpop.f32.mrb[55].mxu0  ;;  %v3731_v11 = vpop.f32.mrb[27].mxu1  ;;  %5029 = vmatprep.subr.bf16.mxu0 %v13900_v7  ;;  %v13949_v29 = vld [vmem:[#allocation8 + $0xac0] ss:$16 sps:$4 sm:$0xff]   ;;  %v13954_v7 = vld [vmem:[#allocation8 + $0x6ec] ss:$16 sps:$4 sm:$0xff]  }
 0x39d   : > { %5770 = vmatprep.subr.bf16.mxu1 %v13903_v12  ;;  %v13957_v12 = vld [vmem:[#allocation8 + $0xae4] ss:$16 sps:$4 sm:$0xff]   ;;  %v5252_v61 = vshrl.u32 %v12309_v9, 16  ;;  %v5255_v30 = vshll.u32 %v12309_v9, 16  ;;  %v13964_v11 = vld [vmem:[#allocation8 + $0xb0c] ss:$16 sps:$4 sm:$0xff]  }
 0x39f   : > { %5030 = vmatpush1.bf16.msra.mxu0 %v13898_v46  ;;  %v13960_v46 = vld [vmem:[#allocation8 + $0x70c] ss:$16 sps:$4 sm:$0xff]   ;;  %v5257_v4 = vrot.slane %v5255_v30, 2  ;;  %v14012_v30 = vld [vmem:[#allocation8 + $0xc04] ss:$16 sps:$4 sm:$0xff]  }
 0x3a0   : > { %5771 = vmatpush1.bf16.msra.mxu1 %v13901_v15  ;;  %5031 = vmatprep.subr.bf16.mxu0 %v13906_v50  ;;  %v13958_v15 = vld [vmem:[#allocation8 + $0x708] ss:$16 sps:$4 sm:$0xff]  }
 0x3a1   : > { %5772 = vmatprep.subr.bf16.mxu1 %v13909_v22  ;;  %v13962_v50 = vld [vmem:[#allocation8 + $0xb08] ss:$16 sps:$4 sm:$0xff]   ;;  %v13967_v22 = vld [vmem:[#allocation8 + $0x72c] ss:$16 sps:$4 sm:$0xff]  }
 0x3a3   : > { %5032 = vmatpush1.bf16.msra.mxu0 %v13904_v59 }
 0x3a4   : > { %5773 = vmatpush1.bf16.msra.mxu1 %v13907_v43  ;;  %5058 = vmatprep.subr.bf16.mxu0 %v13912_v10  ;;  %v13970_v43 = vld [vmem:[#allocation8 + $0xb2c] ss:$16 sps:$4 sm:$0xff]   ;;  %v13965_v10 = vld [vmem:[#allocation8 + $0x728] ss:$16 sps:$4 sm:$0xff]  }
 0x3a5   : > { %5774 = vmatprep.subr.bf16.mxu1 %v13915_v1  ;;  %v13968_v1 = vld [vmem:[#allocation8 + $0xb28] ss:$16 sps:$4 sm:$0xff]  }
 0x3a6   : > { %5050 = vmatmul.mubr.bf16.vlgmr.msra.gmra.mrb[72].mxu0 %v16042_v8  ;;  %v13928_v8 = vld [vmem:[#allocation8 + $0x668] ss:$16 sps:$4 sm:$0xff]  }
 0x3a7   : > { %5059 = vmatpush1.bf16.msra.mxu0 %v13910_v20  ;;  %5090 = vmatprep.mubr.bf16.mxu0 %v16021_v41  ;;  %v13931_v41 = vld [vmem:[#allocation8 + $0xa60] ss:$16 sps:$4 sm:$0xff]   ;;  %v13973_v20 = vld [vmem:[#allocation8 + $0x74c] ss:$16 sps:$4 sm:$0xff]  }
 0x3a8   : > { %5775 = vmatpush1.bf16.msra.mxu1 %v13913_v62  ;;  %5060 = vmatprep.subr.bf16.mxu0 %v13918_v23  ;;  %v13976_v62 = vld [vmem:[#allocation8 + $0xb4c] ss:$16 sps:$4 sm:$0xff]   ;;  %v13971_v23 = vld [vmem:[#allocation8 + $0x748] ss:$16 sps:$4 sm:$0xff]  }
 0x3a9   : > { %5776 = vmatprep.subr.bf16.mxu1 %v13921_v33  ;;  %v13974_v33 = vld [vmem:[#allocation8 + $0xb48] ss:$16 sps:$4 sm:$0xff]  }
 0x3ab   : > { %5061 = vmatpush1.bf16.msra.mxu0 %v13916_v3  ;;  %v13979_v3 = vld [vmem:[#allocation8 + $0x76c] ss:$16 sps:$4 sm:$0xff]  }
 0x3ac   : > { %5777 = vmatpush1.bf16.msra.mxu1 %v13919_v55  ;;  %5062 = vmatprep.subr.bf16.mxu0 %v13924_v57  ;;  %v13982_v55 = vld [vmem:[#allocation8 + $0xb6c] ss:$16 sps:$4 sm:$0xff]   ;;  %v13977_v57 = vld [vmem:[#allocation8 + $0x768] ss:$16 sps:$4 sm:$0xff]  }
 0x3ad   : > { %5778 = vmatprep.subr.bf16.mxu1 %v13927_v2  ;;  %v13980_v2 = vld [vmem:[#allocation8 + $0xb68] ss:$16 sps:$4 sm:$0xff]  }
 0x3af   : > { %5063 = vmatpush1.bf16.msra.mxu0 %v13922_v17  ;;  %v13985_v17 = vld [vmem:[#allocation8 + $0x78c] ss:$16 sps:$4 sm:$0xff]  }
 0x3b0   : > { %5779 = vmatpush1.bf16.msra.mxu1 %v13925_v60  ;;  %5064 = vmatprep.subr.bf16.mxu0 %v13930_v56  ;;  %v13988_v60 = vld [vmem:[#allocation8 + $0xb8c] ss:$16 sps:$4 sm:$0xff]   ;;  %v13983_v56 = vld [vmem:[#allocation8 + $0x788] ss:$16 sps:$4 sm:$0xff]  }
 0x3b1   : > { %5780 = vmatprep.subr.bf16.mxu1 %v13933_v34  ;;  %v13986_v34 = vld [vmem:[#allocation8 + $0xb88] ss:$16 sps:$4 sm:$0xff]  }
 0x3b3   : > { %5065 = vmatpush1.bf16.msra.mxu0 %v13928_v8  ;;  %v13991_v8 = vld [vmem:[#allocation8 + $0x7ac] ss:$16 sps:$4 sm:$0xff]  }
 0x3b4   : > { %5781 = vmatpush1.bf16.msra.mxu1 %v13931_v41  ;;  %5066 = vmatprep.subr.bf16.mxu0 %v13936_v39  ;;  %v13994_v41 = vld [vmem:[#allocation8 + $0xbac] ss:$16 sps:$4 sm:$0xff]   ;;  %v16072_v39 = vld [vmem:[#allocation2 + $0x14] sm:$0x3] }
 0x3b5   : > { %5782 = vmatprep.subr.bf16.mxu1 %v13939_v44  ;;  %v13989_v44 = vld [vmem:[#allocation8 + $0x7a8] ss:$16 sps:$4 sm:$0xff]  }
 0x3b7   : > { %5067 = vmatpush1.bf16.msra.mxu0 %v13934_v27  ;;  %v13992_v27 = vld [vmem:[#allocation8 + $0xba8] ss:$16 sps:$4 sm:$0xff]  }
 0x3b8   : > { %5783 = vmatpush1.bf16.msra.mxu1 %v13937_v28  ;;  %5068 = vmatprep.subr.bf16.mxu0 %v13942_v5  ;;  %v13997_v28 = vld [vmem:[#allocation8 + $0x7cc] ss:$16 sps:$4 sm:$0xff]   ;;  %v12311_v5 = vcombine.low %v16038_v40, %v16072_v39 }
 0x3b9   : > { %v3644_v38 = vpop.f32.mrb[56].mxu0  ;;  %5784 = vmatprep.subr.bf16.mxu1 %v13945_v37  ;;  %v14000_v37 = vld [vmem:[#allocation8 + $0xbcc] ss:$16 sps:$4 sm:$0xff]  }
 0x3ba   : > { %v16063_v45 = vadd.f32 %v3644_v38, %v16050_v25  ;;  %v3646_v47 = vpop.f32.mrb[57].mxu0  ;;  %v13955_v25 = vld [vmem:[#allocation8 + $0xae0] ss:$16 sps:$4 sm:$0xff]   ;;  %v13995_v38 = vld [vmem:[#allocation8 + $0x7c8] ss:$16 sps:$4 sm:$0xff]  }
 0x3bb   : > { %v16066_v54 = vadd.f32 %v3646_v47, %v16054_v18  ;;  %v3648_v58 = vpop.f32.mrb[58].mxu0  ;;  %5069 = vmatpush1.bf16.msra.mxu0 %v13940_v19  ;;  %v5254_v18 = vrot.slane %v5252_v61, 1  ;;  %v13998_v47 = vld [vmem:[#allocation8 + $0xbc8] ss:$16 sps:$4 sm:$0xff]   ;;  %v14006_v40 = vld [vmem:[#allocation8 + $0xbec] ss:$16 sps:$4 sm:$0xff]  }
 0x3bc   : > { %5785 = vmatpush1.bf16.msra.mxu1 %v13943_v49  ;;  %v3649_v42 = vpop.f32.mrb[59].mxu0  ;;  %5070 = vmatprep.subr.bf16.mxu0 %v13948_v16  ;;  %v14003_v58 = vld [vmem:[#allocation8 + $0x7ec] ss:$16 sps:$4 sm:$0xff]  }
 0x3bd   : > { %5786 = vmatprep.subr.bf16.mxu1 %v13951_v21  ;;  %v16068_v59 = vor.u32 %v5257_v4, %v5254_v18  ;;  %v5268_v42 = vshrl.u32 %v12311_v5, 16  ;;  %v14010_v18 = vld [vmem:[#allocation8 + $0xc00] ss:$16 sps:$4 sm:$0xff]  }
 0x3bf   : > { %5071 = vmatpush1.bf16.msra.mxu0 %v13946_v51  ;;  %v5270_v61 = vrot.slane %v5268_v42, 1 }
 0x3c0   : > { %5787 = vmatpush1.bf16.msra.mxu1 %v13949_v29  ;;  %5072 = vmatprep.subr.bf16.mxu0 %v13954_v7  ;;  %v5271_v29 = vshll.u32 %v12311_v5, 16  ;;  %v14001_v7 = vld [vmem:[#allocation8 + $0x7e8] ss:$16 sps:$4 sm:$0xff]  }
 0x3c1   : > { %5788 = vmatprep.subr.bf16.mxu1 %v13957_v12  ;;  %v14009_v12 = vld [vmem:[#allocation8 + $0xb04] ss:$16 sps:$4 sm:$0xff]  }
 0x3c3   : > { %5073 = vmatpush1.bf16.msra.mxu0 %v13952_v36  ;;  %v16082_v36 = vld [vmem:[#allocation2] sm:$0xcc] }
 0x3c4   : > { %5789 = vmatpush1.bf16.msra.mxu1 %v13955_v25  ;;  %5074 = vmatprep.subr.bf16.mxu0 %v13960_v46  ;;  %v12409_v25 = vcombine.high %v16082_v36, %v16034_v14  ;;  %v14007_v46 = vld [vmem:[#allocation8 + $0xb00] ss:$16 sps:$4 sm:$0xff]  }
 0x3c5   : > { %5881 = vmatprep.subr.bf16.mxu1 %v13964_v11  ;;  %v14017_v11 = vld [vmem:[#allocation8 + $0xb24] ss:$16 sps:$4 sm:$0xff]  }
 0x3c7   : > { %5791 = vmatmul.mubr.bf16.vlgmr.msra.gmra.mrb[44].mxu1 %v16068_v59  ;;  %5075 = vmatpush1.bf16.msra.mxu0 %v13958_v15  ;;  %v14020_v15 = vld [vmem:[#allocation8 + $0xc24] ss:$16 sps:$4 sm:$0xff]  }
 0x3c8   : > { %5882 = vmatpush1.bf16.msra.mxu1 %v13962_v50  ;;  %5076 = vmatprep.subr.bf16.mxu0 %v13967_v22  ;;  %v16089_v50 = vrot.slane %v12409_v25, 2  ;;  %v14015_v22 = vld [vmem:[#allocation8 + $0xb20] ss:$16 sps:$4 sm:$0xff]   ;;  %v14063_v25 = vld [vmem:[#allocation8 + $0x928] ss:$16 sps:$4 sm:$0xff]  }
 0x3c9   : > { %5883 = vmatprep.subr.bf16.mxu1 %v13970_v43  ;;  %5913 = vmatprep.mubr.bf16.mxu1 %v14787_v0  ;;  %v14018_v43 = vld [vmem:[#allocation8 + $0xc20] ss:$16 sps:$4 sm:$0xff]  }
 0x3cb   : > { %5077 = vmatpush1.bf16.msra.mxu0 %v13965_v10  ;;  %v14023_v10 = vld [vmem:[#allocation8 + $0xb44] ss:$16 sps:$4 sm:$0xff]  }
 0x3cc   : > { %5884 = vmatpush1.bf16.msra.mxu1 %v13968_v1  ;;  %5078 = vmatprep.subr.bf16.mxu0 %v13973_v20  ;;  %v14026_v1 = vld [vmem:[#allocation8 + $0xc44] ss:$16 sps:$4 sm:$0xff]   ;;  %v14021_v20 = vld [vmem:[#allocation8 + $0xb40] ss:$16 sps:$4 sm:$0xff]  }
 0x3cd   : > { %5885 = vmatprep.subr.bf16.mxu1 %v13976_v62  ;;  %v14029_v62 = vld [vmem:[#allocation8 + $0xb64] ss:$16 sps:$4 sm:$0xff]  }
 0x3cf   : > { %5079 = vmatpush1.bf16.msra.mxu0 %v13971_v23  ;;  %v14032_v23 = vld [vmem:[#allocation8 + $0xc64] ss:$16 sps:$4 sm:$0xff]  }
 0x3d0   : > { %5886 = vmatpush1.bf16.msra.mxu1 %v13974_v33  ;;  %5080 = vmatprep.subr.bf16.mxu0 %v13979_v3  ;;  %v14027_v33 = vld [vmem:[#allocation8 + $0xb60] ss:$16 sps:$4 sm:$0xff]  }
 0x3d1   : > { %5887 = vmatprep.subr.bf16.mxu1 %v13982_v55  ;;  %v14030_v3 = vld [vmem:[#allocation8 + $0xc60] ss:$16 sps:$4 sm:$0xff]   ;;  %v14035_v55 = vld [vmem:[#allocation8 + $0xb84] ss:$16 sps:$4 sm:$0xff]  }
 0x3d3   : > { %5081 = vmatpush1.bf16.msra.mxu0 %v13977_v57  ;;  %v14038_v57 = vld [vmem:[#allocation8 + $0xc84] ss:$16 sps:$4 sm:$0xff]  }
 0x3d4   : > { %5888 = vmatpush1.bf16.msra.mxu1 %v13980_v2  ;;  %5082 = vmatprep.subr.bf16.mxu0 %v13985_v17  ;;  %v14033_v2 = vld [vmem:[#allocation8 + $0xb80] ss:$16 sps:$4 sm:$0xff]  }
 0x3d5   : > { %5889 = vmatprep.subr.bf16.mxu1 %v13988_v60  ;;  %v14036_v17 = vld [vmem:[#allocation8 + $0xc80] ss:$16 sps:$4 sm:$0xff]   ;;  %v14041_v60 = vld [vmem:[#allocation8 + $0xba4] ss:$16 sps:$4 sm:$0xff]  }
 0x3d7   : > { %5083 = vmatpush1.bf16.msra.mxu0 %v13983_v56  ;;  %v14044_v56 = vld [vmem:[#allocation8 + $0xca4] ss:$16 sps:$4 sm:$0xff]  }
 0x3d8   : > { %5890 = vmatpush1.bf16.msra.mxu1 %v13986_v34  ;;  %5084 = vmatprep.subr.bf16.mxu0 %v13991_v8  ;;  %v14039_v34 = vld [vmem:[#allocation8 + $0xba0] ss:$16 sps:$4 sm:$0xff]  }
 0x3d9   : > { %5891 = vmatprep.subr.bf16.mxu1 %v13994_v41  ;;  %v14042_v8 = vld [vmem:[#allocation8 + $0xca0] ss:$16 sps:$4 sm:$0xff]   ;;  %v14047_v41 = vld [vmem:[#allocation8 + $0xbc4] ss:$16 sps:$4 sm:$0xff]  }
 0x3da   : > { %v4253_v19 = vpop.f32.mrb[28].mxu1 }
 0x3db   : > { %v16077_v49 = vadd.f32 %v4253_v19, %v16063_v45  ;;  %v4255_v16 = vpop.f32.mrb[29].mxu1  ;;  %5085 = vmatpush1.bf16.msra.mxu0 %v13989_v44  ;;  %v14004_v45 = vld [vmem:[#allocation8 + $0xbe8] ss:$16 sps:$4 sm:$0xff]  }
 0x3dc   : > { %v16080_v21 = vadd.f32 %v4255_v16, %v16066_v54  ;;  %v4257_v9 = vpop.f32.mrb[30].mxu1  ;;  %5892 = vmatpush1.bf16.msra.mxu1 %v13992_v27  ;;  %5086 = vmatprep.subr.bf16.mxu0 %v13997_v28  ;;  %v5273_v54 = vrot.slane %v5271_v29, 2  ;;  %v14050_v27 = vld [vmem:[#allocation8 + $0xcc4] ss:$16 sps:$4 sm:$0xff]   ;;  %v14051_v29 = vld [vmem:[#allocation8 + $0xbe0] ss:$16 sps:$4 sm:$0xff]  }
 0x3dd   : > { %v4258_v51 = vpop.f32.mrb[31].mxu1  ;;  %5893 = vmatprep.subr.bf16.mxu1 %v14000_v37  ;;  %v14045_v9 = vld [vmem:[#allocation8 + $0xbc0] ss:$16 sps:$4 sm:$0xff]  }
 0x3de   : > { %v16086_v4 = vor.u32 %v5273_v54, %v5270_v61  ;;  %v14048_v51 = vld [vmem:[#allocation8 + $0xcc0] ss:$16 sps:$4 sm:$0xff]   ;;  %v14065_v54 = vld [vmem:[#allocation8 + $0x92c] ss:$16 sps:$4 sm:$0xff]  }
 0x3df   : > { %5087 = vmatpush1.bf16.msra.mxu0 %v13995_v38  ;;  %v14060_v61 = vld [vmem:[#allocation8 + $0xd00] ss:$16 sps:$4 sm:$0xff]  }
 0x3e0   : > { %5894 = vmatpush1.bf16.msra.mxu1 %v13998_v47  ;;  %5088 = vmatprep.subr.bf16.mxu0 %v14003_v58 }
 0x3e1   : > { %5895 = vmatprep.subr.bf16.mxu1 %v14006_v40  ;;  %v14053_v40 = vld [vmem:[#allocation8 + $0xbe4] ss:$16 sps:$4 sm:$0xff]  }
 0x3e3   : > { %5089 = vmatpush1.bf16.msra.mxu0 %v14001_v7  ;;  %v14059_v7 = vld [vmem:[#allocation8 + $0x90c] ss:$16 sps:$4 sm:$0xff]  }
 0x3e4   : > { %5896 = vmatpush1.bf16.msra.mxu1 %v14004_v45  ;;  %5799 = vmatprep.subr.bf16.mxu0 %v14009_v12  ;;  %v14062_v45 = vld [vmem:[#allocation8 + $0xd04] ss:$16 sps:$4 sm:$0xff]   ;;  %v14057_v12 = vld [vmem:[#allocation8 + $0x908] ss:$16 sps:$4 sm:$0xff]  }
 0x3e5   : > { %6519 = vmatprep.subr.bf16.mxu1 %v14012_v30  ;;  %v14068_v30 = vld [vmem:[#allocation8 + $0xd24] ss:$16 sps:$4 sm:$0xff]  }
 0x3e6   : > { %5091 = vmatmul.mubr.bf16.vlgmr.msra.gmra.mrb[76].mxu0 %v16030_v24  ;;  %v14024_v24 = vld [vmem:[#allocation8 + $0xc40] ss:$16 sps:$4 sm:$0xff]  }
 0x3e7   : > { %5914 = vmatmul.mubr.bf16.vlgmr.msra.gmra.mrb[48].mxu1 %v16086_v4  ;;  %5800 = vmatpush1.bf16.msra.mxu0 %v14007_v46  ;;  %v14066_v46 = vld [vmem:[#allocation8 + $0xd20] ss:$16 sps:$4 sm:$0xff]  }
 0x3e8   : > { %6520 = vmatpush1.bf16.msra.mxu1 %v14010_v18  ;;  %6551 = vmatprep.mubr.bf16.mxu1 %v16089_v50  ;;  %v14071_v18 = vld [vmem:[#allocation8 + $0x94c] ss:$16 sps:$4 sm:$0xff]  }
 0x3e9   : > { %5801 = vmatprep.subr.bf16.mxu0 %v14017_v11  ;;  %6521 = vmatprep.subr.bf16.mxu1 %v14020_v15  ;;  %v14074_v11 = vld [vmem:[#allocation8 + $0xd44] ss:$16 sps:$4 sm:$0xff]   ;;  %v14069_v15 = vld [vmem:[#allocation8 + $0x948] ss:$16 sps:$4 sm:$0xff]  }
 0x3ea   : > { %5831 = vmatprep.mubr.bf16.mxu0 %v14787_v0 }
 0x3eb   : > { %5802 = vmatpush1.bf16.msra.mxu0 %v14015_v22  ;;  %v14072_v22 = vld [vmem:[#allocation8 + $0xd40] ss:$16 sps:$4 sm:$0xff]  }
 0x3ec   : > { %6522 = vmatpush1.bf16.msra.mxu1 %v14018_v43  ;;  %5803 = vmatprep.subr.bf16.mxu0 %v14023_v10  ;;  %v14077_v43 = vld [vmem:[#allocation8 + $0x96c] ss:$16 sps:$4 sm:$0xff]   ;;  %v14080_v10 = vld [vmem:[#allocation8 + $0xd64] ss:$16 sps:$4 sm:$0xff]  }
 0x3ed   : > { %6523 = vmatprep.subr.bf16.mxu1 %v14026_v1  ;;  %v14083_v1 = vld [vmem:[#allocation8 + $0x98c] ss:$16 sps:$4 sm:$0xff]  }
 0x3ef   : > { %5804 = vmatpush1.bf16.msra.mxu0 %v14021_v20  ;;  %v14086_v20 = vld [vmem:[#allocation8 + $0xd84] ss:$16 sps:$4 sm:$0xff]  }
 0x3f0   : > { %6524 = vmatpush1.bf16.msra.mxu1 %v14024_v24  ;;  %5805 = vmatprep.subr.bf16.mxu0 %v14029_v62  ;;  %v14081_v24 = vld [vmem:[#allocation8 + $0x988] ss:$16 sps:$4 sm:$0xff]   ;;  %v14084_v62 = vld [vmem:[#allocation8 + $0xd80] ss:$16 sps:$4 sm:$0xff]  }
 0x3f1   : > { %6525 = vmatprep.subr.bf16.mxu1 %v14032_v23  ;;  %v14089_v23 = vld [vmem:[#allocation8 + $0x9ac] ss:$16 sps:$4 sm:$0xff]  }
 0x3f3   : > { %5806 = vmatpush1.bf16.msra.mxu0 %v14027_v33  ;;  %v14092_v33 = vld [vmem:[#allocation8 + $0xda4] ss:$16 sps:$4 sm:$0xff]  }
 0x3f4   : > { %6526 = vmatpush1.bf16.msra.mxu1 %v14030_v3  ;;  %5807 = vmatprep.subr.bf16.mxu0 %v14035_v55  ;;  %v14087_v3 = vld [vmem:[#allocation8 + $0x9a8] ss:$16 sps:$4 sm:$0xff]   ;;  %v14090_v55 = vld [vmem:[#allocation8 + $0xda0] ss:$16 sps:$4 sm:$0xff]  }
 0x3f5   : > { %6527 = vmatprep.subr.bf16.mxu1 %v14038_v57  ;;  %v14095_v57 = vld [vmem:[#allocation8 + $0x9cc] ss:$16 sps:$4 sm:$0xff]  }
 0x3f7   : > { %5808 = vmatpush1.bf16.msra.mxu0 %v14033_v2 }
 0x3f8   : > { %6528 = vmatpush1.bf16.msra.mxu1 %v14036_v17  ;;  %5809 = vmatprep.subr.bf16.mxu0 %v14041_v60  ;;  %v14098_v17 = vld [vmem:[#allocation8 + $0xdc4] ss:$16 sps:$4 sm:$0xff]  }
 0x3f9   : > { %v3685_v44 = vpop.f32.mrb[60].mxu0  ;;  %6529 = vmatprep.subr.bf16.mxu1 %v14044_v56 }
 0x3fa   : > { %v16095_v28 = vadd.f32 %v16052_v52, %v3685_v44  ;;  %v16097_v5 = vpop.f32.mrb[32].mxu1  ;;  %v3687_v37 = vpop.f32.mrb[61].mxu0  ;;  %v14056_v52 = vld [vmem:[#allocation8 + $0xce4] ss:$16 sps:$4 sm:$0xff]  }
 0x3fb   : > { %v16100_v19 = vadd.f32 %v16056_v13, %v3687_v37  ;;  %v16102_v16 = vpop.f32.mrb[33].mxu1  ;;  %v3689_v38 = vpop.f32.mrb[62].mxu0  ;;  %5810 = vmatpush1.bf16.msra.mxu0 %v14039_v34  ;;  %v14054_v13 = vld [vmem:[#allocation8 + $0xce0] ss:$16 sps:$4 sm:$0xff]   ;;  %v14101_v37 = vld [vmem:[#allocation8 + $0x9ec] ss:$16 sps:$4 sm:$0xff]  }
 0x3fc   : > { %v4380_v47 = vpop.f32.mrb[34].mxu1  ;;  %6530 = vmatpush1.bf16.msra.mxu1 %v14042_v8  ;;  %v3690_v58 = vpop.f32.mrb[63].mxu0  ;;  %5811 = vmatprep.subr.bf16.mxu0 %v14047_v41  ;;  %v14093_v41 = vld [vmem:[#allocation8 + $0x9c8] ss:$16 sps:$4 sm:$0xff]   ;;  %v14104_v38 = vld [vmem:[#allocation8 + $0xde4] ss:$16 sps:$4 sm:$0xff]  }
 0x3fd   : > { %v4381_v42 = vpop.f32.mrb[35].mxu1  ;;  %6531 = vmatprep.subr.bf16.mxu1 %v14050_v27  ;;  %v14096_v27 = vld [vmem:[#allocation8 + $0xdc0] ss:$16 sps:$4 sm:$0xff]   ;;  %v14107_v47 = vld [vmem:[#allocation8 + $0xa0c] ss:$16 sps:$4 sm:$0xff]  }
 0x3fe   : > { %v14110_v58 = vld [vmem:[#allocation8 + $0xe0c] ss:$16 sps:$4 sm:$0xff]  }
 0x3ff   : > { %5812 = vmatpush1.bf16.msra.mxu0 %v14045_v9  ;;  %v14099_v9 = vld [vmem:[#allocation8 + $0x9e8] ss:$16 sps:$4 sm:$0xff]   ;;  %v14113_v42 = vld [vmem:[#allocation8 + $0xa2c] ss:$16 sps:$4 sm:$0xff]  }
 0x400   : > { %6532 = vmatpush1.bf16.msra.mxu1 %v14048_v51  ;;  %5813 = vmatprep.subr.bf16.mxu0 %v14053_v40  ;;  %v14105_v51 = vld [vmem:[#allocation8 + $0xa08] ss:$16 sps:$4 sm:$0xff]  }
 0x401   : > { %6533 = vmatprep.subr.bf16.mxu1 %v14056_v52  ;;  %v14108_v40 = vld [vmem:[#allocation8 + $0xe08] ss:$16 sps:$4 sm:$0xff]  }
 0x403   : > { %5814 = vmatpush1.bf16.msra.mxu0 %v14051_v29  ;;  %v14116_v29 = vld [vmem:[#allocation8 + $0xe2c] ss:$16 sps:$4 sm:$0xff]  }
 0x404   : > { %6534 = vmatpush1.bf16.msra.mxu1 %v14054_v13  ;;  %5840 = vmatprep.subr.bf16.mxu0 %v14059_v7  ;;  %v14111_v13 = vld [vmem:[#allocation8 + $0xa28] ss:$16 sps:$4 sm:$0xff]  }
 0x405   : > { %6535 = vmatprep.subr.bf16.mxu1 %v14062_v45  ;;  %v14114_v7 = vld [vmem:[#allocation8 + $0xe28] ss:$16 sps:$4 sm:$0xff]  }
 0x406   : > { %5832 = vmatmul.mubr.bf16.vlgmr.msra.gmra.mrb[80].mxu0 %v16086_v4  ;;  %v14075_v4 = vld [vmem:[#allocation8 + $0x968] ss:$16 sps:$4 sm:$0xff]  }
 0x407   : > { %5841 = vmatpush1.bf16.msra.mxu0 %v14057_v12  ;;  %5872 = vmatprep.mubr.bf16.mxu0 %v16045_v48  ;;  %v14078_v48 = vld [vmem:[#allocation8 + $0xd60] ss:$16 sps:$4 sm:$0xff]   ;;  %v14117_v45 = vld [vmem:[#allocation8 + $0xa48] ss:$16 sps:$4 sm:$0xff]  }
 0x408   : > { %6536 = vmatpush1.bf16.msra.mxu1 %v14060_v61  ;;  %5842 = vmatprep.subr.bf16.mxu0 %v14065_v54  ;;  %v14120_v12 = vld [vmem:[#allocation8 + $0xe48] ss:$16 sps:$4 sm:$0xff]   ;;  %v14125_v61 = vld [vmem:[#allocation8 + $0xa6c] ss:$16 sps:$4 sm:$0xff]  }
 0x409   : > { %6537 = vmatprep.subr.bf16.mxu1 %v14068_v30  ;;  %v14128_v54 = vld [vmem:[#allocation8 + $0xe6c] ss:$16 sps:$4 sm:$0xff]   ;;  %v14123_v30 = vld [vmem:[#allocation8 + $0xa68] ss:$16 sps:$4 sm:$0xff]  }
 0x40b   : > { %5843 = vmatpush1.bf16.msra.mxu0 %v14063_v25  ;;  %v14126_v25 = vld [vmem:[#allocation8 + $0xe68] ss:$16 sps:$4 sm:$0xff]  }
 0x40c   : > { %6538 = vmatpush1.bf16.msra.mxu1 %v14066_v46  ;;  %5844 = vmatprep.subr.bf16.mxu0 %v14071_v18  ;;  %v14131_v46 = vld [vmem:[#allocation8 + $0xa8c] ss:$16 sps:$4 sm:$0xff]  }
 0x40d   : > { %6539 = vmatprep.subr.bf16.mxu1 %v14074_v11  ;;  %v14134_v18 = vld [vmem:[#allocation8 + $0xe8c] ss:$16 sps:$4 sm:$0xff]   ;;  %v14129_v11 = vld [vmem:[#allocation8 + $0xa88] ss:$16 sps:$4 sm:$0xff]  }
 0x40f   : > { %5845 = vmatpush1.bf16.msra.mxu0 %v14069_v15  ;;  %v14132_v15 = vld [vmem:[#allocation8 + $0xe88] ss:$16 sps:$4 sm:$0xff]  }
 0x410   : > { %6540 = vmatpush1.bf16.msra.mxu1 %v14072_v22  ;;  %5846 = vmatprep.subr.bf16.mxu0 %v14077_v43  ;;  %v14137_v22 = vld [vmem:[#allocation8 + $0xaac] ss:$16 sps:$4 sm:$0xff]  }
 0x411   : > { %6541 = vmatprep.subr.bf16.mxu1 %v14080_v10  ;;  %v14140_v43 = vld [vmem:[#allocation8 + $0xeac] ss:$16 sps:$4 sm:$0xff]   ;;  %v14135_v10 = vld [vmem:[#allocation8 + $0xaa8] ss:$16 sps:$4 sm:$0xff]  }
 0x413   : > { %5847 = vmatpush1.bf16.msra.mxu0 %v14075_v4  ;;  %v14138_v4 = vld [vmem:[#allocation8 + $0xea8] ss:$16 sps:$4 sm:$0xff]  }
 0x414   : > { %6542 = vmatpush1.bf16.msra.mxu1 %v14078_v48  ;;  %5848 = vmatprep.subr.bf16.mxu0 %v14083_v1  ;;  %v14143_v48 = vld [vmem:[#allocation8 + $0xacc] ss:$16 sps:$4 sm:$0xff]  }
 0x415   : > { %6543 = vmatprep.subr.bf16.mxu1 %v14086_v20  ;;  %v14146_v1 = vld [vmem:[#allocation8 + $0xecc] ss:$16 sps:$4 sm:$0xff]  }
 0x417   : > { %5849 = vmatpush1.bf16.msra.mxu0 %v14081_v24 }
 0x418   : > { %6544 = vmatpush1.bf16.msra.mxu1 %v14084_v62  ;;  %5850 = vmatprep.subr.bf16.mxu0 %v14089_v23  ;;  %v14141_v62 = vld [vmem:[#allocation8 + $0xac8] ss:$16 sps:$4 sm:$0xff]  }
 0x419   : > { %v4294_v2 = vpop.f32.mrb[64].mxu0  ;;  %6545 = vmatprep.subr.bf16.mxu1 %v14092_v33  ;;  %v14144_v33 = vld [vmem:[#allocation8 + $0xec8] ss:$16 sps:$4 sm:$0xff]  }
 0x41a   : > { %v16107_v60 = vadd.f32 %v4294_v2, %v16077_v49  ;;  %v4296_v56 = vpop.f32.mrb[65].mxu0  ;;  %v14102_v49 = vld [vmem:[#allocation8 + $0xde0] ss:$16 sps:$4 sm:$0xff]   ;;  %v14147_v2 = vld [vmem:[#allocation8 + $0xae8] ss:$16 sps:$4 sm:$0xff]  }
 0x41b   : > { %v16110_v34 = vadd.f32 %v4296_v56, %v16080_v21  ;;  %v4298_v8 = vpop.f32.mrb[66].mxu0  ;;  %5851 = vmatpush1.bf16.msra.mxu0 %v14087_v3  ;;  %v12408_v21 = vcombine.low %v16082_v36, %v16034_v14  ;;  %v14119_v14 = vld [vmem:[#allocation8 + $0xa4c] ss:$16 sps:$4 sm:$0xff]   ;;  %v14155_v56 = vld [vmem:[#allocation8 + $0xe04] ss:$16 sps:$4 sm:$0xff]  }
 0x41c   : > { %6546 = vmatpush1.bf16.msra.mxu1 %v14090_v55  ;;  %v4299_v44 = vpop.f32.mrb[67].mxu0  ;;  %5852 = vmatprep.subr.bf16.mxu0 %v14095_v57  ;;  %v14122_v36 = vld [vmem:[#allocation8 + $0xe4c] ss:$16 sps:$4 sm:$0xff]  }
 0x41d   : > { %6547 = vmatprep.subr.bf16.mxu1 %v14098_v17  ;;  %v16114_v52 = vrot.slane %v12408_v21, 2  ;;  %v14149_v3 = vld [vmem:[#allocation8 + $0xaec] ss:$16 sps:$4 sm:$0xff]   ;;  %v14150_v17 = vld [vmem:[#allocation8 + $0xee8] ss:$16 sps:$4 sm:$0xff]  }
 0x41e   : > { %v14152_v57 = vld [vmem:[#allocation8 + $0xeec] ss:$16 sps:$4 sm:$0xff]   ;;  %v14153_v44 = vld [vmem:[#allocation8 + $0xe00] ss:$16 sps:$4 sm:$0xff]   ;;  %v14168_v21 = vld [vmem:[#allocation8 + $0xe84] ss:$16 sps:$4 sm:$0xff]  }
 0x41f   : > { %5853 = vmatpush1.bf16.msra.mxu0 %v14093_v41  ;;  %v5927_v8 = vld [vmem:[#allocation2 + $0x8] sm:$0xc] }
 0x420   : > { %6548 = vmatpush1.bf16.msra.mxu1 %v14096_v27  ;;  %5854 = vmatprep.subr.bf16.mxu0 %v14101_v37  ;;  %v12410_v41 = vcombine.low %v5927_v8, %v16072_v39  ;;  %v14159_v27 = vld [vmem:[#allocation8 + $0xe24] ss:$16 sps:$4 sm:$0xff]   ;;  %v14163_v39 = vld [vmem:[#allocation8 + $0xe60] ss:$16 sps:$4 sm:$0xff]  }
 0x421   : > { %6549 = vmatprep.subr.bf16.mxu1 %v14104_v38  ;;  %v14157_v38 = vld [vmem:[#allocation8 + $0xe20] ss:$16 sps:$4 sm:$0xff]  }
 0x422   : > { %v6035_v37 = vrot.slane %v12410_v41, 2  ;;  %v14199_v41 = vld [vmem:[#allocation8 + $0xce8] ss:$16 sps:$4 sm:$0xff]  }
 0x423   : > { %5855 = vmatpush1.bf16.msra.mxu0 %v14099_v9  ;;  %v14162_v9 = vld [vmem:[#allocation8 + $0xe44] ss:$16 sps:$4 sm:$0xff]  }
 0x424   : > { %6550 = vmatpush1.bf16.msra.mxu1 %v14102_v49  ;;  %5856 = vmatprep.subr.bf16.mxu0 %v14107_v47  ;;  %v14160_v49 = vld [vmem:[#allocation8 + $0xe40] ss:$16 sps:$4 sm:$0xff]   ;;  %v14165_v47 = vld [vmem:[#allocation8 + $0xe64] ss:$16 sps:$4 sm:$0xff]  }
 0x425   : > { %6642 = vmatprep.subr.bf16.mxu1 %v14110_v58  ;;  %v14166_v58 = vld [vmem:[#allocation8 + $0xe80] ss:$16 sps:$4 sm:$0xff]  }
 0x427   : > { %6552 = vmatmul.mubr.bf16.vlgmr.msra.gmra.mrb[52].mxu1 %v16114_v52  ;;  %5857 = vmatpush1.bf16.msra.mxu0 %v14105_v51  ;;  %v14171_v51 = vld [vmem:[#allocation8 + $0xea4] ss:$16 sps:$4 sm:$0xff]  }
 0x428   : > { %6643 = vmatpush1.bf16.msra.mxu1 %v14108_v40  ;;  %5858 = vmatprep.subr.bf16.mxu0 %v14113_v42  ;;  %v14174_v40 = vld [vmem:[#allocation8 + $0xec4] ss:$16 sps:$4 sm:$0xff]  }
 0x429   : > { %6644 = vmatprep.subr.bf16.mxu1 %v14116_v29  ;;  %6674 = vmatprep.mubr.bf16.mxu1 %v14787_v0 }
 0x42b   : > { %5859 = vmatpush1.bf16.msra.mxu0 %v14111_v13 }
 0x42c   : > { %6645 = vmatpush1.bf16.msra.mxu1 %v14114_v7  ;;  %5860 = vmatprep.subr.bf16.mxu0 %v14119_v14 }
 0x42d   : > { %6646 = vmatprep.subr.bf16.mxu1 %v14122_v36 }
 0x42f   : > { %5861 = vmatpush1.bf16.msra.mxu0 %v14117_v45  ;;  %v14172_v45 = vld [vmem:[#allocation8 + $0xec0] ss:$16 sps:$4 sm:$0xff]  }
 0x430   : > { %6647 = vmatpush1.bf16.msra.mxu1 %v14120_v12  ;;  %5862 = vmatprep.subr.bf16.mxu0 %v14125_v61 }
 0x431   : > { %6648 = vmatprep.subr.bf16.mxu1 %v14128_v54 }
 0x433   : > { %5863 = vmatpush1.bf16.msra.mxu0 %v14123_v30  ;;  %v14177_v30 = vld [vmem:[#allocation8 + $0xee4] ss:$16 sps:$4 sm:$0xff]  }
 0x434   : > { %6649 = vmatpush1.bf16.msra.mxu1 %v14126_v25  ;;  %5864 = vmatprep.subr.bf16.mxu0 %v14131_v46  ;;  %v14175_v46 = vld [vmem:[#allocation8 + $0xee0] ss:$16 sps:$4 sm:$0xff]  }
 0x435   : > { %6650 = vmatprep.subr.bf16.mxu1 %v14134_v18  ;;  %v14178_v18 = vld [vmem:[#allocation8 + $0xc08] ss:$16 sps:$4 sm:$0xff]  }
 0x437   : > { %5865 = vmatpush1.bf16.msra.mxu0 %v14129_v11  ;;  %v14183_v11 = vld [vmem:[#allocation8 + $0xc2c] ss:$16 sps:$4 sm:$0xff]  }
 0x438   : > { %6651 = vmatpush1.bf16.msra.mxu1 %v14132_v15  ;;  %5866 = vmatprep.subr.bf16.mxu0 %v14137_v22  ;;  %v14186_v15 = vld [vmem:[#allocation8 + $0xc4c] ss:$16 sps:$4 sm:$0xff]   ;;  %v14184_v22 = vld [vmem:[#allocation8 + $0xc48] ss:$16 sps:$4 sm:$0xff]  }
 0x439   : > { %6652 = vmatprep.subr.bf16.mxu1 %v14140_v43  ;;  %v14187_v43 = vld [vmem:[#allocation8 + $0xc68] ss:$16 sps:$4 sm:$0xff]  }
 0x43a   : > { %v16118_v20 = vpop.f32.mrb[36].mxu1 }
 0x43b   : > { %v16120_v24 = vpop.f32.mrb[37].mxu1  ;;  %5867 = vmatpush1.bf16.msra.mxu0 %v14135_v10  ;;  %v14192_v10 = vld [vmem:[#allocation8 + $0xc8c] ss:$16 sps:$4 sm:$0xff]  }
 0x43c   : > { %v5014_v23 = vpop.f32.mrb[38].mxu1  ;;  %6653 = vmatpush1.bf16.msra.mxu1 %v14138_v4  ;;  %5868 = vmatprep.subr.bf16.mxu0 %v14143_v48  ;;  %v14190_v4 = vld [vmem:[#allocation8 + $0xc88] ss:$16 sps:$4 sm:$0xff]   ;;  %v14195_v48 = vld [vmem:[#allocation8 + $0xcac] ss:$16 sps:$4 sm:$0xff]  }
 0x43d   : > { %v5015_v55 = vpop.f32.mrb[39].mxu1  ;;  %6654 = vmatprep.subr.bf16.mxu1 %v14146_v1  ;;  %v14193_v1 = vld [vmem:[#allocation8 + $0xca8] ss:$16 sps:$4 sm:$0xff]  }
 0x43f   : > { %5869 = vmatpush1.bf16.msra.mxu0 %v14141_v62  ;;  %v14198_v62 = vld [vmem:[#allocation8 + $0xccc] ss:$16 sps:$4 sm:$0xff]  }
 0x440   : > { %6655 = vmatpush1.bf16.msra.mxu1 %v14144_v33  ;;  %5870 = vmatprep.subr.bf16.mxu0 %v14149_v3 }
 0x441   : > { %6656 = vmatprep.subr.bf16.mxu1 %v14152_v57  ;;  %v14196_v57 = vld [vmem:[#allocation8 + $0xcc8] ss:$16 sps:$4 sm:$0xff]  }
 0x443   : > { %5871 = vmatpush1.bf16.msra.mxu0 %v14147_v2 }
 0x444   : > { %6657 = vmatpush1.bf16.msra.mxu1 %v14150_v17  ;;  %6560 = vmatprep.subr.bf16.mxu0 %v14155_v56  ;;  %v14201_v56 = vld [vmem:[#allocation8 + $0xcec] ss:$16 sps:$4 sm:$0xff]  }
 0x446   : > { %5873 = vmatmul.mubr.bf16.vlgmr.msra.gmra.mrb[84].mxu0 %v16068_v59  ;;  %v14169_v59 = vld [vmem:[#allocation8 + $0xea0] ss:$16 sps:$4 sm:$0xff]  }
 0x447   : > { %6675 = vmatmul.mubr.bf16.vlgmr.msra.gmra.mrb[56].mxu1 %v6035_v37  ;;  %6561 = vmatpush1.bf16.msra.mxu0 %v14153_v44  ;;  %v14204_v44 = vld [vmem:[#allocation8 + $0xd0c] ss:$16 sps:$4 sm:$0xff]  }
 0x448   : > { %6562 = vmatprep.subr.bf16.mxu0 %v14159_v27  ;;  %6592 = vmatprep.mubr.bf16.mxu0 %v14787_v0  ;;  %v14205_v27 = vld [vmem:[#allocation8 + $0xd28] ss:$16 sps:$4 sm:$0xff]  }
 0x44b   : > { %6563 = vmatpush1.bf16.msra.mxu0 %v14157_v38  ;;  %v14213_v38 = vld [vmem:[#allocation8 + $0xd6c] ss:$16 sps:$4 sm:$0xff]  }
 0x44c   : > { %6564 = vmatprep.subr.bf16.mxu0 %v14162_v9  ;;  %v14211_v9 = vld [vmem:[#allocation8 + $0xd68] ss:$16 sps:$4 sm:$0xff]  }
 0x44f   : > { %6565 = vmatpush1.bf16.msra.mxu0 %v14160_v49  ;;  %v14214_v49 = vld [vmem:[#allocation8 + $0xd88] ss:$16 sps:$4 sm:$0xff]  }
 0x450   : > { %6566 = vmatprep.subr.bf16.mxu0 %v14165_v47  ;;  %v14219_v47 = vld [vmem:[#allocation8 + $0xdac] ss:$16 sps:$4 sm:$0xff]  }
 0x453   : > { %6567 = vmatpush1.bf16.msra.mxu0 %v14163_v39  ;;  %v14217_v39 = vld [vmem:[#allocation8 + $0xda8] ss:$16 sps:$4 sm:$0xff]  }
 0x454   : > { %6568 = vmatprep.subr.bf16.mxu0 %v14168_v21  ;;  %v14222_v21 = vld [vmem:[#allocation8 + $0xdcc] ss:$16 sps:$4 sm:$0xff]  }
 0x457   : > { %6569 = vmatpush1.bf16.msra.mxu0 %v14166_v58 }
 0x458   : > { %6570 = vmatprep.subr.bf16.mxu0 %v14171_v51 }
 0x459   : > { %v4335_v42 = vpop.f32.mrb[68].mxu0 }
 0x45a   : > { %v4336_v29 = vadd.f32 %v4335_v42, %v16095_v28  ;;  %v16126_v0 = vpop.f32.mrb[40].mxu1  ;;  %v4337_v13 = vpop.f32.mrb[69].mxu0  ;;  %v14225_v42 = vld [vmem:[#allocation8 + $0xdec] ss:$16 sps:$4 sm:$0xff]  }
 0x45b   : > { %v4338_v7 = vadd.f32 %v4337_v13, %v16100_v19  ;;  %v16129_v14 = vpop.f32.mrb[41].mxu1  ;;  %v4339_v36 = vpop.f32.mrb[70].mxu0  ;;  %6571 = vmatpush1.bf16.msra.mxu0 %v14169_v59  ;;  %v14180_v19 = vld [vmem:[#allocation8 + $0xc0c] ss:$16 sps:$4 sm:$0xff]   ;;  %v14220_v59 = vld [vmem:[#allocation8 + $0xdc8] ss:$16 sps:$4 sm:$0xff]  }
 0x45c   : > { %v16132_v12 = vadd.f32 %v16097_v5, %v4336_v29  ;;  %v5137_v61 = vpop.f32.mrb[42].mxu1  ;;  %v4340_v54 = vpop.f32.mrb[71].mxu0  ;;  %6572 = vmatprep.subr.bf16.mxu0 %v14174_v40  ;;  %v14181_v5 = vld [vmem:[#allocation8 + $0xc28] ss:$16 sps:$4 sm:$0xff]  }
 0x45d   : > { %v16135_v25 = vadd.f32 %v16102_v16, %v4338_v7  ;;  %v5138_v28 = vpop.f32.mrb[43].mxu1  ;;  %v14189_v16 = vld [vmem:[#allocation8 + $0xc6c] ss:$16 sps:$4 sm:$0xff]   ;;  %v14223_v13 = vld [vmem:[#allocation8 + $0xde8] ss:$16 sps:$4 sm:$0xff]  }
 0x45f   : > { %6573 = vmatpush1.bf16.msra.mxu0 %v14172_v45 }
 0x460   : > { %6574 = vmatprep.subr.bf16.mxu0 %v14177_v30 }
 0x463   : > { %6575 = vmatpush1.bf16.msra.mxu0 %v14175_v46 }
 0x464   : > { %6601 = vmatprep.subr.bf16.mxu0 %v14180_v19 }
 0x466   : > { %6593 = vmatmul.mubr.bf16.vlgmr.msra.gmra.mrb[88].mxu0 %v6035_v37  ;;  %v14210_v37 = vld [vmem:[#allocation8 + $0xd4c] ss:$16 sps:$4 sm:$0xff]  }
 0x467   : > { %6602 = vmatpush1.bf16.msra.mxu0 %v14178_v18  ;;  %6633 = vmatprep.mubr.bf16.mxu0 %v16089_v50 }
 0x468   : > { %6603 = vmatprep.subr.bf16.mxu0 %v14183_v11 }
 0x46b   : > { %6604 = vmatpush1.bf16.msra.mxu0 %v14181_v5  ;;  %v6866_v5 = vld [vmem:[#allocation11 + $0x400] sm:$0xff] }
 0x46c   : > { %6605 = vmatprep.subr.bf16.mxu0 %v14186_v15  ;;  %v6870_v15 = vld [vmem:[#allocation11 + $0x420] sm:$0xff] }
 0x46f   : > { %6606 = vmatpush1.bf16.msra.mxu0 %v14184_v22  ;;  %v12507_v22 = vcombine.low %v6866_v5, %v6870_v15 }
 0x470   : > { %6607 = vmatprep.subr.bf16.mxu0 %v14189_v16  ;;  %v12508_v16 = vcombine.high %v6866_v5, %v6870_v15  ;;  %v6919_v5 = vld [vmem:[#allocation11 + $0x5a8] sm:$0xff] }
 0x472   : > { %7640 = vmatprep.subr.bf16.mxu1 %v12508_v16 }
 0x473   : > { %6608 = vmatpush1.bf16.msra.mxu0 %v14187_v43  ;;  %v6871_v43 = vld [vmem:[#allocation11 + $0x428] sm:$0xff]  ;;  %7641 = vmatpush1.bf16.msra.mxu1 %v12507_v22 }
 0x474   : > { %6609 = vmatprep.subr.bf16.mxu0 %v14192_v10  ;;  %v6874_v10 = vld [vmem:[#allocation11 + $0x440] sm:$0xff] }
 0x477   : > { %6610 = vmatpush1.bf16.msra.mxu0 %v14190_v4 }
 0x478   : > { %6611 = vmatprep.subr.bf16.mxu0 %v14195_v48 }
 0x479   : > { %v5051_v50 = vpop.f32.mrb[72].mxu0 }
 0x47a   : > { %v5052_v23 = vadd.f32 %v5051_v50, %v16118_v20  ;;  %v5053_v33 = vpop.f32.mrb[73].mxu0  ;;  %v14202_v20 = vld [vmem:[#allocation8 + $0xd08] ss:$16 sps:$4 sm:$0xff]  }
 0x47b   : > { %v5054_v3 = vadd.f32 %v5053_v33, %v16120_v24  ;;  %v5055_v55 = vpop.f32.mrb[74].mxu0  ;;  %6612 = vmatpush1.bf16.msra.mxu0 %v14193_v1  ;;  %v14207_v24 = vld [vmem:[#allocation8 + $0xd2c] ss:$16 sps:$4 sm:$0xff]   ;;  %v6882_v50 = vld [vmem:[#allocation11 + $0x480] sm:$0xff] }
 0x47c   : > { %v16141_v2 = vadd.f32 %v5052_v23, %v16107_v60  ;;  %v5056_v17 = vpop.f32.mrb[75].mxu0  ;;  %6613 = vmatprep.subr.bf16.mxu0 %v14198_v62  ;;  %v14208_v60 = vld [vmem:[#allocation8 + $0xd48] ss:$16 sps:$4 sm:$0xff]   ;;  %v6875_v62 = vld [vmem:[#allocation11 + $0x448] sm:$0xff] }
 0x47d   : > { %v16144_v8 = vadd.f32 %v5054_v3, %v16110_v34  ;;  %v14216_v34 = vld [vmem:[#allocation8 + $0xd8c] ss:$16 sps:$4 sm:$0xff]   ;;  %v6886_v33 = vld [vmem:[#allocation11 + $0x4a0] sm:$0xff] }
 0x47e   : > { %v6887_v3 = vld [vmem:[#allocation11 + $0x4a8] sm:$0xff]  ;;  %v12524_v17 = vcombine.high %v6882_v50, %v6886_v33 }
 0x47f   : > { %6614 = vmatpush1.bf16.msra.mxu0 %v14196_v57 }
 0x480   : > { %6615 = vmatprep.subr.bf16.mxu0 %v14201_v56 }
 0x483   : > { %6616 = vmatpush1.bf16.msra.mxu0 %v14199_v41  ;;  %v6890_v41 = vld [vmem:[#allocation11 + $0x4c0] sm:$0xff] }
 0x484   : > { %6617 = vmatprep.subr.bf16.mxu0 %v14204_v44  ;;  %v6894_v44 = vld [vmem:[#allocation11 + $0x4e0] sm:$0xff] }
 0x487   : > { %6618 = vmatpush1.bf16.msra.mxu0 %v14202_v20  ;;  %v6891_v20 = vld [vmem:[#allocation11 + $0x4c8] sm:$0xff] }
 0x488   : > { %6619 = vmatprep.subr.bf16.mxu0 %v14207_v24  ;;  %v6895_v24 = vld [vmem:[#allocation11 + $0x4e8] sm:$0xff] }
 0x48b   : > { %6620 = vmatpush1.bf16.msra.mxu0 %v14205_v27  ;;  %v12523_v27 = vcombine.low %v6882_v50, %v6886_v33  ;;  %v6927_v33 = vld [vmem:[#allocation11 + $0x5e8] sm:$0xff] }
 0x48c   : > { %6621 = vmatprep.subr.bf16.mxu0 %v14210_v37 }
 0x48f   : > { %6622 = vmatpush1.bf16.msra.mxu0 %v14208_v60  ;;  %v12532_v60 = vcombine.high %v6890_v41, %v6894_v44 }
 0x490   : > { %6623 = vmatprep.subr.bf16.mxu0 %v14213_v38  ;;  %v12534_v38 = vcombine.high %v6891_v20, %v6895_v24 }
 0x493   : > { %6624 = vmatpush1.bf16.msra.mxu0 %v14211_v9  ;;  %v6898_v9 = vld [vmem:[#allocation11 + $0x500] sm:$0xff] }
 0x494   : > { %6625 = vmatprep.subr.bf16.mxu0 %v14216_v34  ;;  %v6902_v34 = vld [vmem:[#allocation11 + $0x520] sm:$0xff] }
 0x497   : > { %6626 = vmatpush1.bf16.msra.mxu0 %v14214_v49  ;;  %v6899_v49 = vld [vmem:[#allocation11 + $0x508] sm:$0xff] }
 0x498   : > { %6627 = vmatprep.subr.bf16.mxu0 %v14219_v47  ;;  %v6903_v47 = vld [vmem:[#allocation11 + $0x528] sm:$0xff] }
 0x49a   : > { %v16146_v58 = vpop.f32.mrb[44].mxu1 }
 0x49b   : > { %v16148_v51 = vpop.f32.mrb[45].mxu1  ;;  %6628 = vmatpush1.bf16.msra.mxu0 %v14217_v39  ;;  %v12531_v39 = vcombine.low %v6890_v41, %v6894_v44  ;;  %v6935_v41 = vld [vmem:[#allocation11 + $0x628] sm:$0xff] }
 0x49c   : > { %v5796_v40 = vpop.f32.mrb[46].mxu1  ;;  %6629 = vmatprep.subr.bf16.mxu0 %v14222_v21  ;;  %v12533_v21 = vcombine.low %v6891_v20, %v6895_v24  ;;  %v6938_v24 = vld [vmem:[#allocation11 + $0x640] sm:$0xff] }
 0x49d   : > { %v5797_v29 = vpop.f32.mrb[47].mxu1  ;;  %v12542_v40 = vcombine.high %v6899_v49, %v6903_v47 }
 0x49e   : > { %v6910_v29 = vld [vmem:[#allocation11 + $0x560] sm:$0xff] }
 0x49f   : > { %6630 = vmatpush1.bf16.msra.mxu0 %v14220_v59  ;;  %v12540_v59 = vcombine.high %v6898_v9, %v6902_v34 }
 0x4a0   : > { %6631 = vmatprep.subr.bf16.mxu0 %v14225_v42  ;;  %v6906_v42 = vld [vmem:[#allocation11 + $0x540] sm:$0xff] }
 0x4a3   : > { %6632 = vmatpush1.bf16.msra.mxu0 %v14223_v13  ;;  %v6907_v13 = vld [vmem:[#allocation11 + $0x548] sm:$0xff] }
 0x4a6   : > { %6634 = vmatmul.mubr.bf16.vlgmr.msra.gmra.mrb[92].mxu0 %v16114_v52 }
 0x4b9   : > { %v5092_v7 = vpop.f32.mrb[76].mxu0 }
 0x4ba   : > { %v5134_v36 = vadd.f32 %v16126_v0, %v5092_v7  ;;  %v16152_v45 = vpop.f32.mrb[48].mxu1  ;;  %v5094_v61 = vpop.f32.mrb[77].mxu0  ;;  %v6867_v0 = vld [vmem:[#allocation11 + $0x408] sm:$0xff] }
 0x4bb   : > { %v5136_v54 = vadd.f32 %v16129_v14, %v5094_v61  ;;  %v16155_v30 = vpop.f32.mrb[49].mxu1  ;;  %v5096_v28 = vpop.f32.mrb[78].mxu0  ;;  %v6878_v14 = vld [vmem:[#allocation11 + $0x460] sm:$0xff]  ;;  %v12509_v4 = vcombine.low %v6867_v0, %v6871_v43  ;;  %v12510_v48 = vcombine.high %v6867_v0, %v6871_v43  ;;  %v6911_v7 = vld [vmem:[#allocation11 + $0x568] sm:$0xff]  ;;  %v12541_v61 = vcombine.low %v6899_v49, %v6903_v47 }
 0x4bc   : > { %v16158_v46 = vadd.f32 %v5134_v36, %v16132_v12  ;;  %v5919_v19 = vpop.f32.mrb[50].mxu1  ;;  %v5097_v18 = vpop.f32.mrb[79].mxu0  ;;  %v12516_v1 = vcombine.high %v6874_v10, %v6878_v14  ;;  %v6879_v12 = vld [vmem:[#allocation11 + $0x468] sm:$0xff]  ;;  %v12515_v55 = vcombine.low %v6874_v10, %v6878_v14  ;;  %v12539_v36 = vcombine.low %v6898_v9, %v6902_v34  ;;  %v6946_v47 = vld [vmem:[#allocation11 + $0x680] sm:$0xff] }
 0x4bd   : > { %v16161_v11 = vadd.f32 %v5136_v54, %v16135_v25  ;;  %v5920_v52 = vpop.f32.mrb[51].mxu1  ;;  %v12518_v23 = vcombine.high %v6875_v62, %v6879_v12  ;;  %v6883_v25 = vld [vmem:[#allocation11 + $0x488] sm:$0xff]  ;;  %7681 = vmatprep.subr.bf16.mxu0 %v12510_v48  ;;  %v12517_v57 = vcombine.low %v6875_v62, %v6879_v12  ;;  %v12548_v54 = vcombine.high %v6906_v42, %v6910_v29  ;;  %v6914_v19 = vld [vmem:[#allocation11 + $0x580] sm:$0xff] }
 0x4be   : > { %7682 = vmatpush1.bf16.msra.mxu0 %v12509_v4  ;;  %7642 = vmatprep.subr.bf16.mxu1 %v12516_v1  ;;  %v12526_v56 = vcombine.high %v6883_v25, %v6887_v3  ;;  %v12525_v37 = vcombine.low %v6883_v25, %v6887_v3  ;;  %v12550_v28 = vcombine.high %v6907_v13, %v6911_v7  ;;  %v6918_v18 = vld [vmem:[#allocation11 + $0x5a0] sm:$0xff]  ;;  %v6915_v52 = vld [vmem:[#allocation11 + $0x588] sm:$0xff] }
 0x4bf   : > { %7683 = vmatprep.subr.bf16.mxu0 %v12518_v23  ;;  %7643 = vmatpush1.bf16.msra.mxu1 %v12515_v55  ;;  %v12547_v0 = vcombine.low %v6906_v42, %v6910_v29  ;;  %v12549_v43 = vcombine.low %v6907_v13, %v6911_v7  ;;  %v12556_v10 = vcombine.high %v6914_v19, %v6918_v18  ;;  %v6922_v1 = vld [vmem:[#allocation11 + $0x5c0] sm:$0xff]  ;;  %v6923_v23 = vld [vmem:[#allocation11 + $0x5c8] sm:$0xff] }
 0x4c0   : > { %7644 = vmatprep.subr.bf16.mxu1 %v12524_v17  ;;  %v12558_v48 = vcombine.high %v6915_v52, %v6919_v5  ;;  %v6926_v62 = vld [vmem:[#allocation11 + $0x5e0] sm:$0xff]  ;;  %v12555_v25 = vcombine.low %v6914_v19, %v6918_v18  ;;  %v12557_v3 = vcombine.low %v6915_v52, %v6919_v5  ;;  %v12566_v55 = vcombine.high %v6923_v23, %v6927_v33  ;;  %v6955_v5 = vld [vmem:[#allocation11 + $0x6c8] sm:$0xff] }
 0x4c1   : > { %v6934_v17 = vld [vmem:[#allocation11 + $0x620] sm:$0xff]  ;;  %v12565_v44 = vcombine.low %v6923_v23, %v6927_v33 }
 0x4c2   : > { %7684 = vmatpush1.bf16.msra.mxu0 %v12517_v57  ;;  %v6930_v57 = vld [vmem:[#allocation11 + $0x600] sm:$0xff] }
 0x4c3   : > { %7685 = vmatprep.subr.bf16.mxu0 %v12526_v56  ;;  %7645 = vmatpush1.bf16.msra.mxu1 %v12523_v27  ;;  %v6931_v56 = vld [vmem:[#allocation11 + $0x608] sm:$0xff]  ;;  %v12572_v20 = vcombine.high %v6930_v57, %v6934_v17  ;;  %v6942_v27 = vld [vmem:[#allocation11 + $0x660] sm:$0xff] }
 0x4c4   : > { %7646 = vmatprep.subr.bf16.mxu1 %v12532_v60  ;;  %v6943_v60 = vld [vmem:[#allocation11 + $0x668] sm:$0xff]  ;;  %v12573_v9 = vcombine.low %v6931_v56, %v6935_v41  ;;  %v12580_v34 = vcombine.high %v6938_v24, %v6942_v27  ;;  %v6954_v18 = vld [vmem:[#allocation11 + $0x6c0] sm:$0xff] }
 0x4c5   : > { %v6958_v52 = vld [vmem:[#allocation11 + $0x6e0] sm:$0xff] }
 0x4c6   : > { %7686 = vmatpush1.bf16.msra.mxu0 %v12525_v37  ;;  %v6939_v37 = vld [vmem:[#allocation11 + $0x648] sm:$0xff]  ;;  %v6970_v33 = vld [vmem:[#allocation11 + $0x740] sm:$0xff] }
 0x4c7   : > { %7687 = vmatprep.subr.bf16.mxu0 %v12534_v38  ;;  %7647 = vmatpush1.bf16.msra.mxu1 %v12531_v39  ;;  %v12571_v38 = vcombine.low %v6930_v57, %v6934_v17  ;;  %v12582_v49 = vcombine.high %v6939_v37, %v6943_v60  ;;  %v6950_v39 = vld [vmem:[#allocation11 + $0x6a0] sm:$0xff]  ;;  %v12581_v42 = vcombine.low %v6939_v37, %v6943_v60 }
 0x4c8   : > { %7648 = vmatprep.subr.bf16.mxu1 %v12540_v59  ;;  %v6951_v59 = vld [vmem:[#allocation11 + $0x6a8] sm:$0xff]  ;;  %v12588_v29 = vcombine.high %v6946_v47, %v6950_v39  ;;  %v12587_v7 = vcombine.low %v6946_v47, %v6950_v39  ;;  %v6990_v37 = vld [vmem:[#allocation11 + $0x7e0] sm:$0xff] }
 0x4ca   : > { %7688 = vmatpush1.bf16.msra.mxu0 %v12533_v21  ;;  %v6947_v21 = vld [vmem:[#allocation11 + $0x688] sm:$0xff] }
 0x4cb   : > { %7689 = vmatprep.subr.bf16.mxu0 %v12542_v40  ;;  %7649 = vmatpush1.bf16.msra.mxu1 %v12539_v36  ;;  %v12579_v40 = vcombine.low %v6938_v24, %v6942_v27  ;;  %v12590_v13 = vcombine.high %v6947_v21, %v6951_v59  ;;  %v12589_v36 = vcombine.low %v6947_v21, %v6951_v59  ;;  %v6983_v24 = vld [vmem:[#allocation11 + $0x7a8] sm:$0xff]  ;;  %v6986_v27 = vld [vmem:[#allocation11 + $0x7c0] sm:$0xff]  ;;  %v16175_v21 = vld [vmem:[#allocation11 + $0x410] sm:$0xff] }
 0x4cc   : > { %7650 = vmatprep.subr.bf16.mxu1 %v12548_v54  ;;  %v12627_v39 = vcombine.low %v6986_v27, %v6990_v37  ;;  %v16177_v59 = vld [vmem:[#allocation11 + $0x430] sm:$0xff] }
 0x4ce   : > { %7690 = vmatpush1.bf16.msra.mxu0 %v12541_v61 }
 0x4cf   : > { %7691 = vmatprep.subr.bf16.mxu0 %v12550_v28  ;;  %7651 = vmatpush1.bf16.msra.mxu1 %v12547_v0  ;;  %v6959_v0 = vld [vmem:[#allocation11 + $0x6e8] sm:$0xff] }
 0x4d0   : > { %7652 = vmatprep.subr.bf16.mxu1 %v12556_v10  ;;  %v6962_v10 = vld [vmem:[#allocation11 + $0x700] sm:$0xff] }
 0x4d2   : > { %7692 = vmatpush1.bf16.msra.mxu0 %v12549_v43  ;;  %v12598_v43 = vcombine.high %v6955_v5, %v6959_v0 }
 0x4d3   : > { %7693 = vmatprep.subr.bf16.mxu0 %v12558_v48  ;;  %7653 = vmatpush1.bf16.msra.mxu1 %v12555_v25  ;;  %v6974_v25 = vld [vmem:[#allocation11 + $0x760] sm:$0xff] }
 0x4d4   : > { %v12611_v57 = vcombine.low %v6970_v33, %v6974_v25 }
 0x4d6   : > { %7694 = vmatpush1.bf16.msra.mxu0 %v12557_v3  ;;  %v6971_v3 = vld [vmem:[#allocation11 + $0x748] sm:$0xff] }
 0x4d7   : > { %7695 = vmatprep.subr.bf16.mxu0 %v12566_v55  ;;  %v6975_v55 = vld [vmem:[#allocation11 + $0x768] sm:$0xff] }
 0x4d8   : > { %v12613_v17 = vcombine.low %v6971_v3, %v6975_v55 }
 0x4d9   : > { %v5833_v15 = vpop.f32.mrb[80].mxu0 }
 0x4da   : > { %v5834_v22 = vadd.f32 %v5833_v15, %v16146_v58  ;;  %v5835_v16 = vpop.f32.mrb[81].mxu0  ;;  %7696 = vmatpush1.bf16.msra.mxu0 %v12565_v44  ;;  %v12596_v15 = vcombine.high %v6954_v18, %v6958_v52  ;;  %v6979_v44 = vld [vmem:[#allocation11 + $0x788] sm:$0xff] }
 0x4db   : > { %v5836_v14 = vadd.f32 %v5835_v16, %v16148_v51  ;;  %v5837_v4 = vpop.f32.mrb[82].mxu0  ;;  %v12564_v51 = vcombine.high %v6922_v1, %v6926_v62  ;;  %v12597_v16 = vcombine.low %v6955_v5, %v6959_v0  ;;  %v12621_v60 = vcombine.low %v6979_v44, %v6983_v24 }
 0x4dc   : > { %v16166_v12 = vadd.f32 %v5834_v22, %v16141_v2  ;;  %v5838_v50 = vpop.f32.mrb[83].mxu0  ;;  %v12563_v2 = vcombine.low %v6922_v1, %v6926_v62  ;;  %v12595_v22 = vcombine.low %v6954_v18, %v6958_v52  ;;  %v6963_v4 = vld [vmem:[#allocation11 + $0x708] sm:$0xff] }
 0x4dd   : > { %v16169_v58 = vadd.f32 %v5836_v14, %v16144_v8  ;;  %7654 = vmatprep.subr.bf16.mxu1 %v12564_v51  ;;  %v12574_v8 = vcombine.high %v6931_v56, %v6935_v41  ;;  %v6966_v14 = vld [vmem:[#allocation11 + $0x720] sm:$0xff]  ;;  %v6967_v1 = vld [vmem:[#allocation11 + $0x728] sm:$0xff]  ;;  %v12612_v51 = vcombine.high %v6970_v33, %v6974_v25  ;;  %v12614_v56 = vcombine.high %v6971_v3, %v6975_v55  ;;  %v6687_v25 = vld [vmem:[#allocation9] sm:$0xf] }
 0x4de   : > { %7655 = vmatpush1.bf16.msra.mxu1 %v12563_v2  ;;  %v12604_v48 = vcombine.high %v6962_v10, %v6966_v14  ;;  %v12603_v62 = vcombine.low %v6962_v10, %v6966_v14  ;;  %v12605_v50 = vcombine.low %v6963_v4, %v6967_v1  ;;  %v12606_v23 = vcombine.high %v6963_v4, %v6967_v1  ;;  %v6978_v41 = vld [vmem:[#allocation11 + $0x780] sm:$0xff] }
 0x4df   : > { %7656 = vmatprep.subr.bf16.mxu1 %v12572_v20  ;;  %7697 = vmatprep.subr.bf16.mxu0 %v12574_v8  ;;  %v6982_v2 = vld [vmem:[#allocation11 + $0x7a0] sm:$0xff]  ;;  %v6696_v3 = vrot.slane %v6687_v25, %v15683_v26 }
 0x4e0   : > { %7698 = vmatpush1.bf16.msra.mxu0 %v12573_v9  ;;  %v12619_v20 = vcombine.low %v6978_v41, %v6982_v2  ;;  %v12620_v8 = vcombine.high %v6978_v41, %v6982_v2  ;;  %v12628_v9 = vcombine.high %v6986_v27, %v6990_v37 }
 0x4e1   : > { %7699 = vmatprep.subr.bf16.mxu0 %v12582_v49  ;;  %v6991_v49 = vld [vmem:[#allocation11 + $0x7e8] sm:$0xff] }
 0x4e2   : > { %7657 = vmatpush1.bf16.msra.mxu1 %v12571_v38  ;;  %v12622_v38 = vcombine.high %v6979_v44, %v6983_v24 }
 0x4e3   : > { %7658 = vmatprep.subr.bf16.mxu1 %v12580_v34  ;;  %v6987_v34 = vld [vmem:[#allocation11 + $0x7c8] sm:$0xff] }
 0x4e4   : > { %7700 = vmatpush1.bf16.msra.mxu0 %v12581_v42  ;;  %v12630_v47 = vcombine.high %v6987_v34, %v6991_v49  ;;  %v12629_v42 = vcombine.low %v6987_v34, %v6991_v49 }
 0x4e5   : > { %7701 = vmatprep.subr.bf16.mxu0 %v12590_v13  ;;  %v12512_v13 = vcombine.high %v16175_v21, %v16177_v59 }
 0x4e6   : > { %7659 = vmatpush1.bf16.msra.mxu1 %v12579_v40  ;;  %v16179_v40 = vld [vmem:[#allocation11 + $0x418] sm:$0xff] }
 0x4e7   : > { %7660 = vmatprep.subr.bf16.mxu1 %v12588_v29  ;;  %v12511_v29 = vcombine.low %v16175_v21, %v16177_v59 }
 0x4e8   : > { %7702 = vmatpush1.bf16.msra.mxu0 %v12589_v36 }
 0x4e9   : > { %7703 = vmatprep.subr.bf16.mxu0 %v12598_v43 }
 0x4ea   : > { %7661 = vmatpush1.bf16.msra.mxu1 %v12587_v7  ;;  %v16185_v7 = vld [vmem:[#allocation11 + $0x438] sm:$0xff] }
 0x4eb   : > { %7662 = vmatprep.subr.bf16.mxu1 %v12596_v15  ;;  %v12513_v36 = vcombine.low %v16179_v40, %v16185_v7 }
 0x4ec   : > { %7704 = vmatpush1.bf16.msra.mxu0 %v12597_v16 }
 0x4ed   : > { %7705 = vmatprep.subr.bf16.mxu0 %v12606_v23 }
 0x4ee   : > { %7663 = vmatpush1.bf16.msra.mxu1 %v12595_v22 }
 0x4ef   : > { %7664 = vmatprep.subr.bf16.mxu1 %v12604_v48 }
 0x4f0   : > { %7706 = vmatpush1.bf16.msra.mxu0 %v12605_v50 }
 0x4f1   : > { %7707 = vmatprep.subr.bf16.mxu0 %v12614_v56 }
 0x4f2   : > { %7665 = vmatpush1.bf16.msra.mxu1 %v12603_v62 }
 0x4f3   : > { %7666 = vmatprep.subr.bf16.mxu1 %v12612_v51 }
 0x4f4   : > { %7708 = vmatpush1.bf16.msra.mxu0 %v12613_v17 }
 0x4f5   : > { %7709 = vmatprep.subr.bf16.mxu0 %v12622_v38 }
 0x4f6   : > { %7667 = vmatpush1.bf16.msra.mxu1 %v12611_v57 }
 0x4f7   : > { %7668 = vmatprep.subr.bf16.mxu1 %v12620_v8 }
 0x4f8   : > { %7710 = vmatpush1.bf16.msra.mxu0 %v12621_v60 }
 0x4f9   : > { %7711 = vmatprep.subr.bf16.mxu0 %v12630_v47 }
 0x4fa   : > { %v16171_v61 = vpop.f32.mrb[52].mxu1  ;;  %7669 = vmatpush1.bf16.msra.mxu1 %v12619_v20 }
 0x4fb   : > { %v16173_v54 = vpop.f32.mrb[53].mxu1  ;;  %7670 = vmatprep.subr.bf16.mxu1 %v12628_v9 }
 0x4fc   : > { %v6557_v28 = vpop.f32.mrb[54].mxu1  ;;  %7712 = vmatpush1.bf16.msra.mxu0 %v12629_v42 }
 0x4fd   : > { %v6558_v19 = vpop.f32.mrb[55].mxu1  ;;  %v12514_v28 = vcombine.high %v16179_v40, %v16185_v7  ;;  %v6900_v7 = vld [vmem:[#allocation11 + $0x510] sm:$0xff] }
 0x4fe   : > { %7671 = vmatpush1.bf16.msra.mxu1 %v12627_v39 }
 0x4ff   : > { %7722 = vmatprep.subr.bf16.mxu1 %v12512_v13  ;;  %7763 = vmatprep.subr.bf16.mxu0 %v12514_v28 }
 0x519   : > { %v5874_v19 = vpop.f32.mrb[84].mxu0 }
 0x51a   : > { %v5916_v18 = vadd.f32 %v16152_v45, %v5874_v19  ;;  %v6676_v52 = vpop.f32.mrb[56].mxu1  ;;  %v5876_v5 = vpop.f32.mrb[85].mxu0 }
 0x51b   : > { %v5918_v15 = vadd.f32 %v16155_v30, %v5876_v5  ;;  %v6678_v0 = vpop.f32.mrb[57].mxu1  ;;  %v5878_v22 = vpop.f32.mrb[86].mxu0  ;;  %v6880_v5 = vld [vmem:[#allocation11 + $0x470] sm:$0xff] }
 0x51c   : > { %v5924_v16 = vadd.f32 %v5916_v18, %v16158_v46  ;;  %v6680_v43 = vpop.f32.mrb[58].mxu1  ;;  %v5879_v10 = vpop.f32.mrb[87].mxu0  ;;  %v6692_v46 = vrot.slane %v6687_v25, %v15672_v63 }
 0x51d   : > { %v5925_v14 = vadd.f32 %v5918_v15, %v16161_v11  ;;  %v6681_v4 = vpop.f32.mrb[59].mxu1  ;;  %v6877_v15 = vld [vmem:[#allocation11 + $0x458] sm:$0xff]  ;;  %v6884_v43 = vld [vmem:[#allocation11 + $0x490] sm:$0xff] }
 0x51e   : > { %v6888_v4 = vld [vmem:[#allocation11 + $0x4b0] sm:$0xff] }
 0x51f   : > { %v12527_v21 = vcombine.low %v6884_v43, %v6888_v4 }
 0x539   : > { %v6594_v48 = vpop.f32.mrb[88].mxu0 }
 0x53a   : > { %v6595_v1 = vadd.f32 %v6594_v48, %v16171_v61  ;;  %v6596_v62 = vpop.f32.mrb[89].mxu0  ;;  %v6700_v61 = vrot.slane %v6687_v25, %v15680_v31  ;;  %v6885_v48 = vld [vmem:[#allocation11 + $0x498] sm:$0xff] }
 0x53b   : > { %v6597_v50 = vadd.f32 %v6596_v62, %v16173_v54  ;;  %v6598_v45 = vpop.f32.mrb[90].mxu0  ;;  %v6704_v54 = vrot.slane %v6687_v25, %v15666_v53  ;;  %v6893_v25 = vld [vmem:[#allocation11 + $0x4d8] sm:$0xff] }
 0x53c   : > { %v6683_v23 = vadd.f32 %v6595_v1, %v16166_v12  ;;  %v6599_v33 = vpop.f32.mrb[91].mxu0  ;;  %v6889_v1 = vld [vmem:[#allocation11 + $0x4b8] sm:$0xff]  ;;  %v12528_v45 = vcombine.high %v6884_v43, %v6888_v4 }
 0x53d   : > { %v6684_v30 = vadd.f32 %v6597_v50, %v16169_v58  ;;  %v6892_v33 = vld [vmem:[#allocation11 + $0x4d0] sm:$0xff]  ;;  %v12529_v59 = vcombine.low %v6885_v48, %v6889_v1 }
 0x53e   : > { %v6709_v51 = vadd.f32 %v6692_v46, %v6683_v23  ;;  %v12530_v23 = vcombine.high %v6885_v48, %v6889_v1  ;;  %v6897_v46 = vld [vmem:[#allocation11 + $0x4f8] sm:$0xff]  ;;  %v6940_v48 = vld [vmem:[#allocation11 + $0x650] sm:$0xff] }
 0x53f   : > { %v6710_v11 = vadd.f32 %v6696_v3, %v6684_v30  ;;  %v6896_v30 = vld [vmem:[#allocation11 + $0x4f0] sm:$0xff]  ;;  %v6901_v3 = vld [vmem:[#allocation11 + $0x518] sm:$0xff] }
 0x540   : > { %v6713_v12 = vmax.f32 %v6709_v51, 0.0  ;;  %v12536_v40 = vcombine.high %v6892_v33, %v6896_v30  ;;  %v6905_v51 = vld [vmem:[#allocation11 + $0x538] sm:$0xff]  ;;  %v6944_v1 = vld [vmem:[#allocation11 + $0x670] sm:$0xff] }
 0x541   : > { %v6714_v58 = vmax.f32 %v6710_v11, 0.0  ;;  %v12535_v11 = vcombine.low %v6892_v33, %v6896_v30  ;;  %v12584_v33 = vcombine.high %v6940_v48, %v6944_v1 }
 0x542   : > { %v6721_v27 = vrot.slane %v6713_v12, 1 }
 0x543   : > { %v6722_v60 = vrot.slane %v6714_v58, 1 }
 0x544   : > { %v6729_v49 = vmax.f32 %v6713_v12, %v6721_v27  ;;  %v6921_v27 = vld [vmem:[#allocation11 + $0x5b8] sm:$0xff] }
 0x545   : > { %v6730_v39 = vmax.f32 %v6714_v58, %v6722_v60 }
 0x579   : > { %v6635_v55 = vpop.f32.mrb[92].mxu0 }
 0x57a   : > { %v6677_v57 = vadd.f32 %v6676_v52, %v6635_v55  ;;  %v6637_v17 = vpop.f32.mrb[93].mxu0  ;;  %v6876_v52 = vld [vmem:[#allocation11 + $0x450] sm:$0xff]  ;;  %v12537_v55 = vcombine.low %v6893_v25, %v6897_v46 }
 0x57b   : > { %v6679_v56 = vadd.f32 %v6678_v0, %v6637_v17  ;;  %v6639_v41 = vpop.f32.mrb[94].mxu0  ;;  %v6881_v0 = vld [vmem:[#allocation11 + $0x478] sm:$0xff]  ;;  %v12520_v10 = vcombine.high %v6876_v52, %v6880_v5  ;;  %v12519_v62 = vcombine.low %v6876_v52, %v6880_v5  ;;  %v6908_v17 = vld [vmem:[#allocation11 + $0x550] sm:$0xff] }
 0x57c   : > { %v6685_v2 = vadd.f32 %v6677_v57, %v5924_v16  ;;  %v6640_v44 = vpop.f32.mrb[95].mxu0  ;;  %v12521_v50 = vcombine.low %v6877_v15, %v6881_v0  ;;  %v6913_v41 = vld [vmem:[#allocation11 + $0x578] sm:$0xff]  ;;  %v6932_v5 = vld [vmem:[#allocation11 + $0x610] sm:$0xff] }
 0x57d   : > { %v6686_v20 = vadd.f32 %v6679_v56, %v5925_v14  ;;  %v12522_v14 = vcombine.high %v6877_v15, %v6881_v0  ;;  %v6912_v56 = vld [vmem:[#allocation11 + $0x570] sm:$0xff]  ;;  %v6933_v0 = vld [vmem:[#allocation11 + $0x618] sm:$0xff] }
 0x57e   : > { %v6711_v8 = vadd.f32 %v6700_v61, %v6685_v2  ;;  %v12546_v61 = vcombine.high %v6901_v3, %v6905_v51  ;;  %v12545_v2 = vcombine.low %v6901_v3, %v6905_v51  ;;  %v12552_v44 = vcombine.high %v6908_v17, %v6912_v56  ;;  %v6936_v15 = vld [vmem:[#allocation11 + $0x630] sm:$0xff] }
 0x57f   : > { %v6712_v24 = vadd.f32 %v6704_v54, %v6686_v20  ;;  %v6909_v54 = vld [vmem:[#allocation11 + $0x558] sm:$0xff]  ;;  %v6916_v20 = vld [vmem:[#allocation11 + $0x590] sm:$0xff] }
 0x580   : > { %v6715_v37 = vmax.f32 %v6711_v8, 0.0  ;;  %v12554_v58 = vcombine.high %v6909_v54, %v6913_v41  ;;  %v6920_v8 = vld [vmem:[#allocation11 + $0x5b0] sm:$0xff]  ;;  %v12553_v60 = vcombine.low %v6909_v54, %v6913_v41 }
 0x581   : > { %v6716_v38 = vmax.f32 %v6712_v24, 0.0  ;;  %v6917_v24 = vld [vmem:[#allocation11 + $0x598] sm:$0xff]  ;;  %v6956_v3 = vld [vmem:[#allocation11 + $0x6d0] sm:$0xff] }
 0x582   : > { %v6723_v9 = vrot.slane %v6715_v37, 1  ;;  %v6960_v51 = vld [vmem:[#allocation11 + $0x6f0] sm:$0xff] }
 0x583   : > { %v6724_v34 = vrot.slane %v6716_v38, 1  ;;  %v6964_v54 = vld [vmem:[#allocation11 + $0x710] sm:$0xff] }
 0x584   : > { %v6731_v47 = vmax.f32 %v6715_v37, %v6723_v9  ;;  %v12551_v37 = vcombine.low %v6908_v17, %v6912_v56  ;;  %v12562_v9 = vcombine.high %v6917_v24, %v6921_v27  ;;  %v12600_v17 = vcombine.high %v6956_v3, %v6960_v51  ;;  %v6968_v41 = vld [vmem:[#allocation11 + $0x730] sm:$0xff] }
 0x585   : > { %v6732_v42 = vmax.f32 %v6716_v38, %v6724_v34  ;;  %v12560_v38 = vcombine.high %v6916_v20, %v6920_v8  ;;  %v6924_v34 = vld [vmem:[#allocation11 + $0x5d0] sm:$0xff] }
 0x586   : > { %v6733_v13 = vmax.f32 %v6729_v49, %v6731_v47  ;;  %v6928_v49 = vld [vmem:[#allocation11 + $0x5f0] sm:$0xff]  ;;  %v6925_v47 = vld [vmem:[#allocation11 + $0x5d8] sm:$0xff] }
 0x587   : > { %v6734_v28 = vmax.f32 %v6730_v39, %v6732_v42  ;;  %v6929_v39 = vld [vmem:[#allocation11 + $0x5f8] sm:$0xff]  ;;  %v12559_v42 = vcombine.low %v6916_v20, %v6920_v8  ;;  %v12567_v43 = vcombine.low %v6924_v34, %v6928_v49  ;;  %v12608_v20 = vcombine.high %v6964_v54, %v6968_v41 }
 0x588   : > { %v16203_v19 = vpack.c.bf16 %v6733_v13, %v6733_v13  ;;  %v12561_v13 = vcombine.low %v6917_v24, %v6921_v27  ;;  %v12570_v52 = vcombine.high %v6925_v47, %v6929_v39  ;;  %v6972_v24 = vld [vmem:[#allocation11 + $0x750] sm:$0xff] }
 0x589   : > { %v16205_v18 = vpack.c.bf16 %v6734_v28, %v6734_v28  ;;  %v12568_v28 = vcombine.high %v6924_v34, %v6928_v49  ;;  %v6976_v27 = vld [vmem:[#allocation11 + $0x770] sm:$0xff] }
 0x58a   : > { %v16209_v16 = vrot.slane %v16203_v19, 1  ;;  %v12616_v34 = vcombine.high %v6972_v24, %v6976_v27 }
 0x58b   : > { %v6997_v22 = vrot.slane %v16205_v18, 1 }
 0x58d   : > { %7672 = vmatprep.mubr.bf16.mxu1 %v6997_v22  ;;  %7713 = vmatprep.mubr.bf16.mxu0 %v6997_v22 }
 0x58e   : > { %7673 = vmatmul.mubr.bf16.vlgmr.msra.gmra.mrb[60].mxu1 %v16209_v16  ;;  %7714 = vmatmul.mubr.bf16.vlgmr.msra.gmra.mrb[96].mxu0 %v16209_v16 }
 0x58f   : > { %7723 = vmatpush1.bf16.msra.mxu1 %v12511_v29  ;;  %7764 = vmatpush1.bf16.msra.mxu0 %v12513_v36  ;;  %v12538_v29 = vcombine.high %v6893_v25, %v6897_v46  ;;  %v6904_v36 = vld [vmem:[#allocation11 + $0x530] sm:$0xff] }
 0x590   : > { %7754 = vmatprep.mubr.bf16.mxu1 %v6997_v22  ;;  %7795 = vmatprep.mubr.bf16.mxu0 %v6997_v22  ;;  %v12544_v57 = vcombine.high %v6900_v7, %v6904_v36  ;;  %v12543_v12 = vcombine.low %v6900_v7, %v6904_v36  ;;  %v6937_v22 = vld [vmem:[#allocation11 + $0x638] sm:$0xff]  ;;  %v6948_v25 = vld [vmem:[#allocation11 + $0x690] sm:$0xff] }
 0x591   : > { %7724 = vmatprep.subr.bf16.mxu1 %v12520_v10  ;;  %7765 = vmatprep.subr.bf16.mxu0 %v12522_v14  ;;  %v12569_v10 = vcombine.low %v6925_v47, %v6929_v39  ;;  %v12576_v14 = vcombine.high %v6932_v5, %v6936_v15  ;;  %v12578_v4 = vcombine.high %v6933_v0, %v6937_v22  ;;  %v6952_v46 = vld [vmem:[#allocation11 + $0x6b0] sm:$0xff] }
 0x592   : > { %v12592_v7 = vcombine.high %v6948_v25, %v6952_v46  ;;  %v6980_v47 = vld [vmem:[#allocation11 + $0x790] sm:$0xff] }
 0x593   : > { %7725 = vmatpush1.bf16.msra.mxu1 %v12519_v62  ;;  %7766 = vmatpush1.bf16.msra.mxu0 %v12521_v50  ;;  %v6941_v62 = vld [vmem:[#allocation11 + $0x658] sm:$0xff]  ;;  %v6984_v39 = vld [vmem:[#allocation11 + $0x7b0] sm:$0xff] }
 0x594   : > { %7726 = vmatprep.subr.bf16.mxu1 %v12528_v45  ;;  %7767 = vmatprep.subr.bf16.mxu0 %v12530_v23  ;;  %v6945_v50 = vld [vmem:[#allocation11 + $0x678] sm:$0xff]  ;;  %v12575_v45 = vcombine.low %v6932_v5, %v6936_v15  ;;  %v12577_v23 = vcombine.low %v6933_v0, %v6937_v22  ;;  %v12624_v5 = vcombine.high %v6980_v47, %v6984_v39  ;;  %v6988_v0 = vld [vmem:[#allocation11 + $0x7d0] sm:$0xff] }
 0x595   : > { %v12586_v30 = vcombine.high %v6941_v62, %v6945_v50  ;;  %v6992_v22 = vld [vmem:[#allocation11 + $0x7f0] sm:$0xff] }
 0x597   : > { %7727 = vmatpush1.bf16.msra.mxu1 %v12527_v21  ;;  %7768 = vmatpush1.bf16.msra.mxu0 %v12529_v59  ;;  %v6949_v21 = vld [vmem:[#allocation11 + $0x698] sm:$0xff] }
 0x598   : > { %7728 = vmatprep.subr.bf16.mxu1 %v12536_v40  ;;  %7769 = vmatprep.subr.bf16.mxu0 %v12538_v29  ;;  %v6953_v59 = vld [vmem:[#allocation11 + $0x6b8] sm:$0xff]  ;;  %v12583_v40 = vcombine.low %v6940_v48, %v6944_v1  ;;  %v12585_v29 = vcombine.low %v6941_v62, %v6945_v50  ;;  %v12632_v48 = vcombine.high %v6988_v0, %v6992_v22  ;;  %v6737_v62 = vld [vmem:[#allocation11] sm:$0xff] }
 0x599   : > { %v12594_v36 = vcombine.high %v6949_v21, %v6953_v59  ;;  %v6741_v50 = vld [vmem:[#allocation11 + $0x20] sm:$0xff] }
 0x59b   : > { %7729 = vmatpush1.bf16.msra.mxu1 %v12535_v11  ;;  %7770 = vmatpush1.bf16.msra.mxu0 %v12537_v55  ;;  %v6957_v11 = vld [vmem:[#allocation11 + $0x6d8] sm:$0xff] }
 0x59c   : > { %7730 = vmatprep.subr.bf16.mxu1 %v12544_v57  ;;  %7771 = vmatprep.subr.bf16.mxu0 %v12546_v61  ;;  %v6961_v55 = vld [vmem:[#allocation11 + $0x6f8] sm:$0xff]  ;;  %v12591_v57 = vcombine.low %v6948_v25, %v6952_v46  ;;  %v12593_v61 = vcombine.low %v6949_v21, %v6953_v59  ;;  %v12636_v25 = vcombine.high %v6737_v62, %v6741_v50  ;;  %v6745_v21 = vld [vmem:[#allocation11 + $0x40] sm:$0xff] }
 0x59d   : > { %v12602_v56 = vcombine.high %v6957_v11, %v6961_v55  ;;  %v6749_v59 = vld [vmem:[#allocation11 + $0x60] sm:$0xff] }
 0x59f   : > { %7731 = vmatpush1.bf16.msra.mxu1 %v12543_v12  ;;  %7772 = vmatpush1.bf16.msra.mxu0 %v12545_v2  ;;  %v6965_v12 = vld [vmem:[#allocation11 + $0x718] sm:$0xff] }
 0x5a0   : > { %7732 = vmatprep.subr.bf16.mxu1 %v12552_v44  ;;  %7773 = vmatprep.subr.bf16.mxu0 %v12554_v58  ;;  %v6969_v2 = vld [vmem:[#allocation11 + $0x738] sm:$0xff]  ;;  %v12599_v44 = vcombine.low %v6956_v3, %v6960_v51  ;;  %v12601_v58 = vcombine.low %v6957_v11, %v6961_v55  ;;  %v12644_v3 = vcombine.high %v6745_v21, %v6749_v59  ;;  %v6753_v11 = vld [vmem:[#allocation11 + $0x80] sm:$0xff] }
 0x5a1   : > { %v12610_v8 = vcombine.high %v6965_v12, %v6969_v2  ;;  %v6757_v55 = vld [vmem:[#allocation11 + $0xa0] sm:$0xff] }
 0x5a3   : > { %7733 = vmatpush1.bf16.msra.mxu1 %v12551_v37  ;;  %7774 = vmatpush1.bf16.msra.mxu0 %v12553_v60  ;;  %v6973_v37 = vld [vmem:[#allocation11 + $0x758] sm:$0xff] }
 0x5a4   : > { %7734 = vmatprep.subr.bf16.mxu1 %v12560_v38  ;;  %7775 = vmatprep.subr.bf16.mxu0 %v12562_v9  ;;  %v6977_v60 = vld [vmem:[#allocation11 + $0x778] sm:$0xff]  ;;  %v12607_v38 = vcombine.low %v6964_v54, %v6968_v41  ;;  %v12609_v9 = vcombine.low %v6965_v12, %v6969_v2  ;;  %v12652_v54 = vcombine.high %v6753_v11, %v6757_v55  ;;  %v6761_v12 = vld [vmem:[#allocation11 + $0xc0] sm:$0xff] }
 0x5a5   : > { %v12618_v49 = vcombine.high %v6973_v37, %v6977_v60  ;;  %v6765_v2 = vld [vmem:[#allocation11 + $0xe0] sm:$0xff] }
 0x5a7   : > { %7735 = vmatpush1.bf16.msra.mxu1 %v12559_v42  ;;  %7776 = vmatpush1.bf16.msra.mxu0 %v12561_v13  ;;  %v6981_v42 = vld [vmem:[#allocation11 + $0x798] sm:$0xff] }
 0x5a8   : > { %7736 = vmatprep.subr.bf16.mxu1 %v12568_v28  ;;  %7777 = vmatprep.subr.bf16.mxu0 %v12570_v52  ;;  %v6985_v13 = vld [vmem:[#allocation11 + $0x7b8] sm:$0xff]  ;;  %v12615_v28 = vcombine.low %v6972_v24, %v6976_v27  ;;  %v12617_v52 = vcombine.low %v6973_v37, %v6977_v60  ;;  %v6769_v27 = vld [vmem:[#allocation11 + $0x100] sm:$0xff]  ;;  %v6770_v60 = vld [vmem:[#allocation11 + $0x108] sm:$0xff] }
 0x5a9   : > { %v12626_v15 = vcombine.high %v6981_v42, %v6985_v13  ;;  %v6773_v37 = vld [vmem:[#allocation11 + $0x120] sm:$0xff] }
 0x5ab   : > { %7737 = vmatpush1.bf16.msra.mxu1 %v12567_v43  ;;  %7778 = vmatpush1.bf16.msra.mxu0 %v12569_v10  ;;  %v6989_v43 = vld [vmem:[#allocation11 + $0x7d8] sm:$0xff] }
 0x5ac   : > { %7738 = vmatprep.subr.bf16.mxu1 %v12576_v14  ;;  %7779 = vmatprep.subr.bf16.mxu0 %v12578_v4  ;;  %v6993_v10 = vld [vmem:[#allocation11 + $0x7f8] sm:$0xff]  ;;  %v12623_v14 = vcombine.low %v6980_v47, %v6984_v39  ;;  %v12625_v4 = vcombine.low %v6981_v42, %v6985_v13  ;;  %v6777_v39 = vld [vmem:[#allocation11 + $0x140] sm:$0xff]  ;;  %v6778_v13 = vld [vmem:[#allocation11 + $0x148] sm:$0xff] }
 0x5ad   : > { %v12634_v1 = vcombine.high %v6989_v43, %v6993_v10  ;;  %v6781_v42 = vld [vmem:[#allocation11 + $0x160] sm:$0xff] }
 0x5af   : > { %7739 = vmatpush1.bf16.msra.mxu1 %v12575_v45  ;;  %7780 = vmatpush1.bf16.msra.mxu0 %v12577_v23  ;;  %v6738_v45 = vld [vmem:[#allocation11 + $0x8] sm:$0xff] }
 0x5b0   : > { %7740 = vmatprep.subr.bf16.mxu1 %v12584_v33  ;;  %7781 = vmatprep.subr.bf16.mxu0 %v12586_v30  ;;  %v6742_v23 = vld [vmem:[#allocation11 + $0x28] sm:$0xff]  ;;  %v12631_v33 = vcombine.low %v6988_v0, %v6992_v22  ;;  %v12633_v30 = vcombine.low %v6989_v43, %v6993_v10  ;;  %v6785_v22 = vld [vmem:[#allocation11 + $0x180] sm:$0xff] }
 0x5b1   : > { %v12638_v46 = vcombine.high %v6738_v45, %v6742_v23  ;;  %v6789_v43 = vld [vmem:[#allocation11 + $0x1a0] sm:$0xff]  ;;  %v6786_v10 = vld [vmem:[#allocation11 + $0x188] sm:$0xff] }
 0x5b3   : > { %7741 = vmatpush1.bf16.msra.mxu1 %v12583_v40  ;;  %7782 = vmatpush1.bf16.msra.mxu0 %v12585_v29  ;;  %v6746_v40 = vld [vmem:[#allocation11 + $0x48] sm:$0xff] }
 0x5b4   : > { %7742 = vmatprep.subr.bf16.mxu1 %v12592_v7  ;;  %7783 = vmatprep.subr.bf16.mxu0 %v12594_v36  ;;  %v6750_v29 = vld [vmem:[#allocation11 + $0x68] sm:$0xff]  ;;  %v12635_v7 = vcombine.low %v6737_v62, %v6741_v50  ;;  %v12637_v36 = vcombine.low %v6738_v45, %v6742_v23  ;;  %v6793_v50 = vld [vmem:[#allocation11 + $0x1c0] sm:$0xff] }
 0x5b5   : > { %v12646_v51 = vcombine.high %v6746_v40, %v6750_v29  ;;  %v6797_v45 = vld [vmem:[#allocation11 + $0x1e0] sm:$0xff]  ;;  %v6794_v23 = vld [vmem:[#allocation11 + $0x1c8] sm:$0xff] }
 0x5b7   : > { %7743 = vmatpush1.bf16.msra.mxu1 %v12591_v57  ;;  %7784 = vmatpush1.bf16.msra.mxu0 %v12593_v61  ;;  %v6754_v57 = vld [vmem:[#allocation11 + $0x88] sm:$0xff] }
 0x5b8   : > { %7744 = vmatprep.subr.bf16.mxu1 %v12600_v17  ;;  %7785 = vmatprep.subr.bf16.mxu0 %v12602_v56  ;;  %v6758_v61 = vld [vmem:[#allocation11 + $0xa8] sm:$0xff]  ;;  %v12643_v17 = vcombine.low %v6745_v21, %v6749_v59  ;;  %v12645_v56 = vcombine.low %v6746_v40, %v6750_v29  ;;  %v6801_v59 = vld [vmem:[#allocation11 + $0x200] sm:$0xff] }
 0x5b9   : > { %v12654_v41 = vcombine.high %v6754_v57, %v6758_v61  ;;  %v6805_v40 = vld [vmem:[#allocation11 + $0x220] sm:$0xff]  ;;  %v6802_v29 = vld [vmem:[#allocation11 + $0x208] sm:$0xff] }
 0x5bb   : > { %7745 = vmatpush1.bf16.msra.mxu1 %v12599_v44  ;;  %7786 = vmatpush1.bf16.msra.mxu0 %v12601_v58  ;;  %v6762_v44 = vld [vmem:[#allocation11 + $0xc8] sm:$0xff] }
 0x5bc   : > { %7746 = vmatprep.subr.bf16.mxu1 %v12608_v20  ;;  %7787 = vmatprep.subr.bf16.mxu0 %v12610_v8  ;;  %v6766_v58 = vld [vmem:[#allocation11 + $0xe8] sm:$0xff]  ;;  %v12653_v20 = vcombine.low %v6754_v57, %v6758_v61  ;;  %v12660_v8 = vcombine.high %v6761_v12, %v6765_v2  ;;  %v6813_v57 = vld [vmem:[#allocation11 + $0x260] sm:$0xff] }
 0x5bd   : > { %v12662_v24 = vcombine.high %v6762_v44, %v6766_v58  ;;  %v6810_v61 = vld [vmem:[#allocation11 + $0x248] sm:$0xff] }
 0x5bf   : > { %7747 = vmatpush1.bf16.msra.mxu1 %v12607_v38  ;;  %7788 = vmatpush1.bf16.msra.mxu0 %v12609_v9  ;;  %v6774_v38 = vld [vmem:[#allocation11 + $0x128] sm:$0xff]  ;;  %v12659_v9 = vcombine.low %v6761_v12, %v6765_v2  ;;  %v6817_v2 = vld [vmem:[#allocation11 + $0x280] sm:$0xff] }
 0x5c0   : > { %7748 = vmatprep.subr.bf16.mxu1 %v12616_v34  ;;  %7789 = vmatprep.subr.bf16.mxu0 %v12618_v49  ;;  %v12661_v34 = vcombine.low %v6762_v44, %v6766_v58  ;;  %v12668_v49 = vcombine.high %v6769_v27, %v6773_v37  ;;  %v12670_v47 = vcombine.high %v6770_v60, %v6774_v38  ;;  %v6821_v44 = vld [vmem:[#allocation11 + $0x2a0] sm:$0xff]  ;;  %v6818_v58 = vld [vmem:[#allocation11 + $0x288] sm:$0xff] }
 0x5c3   : > { %7749 = vmatpush1.bf16.msra.mxu1 %v12615_v28  ;;  %7790 = vmatpush1.bf16.msra.mxu0 %v12617_v52  ;;  %v6782_v28 = vld [vmem:[#allocation11 + $0x168] sm:$0xff]  ;;  %v12667_v52 = vcombine.low %v6769_v27, %v6773_v37  ;;  %v6825_v37 = vld [vmem:[#allocation11 + $0x2c0] sm:$0xff] }
 0x5c4   : > { %7750 = vmatprep.subr.bf16.mxu1 %v12624_v5  ;;  %7791 = vmatprep.subr.bf16.mxu0 %v12626_v15  ;;  %v12669_v5 = vcombine.low %v6770_v60, %v6774_v38  ;;  %v12676_v15 = vcombine.high %v6777_v39, %v6781_v42  ;;  %v12678_v0 = vcombine.high %v6778_v13, %v6782_v28  ;;  %v6829_v60 = vld [vmem:[#allocation11 + $0x2e0] sm:$0xff]  ;;  %v6826_v38 = vld [vmem:[#allocation11 + $0x2c8] sm:$0xff] }
 0x5c7   : > { %7751 = vmatpush1.bf16.msra.mxu1 %v12623_v14  ;;  %7792 = vmatpush1.bf16.msra.mxu0 %v12625_v4  ;;  %v6790_v14 = vld [vmem:[#allocation11 + $0x1a8] sm:$0xff]  ;;  %v12675_v4 = vcombine.low %v6777_v39, %v6781_v42  ;;  %v6833_v42 = vld [vmem:[#allocation11 + $0x300] sm:$0xff] }
 0x5c8   : > { %7752 = vmatprep.subr.bf16.mxu1 %v12632_v48  ;;  %7793 = vmatprep.subr.bf16.mxu0 %v12634_v1  ;;  %v12677_v48 = vcombine.low %v6778_v13, %v6782_v28  ;;  %v12684_v1 = vcombine.high %v6785_v22, %v6789_v43  ;;  %v12686_v62 = vcombine.high %v6786_v10, %v6790_v14  ;;  %v6837_v13 = vld [vmem:[#allocation11 + $0x320] sm:$0xff]  ;;  %v6834_v28 = vld [vmem:[#allocation11 + $0x308] sm:$0xff] }
 0x5cb   : > { %7753 = vmatpush1.bf16.msra.mxu1 %v12631_v33  ;;  %7794 = vmatpush1.bf16.msra.mxu0 %v12633_v30  ;;  %v6798_v33 = vld [vmem:[#allocation11 + $0x1e8] sm:$0xff]  ;;  %v12683_v30 = vcombine.low %v6785_v22, %v6789_v43  ;;  %v6841_v43 = vld [vmem:[#allocation11 + $0x340] sm:$0xff] }
 0x5cc   : > { %8444 = vmatprep.subr.bf16.mxu1 %v12636_v25  ;;  %8485 = vmatprep.subr.bf16.mxu0 %v12638_v46  ;;  %v12685_v25 = vcombine.low %v6786_v10, %v6790_v14  ;;  %v12692_v46 = vcombine.high %v6793_v50, %v6797_v45  ;;  %v12694_v21 = vcombine.high %v6794_v23, %v6798_v33  ;;  %v6845_v10 = vld [vmem:[#allocation11 + $0x360] sm:$0xff]  ;;  %v6842_v14 = vld [vmem:[#allocation11 + $0x348] sm:$0xff] }
 0x5ce   : > { %7755 = vmatmul.mubr.bf16.vlgmr.msra.gmra.mrb[64].mxu1 %v16209_v16  ;;  %7796 = vmatmul.mubr.bf16.vlgmr.msra.gmra.mrb[100].mxu0 %v16209_v16  ;;  %v12651_v16 = vcombine.low %v6753_v11, %v6757_v55  ;;  %v6809_v55 = vld [vmem:[#allocation11 + $0x240] sm:$0xff] }
 0x5cf   : > { %8445 = vmatpush1.bf16.msra.mxu1 %v12635_v7  ;;  %8476 = vmatprep.mubr.bf16.mxu1 %v16205_v18  ;;  %v6806_v7 = vld [vmem:[#allocation11 + $0x228] sm:$0xff] }
 0x5d0   : > { %8486 = vmatpush1.bf16.msra.mxu0 %v12637_v36  ;;  %8517 = vmatprep.mubr.bf16.mxu0 %v16205_v18  ;;  %v12691_v36 = vcombine.low %v6793_v50, %v6797_v45  ;;  %v12702_v11 = vcombine.high %v6802_v29, %v6806_v7  ;;  %v6849_v45 = vld [vmem:[#allocation11 + $0x380] sm:$0xff] }
 0x5d1   : > { %8446 = vmatprep.subr.bf16.mxu1 %v12644_v3  ;;  %8487 = vmatprep.subr.bf16.mxu0 %v12646_v51  ;;  %v12693_v3 = vcombine.low %v6794_v23, %v6798_v33  ;;  %v12700_v51 = vcombine.high %v6801_v59, %v6805_v40  ;;  %v6853_v23 = vld [vmem:[#allocation11 + $0x3a0] sm:$0xff]  ;;  %v6850_v33 = vld [vmem:[#allocation11 + $0x388] sm:$0xff] }
 0x5d3   : > { %8447 = vmatpush1.bf16.msra.mxu1 %v12643_v17  ;;  %v6814_v17 = vld [vmem:[#allocation11 + $0x268] sm:$0xff] }
 0x5d4   : > { %8488 = vmatpush1.bf16.msra.mxu0 %v12645_v56  ;;  %8448 = vmatprep.subr.bf16.mxu1 %v12652_v54  ;;  %v12699_v56 = vcombine.low %v6801_v59, %v6805_v40  ;;  %v12701_v54 = vcombine.low %v6802_v29, %v6806_v7  ;;  %v12710_v12 = vcombine.high %v6810_v61, %v6814_v17  ;;  %v6857_v40 = vld [vmem:[#allocation11 + $0x3c0] sm:$0xff]  ;;  %v6858_v7 = vld [vmem:[#allocation11 + $0x3c8] sm:$0xff] }
 0x5d5   : > { %8489 = vmatprep.subr.bf16.mxu0 %v12654_v41  ;;  %v12708_v41 = vcombine.high %v6809_v55, %v6813_v57  ;;  %v6861_v29 = vld [vmem:[#allocation11 + $0x3e0] sm:$0xff] }
 0x5d7   : > { %8449 = vmatpush1.bf16.msra.mxu1 %v12651_v16  ;;  %v6822_v16 = vld [vmem:[#allocation11 + $0x2a8] sm:$0xff] }
 0x5d8   : > { %8490 = vmatpush1.bf16.msra.mxu0 %v12653_v20  ;;  %8450 = vmatprep.subr.bf16.mxu1 %v12660_v8  ;;  %v12707_v20 = vcombine.low %v6809_v55, %v6813_v57  ;;  %v12709_v8 = vcombine.low %v6810_v61, %v6814_v17  ;;  %v12718_v27 = vcombine.high %v6818_v58, %v6822_v16  ;;  %v6739_v57 = vld [vmem:[#allocation11 + $0x10] sm:$0xff]  ;;  %v6740_v17 = vld [vmem:[#allocation11 + $0x18] sm:$0xff] }
 0x5d9   : > { %8491 = vmatprep.subr.bf16.mxu0 %v12662_v24  ;;  %v12716_v24 = vcombine.high %v6817_v2, %v6821_v44  ;;  %v6743_v61 = vld [vmem:[#allocation11 + $0x30] sm:$0xff] }
 0x5db   : > { %8451 = vmatpush1.bf16.msra.mxu1 %v12659_v9  ;;  %v6830_v9 = vld [vmem:[#allocation11 + $0x2e8] sm:$0xff] }
 0x5dc   : > { %8492 = vmatpush1.bf16.msra.mxu0 %v12661_v34  ;;  %8452 = vmatprep.subr.bf16.mxu1 %v12668_v49  ;;  %v12715_v34 = vcombine.low %v6817_v2, %v6821_v44  ;;  %v12717_v49 = vcombine.low %v6818_v58, %v6822_v16  ;;  %v12726_v39 = vcombine.high %v6826_v38, %v6830_v9  ;;  %v6747_v44 = vld [vmem:[#allocation11 + $0x50] sm:$0xff] }
 0x5dd   : > { %8493 = vmatprep.subr.bf16.mxu0 %v12670_v47  ;;  %v12724_v47 = vcombine.high %v6825_v37, %v6829_v60  ;;  %v6751_v58 = vld [vmem:[#allocation11 + $0x70] sm:$0xff]  ;;  %v12639_v16 = vcombine.low %v6739_v57, %v6743_v61 }
 0x5df   : > { %8453 = vmatpush1.bf16.msra.mxu1 %v12667_v52  ;;  %v6838_v52 = vld [vmem:[#allocation11 + $0x328] sm:$0xff] }
 0x5e0   : > { %8494 = vmatpush1.bf16.msra.mxu0 %v12669_v5  ;;  %8454 = vmatprep.subr.bf16.mxu1 %v12676_v15  ;;  %v12723_v5 = vcombine.low %v6825_v37, %v6829_v60  ;;  %v12725_v15 = vcombine.low %v6826_v38, %v6830_v9  ;;  %v12734_v22 = vcombine.high %v6834_v28, %v6838_v52  ;;  %v6755_v37 = vld [vmem:[#allocation11 + $0x90] sm:$0xff]  ;;  %v6756_v9 = vld [vmem:[#allocation11 + $0x98] sm:$0xff] }
 0x5e1   : > { %8495 = vmatprep.subr.bf16.mxu0 %v12678_v0  ;;  %v12732_v0 = vcombine.high %v6833_v42, %v6837_v13  ;;  %v6759_v60 = vld [vmem:[#allocation11 + $0xb0] sm:$0xff] }
 0x5e3   : > { %8455 = vmatpush1.bf16.msra.mxu1 %v12675_v4  ;;  %v6846_v4 = vld [vmem:[#allocation11 + $0x368] sm:$0xff] }
 0x5e4   : > { %8496 = vmatpush1.bf16.msra.mxu0 %v12677_v48  ;;  %8456 = vmatprep.subr.bf16.mxu1 %v12684_v1  ;;  %v12731_v48 = vcombine.low %v6833_v42, %v6837_v13  ;;  %v12733_v1 = vcombine.low %v6834_v28, %v6838_v52  ;;  %v12742_v50 = vcombine.high %v6842_v14, %v6846_v4  ;;  %v6763_v13 = vld [vmem:[#allocation11 + $0xd0] sm:$0xff]  ;;  %v6764_v52 = vld [vmem:[#allocation11 + $0xd8] sm:$0xff] }
 0x5e5   : > { %8497 = vmatprep.subr.bf16.mxu0 %v12686_v62  ;;  %v12740_v62 = vcombine.high %v6841_v43, %v6845_v10  ;;  %v6767_v28 = vld [vmem:[#allocation11 + $0xf0] sm:$0xff] }
 0x5e7   : > { %8457 = vmatpush1.bf16.msra.mxu1 %v12683_v30  ;;  %v6854_v30 = vld [vmem:[#allocation11 + $0x3a8] sm:$0xff] }
 0x5e8   : > { %8498 = vmatpush1.bf16.msra.mxu0 %v12685_v25  ;;  %8458 = vmatprep.subr.bf16.mxu1 %v12692_v46  ;;  %v12739_v25 = vcombine.low %v6841_v43, %v6845_v10  ;;  %v12741_v46 = vcombine.low %v6842_v14, %v6846_v4  ;;  %v12750_v59 = vcombine.high %v6850_v33, %v6854_v30  ;;  %v6771_v10 = vld [vmem:[#allocation11 + $0x110] sm:$0xff]  ;;  %v6772_v4 = vld [vmem:[#allocation11 + $0x118] sm:$0xff] }
 0x5e9   : > { %8499 = vmatprep.subr.bf16.mxu0 %v12694_v21  ;;  %v12748_v21 = vcombine.high %v6849_v45, %v6853_v23  ;;  %v6775_v14 = vld [vmem:[#allocation11 + $0x130] sm:$0xff] }
 0x5eb   : > { %8459 = vmatpush1.bf16.msra.mxu1 %v12691_v36  ;;  %v6862_v36 = vld [vmem:[#allocation11 + $0x3e8] sm:$0xff] }
 0x5ec   : > { %8500 = vmatpush1.bf16.msra.mxu0 %v12693_v3  ;;  %8460 = vmatprep.subr.bf16.mxu1 %v12700_v51  ;;  %v12747_v3 = vcombine.low %v6849_v45, %v6853_v23  ;;  %v12749_v51 = vcombine.low %v6850_v33, %v6854_v30  ;;  %v12758_v55 = vcombine.high %v6858_v7, %v6862_v36  ;;  %v6779_v23 = vld [vmem:[#allocation11 + $0x150] sm:$0xff]  ;;  %v6780_v30 = vld [vmem:[#allocation11 + $0x158] sm:$0xff] }
 0x5ed   : > { %8501 = vmatprep.subr.bf16.mxu0 %v12702_v11  ;;  %v12756_v11 = vcombine.high %v6857_v40, %v6861_v29  ;;  %v6783_v33 = vld [vmem:[#allocation11 + $0x170] sm:$0xff] }
 0x5ef   : > { %8461 = vmatpush1.bf16.msra.mxu1 %v12699_v56  ;;  %v6744_v56 = vld [vmem:[#allocation11 + $0x38] sm:$0xff] }
 0x5f0   : > { %8502 = vmatpush1.bf16.msra.mxu0 %v12701_v54  ;;  %8462 = vmatprep.subr.bf16.mxu1 %v12708_v41  ;;  %v12755_v54 = vcombine.low %v6857_v40, %v6861_v29  ;;  %v12757_v41 = vcombine.low %v6858_v7, %v6862_v36  ;;  %v12642_v2 = vcombine.high %v6740_v17, %v6744_v56  ;;  %v6787_v29 = vld [vmem:[#allocation11 + $0x190] sm:$0xff]  ;;  %v6788_v36 = vld [vmem:[#allocation11 + $0x198] sm:$0xff] }
 0x5f1   : > { %8503 = vmatprep.subr.bf16.mxu0 %v12710_v12  ;;  %v12640_v12 = vcombine.high %v6739_v57, %v6743_v61  ;;  %v6791_v7 = vld [vmem:[#allocation11 + $0x1b0] sm:$0xff] }
 0x5f2   : > { %v6795_v61 = vld [vmem:[#allocation11 + $0x1d0] sm:$0xff] }
 0x5f3   : > { %8463 = vmatpush1.bf16.msra.mxu1 %v12707_v20  ;;  %v6748_v20 = vld [vmem:[#allocation11 + $0x58] sm:$0xff] }
 0x5f4   : > { %8504 = vmatpush1.bf16.msra.mxu0 %v12709_v8  ;;  %8464 = vmatprep.subr.bf16.mxu1 %v12716_v24  ;;  %v6752_v8 = vld [vmem:[#allocation11 + $0x78] sm:$0xff]  ;;  %v12641_v24 = vcombine.low %v6740_v17, %v6744_v56  ;;  %v6799_v17 = vld [vmem:[#allocation11 + $0x1f0] sm:$0xff] }
 0x5f5   : > { %8505 = vmatprep.subr.bf16.mxu0 %v12718_v27  ;;  %v12648_v27 = vcombine.high %v6747_v44, %v6751_v58  ;;  %v12650_v38 = vcombine.high %v6748_v20, %v6752_v8  ;;  %v6796_v56 = vld [vmem:[#allocation11 + $0x1d8] sm:$0xff] }
 0x5f7   : > { %8465 = vmatpush1.bf16.msra.mxu1 %v12715_v34  ;;  %v6760_v34 = vld [vmem:[#allocation11 + $0xb8] sm:$0xff] }
 0x5f8   : > { %8506 = vmatpush1.bf16.msra.mxu0 %v12717_v49  ;;  %8466 = vmatprep.subr.bf16.mxu1 %v12724_v47  ;;  %v12647_v49 = vcombine.low %v6747_v44, %v6751_v58  ;;  %v12649_v47 = vcombine.low %v6748_v20, %v6752_v8  ;;  %v12658_v42 = vcombine.high %v6756_v9, %v6760_v34  ;;  %v6803_v58 = vld [vmem:[#allocation11 + $0x210] sm:$0xff]  ;;  %v6804_v20 = vld [vmem:[#allocation11 + $0x218] sm:$0xff] }
 0x5f9   : > { %8507 = vmatprep.subr.bf16.mxu0 %v12726_v39  ;;  %v12656_v39 = vcombine.high %v6755_v37, %v6759_v60  ;;  %v6808_v8 = vld [vmem:[#allocation11 + $0x238] sm:$0xff] }
 0x5fb   : > { %8467 = vmatpush1.bf16.msra.mxu1 %v12723_v5  ;;  %v6768_v5 = vld [vmem:[#allocation11 + $0xf8] sm:$0xff] }
 0x5fc   : > { %8508 = vmatpush1.bf16.msra.mxu0 %v12725_v15  ;;  %8468 = vmatprep.subr.bf16.mxu1 %v12732_v0  ;;  %v12655_v15 = vcombine.low %v6755_v37, %v6759_v60  ;;  %v12657_v0 = vcombine.low %v6756_v9, %v6760_v34  ;;  %v12666_v43 = vcombine.high %v6764_v52, %v6768_v5  ;;  %v6815_v9 = vld [vmem:[#allocation11 + $0x270] sm:$0xff]  ;;  %v6812_v34 = vld [vmem:[#allocation11 + $0x258] sm:$0xff] }
 0x5fd   : > { %8509 = vmatprep.subr.bf16.mxu0 %v12734_v22  ;;  %v12664_v22 = vcombine.high %v6763_v13, %v6767_v28  ;;  %v12706_v60 = vcombine.high %v6804_v20, %v6808_v8 }
 0x5ff   : > { %8469 = vmatpush1.bf16.msra.mxu1 %v12731_v48  ;;  %v6776_v48 = vld [vmem:[#allocation11 + $0x138] sm:$0xff] }
 0x600   : > { %8510 = vmatpush1.bf16.msra.mxu0 %v12733_v1  ;;  %8470 = vmatprep.subr.bf16.mxu1 %v12740_v62  ;;  %v12663_v1 = vcombine.low %v6763_v13, %v6767_v28  ;;  %v12665_v62 = vcombine.low %v6764_v52, %v6768_v5  ;;  %v12674_v45 = vcombine.high %v6772_v4, %v6776_v48  ;;  %v6819_v28 = vld [vmem:[#allocation11 + $0x290] sm:$0xff]  ;;  %v6820_v5 = vld [vmem:[#allocation11 + $0x298] sm:$0xff] }
 0x601   : > { %8511 = vmatprep.subr.bf16.mxu0 %v12742_v50  ;;  %v12672_v50 = vcombine.high %v6771_v10, %v6775_v14  ;;  %v6823_v52 = vld [vmem:[#allocation11 + $0x2b0] sm:$0xff] }
 0x603   : > { %8471 = vmatpush1.bf16.msra.mxu1 %v12739_v25  ;;  %v6784_v25 = vld [vmem:[#allocation11 + $0x178] sm:$0xff] }
 0x604   : > { %8512 = vmatpush1.bf16.msra.mxu0 %v12741_v46  ;;  %8472 = vmatprep.subr.bf16.mxu1 %v12748_v21  ;;  %v12671_v46 = vcombine.low %v6771_v10, %v6775_v14  ;;  %v12673_v21 = vcombine.low %v6772_v4, %v6776_v48  ;;  %v12682_v40 = vcombine.high %v6780_v30, %v6784_v25  ;;  %v6827_v14 = vld [vmem:[#allocation11 + $0x2d0] sm:$0xff]  ;;  %v6828_v48 = vld [vmem:[#allocation11 + $0x2d8] sm:$0xff] }
 0x605   : > { %8513 = vmatprep.subr.bf16.mxu0 %v12750_v59  ;;  %v12680_v59 = vcombine.high %v6779_v23, %v6783_v33  ;;  %v6831_v4 = vld [vmem:[#allocation11 + $0x2f0] sm:$0xff] }
 0x607   : > { %8473 = vmatpush1.bf16.msra.mxu1 %v12747_v3  ;;  %v6792_v3 = vld [vmem:[#allocation11 + $0x1b8] sm:$0xff] }
 0x608   : > { %8514 = vmatpush1.bf16.msra.mxu0 %v12749_v51  ;;  %8474 = vmatprep.subr.bf16.mxu1 %v12756_v11  ;;  %v12679_v51 = vcombine.low %v6779_v23, %v6783_v33  ;;  %v12681_v11 = vcombine.low %v6780_v30, %v6784_v25  ;;  %v12690_v57 = vcombine.high %v6788_v36, %v6792_v3  ;;  %v6835_v33 = vld [vmem:[#allocation11 + $0x310] sm:$0xff]  ;;  %v6836_v25 = vld [vmem:[#allocation11 + $0x318] sm:$0xff] }
 0x609   : > { %8515 = vmatprep.subr.bf16.mxu0 %v12758_v55  ;;  %v12688_v55 = vcombine.high %v6787_v29, %v6791_v7  ;;  %v6839_v30 = vld [vmem:[#allocation11 + $0x330] sm:$0xff] }
 0x60b   : > { %8475 = vmatpush1.bf16.msra.mxu1 %v12755_v54  ;;  %v6800_v54 = vld [vmem:[#allocation11 + $0x1f8] sm:$0xff] }
 0x60c   : > { %8516 = vmatpush1.bf16.msra.mxu0 %v12757_v41  ;;  %8526 = vmatprep.subr.bf16.mxu1 %v12640_v12  ;;  %v12687_v41 = vcombine.low %v6787_v29, %v6791_v7  ;;  %v12689_v12 = vcombine.low %v6788_v36, %v6792_v3  ;;  %v12698_v44 = vcombine.high %v6796_v56, %v6800_v54  ;;  %v6843_v7 = vld [vmem:[#allocation11 + $0x350] sm:$0xff]  ;;  %v6844_v3 = vld [vmem:[#allocation11 + $0x358] sm:$0xff] }
 0x60d   : > { %8567 = vmatprep.subr.bf16.mxu0 %v12642_v2  ;;  %v12696_v2 = vcombine.high %v6795_v61, %v6799_v17  ;;  %v6847_v36 = vld [vmem:[#allocation11 + $0x370] sm:$0xff] }
 0x60e   : > { %8477 = vmatmul.mubr.bf16.vlgmr.msra.gmra.mrb[68].mxu1 %v16203_v19 }
 0x60f   : > { %8518 = vmatmul.mubr.bf16.vlgmr.msra.gmra.mrb[104].mxu0 %v16203_v19  ;;  %8527 = vmatpush1.bf16.msra.mxu1 %v12639_v16  ;;  %v6807_v16 = vld [vmem:[#allocation11 + $0x230] sm:$0xff] }
 0x610   : > { %8558 = vmatprep.mubr.bf16.mxu1 %v16205_v18  ;;  %8568 = vmatpush1.bf16.msra.mxu0 %v12641_v24  ;;  %v12695_v24 = vcombine.low %v6795_v61, %v6799_v17  ;;  %v12704_v37 = vcombine.high %v6803_v58, %v6807_v16  ;;  %v6851_v17 = vld [vmem:[#allocation11 + $0x390] sm:$0xff] }
 0x611   : > { %8599 = vmatprep.mubr.bf16.mxu0 %v16205_v18  ;;  %8528 = vmatprep.subr.bf16.mxu1 %v12648_v27  ;;  %v12697_v27 = vcombine.low %v6796_v56, %v6800_v54  ;;  %v6855_v56 = vld [vmem:[#allocation11 + $0x3b0] sm:$0xff]  ;;  %v6852_v54 = vld [vmem:[#allocation11 + $0x398] sm:$0xff] }
 0x612   : > { %8569 = vmatprep.subr.bf16.mxu0 %v12650_v38  ;;  %v6811_v38 = vld [vmem:[#allocation11 + $0x250] sm:$0xff] }
 0x613   : > { %8529 = vmatpush1.bf16.msra.mxu1 %v12647_v49  ;;  %v6816_v49 = vld [vmem:[#allocation11 + $0x278] sm:$0xff] }
 0x614   : > { %8570 = vmatpush1.bf16.msra.mxu0 %v12649_v47  ;;  %8530 = vmatprep.subr.bf16.mxu1 %v12656_v39  ;;  %v12703_v47 = vcombine.low %v6803_v58, %v6807_v16  ;;  %v12705_v39 = vcombine.low %v6804_v20, %v6808_v8  ;;  %v12714_v13 = vcombine.high %v6812_v34, %v6816_v49  ;;  %v6859_v16 = vld [vmem:[#allocation11 + $0x3d0] sm:$0xff]  ;;  %v6860_v8 = vld [vmem:[#allocation11 + $0x3d8] sm:$0xff] }
 0x615   : > { %8571 = vmatprep.subr.bf16.mxu0 %v12658_v42  ;;  %v12712_v42 = vcombine.high %v6811_v38, %v6815_v9  ;;  %v6863_v20 = vld [vmem:[#allocation11 + $0x3f0] sm:$0xff] }
 0x617   : > { %8531 = vmatpush1.bf16.msra.mxu1 %v12655_v15  ;;  %v6824_v15 = vld [vmem:[#allocation11 + $0x2b8] sm:$0xff] }
 0x618   : > { %8572 = vmatpush1.bf16.msra.mxu0 %v12657_v0  ;;  %8532 = vmatprep.subr.bf16.mxu1 %v12664_v22  ;;  %v12711_v0 = vcombine.low %v6811_v38, %v6815_v9  ;;  %v12713_v22 = vcombine.low %v6812_v34, %v6816_v49  ;;  %v12722_v10 = vcombine.high %v6820_v5, %v6824_v15  ;;  %v8609_v9 = vld [vmem:[#allocation11 + $0x800] sm:$0xff]  ;;  %v8610_v49 = vld [vmem:[#allocation11 + $0x808] sm:$0xff] }
 0x619   : > { %8573 = vmatprep.subr.bf16.mxu0 %v12666_v43  ;;  %v12720_v43 = vcombine.high %v6819_v28, %v6823_v52  ;;  %v8613_v34 = vld [vmem:[#allocation11 + $0x820] sm:$0xff] }
 0x61b   : > { %8533 = vmatpush1.bf16.msra.mxu1 %v12663_v1  ;;  %v6832_v1 = vld [vmem:[#allocation11 + $0x2f8] sm:$0xff] }
 0x61c   : > { %8574 = vmatpush1.bf16.msra.mxu0 %v12665_v62  ;;  %8534 = vmatprep.subr.bf16.mxu1 %v12672_v50  ;;  %v12719_v62 = vcombine.low %v6819_v28, %v6823_v52  ;;  %v12721_v50 = vcombine.low %v6820_v5, %v6824_v15  ;;  %v12730_v23 = vcombine.high %v6828_v48, %v6832_v1  ;;  %v8617_v52 = vld [vmem:[#allocation11 + $0x840] sm:$0xff] }
 0x61d   : > { %8575 = vmatprep.subr.bf16.mxu0 %v12674_v45  ;;  %v12728_v45 = vcombine.high %v6827_v14, %v6831_v4  ;;  %v8621_v5 = vld [vmem:[#allocation11 + $0x860] sm:$0xff]  ;;  %v12763_v15 = vcombine.low %v8609_v9, %v8613_v34 }
 0x61f   : > { %8535 = vmatpush1.bf16.msra.mxu1 %v12671_v46  ;;  %v6840_v46 = vld [vmem:[#allocation11 + $0x338] sm:$0xff] }
 0x620   : > { %8576 = vmatpush1.bf16.msra.mxu0 %v12673_v21  ;;  %8536 = vmatprep.subr.bf16.mxu1 %v12680_v59  ;;  %v12727_v21 = vcombine.low %v6827_v14, %v6831_v4  ;;  %v12729_v59 = vcombine.low %v6828_v48, %v6832_v1  ;;  %v12738_v29 = vcombine.high %v6836_v25, %v6840_v46  ;;  %v8625_v14 = vld [vmem:[#allocation11 + $0x880] sm:$0xff]  ;;  %v16229_v48 = vrot.slane %v16205_v18, 2 }
 0x621   : > { %8577 = vmatprep.subr.bf16.mxu0 %v12682_v40  ;;  %v12736_v40 = vcombine.high %v6835_v33, %v6839_v30  ;;  %v8629_v4 = vld [vmem:[#allocation11 + $0x8a0] sm:$0xff] }
 0x623   : > { %8537 = vmatpush1.bf16.msra.mxu1 %v12679_v51  ;;  %v6848_v51 = vld [vmem:[#allocation11 + $0x378] sm:$0xff] }
 0x624   : > { %8578 = vmatpush1.bf16.msra.mxu0 %v12681_v11  ;;  %8538 = vmatprep.subr.bf16.mxu1 %v12688_v55  ;;  %v12735_v11 = vcombine.low %v6835_v33, %v6839_v30  ;;  %v12737_v55 = vcombine.low %v6836_v25, %v6840_v46  ;;  %v12746_v61 = vcombine.high %v6844_v3, %v6848_v51  ;;  %v8633_v25 = vld [vmem:[#allocation11 + $0x8c0] sm:$0xff] }
 0x625   : > { %8579 = vmatprep.subr.bf16.mxu0 %v12690_v57  ;;  %v12744_v57 = vcombine.high %v6843_v7, %v6847_v36  ;;  %v12780_v33 = vcombine.high %v8625_v14, %v8629_v4  ;;  %v8637_v46 = vld [vmem:[#allocation11 + $0x8e0] sm:$0xff] }
 0x627   : > { %8539 = vmatpush1.bf16.msra.mxu1 %v12687_v41  ;;  %v6856_v41 = vld [vmem:[#allocation11 + $0x3b8] sm:$0xff] }
 0x628   : > { %8580 = vmatpush1.bf16.msra.mxu0 %v12689_v12  ;;  %8540 = vmatprep.subr.bf16.mxu1 %v12696_v2  ;;  %v12743_v12 = vcombine.low %v6843_v7, %v6847_v36  ;;  %v12745_v2 = vcombine.low %v6844_v3, %v6848_v51  ;;  %v12754_v58 = vcombine.high %v6852_v54, %v6856_v41  ;;  %v8641_v3 = vld [vmem:[#allocation11 + $0x900] sm:$0xff] }
 0x629   : > { %8581 = vmatprep.subr.bf16.mxu0 %v12698_v44  ;;  %v12752_v44 = vcombine.high %v6851_v17, %v6855_v56  ;;  %v12788_v7 = vcombine.high %v8633_v25, %v8637_v46  ;;  %v8645_v51 = vld [vmem:[#allocation11 + $0x920] sm:$0xff] }
 0x62b   : > { %8541 = vmatpush1.bf16.msra.mxu1 %v12695_v24  ;;  %v6864_v24 = vld [vmem:[#allocation11 + $0x3f8] sm:$0xff] }
 0x62c   : > { %8582 = vmatpush1.bf16.msra.mxu0 %v12697_v27  ;;  %8542 = vmatprep.subr.bf16.mxu1 %v12704_v37  ;;  %v12751_v27 = vcombine.low %v6851_v17, %v6855_v56  ;;  %v12753_v37 = vcombine.low %v6852_v54, %v6856_v41  ;;  %v12762_v38 = vcombine.high %v6860_v8, %v6864_v24  ;;  %v8649_v54 = vld [vmem:[#allocation11 + $0x940] sm:$0xff] }
 0x62d   : > { %8583 = vmatprep.subr.bf16.mxu0 %v12706_v60  ;;  %v12760_v60 = vcombine.high %v6859_v16, %v6863_v20  ;;  %v12796_v17 = vcombine.high %v8641_v3, %v8645_v51  ;;  %v8653_v41 = vld [vmem:[#allocation11 + $0x960] sm:$0xff] }
 0x62f   : > { %8543 = vmatpush1.bf16.msra.mxu1 %v12703_v47  ;;  %v8614_v47 = vld [vmem:[#allocation11 + $0x828] sm:$0xff] }
 0x630   : > { %8584 = vmatpush1.bf16.msra.mxu0 %v12705_v39  ;;  %8544 = vmatprep.subr.bf16.mxu1 %v12712_v42  ;;  %v12759_v39 = vcombine.low %v6859_v16, %v6863_v20  ;;  %v12761_v42 = vcombine.low %v6860_v8, %v6864_v24  ;;  %v12766_v28 = vcombine.high %v8610_v49, %v8614_v47  ;;  %v8657_v8 = vld [vmem:[#allocation11 + $0x980] sm:$0xff] }
 0x631   : > { %8585 = vmatprep.subr.bf16.mxu0 %v12714_v13  ;;  %v12764_v13 = vcombine.high %v8609_v9, %v8613_v34  ;;  %v12804_v16 = vcombine.high %v8649_v54, %v8653_v41  ;;  %v8661_v24 = vld [vmem:[#allocation11 + $0x9a0] sm:$0xff] }
 0x632   : > { %v12812_v9 = vcombine.high %v8657_v8, %v8661_v24 }
 0x633   : > { %8545 = vmatpush1.bf16.msra.mxu1 %v12711_v0  ;;  %v8618_v0 = vld [vmem:[#allocation11 + $0x848] sm:$0xff] }
 0x634   : > { %8586 = vmatpush1.bf16.msra.mxu0 %v12713_v22  ;;  %8546 = vmatprep.subr.bf16.mxu1 %v12720_v43  ;;  %v8622_v22 = vld [vmem:[#allocation11 + $0x868] sm:$0xff]  ;;  %v12765_v43 = vcombine.low %v8610_v49, %v8614_v47 }
 0x635   : > { %8587 = vmatprep.subr.bf16.mxu0 %v12722_v10  ;;  %v12772_v10 = vcombine.high %v8617_v52, %v8621_v5  ;;  %v12774_v1 = vcombine.high %v8618_v0, %v8622_v22 }
 0x637   : > { %8547 = vmatpush1.bf16.msra.mxu1 %v12719_v62  ;;  %v8626_v62 = vld [vmem:[#allocation11 + $0x888] sm:$0xff] }
 0x638   : > { %8588 = vmatpush1.bf16.msra.mxu0 %v12721_v50  ;;  %8548 = vmatprep.subr.bf16.mxu1 %v12728_v45  ;;  %v8630_v50 = vld [vmem:[#allocation11 + $0x8a8] sm:$0xff]  ;;  %v12771_v45 = vcombine.low %v8617_v52, %v8621_v5 }
 0x639   : > { %8589 = vmatprep.subr.bf16.mxu0 %v12730_v23  ;;  %v12773_v23 = vcombine.low %v8618_v0, %v8622_v22  ;;  %v12782_v30 = vcombine.high %v8626_v62, %v8630_v50  ;;  %v8666_v52 = vld [vmem:[#allocation11 + $0x9c8] sm:$0xff]  ;;  %v12811_v22 = vcombine.low %v8657_v8, %v8661_v24 }
 0x63a   : > { %v8670_v5 = vld [vmem:[#allocation11 + $0x9e8] sm:$0xff] }
 0x63b   : > { %8549 = vmatpush1.bf16.msra.mxu1 %v12727_v21  ;;  %v8634_v21 = vld [vmem:[#allocation11 + $0x8c8] sm:$0xff] }
 0x63c   : > { %8590 = vmatpush1.bf16.msra.mxu0 %v12729_v59  ;;  %8550 = vmatprep.subr.bf16.mxu1 %v12736_v40  ;;  %v8638_v59 = vld [vmem:[#allocation11 + $0x8e8] sm:$0xff]  ;;  %v12779_v40 = vcombine.low %v8625_v14, %v8629_v4 }
 0x63d   : > { %8591 = vmatprep.subr.bf16.mxu0 %v12738_v29  ;;  %v12781_v29 = vcombine.low %v8626_v62, %v8630_v50  ;;  %v12790_v36 = vcombine.high %v8634_v21, %v8638_v59  ;;  %v8673_v62 = vld [vmem:[#allocation11 + $0xa00] sm:$0xff] }
 0x63e   : > { %v8677_v50 = vld [vmem:[#allocation11 + $0xa20] sm:$0xff] }
 0x63f   : > { %8551 = vmatpush1.bf16.msra.mxu1 %v12735_v11  ;;  %v8642_v11 = vld [vmem:[#allocation11 + $0x908] sm:$0xff] }
 0x640   : > { %8592 = vmatpush1.bf16.msra.mxu0 %v12737_v55  ;;  %8552 = vmatprep.subr.bf16.mxu1 %v12744_v57  ;;  %v8646_v55 = vld [vmem:[#allocation11 + $0x928] sm:$0xff]  ;;  %v12787_v57 = vcombine.low %v8633_v25, %v8637_v46  ;;  %v12828_v25 = vcombine.high %v8673_v62, %v8677_v50 }
 0x641   : > { %8593 = vmatprep.subr.bf16.mxu0 %v12746_v61  ;;  %v12789_v61 = vcombine.low %v8634_v21, %v8638_v59  ;;  %v12798_v56 = vcombine.high %v8642_v11, %v8646_v55  ;;  %v8681_v21 = vld [vmem:[#allocation11 + $0xa40] sm:$0xff] }
 0x642   : > { %v8685_v59 = vld [vmem:[#allocation11 + $0xa60] sm:$0xff] }
 0x643   : > { %8553 = vmatpush1.bf16.msra.mxu1 %v12743_v12  ;;  %v8650_v12 = vld [vmem:[#allocation11 + $0x948] sm:$0xff] }
 0x644   : > { %8594 = vmatpush1.bf16.msra.mxu0 %v12745_v2  ;;  %8554 = vmatprep.subr.bf16.mxu1 %v12752_v44  ;;  %v8654_v2 = vld [vmem:[#allocation11 + $0x968] sm:$0xff]  ;;  %v12795_v44 = vcombine.low %v8641_v3, %v8645_v51  ;;  %v12836_v3 = vcombine.high %v8681_v21, %v8685_v59 }
 0x645   : > { %8595 = vmatprep.subr.bf16.mxu0 %v12754_v58  ;;  %v12797_v58 = vcombine.low %v8642_v11, %v8646_v55  ;;  %v12806_v20 = vcombine.high %v8650_v12, %v8654_v2  ;;  %v8689_v11 = vld [vmem:[#allocation11 + $0xa80] sm:$0xff] }
 0x646   : > { %v8693_v55 = vld [vmem:[#allocation11 + $0xaa0] sm:$0xff] }
 0x647   : > { %8555 = vmatpush1.bf16.msra.mxu1 %v12751_v27  ;;  %v8658_v27 = vld [vmem:[#allocation11 + $0x988] sm:$0xff] }
 0x648   : > { %8596 = vmatpush1.bf16.msra.mxu0 %v12753_v37  ;;  %8556 = vmatprep.subr.bf16.mxu1 %v12760_v60  ;;  %v8662_v37 = vld [vmem:[#allocation11 + $0x9a8] sm:$0xff]  ;;  %v12803_v60 = vcombine.low %v8649_v54, %v8653_v41  ;;  %v12844_v54 = vcombine.high %v8689_v11, %v8693_v55 }
 0x649   : > { %8597 = vmatprep.subr.bf16.mxu0 %v12762_v38  ;;  %v12805_v38 = vcombine.low %v8650_v12, %v8654_v2  ;;  %v12814_v47 = vcombine.high %v8658_v27, %v8662_v37  ;;  %v12813_v14 = vcombine.low %v8658_v27, %v8662_v37  ;;  %v8697_v12 = vld [vmem:[#allocation11 + $0xac0] sm:$0xff] }
 0x64a   : > { %v8701_v2 = vld [vmem:[#allocation11 + $0xae0] sm:$0xff] }
 0x64b   : > { %8557 = vmatpush1.bf16.msra.mxu1 %v12759_v39  ;;  %v8665_v39 = vld [vmem:[#allocation11 + $0x9c0] sm:$0xff]  ;;  %v12852_v8 = vcombine.high %v8697_v12, %v8701_v2 }
 0x64c   : > { %8598 = vmatpush1.bf16.msra.mxu0 %v12761_v42  ;;  %9381 = vmatprep.subr.bf16.mxu1 %v12764_v13  ;;  %v8669_v42 = vld [vmem:[#allocation11 + $0x9e0] sm:$0xff] }
 0x64d   : > { %9422 = vmatprep.subr.bf16.mxu0 %v12766_v28  ;;  %v12820_v4 = vcombine.high %v8665_v39, %v8669_v42  ;;  %v8705_v27 = vld [vmem:[#allocation11 + $0xb00] sm:$0xff] }
 0x64e   : > { %8559 = vmatmul.mubr.bf16.vlgmr.msra.gmra.mrb[72].mxu1 %v16203_v19  ;;  %v8709_v37 = vld [vmem:[#allocation11 + $0xb20] sm:$0xff] }
 0x64f   : > { %8600 = vmatmul.mubr.bf16.vlgmr.msra.gmra.mrb[108].mxu0 %v16203_v19  ;;  %9382 = vmatpush1.bf16.msra.mxu1 %v12763_v15 }
 0x650   : > { %9413 = vmatprep.mubr.bf16.mxu1 %v16229_v48  ;;  %9423 = vmatpush1.bf16.msra.mxu0 %v12765_v43 }
 0x651   : > { %9454 = vmatprep.mubr.bf16.mxu0 %v16229_v48  ;;  %9383 = vmatprep.subr.bf16.mxu1 %v12772_v10 }
 0x652   : > { %9424 = vmatprep.subr.bf16.mxu0 %v12774_v1  ;;  %v12822_v1 = vcombine.high %v8666_v52, %v8670_v5 }
 0x653   : > { %9384 = vmatpush1.bf16.msra.mxu1 %v12771_v45  ;;  %v8674_v45 = vld [vmem:[#allocation11 + $0xa08] sm:$0xff] }
 0x654   : > { %9425 = vmatpush1.bf16.msra.mxu0 %v12773_v23  ;;  %9385 = vmatprep.subr.bf16.mxu1 %v12780_v33  ;;  %v8678_v23 = vld [vmem:[#allocation11 + $0xa28] sm:$0xff]  ;;  %v12819_v33 = vcombine.low %v8665_v39, %v8669_v42  ;;  %v12860_v39 = vcombine.high %v8705_v27, %v8709_v37 }
 0x655   : > { %9426 = vmatprep.subr.bf16.mxu0 %v12782_v30  ;;  %v12821_v30 = vcombine.low %v8666_v52, %v8670_v5  ;;  %v12830_v46 = vcombine.high %v8674_v45, %v8678_v23  ;;  %v8713_v52 = vld [vmem:[#allocation11 + $0xb40] sm:$0xff] }
 0x656   : > { %v8717_v5 = vld [vmem:[#allocation11 + $0xb60] sm:$0xff] }
 0x657   : > { %9386 = vmatpush1.bf16.msra.mxu1 %v12779_v40  ;;  %v8682_v40 = vld [vmem:[#allocation11 + $0xa48] sm:$0xff] }
 0x658   : > { %9427 = vmatpush1.bf16.msra.mxu0 %v12781_v29  ;;  %9387 = vmatprep.subr.bf16.mxu1 %v12788_v7  ;;  %v8686_v29 = vld [vmem:[#allocation11 + $0xa68] sm:$0xff]  ;;  %v12827_v7 = vcombine.low %v8673_v62, %v8677_v50 }
 0x659   : > { %9428 = vmatprep.subr.bf16.mxu0 %v12790_v36  ;;  %v12829_v36 = vcombine.low %v8674_v45, %v8678_v23  ;;  %v12838_v51 = vcombine.high %v8682_v40, %v8686_v29  ;;  %v8722_v62 = vld [vmem:[#allocation11 + $0xb88] sm:$0xff]  ;;  %v12867_v45 = vcombine.low %v8713_v52, %v8717_v5 }
 0x65a   : > { %v8726_v50 = vld [vmem:[#allocation11 + $0xba8] sm:$0xff] }
 0x65b   : > { %9388 = vmatpush1.bf16.msra.mxu1 %v12787_v57  ;;  %v8690_v57 = vld [vmem:[#allocation11 + $0xa88] sm:$0xff] }
 0x65c   : > { %9429 = vmatpush1.bf16.msra.mxu0 %v12789_v61  ;;  %9389 = vmatprep.subr.bf16.mxu1 %v12796_v17  ;;  %v8694_v61 = vld [vmem:[#allocation11 + $0xaa8] sm:$0xff]  ;;  %v12835_v17 = vcombine.low %v8681_v21, %v8685_v59 }
 0x65d   : > { %9430 = vmatprep.subr.bf16.mxu0 %v12798_v56  ;;  %v12837_v56 = vcombine.low %v8682_v40, %v8686_v29  ;;  %v12846_v41 = vcombine.high %v8690_v57, %v8694_v61  ;;  %v8730_v21 = vld [vmem:[#allocation11 + $0xbc8] sm:$0xff]  ;;  %v12877_v29 = vcombine.low %v8722_v62, %v8726_v50 }
 0x65e   : > { %v8734_v59 = vld [vmem:[#allocation11 + $0xbe8] sm:$0xff] }
 0x65f   : > { %9390 = vmatpush1.bf16.msra.mxu1 %v12795_v44  ;;  %v8698_v44 = vld [vmem:[#allocation11 + $0xac8] sm:$0xff] }
 0x660   : > { %9431 = vmatpush1.bf16.msra.mxu0 %v12797_v58  ;;  %9391 = vmatprep.subr.bf16.mxu1 %v12804_v16  ;;  %v8702_v58 = vld [vmem:[#allocation11 + $0xae8] sm:$0xff]  ;;  %v12843_v16 = vcombine.low %v8689_v11, %v8693_v55  ;;  %v8612_v11 = vld [vmem:[#allocation11 + $0x818] sm:$0xff] }
 0x661   : > { %v16234_v34 = vpop.f32.mrb[60].mxu1  ;;  %v16236_v49 = vpop.f32.mrb[96].mxu0  ;;  %9432 = vmatprep.subr.bf16.mxu0 %v12806_v20  ;;  %v12845_v20 = vcombine.low %v8690_v57, %v8694_v61  ;;  %v12854_v24 = vcombine.high %v8698_v44, %v8702_v58  ;;  %v8616_v55 = vld [vmem:[#allocation11 + $0x838] sm:$0xff]  ;;  %v12885_v61 = vcombine.low %v8730_v21, %v8734_v59 }
 0x662   : > { %v16238_v13 = vpop.f32.mrb[61].mxu1  ;;  %v16240_v28 = vpop.f32.mrb[97].mxu0 }
 0x663   : > { %9392 = vmatpush1.bf16.msra.mxu1 %v12803_v60  ;;  %v7678_v15 = vpop.f32.mrb[62].mxu1  ;;  %v7719_v0 = vpop.f32.mrb[98].mxu0  ;;  %v8706_v60 = vld [vmem:[#allocation11 + $0xb08] sm:$0xff] }
 0x664   : > { %9433 = vmatpush1.bf16.msra.mxu0 %v12805_v38  ;;  %v7679_v43 = vpop.f32.mrb[63].mxu1  ;;  %v7720_v10 = vpop.f32.mrb[99].mxu0  ;;  %9393 = vmatprep.subr.bf16.mxu1 %v12812_v9  ;;  %v8710_v38 = vld [vmem:[#allocation11 + $0xb28] sm:$0xff]  ;;  %v12851_v9 = vcombine.low %v8697_v12, %v8701_v2  ;;  %v8620_v2 = vld [vmem:[#allocation11 + $0x858] sm:$0xff] }
 0x665   : > { %9434 = vmatprep.subr.bf16.mxu0 %v12814_v47  ;;  %v12853_v47 = vcombine.low %v8698_v44, %v8702_v58  ;;  %v12862_v42 = vcombine.high %v8706_v60, %v8710_v38  ;;  %v8714_v15 = vld [vmem:[#allocation11 + $0xb48] sm:$0xff]  ;;  %v12861_v43 = vcombine.low %v8706_v60, %v8710_v38  ;;  %v12868_v10 = vcombine.high %v8713_v52, %v8717_v5  ;;  %v8624_v44 = vld [vmem:[#allocation11 + $0x878] sm:$0xff]  ;;  %v8639_v52 = vld [vmem:[#allocation11 + $0x8f0] sm:$0xff] }
 0x666   : > { %v8718_v0 = vld [vmem:[#allocation11 + $0xb68] sm:$0xff]  ;;  %v16243_v58 = vrot.slane %v16203_v19, 2  ;;  %v8632_v60 = vld [vmem:[#allocation11 + $0x8b8] sm:$0xff] }
 0x667   : > { %9394 = vmatpush1.bf16.msra.mxu1 %v12811_v22  ;;  %v12859_v22 = vcombine.low %v8705_v27, %v8709_v37  ;;  %v12869_v23 = vcombine.low %v8714_v15, %v8718_v0  ;;  %v12778_v27 = vcombine.high %v8620_v2, %v8624_v44  ;;  %v8628_v37 = vld [vmem:[#allocation11 + $0x898] sm:$0xff] }
 0x668   : > { %9435 = vmatpush1.bf16.msra.mxu0 %v12813_v14  ;;  %9395 = vmatprep.subr.bf16.mxu1 %v12820_v4  ;;  %v12870_v14 = vcombine.high %v8714_v15, %v8718_v0  ;;  %v8721_v4 = vld [vmem:[#allocation11 + $0xb80] sm:$0xff]  ;;  %v8636_v5 = vld [vmem:[#allocation11 + $0x8d8] sm:$0xff] }
 0x669   : > { %9436 = vmatprep.subr.bf16.mxu0 %v12822_v1  ;;  %v8725_v1 = vld [vmem:[#allocation11 + $0xba0] sm:$0xff]  ;;  %v8640_v15 = vld [vmem:[#allocation11 + $0x8f8] sm:$0xff] }
 0x66a   : > { %v12875_v40 = vcombine.low %v8721_v4, %v8725_v1 }
 0x66b   : > { %9396 = vmatpush1.bf16.msra.mxu1 %v12819_v33  ;;  %v12876_v33 = vcombine.high %v8721_v4, %v8725_v1  ;;  %v8647_v4 = vld [vmem:[#allocation11 + $0x930] sm:$0xff]  ;;  %v8644_v1 = vld [vmem:[#allocation11 + $0x918] sm:$0xff] }
 0x66c   : > { %9437 = vmatpush1.bf16.msra.mxu0 %v12821_v30  ;;  %9397 = vmatprep.subr.bf16.mxu1 %v12828_v25  ;;  %v12878_v30 = vcombine.high %v8722_v62, %v8726_v50  ;;  %v8729_v25 = vld [vmem:[#allocation11 + $0xbc0] sm:$0xff]  ;;  %v8648_v62 = vld [vmem:[#allocation11 + $0x938] sm:$0xff]  ;;  %v12793_v50 = vcombine.low %v8636_v5, %v8640_v15 }
 0x66d   : > { %9438 = vmatprep.subr.bf16.mxu0 %v12830_v46  ;;  %v8733_v46 = vld [vmem:[#allocation11 + $0xbe0] sm:$0xff] }
 0x66e   : > { %v12883_v57 = vcombine.low %v8729_v25, %v8733_v46 }
 0x66f   : > { %9398 = vmatpush1.bf16.msra.mxu1 %v12827_v7  ;;  %v12884_v7 = vcombine.high %v8729_v25, %v8733_v46  ;;  %v8652_v25 = vld [vmem:[#allocation11 + $0x958] sm:$0xff] }
 0x670   : > { %9439 = vmatpush1.bf16.msra.mxu0 %v12829_v36  ;;  %9399 = vmatprep.subr.bf16.mxu1 %v12836_v3  ;;  %v12886_v36 = vcombine.high %v8730_v21, %v8734_v59  ;;  %v8611_v3 = vld [vmem:[#allocation11 + $0x810] sm:$0xff]  ;;  %v8656_v46 = vld [vmem:[#allocation11 + $0x978] sm:$0xff]  ;;  %v12801_v59 = vcombine.low %v8644_v1, %v8648_v62 }
 0x671   : > { %9440 = vmatprep.subr.bf16.mxu0 %v12838_v51  ;;  %v8615_v51 = vld [vmem:[#allocation11 + $0x830] sm:$0xff] }
 0x672   : > { %v12767_v12 = vcombine.low %v8611_v3, %v8615_v51 }
 0x673   : > { %9400 = vmatpush1.bf16.msra.mxu1 %v12835_v17  ;;  %v12768_v17 = vcombine.high %v8611_v3, %v8615_v51  ;;  %v8660_v3 = vld [vmem:[#allocation11 + $0x998] sm:$0xff] }
 0x674   : > { %9441 = vmatpush1.bf16.msra.mxu0 %v12837_v56  ;;  %9401 = vmatprep.subr.bf16.mxu1 %v12844_v54  ;;  %v12770_v56 = vcombine.high %v8612_v11, %v8616_v55  ;;  %v8619_v54 = vld [vmem:[#allocation11 + $0x850] sm:$0xff]  ;;  %v8664_v51 = vld [vmem:[#allocation11 + $0x9b8] sm:$0xff] }
 0x675   : > { %9442 = vmatprep.subr.bf16.mxu0 %v12846_v41  ;;  %v8623_v41 = vld [vmem:[#allocation11 + $0x870] sm:$0xff] }
 0x676   : > { %v12775_v38 = vcombine.low %v8619_v54, %v8623_v41 }
 0x677   : > { %9402 = vmatpush1.bf16.msra.mxu1 %v12843_v16  ;;  %v12769_v16 = vcombine.low %v8612_v11, %v8616_v55  ;;  %v12809_v55 = vcombine.low %v8652_v25, %v8656_v46 }
 0x678   : > { %9443 = vmatpush1.bf16.msra.mxu0 %v12845_v20  ;;  %9403 = vmatprep.subr.bf16.mxu1 %v12852_v8  ;;  %v12776_v20 = vcombine.high %v8619_v54, %v8623_v41  ;;  %v8627_v8 = vld [vmem:[#allocation11 + $0x890] sm:$0xff] }
 0x679   : > { %9444 = vmatprep.subr.bf16.mxu0 %v12854_v24  ;;  %v8631_v24 = vld [vmem:[#allocation11 + $0x8b0] sm:$0xff] }
 0x67a   : > { %v12783_v0 = vcombine.low %v8627_v8, %v8631_v24  ;;  %v8667_v54 = vld [vmem:[#allocation11 + $0x9d0] sm:$0xff] }
 0x67b   : > { %9404 = vmatpush1.bf16.msra.mxu1 %v12851_v9  ;;  %v12777_v9 = vcombine.low %v8620_v2, %v8624_v44  ;;  %v8671_v41 = vld [vmem:[#allocation11 + $0x9f0] sm:$0xff]  ;;  %v8668_v44 = vld [vmem:[#allocation11 + $0x9d8] sm:$0xff] }
 0x67c   : > { %9445 = vmatpush1.bf16.msra.mxu0 %v12853_v47  ;;  %9405 = vmatprep.subr.bf16.mxu1 %v12860_v39  ;;  %v12784_v47 = vcombine.high %v8627_v8, %v8631_v24  ;;  %v12786_v39 = vcombine.high %v8628_v37, %v8632_v60 }
 0x67d   : > { %9446 = vmatprep.subr.bf16.mxu0 %v12862_v42  ;;  %v8635_v42 = vld [vmem:[#allocation11 + $0x8d0] sm:$0xff] }
 0x67f   : > { %9406 = vmatpush1.bf16.msra.mxu1 %v12859_v22  ;;  %v12785_v22 = vcombine.low %v8628_v37, %v8632_v60  ;;  %v12817_v60 = vcombine.low %v8660_v3, %v8664_v51 }
 0x680   : > { %9447 = vmatpush1.bf16.msra.mxu0 %v12861_v43  ;;  %9407 = vmatprep.subr.bf16.mxu1 %v12868_v10  ;;  %v12792_v43 = vcombine.high %v8635_v42, %v8639_v52  ;;  %v12794_v10 = vcombine.high %v8636_v5, %v8640_v15  ;;  %v12823_v5 = vcombine.low %v8667_v54, %v8671_v41 }
 0x681   : > { %9448 = vmatprep.subr.bf16.mxu0 %v12870_v14  ;;  %v8643_v14 = vld [vmem:[#allocation11 + $0x910] sm:$0xff] }
 0x682   : > { %v12799_v21 = vcombine.low %v8643_v14, %v8647_v4 }
 0x683   : > { %9408 = vmatpush1.bf16.msra.mxu1 %v12867_v45  ;;  %v12800_v45 = vcombine.high %v8643_v14, %v8647_v4  ;;  %v8684_v14 = vld [vmem:[#allocation11 + $0xa58] sm:$0xff] }
 0x684   : > { %9449 = vmatpush1.bf16.msra.mxu0 %v12869_v23  ;;  %9409 = vmatprep.subr.bf16.mxu1 %v12876_v33  ;;  %v12802_v23 = vcombine.high %v8644_v1, %v8648_v62  ;;  %v8651_v33 = vld [vmem:[#allocation11 + $0x950] sm:$0xff]  ;;  %v8688_v4 = vld [vmem:[#allocation11 + $0xa78] sm:$0xff] }
 0x685   : > { %9450 = vmatprep.subr.bf16.mxu0 %v12878_v30  ;;  %v8655_v30 = vld [vmem:[#allocation11 + $0x970] sm:$0xff] }
 0x686   : > { %v12807_v11 = vcombine.low %v8651_v33, %v8655_v30 }
 0x687   : > { %9410 = vmatpush1.bf16.msra.mxu1 %v12875_v40  ;;  %v12808_v40 = vcombine.high %v8651_v33, %v8655_v30  ;;  %v8692_v33 = vld [vmem:[#allocation11 + $0xa98] sm:$0xff] }
 0x688   : > { %9451 = vmatpush1.bf16.msra.mxu0 %v12877_v29  ;;  %9411 = vmatprep.subr.bf16.mxu1 %v12884_v7  ;;  %v12810_v29 = vcombine.high %v8652_v25, %v8656_v46  ;;  %v8659_v7 = vld [vmem:[#allocation11 + $0x990] sm:$0xff]  ;;  %v8696_v30 = vld [vmem:[#allocation11 + $0xab8] sm:$0xff]  ;;  %v12841_v46 = vcombine.low %v8684_v14, %v8688_v4 }
 0x689   : > { %9452 = vmatprep.subr.bf16.mxu0 %v12886_v36  ;;  %v8663_v36 = vld [vmem:[#allocation11 + $0x9b0] sm:$0xff] }
 0x68a   : > { %v12815_v24 = vcombine.low %v8659_v7, %v8663_v36 }
 0x68b   : > { %9412 = vmatpush1.bf16.msra.mxu1 %v12883_v57  ;;  %v12816_v57 = vcombine.high %v8659_v7, %v8663_v36  ;;  %v8700_v7 = vld [vmem:[#allocation11 + $0xad8] sm:$0xff] }
 0x68c   : > { %9453 = vmatpush1.bf16.msra.mxu0 %v12885_v61  ;;  %9463 = vmatprep.subr.bf16.mxu1 %v12768_v17  ;;  %v8704_v36 = vld [vmem:[#allocation11 + $0xaf8] sm:$0xff] }
 0x68d   : > { %9504 = vmatprep.subr.bf16.mxu0 %v12770_v56  ;;  %v12818_v56 = vcombine.high %v8660_v3, %v8664_v51  ;;  %v12849_v51 = vcombine.low %v8692_v33, %v8696_v30 }
 0x68e   : > { %9414 = vmatmul.mubr.bf16.vlgmr.msra.gmra.mrb[76].mxu1 %v16243_v58 }
 0x68f   : > { %9455 = vmatmul.mubr.bf16.vlgmr.msra.gmra.mrb[112].mxu0 %v16243_v58  ;;  %9464 = vmatpush1.bf16.msra.mxu1 %v12767_v12 }
 0x690   : > { %9495 = vmatprep.mubr.bf16.mxu1 %v16229_v48  ;;  %9505 = vmatpush1.bf16.msra.mxu0 %v12769_v16  ;;  %v8672_v16 = vld [vmem:[#allocation11 + $0x9f8] sm:$0xff] }
 0x691   : > { %9536 = vmatprep.mubr.bf16.mxu0 %v16229_v48  ;;  %9465 = vmatprep.subr.bf16.mxu1 %v12776_v20  ;;  %v12791_v48 = vcombine.low %v8635_v42, %v8639_v52  ;;  %v8676_v42 = vld [vmem:[#allocation11 + $0xa18] sm:$0xff]  ;;  %v12825_v15 = vcombine.low %v8668_v44, %v8672_v16 }
 0x692   : > { %9506 = vmatprep.subr.bf16.mxu0 %v12778_v27  ;;  %v8680_v52 = vld [vmem:[#allocation11 + $0xa38] sm:$0xff] }
 0x693   : > { %9466 = vmatpush1.bf16.msra.mxu1 %v12775_v38  ;;  %v12824_v38 = vcombine.high %v8667_v54, %v8671_v41  ;;  %v12833_v62 = vcombine.low %v8676_v42, %v8680_v52  ;;  %v8708_v54 = vld [vmem:[#allocation11 + $0xb18] sm:$0xff] }
 0x694   : > { %9507 = vmatpush1.bf16.msra.mxu0 %v12777_v9  ;;  %9467 = vmatprep.subr.bf16.mxu1 %v12784_v47  ;;  %v12826_v9 = vcombine.high %v8668_v44, %v8672_v16  ;;  %v8675_v47 = vld [vmem:[#allocation11 + $0xa10] sm:$0xff]  ;;  %v8712_v41 = vld [vmem:[#allocation11 + $0xb38] sm:$0xff]  ;;  %v12857_v16 = vcombine.low %v8700_v7, %v8704_v36 }
 0x695   : > { %9508 = vmatprep.subr.bf16.mxu0 %v12786_v39  ;;  %v8679_v39 = vld [vmem:[#allocation11 + $0xa30] sm:$0xff] }
 0x696   : > { %v12831_v1 = vcombine.low %v8675_v47, %v8679_v39 }
 0x697   : > { %9468 = vmatpush1.bf16.msra.mxu1 %v12783_v0  ;;  %v12832_v0 = vcombine.high %v8675_v47, %v8679_v39 }
 0x698   : > { %9509 = vmatpush1.bf16.msra.mxu0 %v12785_v22  ;;  %9469 = vmatprep.subr.bf16.mxu1 %v12792_v43  ;;  %v12834_v22 = vcombine.high %v8676_v42, %v8680_v52  ;;  %v8683_v43 = vld [vmem:[#allocation11 + $0xa50] sm:$0xff] }
 0x699   : > { %9510 = vmatprep.subr.bf16.mxu0 %v12794_v10  ;;  %v8687_v10 = vld [vmem:[#allocation11 + $0xa70] sm:$0xff] }
 0x69a   : > { %v12839_v25 = vcombine.low %v8683_v43, %v8687_v10  ;;  %v8723_v42 = vld [vmem:[#allocation11 + $0xb90] sm:$0xff] }
 0x69b   : > { %9470 = vmatpush1.bf16.msra.mxu1 %v12791_v48  ;;  %v12840_v48 = vcombine.high %v8683_v43, %v8687_v10  ;;  %v8727_v52 = vld [vmem:[#allocation11 + $0xbb0] sm:$0xff] }
 0x69c   : > { %9511 = vmatpush1.bf16.msra.mxu0 %v12793_v50  ;;  %9471 = vmatprep.subr.bf16.mxu1 %v12800_v45  ;;  %v12842_v50 = vcombine.high %v8684_v14, %v8688_v4  ;;  %v8691_v45 = vld [vmem:[#allocation11 + $0xa90] sm:$0xff]  ;;  %v12880_v43 = vcombine.high %v8723_v42, %v8727_v52 }
 0x69d   : > { %9512 = vmatprep.subr.bf16.mxu0 %v12802_v23  ;;  %v8695_v23 = vld [vmem:[#allocation11 + $0xab0] sm:$0xff] }
 0x69e   : > { %v12847_v3 = vcombine.low %v8691_v45, %v8695_v23  ;;  %v8731_v14 = vld [vmem:[#allocation11 + $0xbd0] sm:$0xff] }
 0x69f   : > { %9472 = vmatpush1.bf16.msra.mxu1 %v12799_v21  ;;  %v12848_v21 = vcombine.high %v8691_v45, %v8695_v23  ;;  %v8735_v4 = vld [vmem:[#allocation11 + $0xbf0] sm:$0xff] }
 0x6a0   : > { %9513 = vmatpush1.bf16.msra.mxu0 %v12801_v59  ;;  %9473 = vmatprep.subr.bf16.mxu1 %v12808_v40  ;;  %v12850_v59 = vcombine.high %v8692_v33, %v8696_v30  ;;  %v8699_v40 = vld [vmem:[#allocation11 + $0xad0] sm:$0xff]  ;;  %v12888_v45 = vcombine.high %v8731_v14, %v8735_v4  ;;  %v9554_v33 = vld [vmem:[#allocation11 + $0xc00] sm:$0xff] }
 0x6a1   : > { %v16249_v61 = vpop.f32.mrb[64].mxu1  ;;  %v16251_v17 = vpop.f32.mrb[100].mxu0  ;;  %9514 = vmatprep.subr.bf16.mxu0 %v12810_v29  ;;  %v8703_v29 = vld [vmem:[#allocation11 + $0xaf0] sm:$0xff]  ;;  %v9558_v30 = vld [vmem:[#allocation11 + $0xc20] sm:$0xff] }
 0x6a2   : > { %v16253_v12 = vpop.f32.mrb[65].mxu1  ;;  %v16255_v2 = vpop.f32.mrb[101].mxu0  ;;  %v12855_v44 = vcombine.low %v8699_v40, %v8703_v29 }
 0x6a3   : > { %v7760_v20 = vpop.f32.mrb[66].mxu1  ;;  %v7801_v8 = vpop.f32.mrb[102].mxu0  ;;  %9474 = vmatpush1.bf16.msra.mxu1 %v12807_v11  ;;  %v12856_v11 = vcombine.high %v8699_v40, %v8703_v29  ;;  %v12892_v40 = vcombine.high %v9554_v33, %v9558_v30 }
 0x6a4   : > { %9515 = vmatpush1.bf16.msra.mxu0 %v12809_v55  ;;  %v7761_v27 = vpop.f32.mrb[67].mxu1  ;;  %v7802_v37 = vpop.f32.mrb[103].mxu0  ;;  %9475 = vmatprep.subr.bf16.mxu1 %v12816_v57  ;;  %v12858_v55 = vcombine.high %v8700_v7, %v8704_v36  ;;  %v8707_v57 = vld [vmem:[#allocation11 + $0xb10] sm:$0xff]  ;;  %v12866_v8 = vcombine.high %v8708_v54, %v8712_v41  ;;  %v9562_v7 = vld [vmem:[#allocation11 + $0xc40] sm:$0xff] }
 0x6a5   : > { %9516 = vmatprep.subr.bf16.mxu0 %v12818_v56  ;;  %v8711_v56 = vld [vmem:[#allocation11 + $0xb30] sm:$0xff]  ;;  %v8716_v37 = vld [vmem:[#allocation11 + $0xb58] sm:$0xff]  ;;  %v9566_v36 = vld [vmem:[#allocation11 + $0xc60] sm:$0xff] }
 0x6a6   : > { %v12864_v20 = vcombine.high %v8707_v57, %v8711_v56  ;;  %v8719_v27 = vld [vmem:[#allocation11 + $0xb70] sm:$0xff] }
 0x6a7   : > { %9476 = vmatpush1.bf16.msra.mxu1 %v12815_v24  ;;  %v8715_v24 = vld [vmem:[#allocation11 + $0xb50] sm:$0xff] }
 0x6a8   : > { %9517 = vmatpush1.bf16.msra.mxu0 %v12817_v60  ;;  %9477 = vmatprep.subr.bf16.mxu1 %v12824_v38  ;;  %v8720_v60 = vld [vmem:[#allocation11 + $0xb78] sm:$0xff]  ;;  %v12863_v38 = vcombine.low %v8707_v57, %v8711_v56  ;;  %v12872_v47 = vcombine.high %v8715_v24, %v8719_v27  ;;  %v12900_v57 = vcombine.high %v9562_v7, %v9566_v36  ;;  %v9570_v56 = vld [vmem:[#allocation11 + $0xc80] sm:$0xff] }
 0x6a9   : > { %9518 = vmatprep.subr.bf16.mxu0 %v12826_v9  ;;  %v12865_v9 = vcombine.low %v8708_v54, %v8712_v41  ;;  %v12874_v39 = vcombine.high %v8716_v37, %v8720_v60  ;;  %v9574_v54 = vld [vmem:[#allocation11 + $0xca0] sm:$0xff]  ;;  %v16259_v41 = vrot.slane %v16205_v18, 3  ;;  %v9579_v18 = vld [vmem:[#allocation11 + $0xcc8] sm:$0xff] }
 0x6ab   : > { %9478 = vmatpush1.bf16.msra.mxu1 %v12823_v5  ;;  %v8724_v5 = vld [vmem:[#allocation11 + $0xb98] sm:$0xff] }
 0x6ac   : > { %9519 = vmatpush1.bf16.msra.mxu0 %v12825_v15  ;;  %9479 = vmatprep.subr.bf16.mxu1 %v12832_v0  ;;  %v8728_v15 = vld [vmem:[#allocation11 + $0xbb8] sm:$0xff]  ;;  %v12871_v0 = vcombine.low %v8715_v24, %v8719_v27  ;;  %v12908_v27 = vcombine.high %v9570_v56, %v9574_v54 }
 0x6ad   : > { %9520 = vmatprep.subr.bf16.mxu0 %v12834_v22  ;;  %v12873_v22 = vcombine.low %v8716_v37, %v8720_v60  ;;  %v12882_v10 = vcombine.high %v8724_v5, %v8728_v15  ;;  %v9578_v60 = vld [vmem:[#allocation11 + $0xcc0] sm:$0xff] }
 0x6af   : > { %9480 = vmatpush1.bf16.msra.mxu1 %v12831_v1  ;;  %v8732_v1 = vld [vmem:[#allocation11 + $0xbd8] sm:$0xff] }
 0x6b0   : > { %9521 = vmatpush1.bf16.msra.mxu0 %v12833_v62  ;;  %9481 = vmatprep.subr.bf16.mxu1 %v12840_v48  ;;  %v8736_v62 = vld [vmem:[#allocation11 + $0xbf8] sm:$0xff]  ;;  %v12879_v48 = vcombine.low %v8723_v42, %v8727_v52  ;;  %v9586_v52 = vld [vmem:[#allocation11 + $0xd00] sm:$0xff] }
 0x6b1   : > { %9522 = vmatprep.subr.bf16.mxu0 %v12842_v50  ;;  %v12881_v50 = vcombine.low %v8724_v5, %v8728_v15  ;;  %v12890_v23 = vcombine.high %v8732_v1, %v8736_v62  ;;  %v9590_v5 = vld [vmem:[#allocation11 + $0xd20] sm:$0xff]  ;;  %v9587_v15 = vld [vmem:[#allocation11 + $0xd08] sm:$0xff] }
 0x6b3   : > { %9482 = vmatpush1.bf16.msra.mxu1 %v12839_v25  ;;  %v9555_v25 = vld [vmem:[#allocation11 + $0xc08] sm:$0xff] }
 0x6b4   : > { %9523 = vmatpush1.bf16.msra.mxu0 %v12841_v46  ;;  %9483 = vmatprep.subr.bf16.mxu1 %v12848_v21  ;;  %v9559_v46 = vld [vmem:[#allocation11 + $0xc28] sm:$0xff]  ;;  %v12887_v21 = vcombine.low %v8731_v14, %v8735_v4  ;;  %v9594_v4 = vld [vmem:[#allocation11 + $0xd40] sm:$0xff] }
 0x6b5   : > { %9524 = vmatprep.subr.bf16.mxu0 %v12850_v59  ;;  %v12889_v59 = vcombine.low %v8732_v1, %v8736_v62  ;;  %v12894_v29 = vcombine.high %v9555_v25, %v9559_v46  ;;  %v9598_v1 = vld [vmem:[#allocation11 + $0xd60] sm:$0xff]  ;;  %v9595_v62 = vld [vmem:[#allocation11 + $0xd48] sm:$0xff] }
 0x6b7   : > { %9484 = vmatpush1.bf16.msra.mxu1 %v12847_v3  ;;  %v12891_v3 = vcombine.low %v9554_v33, %v9558_v30  ;;  %v9602_v30 = vld [vmem:[#allocation11 + $0xd80] sm:$0xff] }
 0x6b8   : > { %9525 = vmatpush1.bf16.msra.mxu0 %v12849_v51  ;;  %9485 = vmatprep.subr.bf16.mxu1 %v12856_v11  ;;  %v9563_v51 = vld [vmem:[#allocation11 + $0xc48] sm:$0xff] }
 0x6b9   : > { %9526 = vmatprep.subr.bf16.mxu0 %v12858_v55  ;;  %v9567_v11 = vld [vmem:[#allocation11 + $0xc68] sm:$0xff]  ;;  %v12893_v55 = vcombine.low %v9555_v25, %v9559_v46  ;;  %v9606_v25 = vld [vmem:[#allocation11 + $0xda0] sm:$0xff] }
 0x6ba   : > { %v12901_v24 = vcombine.low %v9563_v51, %v9567_v11  ;;  %v9603_v46 = vld [vmem:[#allocation11 + $0xd88] sm:$0xff] }
 0x6bb   : > { %9486 = vmatpush1.bf16.msra.mxu1 %v12855_v44  ;;  %v12902_v44 = vcombine.high %v9563_v51, %v9567_v11  ;;  %v9614_v51 = vld [vmem:[#allocation11 + $0xde0] sm:$0xff] }
 0x6bc   : > { %9527 = vmatpush1.bf16.msra.mxu0 %v12857_v16  ;;  %9487 = vmatprep.subr.bf16.mxu1 %v12864_v20  ;;  %v9571_v16 = vld [vmem:[#allocation11 + $0xc88] sm:$0xff] }
 0x6bd   : > { %9528 = vmatprep.subr.bf16.mxu0 %v12866_v8  ;;  %v9575_v20 = vld [vmem:[#allocation11 + $0xca8] sm:$0xff]  ;;  %v12899_v8 = vcombine.low %v9562_v7, %v9566_v36 }
 0x6be   : > { %v12910_v37 = vcombine.high %v9571_v16, %v9575_v20 }
 0x6bf   : > { %9488 = vmatpush1.bf16.msra.mxu1 %v12863_v38  ;;  %v9582_v38 = vld [vmem:[#allocation11 + $0xce0] sm:$0xff] }
 0x6c0   : > { %9529 = vmatpush1.bf16.msra.mxu0 %v12865_v9  ;;  %9489 = vmatprep.subr.bf16.mxu1 %v12872_v47  ;;  %v9583_v9 = vld [vmem:[#allocation11 + $0xce8] sm:$0xff]  ;;  %v12907_v47 = vcombine.low %v9570_v56, %v9574_v54 }
 0x6c1   : > { %9530 = vmatprep.subr.bf16.mxu0 %v12874_v39  ;;  %v12916_v39 = vcombine.high %v9578_v60, %v9582_v38  ;;  %v12918_v42 = vcombine.high %v9579_v18, %v9583_v9  ;;  %v9611_v56 = vld [vmem:[#allocation11 + $0xdc8] sm:$0xff] }
 0x6c2   : > { %v9615_v54 = vld [vmem:[#allocation11 + $0xde8] sm:$0xff] }
 0x6c3   : > { %9490 = vmatpush1.bf16.msra.mxu1 %v12871_v0  ;;  %v9591_v0 = vld [vmem:[#allocation11 + $0xd28] sm:$0xff] }
 0x6c4   : > { %9531 = vmatpush1.bf16.msra.mxu0 %v12873_v22  ;;  %9491 = vmatprep.subr.bf16.mxu1 %v12880_v43  ;;  %v12915_v22 = vcombine.low %v9578_v60, %v9582_v38  ;;  %v12917_v43 = vcombine.low %v9579_v18, %v9583_v9  ;;  %v12926_v14 = vcombine.high %v9587_v15, %v9591_v0  ;;  %v9618_v9 = vld [vmem:[#allocation11 + $0xe00] sm:$0xff] }
 0x6c5   : > { %9532 = vmatprep.subr.bf16.mxu0 %v12882_v10  ;;  %v12924_v10 = vcombine.high %v9586_v52, %v9590_v5 }
 0x6c7   : > { %9492 = vmatpush1.bf16.msra.mxu1 %v12879_v48  ;;  %v9599_v48 = vld [vmem:[#allocation11 + $0xd68] sm:$0xff] }
 0x6c8   : > { %9533 = vmatpush1.bf16.msra.mxu0 %v12881_v50  ;;  %9493 = vmatprep.subr.bf16.mxu1 %v12888_v45  ;;  %v12923_v50 = vcombine.low %v9586_v52, %v9590_v5  ;;  %v12925_v45 = vcombine.low %v9587_v15, %v9591_v0  ;;  %v12934_v33 = vcombine.high %v9595_v62, %v9599_v48  ;;  %v9626_v5 = vld [vmem:[#allocation11 + $0xe40] sm:$0xff]  ;;  %v9627_v0 = vld [vmem:[#allocation11 + $0xe48] sm:$0xff] }
 0x6c9   : > { %9534 = vmatprep.subr.bf16.mxu0 %v12890_v23  ;;  %v12932_v23 = vcombine.high %v9594_v4, %v9598_v1  ;;  %v9630_v15 = vld [vmem:[#allocation11 + $0xe60] sm:$0xff] }
 0x6cb   : > { %9494 = vmatpush1.bf16.msra.mxu1 %v12887_v21  ;;  %v9607_v21 = vld [vmem:[#allocation11 + $0xda8] sm:$0xff] }
 0x6cc   : > { %9535 = vmatpush1.bf16.msra.mxu0 %v12889_v59  ;;  %10326 = vmatprep.subr.bf16.mxu1 %v12892_v40  ;;  %v12931_v59 = vcombine.low %v9594_v4, %v9598_v1  ;;  %v12933_v40 = vcombine.low %v9595_v62, %v9599_v48  ;;  %v12942_v36 = vcombine.high %v9603_v46, %v9607_v21  ;;  %v9634_v1 = vld [vmem:[#allocation11 + $0xe80] sm:$0xff]  ;;  %v9635_v48 = vld [vmem:[#allocation11 + $0xe88] sm:$0xff] }
 0x6cd   : > { %10367 = vmatprep.subr.bf16.mxu0 %v12894_v29  ;;  %v12940_v29 = vcombine.high %v9602_v30, %v9606_v25  ;;  %v12941_v60 = vcombine.low %v9603_v46, %v9607_v21  ;;  %v9638_v62 = vld [vmem:[#allocation11 + $0xea0] sm:$0xff]  ;;  %v9643_v21 = vld [vmem:[#allocation11 + $0xec8] sm:$0xff] }
 0x6ce   : > { %9496 = vmatmul.mubr.bf16.vlgmr.msra.gmra.mrb[80].mxu1 %v16243_v58  ;;  %v9646_v46 = vld [vmem:[#allocation11 + $0xee0] sm:$0xff] }
 0x6cf   : > { %9537 = vmatmul.mubr.bf16.vlgmr.msra.gmra.mrb[116].mxu0 %v16243_v58  ;;  %10327 = vmatpush1.bf16.msra.mxu1 %v12891_v3  ;;  %v12909_v58 = vcombine.low %v9571_v16, %v9575_v20  ;;  %v9610_v3 = vld [vmem:[#allocation11 + $0xdc0] sm:$0xff] }
 0x6d0   : > { %10358 = vmatprep.mubr.bf16.mxu1 %v16259_v41  ;;  %10368 = vmatpush1.bf16.msra.mxu0 %v12893_v55  ;;  %v12948_v38 = vcombine.high %v9610_v3, %v9614_v51 }
 0x6d1   : > { %10399 = vmatprep.mubr.bf16.mxu0 %v16259_v41  ;;  %10328 = vmatprep.subr.bf16.mxu1 %v12900_v57 }
 0x6d2   : > { %10369 = vmatprep.subr.bf16.mxu0 %v12902_v44 }
 0x6d3   : > { %10329 = vmatpush1.bf16.msra.mxu1 %v12899_v8 }
 0x6d4   : > { %10370 = vmatpush1.bf16.msra.mxu0 %v12901_v24  ;;  %10330 = vmatprep.subr.bf16.mxu1 %v12908_v27  ;;  %v12939_v24 = vcombine.low %v9602_v30, %v9606_v25  ;;  %v9642_v25 = vld [vmem:[#allocation11 + $0xec0] sm:$0xff] }
 0x6d5   : > { %10371 = vmatprep.subr.bf16.mxu0 %v12910_v37 }
 0x6d7   : > { %10331 = vmatpush1.bf16.msra.mxu1 %v12907_v47  ;;  %v9622_v47 = vld [vmem:[#allocation11 + $0xe20] sm:$0xff] }
 0x6d8   : > { %10372 = vmatpush1.bf16.msra.mxu0 %v12909_v58  ;;  %10332 = vmatprep.subr.bf16.mxu1 %v12916_v39  ;;  %v9623_v58 = vld [vmem:[#allocation11 + $0xe28] sm:$0xff]  ;;  %v12947_v39 = vcombine.low %v9610_v3, %v9614_v51  ;;  %v9650_v3 = vld [vmem:[#allocation11 + $0xf00] sm:$0xff] }
 0x6d9   : > { %10373 = vmatprep.subr.bf16.mxu0 %v12918_v42  ;;  %v12949_v42 = vcombine.low %v9611_v56, %v9615_v54  ;;  %v9654_v51 = vld [vmem:[#allocation11 + $0xf20] sm:$0xff] }
 0x6db   : > { %10333 = vmatpush1.bf16.msra.mxu1 %v12915_v22  ;;  %v9631_v22 = vld [vmem:[#allocation11 + $0xe68] sm:$0xff] }
 0x6dc   : > { %10374 = vmatpush1.bf16.msra.mxu0 %v12917_v43  ;;  %10334 = vmatprep.subr.bf16.mxu1 %v12924_v10  ;;  %v12955_v43 = vcombine.low %v9618_v9, %v9622_v47  ;;  %v12966_v4 = vcombine.high %v9627_v0, %v9631_v22 }
 0x6dd   : > { %10375 = vmatprep.subr.bf16.mxu0 %v12926_v14  ;;  %v12964_v14 = vcombine.high %v9626_v5, %v9630_v15 }
 0x6df   : > { %10335 = vmatpush1.bf16.msra.mxu1 %v12923_v50  ;;  %v9639_v50 = vld [vmem:[#allocation11 + $0xea8] sm:$0xff] }
 0x6e0   : > { %10376 = vmatpush1.bf16.msra.mxu0 %v12925_v45  ;;  %10336 = vmatprep.subr.bf16.mxu1 %v12932_v23  ;;  %v12963_v45 = vcombine.low %v9626_v5, %v9630_v15  ;;  %v12965_v23 = vcombine.low %v9627_v0, %v9631_v22  ;;  %v12974_v30 = vcombine.high %v9635_v48, %v9639_v50  ;;  %v9674_v15 = vld [vmem:[#allocation11 + $0xfc0] sm:$0xff]  ;;  %v9675_v22 = vld [vmem:[#allocation11 + $0xfc8] sm:$0xff] }
 0x6e1   : > { %v8478_v7 = vpop.f32.mrb[68].mxu1  ;;  %10377 = vmatprep.subr.bf16.mxu0 %v12934_v33  ;;  %v12972_v33 = vcombine.high %v9634_v1, %v9638_v62  ;;  %v9678_v0 = vld [vmem:[#allocation11 + $0xfe0] sm:$0xff] }
 0x6e2   : > { %v16265_v11 = vadd.f32 %v8478_v7, %v16234_v34  ;;  %v8519_v55 = vpop.f32.mrb[104].mxu0  ;;  %v8480_v57 = vpop.f32.mrb[69].mxu1  ;;  %v12980_v7 = vcombine.high %v9642_v25, %v9646_v46 }
 0x6e3   : > { %v16268_v44 = vadd.f32 %v8519_v55, %v16236_v49  ;;  %v16271_v16 = vadd.f32 %v8480_v57, %v16238_v13  ;;  %v8521_v20 = vpop.f32.mrb[105].mxu0  ;;  %v8482_v8 = vpop.f32.mrb[70].mxu1  ;;  %10337 = vmatpush1.bf16.msra.mxu1 %v12931_v59  ;;  %v12950_v49 = vcombine.high %v9611_v56, %v9615_v54  ;;  %v9619_v13 = vld [vmem:[#allocation11 + $0xe08] sm:$0xff]  ;;  %v12979_v56 = vcombine.low %v9642_v25, %v9646_v46  ;;  %v9564_v46 = vld [vmem:[#allocation11 + $0xc50] sm:$0xff] }
 0x6e4   : > { %v16274_v27 = vadd.f32 %v8521_v20, %v16240_v28  ;;  %v8523_v37 = vpop.f32.mrb[106].mxu0  ;;  %10378 = vmatpush1.bf16.msra.mxu0 %v12933_v40  ;;  %v8483_v34 = vpop.f32.mrb[71].mxu1  ;;  %10338 = vmatprep.subr.bf16.mxu1 %v12940_v29  ;;  %v12956_v28 = vcombine.high %v9618_v9, %v9622_v47  ;;  %v12958_v52 = vcombine.high %v9619_v13, %v9623_v58  ;;  %v9647_v59 = vld [vmem:[#allocation11 + $0xee8] sm:$0xff]  ;;  %v9666_v47 = vld [vmem:[#allocation11 + $0xf80] sm:$0xff] }
 0x6e5   : > { %v8524_v18 = vpop.f32.mrb[107].mxu0  ;;  %10379 = vmatprep.subr.bf16.mxu0 %v12942_v36  ;;  %v12957_v10 = vcombine.low %v9619_v13, %v9623_v58  ;;  %v12971_v40 = vcombine.low %v9634_v1, %v9638_v62  ;;  %v12973_v29 = vcombine.low %v9635_v48, %v9639_v50  ;;  %v12982_v36 = vcombine.high %v9643_v21, %v9647_v59  ;;  %v9651_v55 = vld [vmem:[#allocation11 + $0xf08] sm:$0xff]  ;;  %v9662_v37 = vld [vmem:[#allocation11 + $0xf60] sm:$0xff]  ;;  %v9556_v62 = vld [vmem:[#allocation11 + $0xc10] sm:$0xff] }
 0x6e6   : > { %v9655_v57 = vld [vmem:[#allocation11 + $0xf28] sm:$0xff]  ;;  %v12981_v54 = vcombine.low %v9643_v21, %v9647_v59  ;;  %v12988_v20 = vcombine.high %v9650_v3, %v9654_v51  ;;  %v9670_v13 = vld [vmem:[#allocation11 + $0xfa0] sm:$0xff]  ;;  %v9560_v48 = vld [vmem:[#allocation11 + $0xc30] sm:$0xff] }
 0x6e7   : > { %10339 = vmatpush1.bf16.msra.mxu1 %v12939_v24  ;;  %v12990_v8 = vcombine.high %v9651_v55, %v9655_v57  ;;  %v9658_v24 = vld [vmem:[#allocation11 + $0xf40] sm:$0xff]  ;;  %v9659_v34 = vld [vmem:[#allocation11 + $0xf48] sm:$0xff]  ;;  %v12989_v18 = vcombine.low %v9651_v55, %v9655_v57  ;;  %v9557_v50 = vld [vmem:[#allocation11 + $0xc18] sm:$0xff]  ;;  %v12895_v59 = vcombine.low %v9556_v62, %v9560_v48 }
 0x6e8   : > { %10380 = vmatpush1.bf16.msra.mxu0 %v12941_v60  ;;  %10340 = vmatprep.subr.bf16.mxu1 %v12948_v38  ;;  %v9663_v60 = vld [vmem:[#allocation11 + $0xf68] sm:$0xff]  ;;  %v12987_v38 = vcombine.low %v9650_v3, %v9654_v51  ;;  %v9568_v21 = vld [vmem:[#allocation11 + $0xc70] sm:$0xff] }
 0x6e9   : > { %10381 = vmatprep.subr.bf16.mxu0 %v12950_v49  ;;  %v12996_v49 = vcombine.high %v9658_v24, %v9662_v37  ;;  %v12998_v9 = vcombine.high %v9659_v34, %v9663_v60  ;;  %v9667_v58 = vld [vmem:[#allocation11 + $0xf88] sm:$0xff]  ;;  %v12904_v3 = vcombine.high %v9564_v46, %v9568_v21  ;;  %v9572_v51 = vld [vmem:[#allocation11 + $0xc90] sm:$0xff] }
 0x6ea   : > { %v9576_v55 = vld [vmem:[#allocation11 + $0xcb0] sm:$0xff] }
 0x6eb   : > { %10341 = vmatpush1.bf16.msra.mxu1 %v12947_v39  ;;  %v9671_v39 = vld [vmem:[#allocation11 + $0xfa8] sm:$0xff] }
 0x6ec   : > { %10382 = vmatpush1.bf16.msra.mxu0 %v12949_v42  ;;  %10342 = vmatprep.subr.bf16.mxu1 %v12956_v28  ;;  %v12995_v42 = vcombine.low %v9658_v24, %v9662_v37  ;;  %v12997_v28 = vcombine.low %v9659_v34, %v9663_v60  ;;  %v13006_v5 = vcombine.high %v9667_v58, %v9671_v39  ;;  %v9580_v37 = vld [vmem:[#allocation11 + $0xcd0] sm:$0xff]  ;;  %v9581_v60 = vld [vmem:[#allocation11 + $0xcd8] sm:$0xff] }
 0x6ed   : > { %10383 = vmatprep.subr.bf16.mxu0 %v12958_v52  ;;  %v13004_v52 = vcombine.high %v9666_v47, %v9670_v13  ;;  %v9584_v34 = vld [vmem:[#allocation11 + $0xcf0] sm:$0xff] }
 0x6ef   : > { %10343 = vmatpush1.bf16.msra.mxu1 %v12955_v43  ;;  %v9679_v43 = vld [vmem:[#allocation11 + $0xfe8] sm:$0xff] }
 0x6f0   : > { %10384 = vmatpush1.bf16.msra.mxu0 %v12957_v10  ;;  %10344 = vmatprep.subr.bf16.mxu1 %v12964_v14  ;;  %v13003_v10 = vcombine.low %v9666_v47, %v9670_v13  ;;  %v13005_v14 = vcombine.low %v9667_v58, %v9671_v39  ;;  %v13014_v1 = vcombine.high %v9675_v22, %v9679_v43  ;;  %v9588_v13 = vld [vmem:[#allocation11 + $0xd10] sm:$0xff]  ;;  %v9589_v39 = vld [vmem:[#allocation11 + $0xd18] sm:$0xff] }
 0x6f1   : > { %10385 = vmatprep.subr.bf16.mxu0 %v12966_v4  ;;  %v13012_v4 = vcombine.high %v9674_v15, %v9678_v0  ;;  %v9592_v58 = vld [vmem:[#allocation11 + $0xd30] sm:$0xff] }
 0x6f3   : > { %10345 = vmatpush1.bf16.msra.mxu1 %v12963_v45  ;;  %v9561_v45 = vld [vmem:[#allocation11 + $0xc38] sm:$0xff] }
 0x6f4   : > { %10386 = vmatpush1.bf16.msra.mxu0 %v12965_v23  ;;  %10346 = vmatprep.subr.bf16.mxu1 %v12972_v33  ;;  %v13011_v23 = vcombine.low %v9674_v15, %v9678_v0  ;;  %v13013_v33 = vcombine.low %v9675_v22, %v9679_v43  ;;  %v12898_v25 = vcombine.high %v9557_v50, %v9561_v45  ;;  %v9596_v15 = vld [vmem:[#allocation11 + $0xd50] sm:$0xff]  ;;  %v9597_v22 = vld [vmem:[#allocation11 + $0xd58] sm:$0xff] }
 0x6f5   : > { %10387 = vmatprep.subr.bf16.mxu0 %v12974_v30  ;;  %v12896_v30 = vcombine.high %v9556_v62, %v9560_v48  ;;  %v9600_v0 = vld [vmem:[#allocation11 + $0xd70] sm:$0xff]  ;;  %v9601_v43 = vld [vmem:[#allocation11 + $0xd78] sm:$0xff] }
 0x6f6   : > { %v9604_v62 = vld [vmem:[#allocation11 + $0xd90] sm:$0xff] }
 0x6f7   : > { %10347 = vmatpush1.bf16.msra.mxu1 %v12971_v40  ;;  %v9565_v40 = vld [vmem:[#allocation11 + $0xc58] sm:$0xff]  ;;  %v9608_v48 = vld [vmem:[#allocation11 + $0xdb0] sm:$0xff] }
 0x6f8   : > { %10388 = vmatpush1.bf16.msra.mxu0 %v12973_v29  ;;  %10348 = vmatprep.subr.bf16.mxu1 %v12980_v7  ;;  %v9569_v29 = vld [vmem:[#allocation11 + $0xc78] sm:$0xff]  ;;  %v16277_v7 = vrot.slane %v16203_v19, 3 }
 0x6f9   : > { %10389 = vmatprep.subr.bf16.mxu0 %v12982_v36  ;;  %v12897_v36 = vcombine.low %v9557_v50, %v9561_v45  ;;  %v12906_v57 = vcombine.high %v9565_v40, %v9569_v29  ;;  %v12905_v19 = vcombine.low %v9565_v40, %v9569_v29  ;;  %v9605_v50 = vld [vmem:[#allocation11 + $0xd98] sm:$0xff] }
 0x6fa   : > { %v9609_v45 = vld [vmem:[#allocation11 + $0xdb8] sm:$0xff] }
 0x6fb   : > { %10349 = vmatpush1.bf16.msra.mxu1 %v12979_v56  ;;  %v9573_v56 = vld [vmem:[#allocation11 + $0xc98] sm:$0xff] }
 0x6fc   : > { %10390 = vmatpush1.bf16.msra.mxu0 %v12981_v54  ;;  %10350 = vmatprep.subr.bf16.mxu1 %v12988_v20  ;;  %v9577_v54 = vld [vmem:[#allocation11 + $0xcb8] sm:$0xff]  ;;  %v12903_v20 = vcombine.low %v9564_v46, %v9568_v21  ;;  %v12946_v46 = vcombine.high %v9605_v50, %v9609_v45  ;;  %v9612_v21 = vld [vmem:[#allocation11 + $0xdd0] sm:$0xff] }
 0x6fd   : > { %10391 = vmatprep.subr.bf16.mxu0 %v12990_v8  ;;  %v12912_v8 = vcombine.high %v9572_v51, %v9576_v55  ;;  %v12914_v24 = vcombine.high %v9573_v56, %v9577_v54 }
 0x6ff   : > { %10351 = vmatpush1.bf16.msra.mxu1 %v12987_v38  ;;  %v9585_v38 = vld [vmem:[#allocation11 + $0xcf8] sm:$0xff] }
 0x700   : > { %10392 = vmatpush1.bf16.msra.mxu0 %v12989_v18  ;;  %10352 = vmatprep.subr.bf16.mxu1 %v12996_v49  ;;  %v12911_v18 = vcombine.low %v9572_v51, %v9576_v55  ;;  %v12913_v49 = vcombine.low %v9573_v56, %v9577_v54  ;;  %v12922_v47 = vcombine.high %v9581_v60, %v9585_v38  ;;  %v9617_v51 = vld [vmem:[#allocation11 + $0xdf8] sm:$0xff] }
 0x701   : > { %10393 = vmatprep.subr.bf16.mxu0 %v12998_v9  ;;  %v12920_v9 = vcombine.high %v9580_v37, %v9584_v34 }
 0x703   : > { %10353 = vmatpush1.bf16.msra.mxu1 %v12995_v42  ;;  %v9593_v42 = vld [vmem:[#allocation11 + $0xd38] sm:$0xff] }
 0x704   : > { %10394 = vmatpush1.bf16.msra.mxu0 %v12997_v28  ;;  %10354 = vmatprep.subr.bf16.mxu1 %v13004_v52  ;;  %v12921_v28 = vcombine.low %v9581_v60, %v9585_v38  ;;  %v12928_v52 = vcombine.high %v9588_v13, %v9592_v58  ;;  %v9620_v60 = vld [vmem:[#allocation11 + $0xe10] sm:$0xff] }
 0x705   : > { %10395 = vmatprep.subr.bf16.mxu0 %v13006_v5  ;;  %v12930_v5 = vcombine.high %v9589_v39, %v9593_v42  ;;  %v9624_v38 = vld [vmem:[#allocation11 + $0xe30] sm:$0xff] }
 0x707   : > { %10355 = vmatpush1.bf16.msra.mxu1 %v13003_v10  ;;  %v12927_v10 = vcombine.low %v9588_v13, %v9592_v58  ;;  %v9628_v13 = vld [vmem:[#allocation11 + $0xe50] sm:$0xff] }
 0x708   : > { %10396 = vmatpush1.bf16.msra.mxu0 %v13005_v14  ;;  %10356 = vmatprep.subr.bf16.mxu1 %v13012_v4  ;;  %v12929_v14 = vcombine.low %v9589_v39, %v9593_v42  ;;  %v12936_v4 = vcombine.high %v9596_v15, %v9600_v0  ;;  %v9632_v58 = vld [vmem:[#allocation11 + $0xe70] sm:$0xff]  ;;  %v9629_v39 = vld [vmem:[#allocation11 + $0xe58] sm:$0xff] }
 0x709   : > { %10397 = vmatprep.subr.bf16.mxu0 %v13014_v1  ;;  %v12938_v1 = vcombine.high %v9597_v22, %v9601_v43  ;;  %v9633_v42 = vld [vmem:[#allocation11 + $0xe78] sm:$0xff] }
 0x70b   : > { %10357 = vmatpush1.bf16.msra.mxu1 %v13011_v23  ;;  %v12935_v23 = vcombine.low %v9596_v15, %v9600_v0  ;;  %v9636_v15 = vld [vmem:[#allocation11 + $0xe90] sm:$0xff] }
 0x70c   : > { %10398 = vmatpush1.bf16.msra.mxu0 %v13013_v33  ;;  %10408 = vmatprep.subr.bf16.mxu1 %v12896_v30  ;;  %v12937_v33 = vcombine.low %v9597_v22, %v9601_v43  ;;  %v12944_v30 = vcombine.high %v9604_v62, %v9608_v48  ;;  %v9640_v0 = vld [vmem:[#allocation11 + $0xeb0] sm:$0xff]  ;;  %v9637_v22 = vld [vmem:[#allocation11 + $0xe98] sm:$0xff] }
 0x70d   : > { %10449 = vmatprep.subr.bf16.mxu0 %v12898_v25  ;;  %v9641_v43 = vld [vmem:[#allocation11 + $0xeb8] sm:$0xff] }
 0x70e   : > { %10359 = vmatmul.mubr.bf16.vlgmr.msra.gmra.mrb[84].mxu1 %v16277_v7 }
 0x70f   : > { %10400 = vmatmul.mubr.bf16.vlgmr.msra.gmra.mrb[120].mxu0 %v16277_v7  ;;  %10409 = vmatpush1.bf16.msra.mxu1 %v12895_v59  ;;  %v9616_v59 = vld [vmem:[#allocation11 + $0xdf0] sm:$0xff] }
 0x710   : > { %10440 = vmatprep.mubr.bf16.mxu1 %v16259_v41  ;;  %10450 = vmatpush1.bf16.msra.mxu0 %v12897_v36 }
 0x711   : > { %10481 = vmatprep.mubr.bf16.mxu0 %v16259_v41  ;;  %10410 = vmatprep.subr.bf16.mxu1 %v12904_v3  ;;  %v12919_v41 = vcombine.low %v9580_v37, %v9584_v34  ;;  %v9613_v3 = vld [vmem:[#allocation11 + $0xdd8] sm:$0xff]  ;;  %v12952_v37 = vcombine.high %v9612_v21, %v9616_v59 }
 0x712   : > { %10451 = vmatprep.subr.bf16.mxu0 %v12906_v57 }
 0x713   : > { %10411 = vmatpush1.bf16.msra.mxu1 %v12903_v20  ;;  %v12943_v20 = vcombine.low %v9604_v62, %v9608_v48  ;;  %v9644_v62 = vld [vmem:[#allocation11 + $0xed0] sm:$0xff] }
 0x714   : > { %10452 = vmatpush1.bf16.msra.mxu0 %v12905_v19  ;;  %10412 = vmatprep.subr.bf16.mxu1 %v12912_v8  ;;  %v9648_v48 = vld [vmem:[#allocation11 + $0xef0] sm:$0xff] }
 0x715   : > { %10453 = vmatprep.subr.bf16.mxu0 %v12914_v24  ;;  %v12945_v24 = vcombine.low %v9605_v50, %v9609_v45  ;;  %v9645_v50 = vld [vmem:[#allocation11 + $0xed8] sm:$0xff] }
 0x716   : > { %v9649_v45 = vld [vmem:[#allocation11 + $0xef8] sm:$0xff] }
 0x717   : > { %10413 = vmatpush1.bf16.msra.mxu1 %v12911_v18  ;;  %v9625_v18 = vld [vmem:[#allocation11 + $0xe38] sm:$0xff] }
 0x718   : > { %10454 = vmatpush1.bf16.msra.mxu0 %v12913_v49  ;;  %10414 = vmatprep.subr.bf16.mxu1 %v12920_v9  ;;  %v12951_v49 = vcombine.low %v9612_v21, %v9616_v59  ;;  %v12953_v9 = vcombine.low %v9613_v3, %v9617_v51  ;;  %v9656_v21 = vld [vmem:[#allocation11 + $0xf30] sm:$0xff]  ;;  %v9653_v59 = vld [vmem:[#allocation11 + $0xf18] sm:$0xff] }
 0x719   : > { %10455 = vmatprep.subr.bf16.mxu0 %v12922_v47 }
 0x71b   : > { %10415 = vmatpush1.bf16.msra.mxu1 %v12919_v41  ;;  %v12959_v41 = vcombine.low %v9620_v60, %v9624_v38 }
 0x71c   : > { %10456 = vmatpush1.bf16.msra.mxu0 %v12921_v28  ;;  %10416 = vmatprep.subr.bf16.mxu1 %v12928_v52  ;;  %v12968_v52 = vcombine.high %v9628_v13, %v9632_v58 }
 0x71d   : > { %10457 = vmatprep.subr.bf16.mxu0 %v12930_v5  ;;  %v12970_v5 = vcombine.high %v9629_v39, %v9633_v42 }
 0x71f   : > { %10417 = vmatpush1.bf16.msra.mxu1 %v12927_v10  ;;  %v12967_v10 = vcombine.low %v9628_v13, %v9632_v58  ;;  %v9676_v13 = vld [vmem:[#allocation11 + $0xfd0] sm:$0xff] }
 0x720   : > { %10458 = vmatpush1.bf16.msra.mxu0 %v12929_v14  ;;  %10418 = vmatprep.subr.bf16.mxu1 %v12936_v4  ;;  %v12969_v14 = vcombine.low %v9629_v39, %v9633_v42  ;;  %v12976_v4 = vcombine.high %v9636_v15, %v9640_v0  ;;  %v9680_v58 = vld [vmem:[#allocation11 + $0xff0] sm:$0xff]  ;;  %v9677_v39 = vld [vmem:[#allocation11 + $0xfd8] sm:$0xff] }
 0x721   : > { %v8560_v25 = vpop.f32.mrb[72].mxu1  ;;  %10459 = vmatprep.subr.bf16.mxu0 %v12938_v1  ;;  %v12978_v1 = vcombine.high %v9637_v22, %v9641_v43  ;;  %v9681_v42 = vld [vmem:[#allocation11 + $0xff8] sm:$0xff] }
 0x722   : > { %v16284_v40 = vadd.f32 %v8560_v25, %v16249_v61  ;;  %v8601_v29 = vpop.f32.mrb[108].mxu0  ;;  %v8562_v36 = vpop.f32.mrb[73].mxu1  ;;  %v12986_v25 = vcombine.high %v9645_v50, %v9649_v45 }
 0x723   : > { %v16287_v55 = vadd.f32 %v8601_v29, %v16251_v17  ;;  %v16290_v57 = vadd.f32 %v8562_v36, %v16253_v12  ;;  %v8603_v56 = vpop.f32.mrb[109].mxu0  ;;  %v8564_v54 = vpop.f32.mrb[74].mxu1  ;;  %10419 = vmatpush1.bf16.msra.mxu1 %v12935_v23  ;;  %v12954_v17 = vcombine.high %v9613_v3, %v9617_v51  ;;  %v9621_v12 = vld [vmem:[#allocation11 + $0xe18] sm:$0xff]  ;;  %v12975_v23 = vcombine.low %v9636_v15, %v9640_v0 }
 0x724   : > { %v16293_v19 = vadd.f32 %v8603_v56, %v16255_v2  ;;  %v8605_v8 = vpop.f32.mrb[110].mxu0  ;;  %10460 = vmatpush1.bf16.msra.mxu0 %v12937_v33  ;;  %v8565_v61 = vpop.f32.mrb[75].mxu1  ;;  %10420 = vmatprep.subr.bf16.mxu1 %v12944_v30  ;;  %v12960_v2 = vcombine.high %v9620_v60, %v9624_v38  ;;  %v12962_v47 = vcombine.high %v9621_v12, %v9625_v18  ;;  %v9657_v29 = vld [vmem:[#allocation11 + $0xf38] sm:$0xff]  ;;  %v9660_v54 = vld [vmem:[#allocation11 + $0xf50] sm:$0xff] }
 0x725   : > { %v8606_v34 = vpop.f32.mrb[111].mxu0  ;;  %10461 = vmatprep.subr.bf16.mxu0 %v12946_v46  ;;  %v12961_v28 = vcombine.low %v9621_v12, %v9625_v18  ;;  %v12977_v33 = vcombine.low %v9637_v22, %v9641_v43  ;;  %v12984_v30 = vcombine.high %v9644_v62, %v9648_v48  ;;  %v9652_v46 = vld [vmem:[#allocation11 + $0xf10] sm:$0xff]  ;;  %v12983_v36 = vcombine.low %v9644_v62, %v9648_v48  ;;  %v9661_v8 = vld [vmem:[#allocation11 + $0xf58] sm:$0xff] }
 0x726   : > { %v12985_v3 = vcombine.low %v9645_v50, %v9649_v45  ;;  %v12992_v51 = vcombine.high %v9652_v46, %v9656_v21  ;;  %v12994_v56 = vcombine.high %v9653_v59, %v9657_v29  ;;  %v9665_v61 = vld [vmem:[#allocation11 + $0xf78] sm:$0xff]  ;;  %v9668_v60 = vld [vmem:[#allocation11 + $0xf90] sm:$0xff]  ;;  %v13015_v15 = vcombine.low %v9676_v13, %v9680_v58 }
 0x727   : > { %10421 = vmatpush1.bf16.msra.mxu1 %v12943_v20  ;;  %v9664_v20 = vld [vmem:[#allocation11 + $0xf70] sm:$0xff]  ;;  %v9669_v12 = vld [vmem:[#allocation11 + $0xf98] sm:$0xff]  ;;  %v13017_v0 = vcombine.low %v9677_v39, %v9681_v42 }
 0x728   : > { %10462 = vmatpush1.bf16.msra.mxu0 %v12945_v24  ;;  %10422 = vmatprep.subr.bf16.mxu1 %v12952_v37  ;;  %v12991_v24 = vcombine.low %v9652_v46, %v9656_v21  ;;  %v12993_v37 = vcombine.low %v9653_v59, %v9657_v29  ;;  %v13000_v34 = vcombine.high %v9660_v54, %v9664_v20  ;;  %v9672_v38 = vld [vmem:[#allocation11 + $0xfb0] sm:$0xff]  ;;  %v9673_v18 = vld [vmem:[#allocation11 + $0xfb8] sm:$0xff] }
 0x729   : > { %10463 = vmatprep.subr.bf16.mxu0 %v12954_v17  ;;  %v13002_v17 = vcombine.high %v9661_v8, %v9665_v61  ;;  %v14228_v22 = vld [vmem:[#allocation14 + $0x4] ss:$8 sps:$4 sm:$0xff]   ;;  %v14226_v43 = vld [vmem:[#allocation14] ss:$8 sps:$4 sm:$0xff]   ;;  %v14237_v62 = vld [vmem:[#allocation14 + $0x34] ss:$8 sps:$4 sm:$0xff]  }
 0x72a   : > { %v14235_v48 = vld [vmem:[#allocation14 + $0x30] ss:$8 sps:$4 sm:$0xff]   ;;  %v14240_v50 = vld [vmem:[#allocation14 + $0x44] ss:$8 sps:$4 sm:$0xff]   ;;  %v14238_v45 = vld [vmem:[#allocation14 + $0x40] ss:$8 sps:$4 sm:$0xff]  }
 0x72b   : > { %10423 = vmatpush1.bf16.msra.mxu1 %v12951_v49  ;;  %v12999_v49 = vcombine.low %v9660_v54, %v9664_v20 }
 0x72c   : > { %10464 = vmatpush1.bf16.msra.mxu0 %v12953_v9  ;;  %10424 = vmatprep.subr.bf16.mxu1 %v12960_v2  ;;  %v13001_v9 = vcombine.low %v9661_v8, %v9665_v61  ;;  %v13008_v2 = vcombine.high %v9668_v60, %v9672_v38  ;;  %v14247_v61 = vld [vmem:[#allocation14 + $0x70] ss:$8 sps:$4 sm:$0xff]  }
 0x72d   : > { %10465 = vmatprep.subr.bf16.mxu0 %v12962_v47  ;;  %v13010_v47 = vcombine.high %v9669_v12, %v9673_v18 }
 0x72f   : > { %10425 = vmatpush1.bf16.msra.mxu1 %v12959_v41  ;;  %v13007_v41 = vcombine.low %v9668_v60, %v9672_v38  ;;  %v14259_v60 = vld [vmem:[#allocation14 + $0xb0] ss:$8 sps:$4 sm:$0xff]   ;;  %v14264_v38 = vld [vmem:[#allocation14 + $0xc4] ss:$8 sps:$4 sm:$0xff]  }
 0x730   : > { %10466 = vmatpush1.bf16.msra.mxu0 %v12961_v28  ;;  %10426 = vmatprep.subr.bf16.mxu1 %v12968_v52  ;;  %v13009_v28 = vcombine.low %v9669_v12, %v9673_v18  ;;  %v13016_v52 = vcombine.high %v9676_v13, %v9680_v58  ;;  %v14262_v12 = vld [vmem:[#allocation14 + $0xc0] ss:$8 sps:$4 sm:$0xff]   ;;  %v14267_v18 = vld [vmem:[#allocation14 + $0xd4] ss:$8 sps:$4 sm:$0xff]   ;;  %v14271_v13 = vld [vmem:[#allocation14 + $0xf0] ss:$8 sps:$4 sm:$0xff]  }
 0x731   : > { %10467 = vmatprep.subr.bf16.mxu0 %v12970_v5  ;;  %v13018_v5 = vcombine.high %v9677_v39, %v9681_v42  ;;  %v14276_v58 = vld [vmem:[#allocation14 + $0x104] ss:$8 sps:$4 sm:$0xff]  }
 0x733   : > { %10427 = vmatpush1.bf16.msra.mxu1 %v12967_v10  ;;  %v14231_v10 = vld [vmem:[#allocation14 + $0x14] ss:$8 sps:$4 sm:$0xff]  }
 0x734   : > { %10468 = vmatpush1.bf16.msra.mxu0 %v12969_v14  ;;  %10428 = vmatprep.subr.bf16.mxu1 %v12976_v4  ;;  %v14229_v14 = vld [vmem:[#allocation14 + $0x10] ss:$8 sps:$4 sm:$0xff]   ;;  %v14234_v4 = vld [vmem:[#allocation14 + $0x24] ss:$8 sps:$4 sm:$0xff]  }
 0x735   : > { %10469 = vmatprep.subr.bf16.mxu0 %v12978_v1  ;;  %v14232_v1 = vld [vmem:[#allocation14 + $0x20] ss:$8 sps:$4 sm:$0xff]  }
 0x737   : > { %10429 = vmatpush1.bf16.msra.mxu1 %v12975_v23  ;;  %v14243_v23 = vld [vmem:[#allocation14 + $0x54] ss:$8 sps:$4 sm:$0xff]  }
 0x738   : > { %10470 = vmatpush1.bf16.msra.mxu0 %v12977_v33  ;;  %10430 = vmatprep.subr.bf16.mxu1 %v12984_v30  ;;  %v14241_v33 = vld [vmem:[#allocation14 + $0x50] ss:$8 sps:$4 sm:$0xff]  }
 0x739   : > { %10471 = vmatprep.subr.bf16.mxu0 %v12986_v25 }
 0x73b   : > { %10431 = vmatpush1.bf16.msra.mxu1 %v12983_v36 }
 0x73c   : > { %10472 = vmatpush1.bf16.msra.mxu0 %v12985_v3  ;;  %10432 = vmatprep.subr.bf16.mxu1 %v12992_v51  ;;  %v14244_v51 = vld [vmem:[#allocation14 + $0x60] ss:$8 sps:$4 sm:$0xff]  }
 0x73d   : > { %10473 = vmatprep.subr.bf16.mxu0 %v12994_v56 }
 0x73f   : > { %10433 = vmatpush1.bf16.msra.mxu1 %v12991_v24  ;;  %v14250_v24 = vld [vmem:[#allocation14 + $0x80] ss:$8 sps:$4 sm:$0xff]  }
 0x740   : > { %10474 = vmatpush1.bf16.msra.mxu0 %v12993_v37  ;;  %10434 = vmatprep.subr.bf16.mxu1 %v13000_v34  ;;  %v14253_v37 = vld [vmem:[#allocation14 + $0x90] ss:$8 sps:$4 sm:$0xff]   ;;  %v14258_v34 = vld [vmem:[#allocation14 + $0xa4] ss:$8 sps:$4 sm:$0xff]  }
 0x741   : > { %10475 = vmatprep.subr.bf16.mxu0 %v13002_v17  ;;  %v14261_v17 = vld [vmem:[#allocation14 + $0xb4] ss:$8 sps:$4 sm:$0xff]  }
 0x743   : > { %10435 = vmatpush1.bf16.msra.mxu1 %v12999_v49  ;;  %v14265_v49 = vld [vmem:[#allocation14 + $0xd0] ss:$8 sps:$4 sm:$0xff]  }
 0x744   : > { %10476 = vmatpush1.bf16.msra.mxu0 %v13001_v9  ;;  %10436 = vmatprep.subr.bf16.mxu1 %v13008_v2  ;;  %v14270_v9 = vld [vmem:[#allocation14 + $0xe4] ss:$8 sps:$4 sm:$0xff]   ;;  %v14268_v2 = vld [vmem:[#allocation14 + $0xe0] ss:$8 sps:$4 sm:$0xff]  }
 0x745   : > { %10477 = vmatprep.subr.bf16.mxu0 %v13010_v47  ;;  %v14273_v47 = vld [vmem:[#allocation14 + $0xf4] ss:$8 sps:$4 sm:$0xff]  }
 0x747   : > { %10437 = vmatpush1.bf16.msra.mxu1 %v13007_v41 }
 0x748   : > { %10478 = vmatpush1.bf16.msra.mxu0 %v13009_v28  ;;  %10438 = vmatprep.subr.bf16.mxu1 %v13016_v52 }
 0x749   : > { %10479 = vmatprep.subr.bf16.mxu0 %v13018_v5 }
 0x74b   : > { %10439 = vmatpush1.bf16.msra.mxu1 %v13015_v15 }
 0x74c   : > { %10480 = vmatpush1.bf16.msra.mxu0 %v13017_v0  ;;  %11344 = vmatprep.subr.bf16.mxu1 %v14228_v22 }
 0x74e   : > { %10441 = vmatmul.mubr.bf16.vlgmr.msra.gmra.mrb[88].mxu1 %v16277_v7 }
 0x74f   : > { %10482 = vmatmul.mubr.bf16.vlgmr.msra.gmra.mrb[124].mxu0 %v16277_v7  ;;  %11345 = vmatpush1.bf16.msra.mxu1 %v14226_v43  ;;  %v14246_v7 = vld [vmem:[#allocation14 + $0x64] ss:$8 sps:$4 sm:$0xff]  }
 0x750   : > { %11346 = vmatprep.subr.bf16.mxu1 %v14231_v10 }
 0x753   : > { %11347 = vmatpush1.bf16.msra.mxu1 %v14229_v14 }
 0x754   : > { %11348 = vmatprep.subr.bf16.mxu1 %v14234_v4  ;;  %v16321_v4 = vld [vmem:[#allocation12] sm:$0xff] }
 0x757   : > { %11349 = vmatpush1.bf16.msra.mxu1 %v14232_v1 }
 0x758   : > { %11350 = vmatprep.subr.bf16.mxu1 %v14237_v62 }
 0x75b   : > { %11351 = vmatpush1.bf16.msra.mxu1 %v14235_v48 }
 0x75c   : > { %11352 = vmatprep.subr.bf16.mxu1 %v14240_v50 }
 0x75f   : > { %11353 = vmatpush1.bf16.msra.mxu1 %v14238_v45 }
 0x760   : > { %11354 = vmatprep.subr.bf16.mxu1 %v14243_v23 }
 0x761   : > { %v9415_v30 = vpop.f32.mrb[76].mxu1 }
 0x762   : > { %v16298_v25 = vadd.f32 %v9415_v30, %v16265_v11  ;;  %v9456_v46 = vpop.f32.mrb[112].mxu0  ;;  %v9417_v21 = vpop.f32.mrb[77].mxu1  ;;  %v14249_v11 = vld [vmem:[#allocation14 + $0x74] ss:$8 sps:$4 sm:$0xff]  }
 0x763   : > { %v16301_v59 = vadd.f32 %v9456_v46, %v16268_v44  ;;  %v16304_v29 = vadd.f32 %v9417_v21, %v16271_v16  ;;  %v9458_v36 = vpop.f32.mrb[113].mxu0  ;;  %v9419_v3 = vpop.f32.mrb[78].mxu1  ;;  %11355 = vmatpush1.bf16.msra.mxu1 %v14241_v33  ;;  %v14252_v44 = vld [vmem:[#allocation14 + $0x84] ss:$8 sps:$4 sm:$0xff]   ;;  %v14255_v16 = vld [vmem:[#allocation14 + $0x94] ss:$8 sps:$4 sm:$0xff]  }
 0x764   : > { %v16307_v56 = vadd.f32 %v9458_v36, %v16274_v27  ;;  %v9460_v54 = vpop.f32.mrb[114].mxu0  ;;  %v9420_v20 = vpop.f32.mrb[79].mxu1  ;;  %11356 = vmatprep.subr.bf16.mxu1 %v14246_v7  ;;  %v14256_v27 = vld [vmem:[#allocation14 + $0xa0] ss:$8 sps:$4 sm:$0xff]  }
 0x765   : > { %v9461_v8 = vpop.f32.mrb[115].mxu0 }
 0x767   : > { %11357 = vmatpush1.bf16.msra.mxu1 %v14244_v51 }
 0x768   : > { %11358 = vmatprep.subr.bf16.mxu1 %v14249_v11 }
 0x76b   : > { %11359 = vmatpush1.bf16.msra.mxu1 %v14247_v61 }
 0x76c   : > { %11360 = vmatprep.subr.bf16.mxu1 %v14252_v44  ;;  %v14280_v44 = vld [vmem:[#allocation14 + $0x120] ss:$8 sps:$4 sm:$0xff]  }
 0x76f   : > { %11361 = vmatpush1.bf16.msra.mxu1 %v14250_v24  ;;  %v14285_v24 = vld [vmem:[#allocation14 + $0x134] ss:$8 sps:$4 sm:$0xff]  }
 0x770   : > { %11362 = vmatprep.subr.bf16.mxu1 %v14255_v16  ;;  %v14283_v16 = vld [vmem:[#allocation14 + $0x130] ss:$8 sps:$4 sm:$0xff]  }
 0x773   : > { %11363 = vmatpush1.bf16.msra.mxu1 %v14253_v37  ;;  %v14288_v37 = vld [vmem:[#allocation14 + $0x144] ss:$8 sps:$4 sm:$0xff]  }
 0x774   : > { %11364 = vmatprep.subr.bf16.mxu1 %v14258_v34  ;;  %v14286_v34 = vld [vmem:[#allocation14 + $0x140] ss:$8 sps:$4 sm:$0xff]  }
 0x777   : > { %11365 = vmatpush1.bf16.msra.mxu1 %v14256_v27  ;;  %v14291_v27 = vld [vmem:[#allocation14 + $0x154] ss:$8 sps:$4 sm:$0xff]  }
 0x778   : > { %11366 = vmatprep.subr.bf16.mxu1 %v14261_v17  ;;  %v14289_v17 = vld [vmem:[#allocation14 + $0x150] ss:$8 sps:$4 sm:$0xff]  }
 0x77b   : > { %11367 = vmatpush1.bf16.msra.mxu1 %v14259_v60  ;;  %v14294_v60 = vld [vmem:[#allocation14 + $0x164] ss:$8 sps:$4 sm:$0xff]  }
 0x77c   : > { %11368 = vmatprep.subr.bf16.mxu1 %v14264_v38  ;;  %v14292_v38 = vld [vmem:[#allocation14 + $0x160] ss:$8 sps:$4 sm:$0xff]  }
 0x77f   : > { %11369 = vmatpush1.bf16.msra.mxu1 %v14262_v12  ;;  %v14297_v12 = vld [vmem:[#allocation14 + $0x174] ss:$8 sps:$4 sm:$0xff]  }
 0x780   : > { %11370 = vmatprep.subr.bf16.mxu1 %v14267_v18  ;;  %v14295_v18 = vld [vmem:[#allocation14 + $0x170] ss:$8 sps:$4 sm:$0xff]  }
 0x783   : > { %11371 = vmatpush1.bf16.msra.mxu1 %v14265_v49  ;;  %v14300_v49 = vld [vmem:[#allocation14 + $0x184] ss:$8 sps:$4 sm:$0xff]  }
 0x784   : > { %11372 = vmatprep.subr.bf16.mxu1 %v14270_v9  ;;  %v14298_v9 = vld [vmem:[#allocation14 + $0x180] ss:$8 sps:$4 sm:$0xff]  }
 0x787   : > { %11373 = vmatpush1.bf16.msra.mxu1 %v14268_v2  ;;  %v14303_v2 = vld [vmem:[#allocation14 + $0x194] ss:$8 sps:$4 sm:$0xff]  }
 0x788   : > { %11374 = vmatprep.subr.bf16.mxu1 %v14273_v47  ;;  %v14301_v47 = vld [vmem:[#allocation14 + $0x190] ss:$8 sps:$4 sm:$0xff]  }
 0x78b   : > { %11375 = vmatpush1.bf16.msra.mxu1 %v14271_v13  ;;  %v14306_v13 = vld [vmem:[#allocation14 + $0x1a4] ss:$8 sps:$4 sm:$0xff]  }
 0x78c   : > { %11385 = vmatprep.subr.bf16.mxu1 %v14276_v58  ;;  %v14304_v58 = vld [vmem:[#allocation14 + $0x1a0] ss:$8 sps:$4 sm:$0xff]  }
 0x7a1   : > { %v9497_v39 = vpop.f32.mrb[80].mxu1 }
 0x7a2   : > { %v16310_v42 = vadd.f32 %v9497_v39, %v16284_v40  ;;  %v9538_v41 = vpop.f32.mrb[116].mxu0  ;;  %v9499_v28 = vpop.f32.mrb[81].mxu1  ;;  %v10503_v40 = vrot.slane %v16321_v4, %v15672_v63  ;;  %v14309_v39 = vld [vmem:[#allocation14 + $0x1b4] ss:$8 sps:$4 sm:$0xff]  }
 0x7a3   : > { %v16313_v52 = vadd.f32 %v9538_v41, %v16287_v55  ;;  %v16316_v5 = vadd.f32 %v9499_v28, %v16290_v57  ;;  %v9540_v15 = vpop.f32.mrb[117].mxu0  ;;  %v9501_v0 = vpop.f32.mrb[82].mxu1  ;;  %v10507_v55 = vrot.slane %v16321_v4, %v15683_v26  ;;  %v14307_v41 = vld [vmem:[#allocation14 + $0x1b0] ss:$8 sps:$4 sm:$0xff]   ;;  %v14312_v28 = vld [vmem:[#allocation14 + $0x1c4] ss:$8 sps:$4 sm:$0xff]  }
 0x7a4   : > { %v16319_v22 = vadd.f32 %v9540_v15, %v16293_v19  ;;  %v9542_v43 = vpop.f32.mrb[118].mxu0  ;;  %v9502_v10 = vpop.f32.mrb[83].mxu1  ;;  %v10515_v19 = vrot.slane %v16321_v4, %v15666_v53  ;;  %v14274_v53 = vld [vmem:[#allocation14 + $0x100] ss:$8 sps:$4 sm:$0xff]   ;;  %v14315_v0 = vld [vmem:[#allocation14 + $0x1d4] ss:$8 sps:$4 sm:$0xff]  }
 0x7a5   : > { %v9543_v14 = vpop.f32.mrb[119].mxu0  ;;  %v14310_v15 = vld [vmem:[#allocation14 + $0x1c0] ss:$8 sps:$4 sm:$0xff]   ;;  %v14313_v43 = vld [vmem:[#allocation14 + $0x1d0] ss:$8 sps:$4 sm:$0xff]   ;;  %v10511_v10 = vrot.slane %v16321_v4, %v15680_v31 }
 0x7a6   : > { %v14318_v14 = vld [vmem:[#allocation14 + $0x1e4] ss:$8 sps:$4 sm:$0xff]  }
 0x7e1   : > { %v10360_v1 = vpop.f32.mrb[84].mxu1 }
 0x7e2   : > { %v10490_v57 = vadd.f32 %v10360_v1, %v16298_v25  ;;  %v10401_v62 = vpop.f32.mrb[120].mxu0  ;;  %v10362_v48 = vpop.f32.mrb[85].mxu1  ;;  %v10523_v1 = vrot.slane %v16321_v4, %v2505_v32 }
 0x7e3   : > { %v16331_v50 = vadd.f32 %v10401_v62, %v16301_v59  ;;  %v10491_v45 = vadd.f32 %v10362_v48, %v16304_v29  ;;  %v10403_v23 = vpop.f32.mrb[121].mxu0  ;;  %v10364_v33 = vpop.f32.mrb[86].mxu1  ;;  %v14279_v59 = vld [vmem:[#allocation14 + $0x114] ss:$8 sps:$4 sm:$0xff]   ;;  %v14277_v29 = vld [vmem:[#allocation14 + $0x110] ss:$8 sps:$4 sm:$0xff]  }
 0x7e4   : > { %v10540_v7 = vadd.f32 %v10503_v40, %v10490_v57  ;;  %v10493_v30 = vadd.f32 %v10403_v23, %v16307_v56  ;;  %v10405_v46 = vpop.f32.mrb[122].mxu0  ;;  %v10365_v21 = vpop.f32.mrb[87].mxu1  ;;  %v14282_v56 = vld [vmem:[#allocation14 + $0x124] ss:$8 sps:$4 sm:$0xff]  }
 0x7e5   : > { %v10541_v36 = vadd.f32 %v10507_v55, %v10491_v45  ;;  %v10406_v3 = vpop.f32.mrb[123].mxu0  ;;  %v14316_v55 = vld [vmem:[#allocation14 + $0x1e0] ss:$8 sps:$4 sm:$0xff]   ;;  %v10542_v57 = vadd.f32 %v10511_v10, %v16331_v50  ;;  %v14321_v45 = vld [vmem:[#allocation14 + $0x1f4] ss:$8 sps:$4 sm:$0xff]  }
 0x7e6   : > { %v10548_v25 = vmax.f32 %v10540_v7, 0.0  ;;  %v10543_v51 = vadd.f32 %v10515_v19, %v10493_v30  ;;  %v14324_v3 = vld [vmem:[#allocation14 + $0x204] ss:$8 sps:$4 sm:$0xff]   ;;  %v14355_v10 = vld [vmem:[#allocation14 + $0x2b0] ss:$8 sps:$4 sm:$0xff]  }
 0x7e7   : > { %v10549_v54 = vmax.f32 %v10541_v36, 0.0  ;;  %v10550_v36 = vmax.f32 %v10542_v57, 0.0  ;;  %v14361_v57 = vld [vmem:[#allocation14 + $0x2d0] ss:$8 sps:$4 sm:$0xff]  }
 0x7e8   : > { %v10551_v20 = vmax.f32 %v10543_v51, 0.0  ;;  %v10556_v8 = vpack.c.bf16 %v10548_v25, %v10548_v25 }
 0x7e9   : > { %v10557_v11 = vpack.c.bf16 %v10549_v54, %v10549_v54  ;;  %v10558_v54 = vpack.c.bf16 %v10550_v36, %v10550_v36 }
 0x7ea   : > { %v10559_v61 = vpack.c.bf16 %v10551_v20, %v10551_v20  ;;  %v14419_v20 = vld [vmem:[%s16467_s9] sm:$0xff]  }
 0x7eb   : > { %11376 = vmatprep.mubr.bf16.mxu1 %v10557_v11  ;;  %v14420_v11 = vld [vmem:[%s16467_s9 + $0x48] sm:$0xff]  }
 0x7ec   : > { %11377 = vmatmul.mubr.bf16.vlgmr.msra.gmra.mrb[92].mxu1 %v10556_v8  ;;  %v14330_v8 = vld [vmem:[#allocation14 + $0x224] ss:$8 sps:$4 sm:$0xff]  }
 0x7ed   : > { %11386 = vmatpush1.bf16.msra.mxu1 %v14274_v53  ;;  %11417 = vmatprep.mubr.bf16.mxu1 %v10559_v61  ;;  %v14325_v53 = vld [vmem:[#allocation14 + $0x210] ss:$8 sps:$4 sm:$0xff]   ;;  %v14422_v61 = vld [vmem:[%s16467_s9 + $0x50] sm:$0xff]  }
 0x7ee   : > { %11387 = vmatprep.subr.bf16.mxu1 %v14279_v59  ;;  %v14421_v59 = vld [vmem:[%s16467_s9 + $0x8] sm:$0xff]  }
 0x7f1   : > { %11388 = vmatpush1.bf16.msra.mxu1 %v14277_v29  ;;  %v14328_v29 = vld [vmem:[#allocation14 + $0x220] ss:$8 sps:$4 sm:$0xff]  }
 0x7f2   : > { %11389 = vmatprep.subr.bf16.mxu1 %v14282_v56  ;;  %v14333_v56 = vld [vmem:[#allocation14 + $0x234] ss:$8 sps:$4 sm:$0xff]  }
 0x7f5   : > { %11390 = vmatpush1.bf16.msra.mxu1 %v14280_v44  ;;  %v14423_v44 = vld [vmem:[%s16467_s9 + $0x10] sm:$0xff]  }
 0x7f6   : > { %11391 = vmatprep.subr.bf16.mxu1 %v14285_v24  ;;  %v14424_v24 = vld [vmem:[%s16467_s9 + $0x58] sm:$0xff]  }
 0x7f9   : > { %11392 = vmatpush1.bf16.msra.mxu1 %v14283_v16  ;;  %v14331_v16 = vld [vmem:[#allocation14 + $0x230] ss:$8 sps:$4 sm:$0xff]  }
 0x7fa   : > { %11393 = vmatprep.subr.bf16.mxu1 %v14288_v37  ;;  %v14336_v37 = vld [vmem:[#allocation14 + $0x244] ss:$8 sps:$4 sm:$0xff]  }
 0x7fd   : > { %11394 = vmatpush1.bf16.msra.mxu1 %v14286_v34  ;;  %v14425_v34 = vld [vmem:[%s16467_s9 + $0x18] sm:$0xff]  }
 0x7fe   : > { %11395 = vmatprep.subr.bf16.mxu1 %v14291_v27  ;;  %v14426_v27 = vld [vmem:[%s16467_s9 + $0x60] sm:$0xff]  }
 0x801   : > { %11396 = vmatpush1.bf16.msra.mxu1 %v14289_v17  ;;  %v14334_v17 = vld [vmem:[#allocation14 + $0x240] ss:$8 sps:$4 sm:$0xff]  }
 0x802   : > { %11397 = vmatprep.subr.bf16.mxu1 %v14294_v60  ;;  %v14339_v60 = vld [vmem:[#allocation14 + $0x254] ss:$8 sps:$4 sm:$0xff]  }
 0x805   : > { %11398 = vmatpush1.bf16.msra.mxu1 %v14292_v38  ;;  %v14427_v38 = vld [vmem:[%s16467_s9 + $0x20] sm:$0xff]  }
 0x806   : > { %11399 = vmatprep.subr.bf16.mxu1 %v14297_v12  ;;  %v14428_v12 = vld [vmem:[%s16467_s9 + $0x68] sm:$0xff]  }
 0x809   : > { %11400 = vmatpush1.bf16.msra.mxu1 %v14295_v18  ;;  %v14337_v18 = vld [vmem:[#allocation14 + $0x250] ss:$8 sps:$4 sm:$0xff]  }
 0x80a   : > { %11401 = vmatprep.subr.bf16.mxu1 %v14300_v49  ;;  %v14342_v49 = vld [vmem:[#allocation14 + $0x264] ss:$8 sps:$4 sm:$0xff]  }
 0x80d   : > { %11402 = vmatpush1.bf16.msra.mxu1 %v14298_v9  ;;  %v14429_v9 = vld [vmem:[%s16467_s9 + $0x28] sm:$0xff]  }
 0x80e   : > { %11403 = vmatprep.subr.bf16.mxu1 %v14303_v2  ;;  %v14340_v2 = vld [vmem:[#allocation14 + $0x260] ss:$8 sps:$4 sm:$0xff]  }
 0x811   : > { %11404 = vmatpush1.bf16.msra.mxu1 %v14301_v47  ;;  %v14345_v47 = vld [vmem:[#allocation14 + $0x274] ss:$8 sps:$4 sm:$0xff]  }
 0x812   : > { %11405 = vmatprep.subr.bf16.mxu1 %v14306_v13  ;;  %v14343_v13 = vld [vmem:[#allocation14 + $0x270] ss:$8 sps:$4 sm:$0xff]  }
 0x815   : > { %11406 = vmatpush1.bf16.msra.mxu1 %v14304_v58  ;;  %v14348_v58 = vld [vmem:[#allocation14 + $0x284] ss:$8 sps:$4 sm:$0xff]  }
 0x816   : > { %11407 = vmatprep.subr.bf16.mxu1 %v14309_v39  ;;  %v14346_v39 = vld [vmem:[#allocation14 + $0x280] ss:$8 sps:$4 sm:$0xff]  }
 0x819   : > { %11408 = vmatpush1.bf16.msra.mxu1 %v14307_v41  ;;  %v14351_v41 = vld [vmem:[#allocation14 + $0x294] ss:$8 sps:$4 sm:$0xff]  }
 0x81a   : > { %11409 = vmatprep.subr.bf16.mxu1 %v14312_v28  ;;  %v14349_v28 = vld [vmem:[#allocation14 + $0x290] ss:$8 sps:$4 sm:$0xff]  }
 0x81d   : > { %11410 = vmatpush1.bf16.msra.mxu1 %v14310_v15  ;;  %v14354_v15 = vld [vmem:[#allocation14 + $0x2a4] ss:$8 sps:$4 sm:$0xff]  }
 0x81e   : > { %11411 = vmatprep.subr.bf16.mxu1 %v14315_v0  ;;  %v14352_v0 = vld [vmem:[#allocation14 + $0x2a0] ss:$8 sps:$4 sm:$0xff]  }
 0x821   : > { %11412 = vmatpush1.bf16.msra.mxu1 %v14313_v43  ;;  %v10442_v40 = vpop.f32.mrb[88].mxu1  ;;  %v14357_v43 = vld [vmem:[#allocation14 + $0x2b4] ss:$8 sps:$4 sm:$0xff]  }
 0x822   : > { %v16342_v62 = vadd.f32 %v10442_v40, %v16310_v42  ;;  %v10483_v48 = vpop.f32.mrb[124].mxu0  ;;  %v10444_v19 = vpop.f32.mrb[89].mxu1  ;;  %11413 = vmatprep.subr.bf16.mxu1 %v14318_v14  ;;  %v14319_v42 = vld [vmem:[#allocation14 + $0x1f0] ss:$8 sps:$4 sm:$0xff]   ;;  %v14360_v14 = vld [vmem:[#allocation14 + $0x2c4] ss:$8 sps:$4 sm:$0xff]  }
 0x823   : > { %v16345_v31 = vadd.f32 %v10483_v48, %v16313_v52  ;;  %v10495_v23 = vadd.f32 %v10444_v19, %v16316_v5  ;;  %v10485_v33 = vpop.f32.mrb[125].mxu0  ;;  %v10446_v7 = vpop.f32.mrb[90].mxu1  ;;  %v14322_v52 = vld [vmem:[#allocation14 + $0x200] ss:$8 sps:$4 sm:$0xff]   ;;  %v14327_v5 = vld [vmem:[#allocation14 + $0x214] ss:$8 sps:$4 sm:$0xff]   ;;  %v10519_v48 = vrot.slane %v16321_v4, %v2501_v35 }
 0x824   : > { %v16349_v30 = vadd.f32 %v10485_v33, %v16319_v22  ;;  %v10487_v32 = vpop.f32.mrb[126].mxu0  ;;  %v10447_v46 = vpop.f32.mrb[91].mxu1  ;;  %v14418_v22 = vld [vmem:[%s16467_s9 + $0x40] sm:$0xff]   ;;  %v14358_v40 = vld [vmem:[#allocation14 + $0x2c0] ss:$8 sps:$4 sm:$0xff]  }
 0x825   : > { %v10545_v50 = vadd.f32 %v10523_v1, %v10495_v23  ;;  %v10488_v21 = vpop.f32.mrb[127].mxu0  ;;  %11414 = vmatpush1.bf16.msra.mxu1 %v14316_v55  ;;  %13172 = vmatprep.subr.bf16.mxu0 %v14418_v22  ;;  %v14363_v1 = vld [vmem:[#allocation14 + $0x2d4] ss:$8 sps:$4 sm:$0xff]   ;;  %v10530_v55 = vsub.s32 7, %v15119_v6  ;;  %v14366_v19 = vld [vmem:[#allocation14 + $0x2e4] ss:$8 sps:$4 sm:$0xff]   ;;  %v10544_v33 = vadd.f32 %v10519_v48, %v16342_v62 }
 0x826   : > { %11415 = vmatprep.subr.bf16.mxu1 %v14321_v45  ;;  %13173 = vmatpush3.bf16.msra.mxu0 %v14419_v20  ;;  %v14364_v23 = vld [vmem:[#allocation14 + $0x2e0] ss:$8 sps:$4 sm:$0xff]   ;;  %v14369_v7 = vld [vmem:[#allocation14 + $0x2f4] ss:$8 sps:$4 sm:$0xff]   ;;  %v14367_v46 = vld [vmem:[#allocation14 + $0x2f0] ss:$8 sps:$4 sm:$0xff]  }
 0x827   : > { %v10553_v25 = vmax.f32 %v10545_v50, 0.0  ;;  %13174 = vmatprep.subr.bf16.mxu0 %v14420_v11  ;;  %v10531_v45 = vrot.slane %v16321_v4, %v10530_v55  ;;  %v10552_v50 = vmax.f32 %v10544_v33, 0.0  ;;  %v14372_v21 = vld [vmem:[#allocation14 + $0x304] ss:$8 sps:$4 sm:$0xff]   ;;  %v14370_v35 = vld [vmem:[#allocation14 + $0x300] ss:$8 sps:$4 sm:$0xff]  }
 0x828   : > { %v14373_v62 = vld [vmem:[#allocation14 + $0x310] ss:$8 sps:$4 sm:$0xff]   ;;  %v14382_v22 = vld [vmem:[#allocation14 + $0x340] ss:$8 sps:$4 sm:$0xff]   ;;  %v14387_v20 = vld [vmem:[#allocation14 + $0x354] ss:$8 sps:$4 sm:$0xff]  }
 0x829   : > { %v10561_v51 = vpack.c.bf16 %v10553_v25, %v10553_v25  ;;  %11416 = vmatpush1.bf16.msra.mxu1 %v14319_v42  ;;  %v10547_v32 = vadd.f32 %v10531_v45, %v16349_v30  ;;  %v10560_v36 = vpack.c.bf16 %v10552_v50, %v10552_v50  ;;  %v14376_v30 = vld [vmem:[#allocation14 + $0x320] ss:$8 sps:$4 sm:$0xff]   ;;  %v14385_v11 = vld [vmem:[#allocation14 + $0x350] ss:$8 sps:$4 sm:$0xff]  }
 0x82a   : > { %11426 = vmatprep.subr.bf16.mxu1 %v14324_v3  ;;  %13175 = vmatpush3.bf16.msra.mxu0 %v14421_v59  ;;  %v14375_v3 = vld [vmem:[#allocation14 + $0x314] ss:$8 sps:$4 sm:$0xff]  }
 0x82b   : > { %13176 = vmatprep.subr.bf16.mxu0 %v14422_v61  ;;  %v10555_v42 = vmax.f32 %v10547_v32, 0.0  ;;  %v14393_v59 = vld [vmem:[#allocation14 + $0x374] ss:$8 sps:$4 sm:$0xff]   ;;  %v14391_v61 = vld [vmem:[#allocation14 + $0x370] ss:$8 sps:$4 sm:$0xff]  }
 0x82c   : > { %11418 = vmatmul.mubr.bf16.vlgmr.msra.gmra.mrb[92].mxu1 %v10558_v54  ;;  %v14379_v54 = vld [vmem:[#allocation14 + $0x330] ss:$8 sps:$4 sm:$0xff]  }
 0x82d   : > { %11427 = vmatpush1.bf16.msra.mxu1 %v14322_v52  ;;  %11458 = vmatprep.mubr.bf16.mxu1 %v10561_v51  ;;  %v10563_v25 = vpack.c.bf16 %v10555_v42, %v10555_v42  ;;  %v14378_v51 = vld [vmem:[#allocation14 + $0x324] ss:$8 sps:$4 sm:$0xff]   ;;  %v14381_v52 = vld [vmem:[#allocation14 + $0x334] ss:$8 sps:$4 sm:$0xff]  }
 0x82e   : > { %11428 = vmatprep.subr.bf16.mxu1 %v14327_v5  ;;  %13177 = vmatpush3.bf16.msra.mxu0 %v14423_v44  ;;  %v14384_v5 = vld [vmem:[#allocation14 + $0x344] ss:$8 sps:$4 sm:$0xff]   ;;  %v14399_v44 = vld [vmem:[#allocation14 + $0x394] ss:$8 sps:$4 sm:$0xff]  }
 0x82f   : > { %13178 = vmatprep.subr.bf16.mxu0 %v14424_v24  ;;  %v14397_v24 = vld [vmem:[#allocation14 + $0x390] ss:$8 sps:$4 sm:$0xff]  }
 0x831   : > { %11429 = vmatpush1.bf16.msra.mxu1 %v14325_v53  ;;  %v14390_v53 = vld [vmem:[#allocation14 + $0x364] ss:$8 sps:$4 sm:$0xff]  }
 0x832   : > { %11430 = vmatprep.subr.bf16.mxu1 %v14330_v8  ;;  %13179 = vmatpush3.bf16.msra.mxu0 %v14425_v34  ;;  %v14388_v8 = vld [vmem:[#allocation14 + $0x360] ss:$8 sps:$4 sm:$0xff]   ;;  %v14405_v34 = vld [vmem:[#allocation14 + $0x3b4] ss:$8 sps:$4 sm:$0xff]  }
 0x833   : > { %13180 = vmatprep.subr.bf16.mxu0 %v14426_v27  ;;  %v14403_v27 = vld [vmem:[#allocation14 + $0x3b0] ss:$8 sps:$4 sm:$0xff]  }
 0x835   : > { %11431 = vmatpush1.bf16.msra.mxu1 %v14328_v29  ;;  %v14396_v29 = vld [vmem:[#allocation14 + $0x384] ss:$8 sps:$4 sm:$0xff]  }
 0x836   : > { %11432 = vmatprep.subr.bf16.mxu1 %v14333_v56  ;;  %13181 = vmatpush3.bf16.msra.mxu0 %v14427_v38  ;;  %v14394_v56 = vld [vmem:[#allocation14 + $0x380] ss:$8 sps:$4 sm:$0xff]   ;;  %v10526_v38 = vsub.s32 6, %v15119_v6 }
 0x837   : > { %13182 = vmatprep.subr.bf16.mxu0 %v14428_v12  ;;  %v14411_v12 = vld [vmem:[#allocation14 + $0x3d4] ss:$8 sps:$4 sm:$0xff]  }
 0x839   : > { %11433 = vmatpush1.bf16.msra.mxu1 %v14331_v16  ;;  %v14402_v16 = vld [vmem:[#allocation14 + $0x3a4] ss:$8 sps:$4 sm:$0xff]  }
 0x83a   : > { %11434 = vmatprep.subr.bf16.mxu1 %v14336_v37  ;;  %13183 = vmatpush3.bf16.msra.mxu0 %v14429_v9  ;;  %v14400_v37 = vld [vmem:[#allocation14 + $0x3a0] ss:$8 sps:$4 sm:$0xff]   ;;  %v14414_v9 = vld [vmem:[#allocation14 + $0x3e4] ss:$8 sps:$4 sm:$0xff]  }
 0x83d   : > { %11435 = vmatpush1.bf16.msra.mxu1 %v14334_v17  ;;  %v14408_v17 = vld [vmem:[#allocation14 + $0x3c4] ss:$8 sps:$4 sm:$0xff]  }
 0x83e   : > { %11436 = vmatprep.subr.bf16.mxu1 %v14339_v60  ;;  %v14406_v60 = vld [vmem:[#allocation14 + $0x3c0] ss:$8 sps:$4 sm:$0xff]  }
 0x841   : > { %11437 = vmatpush1.bf16.msra.mxu1 %v14337_v18  ;;  %v14409_v18 = vld [vmem:[#allocation14 + $0x3d0] ss:$8 sps:$4 sm:$0xff]  }
 0x842   : > { %11438 = vmatprep.subr.bf16.mxu1 %v14342_v49  ;;  %v10527_v49 = vrot.slane %v16321_v4, %v10526_v38  ;;  %v14431_v4 = vld [vmem:[%s16467_s9 + $0x30] sm:$0xff]  }
 0x845   : > { %11439 = vmatpush1.bf16.msra.mxu1 %v14340_v2  ;;  %v14412_v2 = vld [vmem:[#allocation14 + $0x3e0] ss:$8 sps:$4 sm:$0xff]  }
 0x846   : > { %11440 = vmatprep.subr.bf16.mxu1 %v14345_v47  ;;  %v10546_v47 = vadd.f32 %v10527_v49, %v16345_v31  ;;  %v14432_v31 = vld [vmem:[%s16467_s9 + $0x78] sm:$0xff]  }
 0x849   : > { %11441 = vmatpush1.bf16.msra.mxu1 %v14343_v13  ;;  %v14417_v13 = vld [vmem:[#allocation14 + $0x3f4] ss:$8 sps:$4 sm:$0xff]  }
 0x84a   : > { %11442 = vmatprep.subr.bf16.mxu1 %v14348_v58  ;;  %v14415_v58 = vld [vmem:[#allocation14 + $0x3f0] ss:$8 sps:$4 sm:$0xff]  }
 0x84d   : > { %11443 = vmatpush1.bf16.msra.mxu1 %v14346_v39  ;;  %v10554_v39 = vmax.f32 %v10546_v47, 0.0 }
 0x84e   : > { %11444 = vmatprep.subr.bf16.mxu1 %v14351_v41  ;;  %v14430_v41 = vld [vmem:[%s16467_s9 + $0x70] sm:$0xff]  }
 0x84f   : > { %v10562_v6 = vpack.c.bf16 %v10554_v39, %v10554_v39  ;;  %13184 = vmatprep.subr.bf16.mxu0 %v14430_v41 }
 0x850   : > { %13185 = vmatpush3.bf16.msra.mxu0 %v14431_v4 }
 0x851   : > { %11445 = vmatpush1.bf16.msra.mxu1 %v14349_v28  ;;  %v14433_v28 = vld [vmem:[%s16467_s9 + $0x38] sm:$0xff]   ;;  %13186 = vmatprep.subr.bf16.mxu0 %v14432_v31 }
 0x852   : > { %11446 = vmatprep.subr.bf16.mxu1 %v14354_v15  ;;  %v10692_v15 = vld [vmem:[#allocation15] sm:$0x3] }
 0x854   : > { %13187 = vmatpush3.bf16.msra.mxu0 %v14433_v28 }
 0x855   : > { %11447 = vmatpush1.bf16.msra.mxu1 %v14352_v0  ;;  %v11337_v0 = vrot.slane %v10692_v15, %v15672_v63 }
 0x856   : > { %11448 = vmatprep.subr.bf16.mxu1 %v14357_v43  ;;  %v11341_v43 = vrot.slane %v10692_v15, %v15683_v26 }
 0x859   : > { %11449 = vmatpush1.bf16.msra.mxu1 %v14355_v10 }
 0x85a   : > { %11450 = vmatprep.subr.bf16.mxu1 %v14360_v14 }
 0x85d   : > { %11451 = vmatpush1.bf16.msra.mxu1 %v14358_v40 }
 0x85e   : > { %11452 = vmatprep.subr.bf16.mxu1 %v14363_v1 }
 0x861   : > { %11453 = vmatpush1.bf16.msra.mxu1 %v14361_v57 }
 0x862   : > { %11454 = vmatprep.subr.bf16.mxu1 %v14366_v19 }
 0x865   : > { %11455 = vmatpush1.bf16.msra.mxu1 %v14364_v23 }
 0x866   : > { %11456 = vmatprep.subr.bf16.mxu1 %v14369_v7  ;;  %v11544_v7 = vld [vmem:[#allocation17] sm:$0x1] }
 0x869   : > { %11457 = vmatpush1.bf16.msra.mxu1 %v14367_v46 }
 0x86a   : > { %11467 = vmatprep.subr.bf16.mxu1 %v14372_v21 }
 0x86c   : > { %11459 = vmatmul.mubr.bf16.vlgmr.msra.gmra.mrb[92].mxu1 %v10560_v36 }
 0x86d   : > { %11468 = vmatpush1.bf16.msra.mxu1 %v14370_v35  ;;  %11499 = vmatprep.mubr.bf16.mxu1 %v10563_v25 }
 0x86e   : > { %11469 = vmatprep.subr.bf16.mxu1 %v14375_v3 }
 0x871   : > { %11470 = vmatpush1.bf16.msra.mxu1 %v14373_v62 }
 0x872   : > { %11471 = vmatprep.subr.bf16.mxu1 %v14378_v51 }
 0x875   : > { %11472 = vmatpush1.bf16.msra.mxu1 %v14376_v30 }
 0x876   : > { %11473 = vmatprep.subr.bf16.mxu1 %v14381_v52 }
 0x879   : > { %11474 = vmatpush1.bf16.msra.mxu1 %v14379_v54 }
 0x87a   : > { %11475 = vmatprep.subr.bf16.mxu1 %v14384_v5 }
 0x87d   : > { %11476 = vmatpush1.bf16.msra.mxu1 %v14382_v22 }
 0x87e   : > { %11477 = vmatprep.subr.bf16.mxu1 %v14387_v20 }
 0x881   : > { %11478 = vmatpush1.bf16.msra.mxu1 %v14385_v11 }
 0x882   : > { %11479 = vmatprep.subr.bf16.mxu1 %v14390_v53 }
 0x885   : > { %11480 = vmatpush1.bf16.msra.mxu1 %v14388_v8 }
 0x886   : > { %11481 = vmatprep.subr.bf16.mxu1 %v14393_v59 }
 0x889   : > { %11482 = vmatpush1.bf16.msra.mxu1 %v14391_v61 }
 0x88a   : > { %11483 = vmatprep.subr.bf16.mxu1 %v14396_v29 }
 0x88d   : > { %11484 = vmatpush1.bf16.msra.mxu1 %v14394_v56 }
 0x88e   : > { %11485 = vmatprep.subr.bf16.mxu1 %v14399_v44 }
 0x891   : > { %11486 = vmatpush1.bf16.msra.mxu1 %v14397_v24 }
 0x892   : > { %11487 = vmatprep.subr.bf16.mxu1 %v14402_v16 }
 0x895   : > { %11488 = vmatpush1.bf16.msra.mxu1 %v14400_v37 }
 0x896   : > { %11489 = vmatprep.subr.bf16.mxu1 %v14405_v34 }
 0x899   : > { %11490 = vmatpush1.bf16.msra.mxu1 %v14403_v27 }
 0x89a   : > { %11491 = vmatprep.subr.bf16.mxu1 %v14408_v17 }
 0x89d   : > { %11492 = vmatpush1.bf16.msra.mxu1 %v14406_v60 }
 0x89e   : > { %11493 = vmatprep.subr.bf16.mxu1 %v14411_v12 }
 0x8a1   : > { %11494 = vmatpush1.bf16.msra.mxu1 %v14409_v18 }
 0x8a2   : > { %11495 = vmatprep.subr.bf16.mxu1 %v14414_v9 }
 0x8a5   : > { %11496 = vmatpush1.bf16.msra.mxu1 %v14412_v2 }
 0x8a6   : > { %11497 = vmatprep.subr.bf16.mxu1 %v14417_v13 }
 0x8a9   : > { %11498 = vmatpush1.bf16.msra.mxu1 %v14415_v58 }
 0x8ac   : > { %11500 = vmatmul.mubr.bf16.vlgmr.msra.gmra.mrb[92].mxu1 %v10562_v6 }
 0x97f   : > { %v11501_v10 = vpop.f32.mrb[92].mxu1 }
 0x980   : > { %v13202_v14 = vadd.f32 %v11501_v10, %v11337_v0  ;;  %v11503_v40 = vpop.f32.mrb[93].mxu1 }
 0x981   : > { %v13203_v1 = vadd.f32 %v11503_v40, %v11341_v43  ;;  %v11505_v55 = vpop.f32.mrb[94].mxu1 }
 0x982   : > { %v11508_v57 = vmax.f32 %v13202_v14, 0.0  ;;  %v11506_v48 = vpop.f32.mrb[95].mxu1 }
 0x983   : > { %v11509_v19 = vmax.f32 %v13203_v1, 0.0 }
 0x984   : > { %v11510_v23 = vpack.c.bf16 %v11508_v57, %v11508_v57 }
 0x985   : > { %v11511_v45 = vpack.c.bf16 %v11509_v19, %v11509_v19 }
 0x987   : > { %11673 = vmatprep.mubr.bf16.mxu0 %v11511_v45 }
 0x988   : > { %11674 = vmatmul.mubr.bf16.vlgmr.msra.gmra.mrb[128].mxu0 %v11510_v23 }
 0xa5b   : > { %v13188_v33 = vpop.f32.mrb[128].mxu0 }
 0xa5c   : > { %v13189_v63 = vpop.f32.mrb[129].mxu0 }
 0xa5d   : > { %v13190_v26 = vadd.f32 %v13189_v63, %v13188_v33  ;;  %v13191_v32 = vpop.f32.mrb[130].mxu0 }
 0xa5e   : > { %v13192_v46 = vpop.f32.mrb[131].mxu0 }
 0xa5f   : > { %v11676_v50 = vadd.f32 %v13190_v26, %v11544_v7 }
 0xa61   : > { %11682 = vst.msk [vmem:[%s497_s30] sm:$0x1] %vm11681_vm0, %v11676_v50 }
 0xa62   : > { %14699 = shalt.err (!%p14696_p9)
}
 0xa63   : > { %s14700_s19 = scalar_lea.hbm %s16416_s12, 16  ;;  %s14704_s29 = scalar_lea.hbm %s16469_s11, 32 }
 0xa64   : > { %p14701_p12 = scmp.ne.s32.totalorder %s16416_s12, %s14700_s19  ;;  %p14705_p3 = scmp.lt.u32.totalorder %s16416_s12, %s16469_s11 }
 0xa65   : > { %p14706_p4 = scmp.lt.u32.totalorder %s14704_s29, %s14700_s19  ;;  %p14708_p8 = scmp.lt.u32.totalorder %s14700_s19, %s16416_s12 }
 0xa66   : > { %p14702_p10 = pnand %p14701_p12, %p16569_p11 }
 0xa67   : > { %p14707_p7 = por %p14706_p4, %p14705_p3 }
 0xa68   : > { %p14703_p2 = pneg %p14702_p10 }
 0xa69   : > { %p14709_p13 = por %p14708_p8, %p14707_p7 }
 0xa6b   : > { %p14710_p1 = pnand %p14709_p13, %p14703_p2 }
 0xa6d   : > { %14713 = shalt.err (!%p14710_p1)
}
 0xa6e   : > { %13297 = dma.vmem_to_hbm [thread:$0]  (%p16569_p11), %s16418_s16, 16, %s16416_s12, %s11684_s23  }
 0xa6f PF: > { %s16570_s17 = sld [smem:[#allocation25_spill]]  ;;  %s16571_s28 = sld [smem:[#allocation29_spill]] }
 0xa70   : > { %p13349_p0 = scmp.ge.s32.totalorder %s14768_s20, 2 }
 0xa75   : > { %s11708_s30 = sand.u32 1, %s16570_s17   ;;  %p16572_p6 = scmp.ne.s32.totalorder %s16571_s28, 0 }
 0xa76   : > { %s11709_s24 = scalar_lea.sflag [#allocation5], %s11708_s30 }
 0xa77   : > { %p13328_p5 = pnand %p13349_p0, %p16572_p6 }
 0xa79   : > { %14751 = dma.done.wait (!%p13328_p5), %s11709_s24, 16  }
 0xa7a   : > { %14753 = vsyncadd (!%p13328_p5), %s11709_s24, 4294967280  ;;  %s16573_s20 = sld [smem:[#allocation27_spill]]  ;;  %s16574_s14 = sld [smem:[#allocation26_spill]] }
 0xa7b   : > { %s16575_s19 = sld [smem:[#allocation28_spill]]  ;;  %s16576_s17 = smov %s14760_s18 }
 0xa80   : > { %p26_p9 = scmp.ge.s32.totalorder %s16573_s20, 4   ;;  %s16577_s18 = smov %s16574_s14 }
 0xa82   :  { %28 = sbr.rel (!%p26_p9) target bundleno = 11 (0xb), region = 147 }
 0xa89   :  { %11713 = vsyncpa [#allocation4], 1 }
 0xa8a   :  { %11715 = vsyncpa [#allocation4 + $0x1], 1 }
 0xa8b   :  { %11716 = vsyncpa [#allocation7], 1 }
 0xa8c   :  { %11717 = vsyncpa [#allocation10], 1 }
 0xa8d   :  { %11718 = vsyncpa [#allocation13], 1 }
 0xa8e   :  { %11719 = vsyncpa [#allocation16], 1 }
 0xa8f   :  { %11720 = vsyncpa [#allocation5], 1 }
 0xa90   :  { %11722 = vsyncpa [#allocation5 + $0x1], 1 }

</bundles_post_ra>
